<compile_context>
chip_gen: v7x
topology: tpu7x:2x2x1
jax: 0.10.0
libtpu: 0.0.40
codegen_flags: <defaults>
</compile_context>

<pallas_src>
import numpy as np
import jax
import jax.numpy as jnp
from jax.experimental import pallas as pl
from jax.experimental.pallas import tpu as pltpu

NUM_JOINTS = 14
N_SUB2 = 431            # coarse mesh vertices
N_SUB = 1723            # mid-resolution mesh vertices
N_SUB_PAD = 1792        # 14 * 128 (lane-aligned)
N_FULL = 6890           # full SMPL mesh vertices
N_FULL_PAD = 6912       # 54 * 128
N_BIG = N_SUB_PAD + N_FULL_PAD   # 8704 = 68 * 128
GRID_TOKENS = 49        # 7 x 7 backbone grid
IMG_FEAT = 2048
GRID_CH = 1024
HID = 2051              # 3 + 2048
HID_PAD = 2176          # 17 * 128 (lane-aligned output of grid_feat_dim)
CAM_MID = 250


# ------------------------- Pallas kernel 1: grid_feat_dim -------------------------

def _grid_feat_kernel(g_ref, w_ref, b_ref, o_ref):
    # g_ref: (1, 49, 1024) f32   w_ref: (1024, 2176) bf16   b_ref: (1, 2176) f32
    g = g_ref[0].astype(jnp.bfloat16)                               # (49, 1024)
    y = jnp.dot(g, w_ref[...], preferred_element_type=jnp.float32)  # (49, 2176)
    o_ref[0] = y + b_ref[...]


def grid_feat_pallas(g_tokens, w_bf16, b_pad):
    """g_tokens: (B, 49, 1024) f32 -> (B, 49, HID_PAD) f32.

    grid_feat_dim (Linear 1024 -> 2051) with the output zero-padded to a
    lane-dense 2176.  bf16 weight, f32 accumulation.  Weight block index is
    constant across the batch grid so it is streamed from HBM once.
    """
    B = g_tokens.shape[0]
    return pl.pallas_call(
        _grid_feat_kernel,
        out_shape=jax.ShapeDtypeStruct((B, GRID_TOKENS, HID_PAD), jnp.float32),
        grid_spec=pltpu.PrefetchScalarGridSpec(
            num_scalar_prefetch=0, grid=(B,),
            in_specs=[pl.BlockSpec((1, GRID_TOKENS, GRID_CH), lambda b: (b, 0, 0)),
                      pl.BlockSpec((GRID_CH, HID_PAD), lambda b: (0, 0)),
                      pl.BlockSpec((1, HID_PAD), lambda b: (0, 0))],
            out_specs=pl.BlockSpec((1, GRID_TOKENS, HID_PAD), lambda b: (b, 0, 0))),
        compiler_params=pltpu.CompilerParams(
            dimension_semantics=("parallel",),
            vmem_limit_bytes=32 * 1024 * 1024),
    )(g_tokens, w_bf16, b_pad)


# --------------- Pallas kernel 2: fused mesh head (up1 || up1@up2 + cam) ---------------

def _make_mesh_head_kernel(batch):
    def kernel(x_ref, wbig_ref, bbig_ref, w1_ref, w23_ref, bcam_ref,
               out_ref, cam_ref):
        # x_ref:    (B, 3, 431)  f32   pred_vertices_sub2 transposed
        # wbig_ref: (431, nb)    bf16  [upsampling || upsampling∘upsampling2] tile
        # bbig_ref: (1, nb)      f32
        # w1_ref:   (3, 1)       f32   cam_param_fc weight (column)
        # w23_ref:  (431, 3)     f32   cam_param_fc2 @ cam_param_fc3 (composed)
        # bcam_ref: (1, 3)       f32   all cam biases folded
        # out_ref:  (B, 3, nb)   f32
        # cam_ref:  (B, 1, 3)    f32
        w = wbig_ref[...]
        bias = bbig_ref[...]                                          # (1, nb)
        for b in range(batch):                                        # B is tiny & static
            xb = x_ref[b]                                             # (3, 431)
            yb = jnp.dot(xb.astype(jnp.bfloat16), w,
                         preferred_element_type=jnp.float32)          # (3, nb)
            out_ref[b] = yb + bias

        @pl.when(pl.program_id(0) == 0)
        def _():
            # fused, bias-folded cam head: cam = (w1 . pv2_t) @ (W2 @ W3) + b_eff
            for b in range(batch):
                xb = x_ref[b]                                         # (3, 431)
                x1 = jnp.sum(w1_ref[...] * xb, axis=0, keepdims=True)  # (1, 431)
                cam_ref[b] = (jnp.dot(x1, w23_ref[...],
                                      preferred_element_type=jnp.float32)
                              + bcam_ref[...])                        # (1, 3)
    return kernel


def mesh_head_pallas(pv2_t, w_big, b_big, w1col, w23, b_cam, *, n_block=2176):
    """pv2_t: (B, 3, 431) f32.

    Single weight-streamed pass over N = [1792 (up1, padded) || 6912 (composite
    up1@up2, padded)].  Each (431, n_block) bf16 weight tile is loaded exactly
    once; the cam head is computed at the first N block only.
    Returns (out_big (B, 3, 8704) f32, cam (B, 1, 3) f32).
    """
    B = pv2_t.shape[0]
    assert N_BIG % n_block == 0
    nblk = N_BIG // n_block
    return pl.pallas_call(
        _make_mesh_head_kernel(B),
        out_shape=(jax.ShapeDtypeStruct((B, 3, N_BIG), jnp.float32),
                   jax.ShapeDtypeStruct((B, 1, 3), jnp.float32)),
        grid_spec=pltpu.PrefetchScalarGridSpec(
            num_scalar_prefetch=0, grid=(nblk,),
            in_specs=[pl.BlockSpec((B, 3, N_SUB2), lambda j: (0, 0, 0)),
                      pl.BlockSpec((N_SUB2, n_block), lambda j: (0, j)),
                      pl.BlockSpec((1, n_block), lambda j: (0, j)),
                      pl.BlockSpec((3, 1), lambda j: (0, 0)),
                      pl.BlockSpec((N_SUB2, 3), lambda j: (0, 0)),
                      pl.BlockSpec((1, 3), lambda j: (0, 0))],
            out_specs=[pl.BlockSpec((B, 3, n_block), lambda j: (0, 0, j)),
                       pl.BlockSpec((B, 1, 3), lambda j: (0, 0, 0))]),
        compiler_params=pltpu.CompilerParams(
            dimension_semantics=("arbitrary",),   # cam written only at block 0
            vmem_limit_bytes=32 * 1024 * 1024),
    )(pv2_t, w_big, b_big, w1col, w23, b_cam)


# ------------------------- stand-ins for external modules -------------------------

def backbone_standin(images, params):
    # TODO(synk): real backbone (HRNet/ResNet) is an external module; deterministic
    # stand-in producing (B, 2048) pooled features and token-major (B, 7, 7, 1024)
    # grid features.  (The real NCHW backbone would add one cheap transpose here,
    # i.e. torch's flatten(start_dim=2).transpose(1, 2).)
    B, C, H, W = images.shape
    pooled = images.mean(axis=(2, 3))                                   # (B, 3)
    image_feat = pooled @ params['bb_feat_w'] + params['bb_feat_b']     # (B, 2048)
    x = images.reshape(B, C, 7, H // 7, 7, W // 7).mean(axis=(3, 5))    # (B, 3, 7, 7)
    x = jnp.transpose(x, (0, 2, 3, 1))                                  # (B, 7, 7, 3)
    grid_hwc = x @ params['bb_grid_w'] + params['bb_grid_b']            # (B, 7, 7, 1024)
    return image_feat, grid_hwc


# ------------------------- forward pass -------------------------

def graphormer_body_forward(images, params, *, use_pallas=True):
    B = images.shape[0]

    # --- template mesh / joints ---
    # TODO(synk): SMPL forward, get_h36m_joints and mesh_sampler.downsample are
    # external modules; replaced by deterministic templates of the correct shapes.
    t_joints17 = params['template_joints17']                     # (1, 17, 3)
    t_verts_sub2 = params['template_vertices_sub2']              # (1, 431, 3)
    pelvis = t_joints17[:, 0, :]                                 # 'Pelvis' index 0 in stand-in
    t_joints14 = t_joints17[:, :NUM_JOINTS, :] - pelvis[:, None, :]
    t_verts_sub2 = t_verts_sub2 - pelvis[:, None, :]
    ref_vertices = jnp.concatenate([t_joints14, t_verts_sub2], axis=1)   # (1, 445, 3)
    ref_vertices = jnp.broadcast_to(ref_vertices, (B,) + ref_vertices.shape[1:])

    # --- backbone ---
    image_feat, grid_hwc = backbone_standin(images, params)      # (B,2048), (B,7,7,1024)
    grid_tokens_raw = grid_hwc.reshape(B, GRID_TOKENS, GRID_CH)  # token-major, free reshape

    # --- grid_feat_dim (module parameter) ---
    if use_pallas:
        grid_feat_pad = grid_feat_pallas(grid_tokens_raw,
                                         params['grid_w_pad_bf16'],
                                         params['grid_b_pad'])            # (B,49,2176)
    else:
        gf = (jnp.einsum('bsk,kn->bsn', grid_tokens_raw, params['grid_feat_dim_w'])
              + params['grid_feat_dim_b'])                                # (B,49,2051)
        grid_feat_pad = jnp.pad(gf, ((0, 0), (0, 0), (0, HID_PAD - HID)))

    # --- trans_encoder ---
    # TODO(synk): real trans_encoder is an external Graphormer stack; stand-in is a
    # per-token Linear(2051,3) plus a mean-pooled grid-token context, applied in
    # decomposed form so the (B,445,2048) image_feat broadcast and the big
    # (B,494,2051) feature concat are never materialized in HBM.
    w_t, b_t = params['trans_w'], params['trans_b']               # (2051,3), (3,)
    img_contrib = image_feat @ w_t[3:HID, :]                      # (B, 3), once per batch
    joint_tokens = (jnp.einsum('bsk,kn->bsn', ref_vertices, w_t[:3, :])
                    + img_contrib[:, None, :] + b_t)              # (B, 445, 3)
    grid_out = (jnp.einsum('bsk,kn->bsn', grid_feat_pad, params['trans_w_pad'])
                + b_t)                                            # (B, 49, 3)
    joint_tokens = joint_tokens + jnp.mean(grid_out, axis=1, keepdims=True)
    features = jnp.concatenate([joint_tokens, grid_out], axis=1)  # (B, 494, 3)

    pred_3d_joints = features[:, :NUM_JOINTS, :]                  # (B, 14, 3)
    pred_vertices_sub2 = features[:, NUM_JOINTS:-GRID_TOKENS, :]  # (B, 431, 3)
    pv2_t = jnp.transpose(pred_vertices_sub2, (0, 2, 1))          # (B, 3, 431)

    # --- cam head + upsampling heads (module parameters) ---
    if use_pallas:
        out_big, cam = mesh_head_pallas(pv2_t, params['w_big_bf16'], params['b_big'],
                                        params['cam_w1col'], params['cam_w23'],
                                        params['cam_b_eff'])
        # matches torch .squeeze() for B > 1; for B == 1 torch would give (3,)
        cam_param = cam[:, 0, :]                                  # (B, 3)
        sub_t = out_big[:, :, :N_SUB]                             # (B, 3, 1723)
        full_t = out_big[:, :, N_SUB_PAD:N_SUB_PAD + N_FULL]      # (B, 3, 6890)
    else:
        x = (jnp.einsum('bvd,do->bvo', pred_vertices_sub2, params['cam1_w'])
             + params['cam1_b'])                                  # (B, 431, 1)
        x = jnp.transpose(x, (0, 2, 1))                           # (B, 1, 431)
        x = jnp.einsum('bsv,vm->bsm', x, params['cam2_w']) + params['cam2_b']
        x = jnp.einsum('bsm,mo->bso', x, params['cam3_w']) + params['cam3_b']
        cam_param = x[:, 0, :]                                    # (B, 3)
        sub_t = (jnp.einsum('bdv,vn->bdn', pv2_t, params['up1_w'])
                 + params['up1_b'])                               # (B, 3, 1723)
        full_t = (jnp.einsum('bdn,nm->bdm', sub_t, params['up2_w'])
                  + params['up2_b'])                              # (B, 3, 6890)

    pred_vertices_sub = jnp.transpose(sub_t, (0, 2, 1))           # (B, 1723, 3)
    pred_vertices_full = jnp.transpose(full_t, (0, 2, 1))         # (B, 6890, 3)
    return (cam_param, pred_3d_joints, pred_vertices_sub2,
            pred_vertices_sub, pred_vertices_full)


# ------------------------- deterministic parameter init -------------------------

def init_params(key):
    ks = jax.random.split(key, 12)

    def lin(k, fin, fout):
        kw, kb = jax.random.split(k)
        w = jax.random.normal(kw, (fin, fout), jnp.float32) * (1.0 / np.sqrt(fin))
        b = jax.random.normal(kb, (fout,), jnp.float32) * 0.01
        return w, b

    p = {}
    # Module's own parameters (shapes from __init__), stored as torch_weight.T
    p['grid_feat_dim_w'], p['grid_feat_dim_b'] = lin(ks[0], GRID_CH, HID)
    p['up1_w'], p['up1_b'] = lin(ks[1], N_SUB2, N_SUB)
    p['up2_w'], p['up2_b'] = lin(ks[2], N_SUB, N_FULL)
    p['cam1_w'], p['cam1_b'] = lin(ks[3], 3, 1)
    p['cam2_w'], p['cam2_b'] = lin(ks[4], N_SUB2, CAM_MID)
    p['cam3_w'], p['cam3_b'] = lin(ks[5], CAM_MID, 3)
    # External-module stand-ins
    p['trans_w'], p['trans_b'] = lin(ks[6], HID, 3)
    p['bb_feat_w'], p['bb_feat_b'] = lin(ks[7], 3, IMG_FEAT)
    p['bb_grid_w'], p['bb_grid_b'] = lin(ks[8], 3, GRID_CH)
    p['template_joints17'] = jax.random.normal(ks[9], (1, 17, 3), jnp.float32) * 0.2
    p['template_vertices_sub2'] = jax.random.normal(ks[10], (1, N_SUB2, 3),
                                                    jnp.float32) * 0.2

    # ---- derived kernel-side parameters (padding / bf16 / composition) ----
    p['grid_w_pad_bf16'] = jnp.pad(
        p['grid_feat_dim_w'], ((0, 0), (0, HID_PAD - HID))).astype(jnp.bfloat16)
    p['grid_b_pad'] = jnp.pad(p['grid_feat_dim_b'],
                              ((0, HID_PAD - HID),)).reshape(1, HID_PAD)
    p['trans_w_pad'] = jnp.pad(p['trans_w'], ((0, HID_PAD - HID), (0, 0)))

    # mesh head: [upsampling || upsampling∘upsampling2] concatenated along N, bf16
    w_comp = p['up1_w'] @ p['up2_w']                        # (431, 6890)
    b_comp = p['up1_b'] @ p['up2_w'] + p['up2_b']           # (6890,)
    w_big = jnp.zeros((N_SUB2, N_BIG), jnp.float32)
    w_big = w_big.at[:, :N_SUB].set(p['up1_w'])
    w_big = w_big.at[:, N_SUB_PAD:N_SUB_PAD + N_FULL].set(w_comp)
    p['w_big_bf16'] = w_big.astype(jnp.bfloat16)
    b_big = jnp.zeros((N_BIG,), jnp.float32)
    b_big = b_big.at[:N_SUB].set(p['up1_b'])
    b_big = b_big.at[N_SUB_PAD:N_SUB_PAD + N_FULL].set(b_comp)
    p['b_big'] = b_big.reshape(1, N_BIG)

    # cam head fully composed: cam = (cam1_w . pv2_t) @ (cam2_w @ cam3_w) + b_eff
    w23 = p['cam2_w'] @ p['cam3_w']                         # (431, 3)
    b_eff = (p['cam1_b'][0] * jnp.sum(w23, axis=0)
             + p['cam2_b'] @ p['cam3_w'] + p['cam3_b'])     # (3,)
    p['cam_w1col'] = p['cam1_w']                            # (3, 1)
    p['cam_w23'] = w23
    p['cam_b_eff'] = b_eff.reshape(1, 3)
    return p


if __name__ == "__main__":
    key = jax.random.PRNGKey(0)
    kp, ki = jax.random.split(key)
    params = init_params(kp)
    images = jax.random.normal(ki, (2, 3, 56, 56), jnp.float32)   # NCHW, batch=2

    fwd_pallas = jax.jit(lambda im, p: graphormer_body_forward(im, p, use_pallas=True))
    fwd_ref = jax.jit(lambda im, p: graphormer_body_forward(im, p, use_pallas=False))

    outs = jax.block_until_ready(fwd_pallas(images, params))
    cam_param, pred_3d_joints, pv_sub2, pv_sub, pv_full = outs
    assert cam_param.shape == (2, 3)
    assert pred_3d_joints.shape == (2, NUM_JOINTS, 3)
    assert pv_sub2.shape == (2, N_SUB2, 3)
    assert pv_sub.shape == (2, N_SUB, 3)
    assert pv_full.shape == (2, N_FULL, 3)

    # sanity check against a pure-JAX (XLA, f32, un-composed) reference
    ref = jax.block_until_ready(fwd_ref(images, params))
    for a, b in zip(outs, ref):
        a = np.asarray(a)
        b = np.asarray(b)
        assert np.all(np.isfinite(a))
        rel = np.max(np.abs(a - b)) / (np.max(np.abs(b)) + 1e-6)
        assert rel < 5e-2, f"mismatch rel err {rel}"

    print("KERNEL_OK")
</pallas_src>

<mosaic_0001>
module attributes {stable_mosaic.version = 11 : i64} {
  func.func @_grid_feat_kernel(%arg0: i32, %arg1: memref<1x49x1024xf32, #tpu.memory_space<vmem>>, %arg2: memref<1024x2176xbf16, #tpu.memory_space<vmem>>, %arg3: memref<1x2176xf32, #tpu.memory_space<vmem>>, %arg4: memref<1x49x2176xf32, #tpu.memory_space<vmem>>) attributes {dimension_semantics = [#tpu.dimension_semantics<parallel>], iteration_bounds = array<i64: 2>, scalar_prefetch = 0 : i64, scratch_operands = 0 : i64, tpu.core_type = #tpu.core_type<tc>, window_params = [{transform_indices = @transform_0, window_bounds = array<i64: 1, 49, 1024>}, {pipeline_mode = #tpu.pipeline_mode<synchronous>, transform_indices = @transform_1, window_bounds = array<i64: 1024, 2176>}, {pipeline_mode = #tpu.pipeline_mode<synchronous>, transform_indices = @transform_2, window_bounds = array<i64: 1, 2176>}, {transform_indices = @transform_3, window_bounds = array<i64: 1, 49, 2176>}]} {
    %c0 = arith.constant 0 : index
    %c0_0 = arith.constant 0 : index
    %c0_1 = arith.constant 0 : index
    %0 = vector.load %arg1[%c0, %c0_0, %c0_1] : memref<1x49x1024xf32, #tpu.memory_space<vmem>>, vector<1x49x1024xf32>
    %1 = vector.shape_cast %0 : vector<1x49x1024xf32> to vector<49x1024xf32>
    %2 = arith.truncf %1 : vector<49x1024xf32> to vector<49x1024xbf16>
    %c0_2 = arith.constant 0 : index
    %c0_3 = arith.constant 0 : index
    %3 = vector.load %arg2[%c0_2, %c0_3] : memref<1024x2176xbf16, #tpu.memory_space<vmem>>, vector<1024x2176xbf16>
    %cst = arith.constant dense<0.000000e+00> : vector<49x2176xf32>
    %4 = tpu.matmul %2, %3, %cst {dimension_numbers = #tpu.dot_dimension_numbers<[1], [0], [0], [1], [0, 0, 1, 1], [], []>} : vector<49x1024xbf16>, vector<1024x2176xbf16>, vector<49x2176xf32> -> vector<49x2176xf32>
    %c0_4 = arith.constant 0 : index
    %c0_5 = arith.constant 0 : index
    %5 = vector.load %arg3[%c0_4, %c0_5] : memref<1x2176xf32, #tpu.memory_space<vmem>>, vector<1x2176xf32>
    %6 = vector.broadcast %5 : vector<1x2176xf32> to vector<49x2176xf32>
    %7 = arith.addf %4, %6 : vector<49x2176xf32>
    %c0_6 = arith.constant 0 : index
    %c0_7 = arith.constant 0 : index
    %c0_8 = arith.constant 0 : index
    %8 = vector.load %arg4[%c0_6, %c0_7, %c0_8] : memref<1x49x2176xf32, #tpu.memory_space<vmem>>, vector<1x49x2176xf32>
    %9 = vector.shape_cast %8 : vector<1x49x2176xf32> to vector<49x2176xf32>
    %10 = vector.shape_cast %7 : vector<49x2176xf32> to vector<1x49x2176xf32>
    tpu.vector_store %arg4[%c0_6, %c0_7, %c0_8], %10 {strides = array<i32>} : memref<1x49x2176xf32, #tpu.memory_space<vmem>>, vector<1x49x2176xf32>,
    return
  }
  func.func @transform_0(%arg0: i32) -> (i32, i32, i32) {
    %c0_i32 = arith.constant 0 : i32
    %c0_i32_0 = arith.constant 0 : i32
    %c0_i32_1 = arith.constant 0 : i32
    return %arg0, %c0_i32, %c0_i32_0 : i32, i32, i32
  }
  func.func @transform_1(%arg0: i32) -> (i32, i32) {
    %c0_i32 = arith.constant 0 : i32
    %c0_i32_0 = arith.constant 0 : i32
    %c0_i32_1 = arith.constant 0 : i32
    return %c0_i32, %c0_i32_0 : i32, i32
  }
  func.func @transform_2(%arg0: i32) -> (i32, i32) {
    %c0_i32 = arith.constant 0 : i32
    %c0_i32_0 = arith.constant 0 : i32
    %c0_i32_1 = arith.constant 0 : i32
    return %c0_i32, %c0_i32_0 : i32, i32
  }
  func.func @transform_3(%arg0: i32) -> (i32, i32, i32) {
    %c0_i32 = arith.constant 0 : i32
    %c0_i32_0 = arith.constant 0 : i32
    %c0_i32_1 = arith.constant 0 : i32
    return %arg0, %c0_i32, %c0_i32_0 : i32, i32, i32
  }
}

module attributes {stable_mosaic.version = 11 : i64} {
  func.func @kernel(%arg0: i32, %arg1: memref<2x3x431xf32, #tpu.memory_space<vmem>>, %arg2: memref<431x2176xbf16, #tpu.memory_space<vmem>>, %arg3: memref<1x2176xf32, #tpu.memory_space<vmem>>, %arg4: memref<3x1xf32, #tpu.memory_space<vmem>>, %arg5: memref<431x3xf32, #tpu.memory_space<vmem>>, %arg6: memref<1x3xf32, #tpu.memory_space<vmem>>, %arg7: memref<2x3x2176xf32, #tpu.memory_space<vmem>>, %arg8: memref<2x1x3xf32, #tpu.memory_space<vmem>>) attributes {dimension_semantics = [#tpu.dimension_semantics<arbitrary>], iteration_bounds = array<i64: 4>, scalar_prefetch = 0 : i64, scratch_operands = 0 : i64, tpu.core_type = #tpu.core_type<tc>, window_params = [{pipeline_mode = #tpu.pipeline_mode<synchronous>, transform_indices = @transform_0, window_bounds = array<i64: 2, 3, 431>}, {transform_indices = @transform_1, window_bounds = array<i64: 431, 2176>}, {transform_indices = @transform_2, window_bounds = array<i64: 1, 2176>}, {pipeline_mode = #tpu.pipeline_mode<synchronous>, transform_indices = @transform_3, window_bounds = array<i64: 3, 1>}, {pipeline_mode = #tpu.pipeline_mode<synchronous>, transform_indices = @transform_4, window_bounds = array<i64: 431, 3>}, {pipeline_mode = #tpu.pipeline_mode<synchronous>, transform_indices = @transform_5, window_bounds = array<i64: 1, 3>}, {transform_indices = @transform_6, window_bounds = array<i64: 2, 3, 2176>}, {pipeline_mode = #tpu.pipeline_mode<synchronous>, transform_indices = @transform_7, window_bounds = array<i64: 2, 1, 3>}]} {
    %c0 = arith.constant 0 : index
    %c0_0 = arith.constant 0 : index
    %0 = vector.load %arg2[%c0, %c0_0] : memref<431x2176xbf16, #tpu.memory_space<vmem>>, vector<431x2176xbf16>
    %c0_1 = arith.constant 0 : index
    %c0_2 = arith.constant 0 : index
    %1 = vector.load %arg3[%c0_1, %c0_2] : memref<1x2176xf32, #tpu.memory_space<vmem>>, vector<1x2176xf32>
    %c0_3 = arith.constant 0 : index
    %c0_4 = arith.constant 0 : index
    %c0_5 = arith.constant 0 : index
    %2 = vector.load %arg1[%c0_3, %c0_4, %c0_5] : memref<2x3x431xf32, #tpu.memory_space<vmem>>, vector<1x3x431xf32>
    %3 = vector.shape_cast %2 : vector<1x3x431xf32> to vector<3x431xf32>
    %4 = arith.truncf %3 : vector<3x431xf32> to vector<3x431xbf16>
    %cst = arith.constant dense<0.000000e+00> : vector<3x2176xf32>
    %5 = tpu.matmul %4, %0, %cst {dimension_numbers = #tpu.dot_dimension_numbers<[1], [0], [0], [1], [0, 0, 1, 1], [], []>} : vector<3x431xbf16>, vector<431x2176xbf16>, vector<3x2176xf32> -> vector<3x2176xf32>
    %6 = vector.broadcast %1 : vector<1x2176xf32> to vector<3x2176xf32>
    %7 = arith.addf %5, %6 : vector<3x2176xf32>
    %c0_6 = arith.constant 0 : index
    %c0_7 = arith.constant 0 : index
    %c0_8 = arith.constant 0 : index
    %8 = vector.load %arg7[%c0_6, %c0_7, %c0_8] : memref<2x3x2176xf32, #tpu.memory_space<vmem>>, vector<1x3x2176xf32>
    %9 = vector.shape_cast %8 : vector<1x3x2176xf32> to vector<3x2176xf32>
    %10 = vector.shape_cast %7 : vector<3x2176xf32> to vector<1x3x2176xf32>
    tpu.vector_store %arg7[%c0_6, %c0_7, %c0_8], %10 {strides = array<i32>} : memref<2x3x2176xf32, #tpu.memory_space<vmem>>, vector<1x3x2176xf32>,
    %c1 = arith.constant 1 : index
    %c0_9 = arith.constant 0 : index
    %c0_10 = arith.constant 0 : index
    %11 = vector.load %arg1[%c1, %c0_9, %c0_10] : memref<2x3x431xf32, #tpu.memory_space<vmem>>, vector<1x3x431xf32>
    %12 = vector.shape_cast %11 : vector<1x3x431xf32> to vector<3x431xf32>
    %13 = arith.truncf %12 : vector<3x431xf32> to vector<3x431xbf16>
    %cst_11 = arith.constant dense<0.000000e+00> : vector<3x2176xf32>
    %14 = tpu.matmul %13, %0, %cst_11 {dimension_numbers = #tpu.dot_dimension_numbers<[1], [0], [0], [1], [0, 0, 1, 1], [], []>} : vector<3x431xbf16>, vector<431x2176xbf16>, vector<3x2176xf32> -> vector<3x2176xf32>
    %15 = vector.broadcast %1 : vector<1x2176xf32> to vector<3x2176xf32>
    %16 = arith.addf %14, %15 : vector<3x2176xf32>
    %c1_12 = arith.constant 1 : index
    %c0_13 = arith.constant 0 : index
    %c0_14 = arith.constant 0 : index
    %17 = vector.load %arg7[%c1_12, %c0_13, %c0_14] : memref<2x3x2176xf32, #tpu.memory_space<vmem>>, vector<1x3x2176xf32>
    %18 = vector.shape_cast %17 : vector<1x3x2176xf32> to vector<3x2176xf32>
    %19 = vector.shape_cast %16 : vector<3x2176xf32> to vector<1x3x2176xf32>
    tpu.vector_store %arg7[%c1_12, %c0_13, %c0_14], %19 {strides = array<i32>} : memref<2x3x2176xf32, #tpu.memory_space<vmem>>, vector<1x3x2176xf32>,
    %c0_i32 = arith.constant 0 : i32
    %20 = arith.cmpi eq, %arg0, %c0_i32 : i32
    %21 = arith.extui %20 : i1 to i32
    %c0_i32_15 = arith.constant 0 : i32
    %22 = arith.cmpi ne, %21, %c0_i32_15 : i32
    scf.if %22 {
      %c0_16 = arith.constant 0 : index
      %c0_17 = arith.constant 0 : index
      %c0_18 = arith.constant 0 : index
      %23 = vector.load %arg1[%c0_16, %c0_17, %c0_18] : memref<2x3x431xf32, #tpu.memory_space<vmem>>, vector<1x3x431xf32>
      %24 = vector.shape_cast %23 : vector<1x3x431xf32> to vector<3x431xf32>
      %c0_19 = arith.constant 0 : index
      %c0_20 = arith.constant 0 : index
      %25 = vector.load %arg4[%c0_19, %c0_20] : memref<3x1xf32, #tpu.memory_space<vmem>>, vector<3x1xf32>
      %26 = vector.broadcast %25 : vector<3x1xf32> to vector<3x431xf32>
      %27 = arith.mulf %26, %24 : vector<3x431xf32>
      %cst_21 = arith.constant dense<0.000000e+00> : vector<431xf32>
      %28 = vector.multi_reduction <add>, %27, %cst_21 [0] : vector<3x431xf32> to vector<431xf32>
      %29 = vector.shape_cast %28 : vector<431xf32> to vector<1x431xf32>
      %c0_22 = arith.constant 0 : index
      %c0_23 = arith.constant 0 : index
      %30 = vector.load %arg5[%c0_22, %c0_23] : memref<431x3xf32, #tpu.memory_space<vmem>>, vector<431x3xf32>
      %cst_24 = arith.constant dense<0.000000e+00> : vector<1x3xf32>
      %31 = tpu.matmul %29, %30, %cst_24 {dimension_numbers = #tpu.dot_dimension_numbers<[1], [0], [0], [1], [0, 0, 1, 1], [], []>} : vector<1x431xf32>, vector<431x3xf32>, vector<1x3xf32> -> vector<1x3xf32>
      %c0_25 = arith.constant 0 : index
      %c0_26 = arith.constant 0 : index
      %32 = vector.load %arg6[%c0_25, %c0_26] : memref<1x3xf32, #tpu.memory_space<vmem>>, vector<1x3xf32>
      %33 = arith.addf %31, %32 : vector<1x3xf32>
      %c0_27 = arith.constant 0 : index
      %c0_28 = arith.constant 0 : index
      %c0_29 = arith.constant 0 : index
      %34 = vector.load %arg8[%c0_27, %c0_28, %c0_29] : memref<2x1x3xf32, #tpu.memory_space<vmem>>, vector<1x1x3xf32>
      %35 = vector.shape_cast %34 : vector<1x1x3xf32> to vector<1x3xf32>
      %36 = vector.shape_cast %33 : vector<1x3xf32> to vector<1x1x3xf32>
      tpu.vector_store %arg8[%c0_27, %c0_28, %c0_29], %36 {strides = array<i32>} : memref<2x1x3xf32, #tpu.memory_space<vmem>>, vector<1x1x3xf32>,
      %c1_30 = arith.constant 1 : index
      %c0_31 = arith.constant 0 : index
      %c0_32 = arith.constant 0 : index
      %37 = vector.load %arg1[%c1_30, %c0_31, %c0_32] : memref<2x3x431xf32, #tpu.memory_space<vmem>>, vector<1x3x431xf32>
      %38 = vector.shape_cast %37 : vector<1x3x431xf32> to vector<3x431xf32>
      %c0_33 = arith.constant 0 : index
      %c0_34 = arith.constant 0 : index
      %39 = vector.load %arg4[%c0_33, %c0_34] : memref<3x1xf32, #tpu.memory_space<vmem>>, vector<3x1xf32>
      %40 = vector.broadcast %39 : vector<3x1xf32> to vector<3x431xf32>
      %41 = arith.mulf %40, %38 : vector<3x431xf32>
      %cst_35 = arith.constant dense<0.000000e+00> : vector<431xf32>
      %42 = vector.multi_reduction <add>, %41, %cst_35 [0] : vector<3x431xf32> to vector<431xf32>
      %43 = vector.shape_cast %42 : vector<431xf32> to vector<1x431xf32>
      %c0_36 = arith.constant 0 : index
      %c0_37 = arith.constant 0 : index
      %44 = vector.load %arg5[%c0_36, %c0_37] : memref<431x3xf32, #tpu.memory_space<vmem>>, vector<431x3xf32>
      %cst_38 = arith.constant dense<0.000000e+00> : vector<1x3xf32>
      %45 = tpu.matmul %43, %44, %cst_38 {dimension_numbers = #tpu.dot_dimension_numbers<[1], [0], [0], [1], [0, 0, 1, 1], [], []>} : vector<1x431xf32>, vector<431x3xf32>, vector<1x3xf32> -> vector<1x3xf32>
      %c0_39 = arith.constant 0 : index
      %c0_40 = arith.constant 0 : index
      %46 = vector.load %arg6[%c0_39, %c0_40] : memref<1x3xf32, #tpu.memory_space<vmem>>, vector<1x3xf32>
      %47 = arith.addf %45, %46 : vector<1x3xf32>
      %c1_41 = arith.constant 1 : index
      %c0_42 = arith.constant 0 : index
      %c0_43 = arith.constant 0 : index
      %48 = vector.load %arg8[%c1_41, %c0_42, %c0_43] : memref<2x1x3xf32, #tpu.memory_space<vmem>>, vector<1x1x3xf32>
      %49 = vector.shape_cast %48 : vector<1x1x3xf32> to vector<1x3xf32>
      %50 = vector.shape_cast %47 : vector<1x3xf32> to vector<1x1x3xf32>
      tpu.vector_store %arg8[%c1_41, %c0_42, %c0_43], %50 {strides = array<i32>} : memref<2x1x3xf32, #tpu.memory_space<vmem>>, vector<1x1x3xf32>,
    } else {
    }
    return
  }
  func.func @transform_0(%arg0: i32) -> (i32, i32, i32) {
    %c0_i32 = arith.constant 0 : i32
    %c0_i32_0 = arith.constant 0 : i32
    %c0_i32_1 = arith.constant 0 : i32
    %c0_i32_2 = arith.constant 0 : i32
    return %c0_i32, %c0_i32_0, %c0_i32_1 : i32, i32, i32
  }
  func.func @transform_1(%arg0: i32) -> (i32, i32) {
    %c0_i32 = arith.constant 0 : i32
    %c0_i32_0 = arith.constant 0 : i32
    return %c0_i32, %arg0 : i32, i32
  }
  func.func @transform_2(%arg0: i32) -> (i32, i32) {
    %c0_i32 = arith.constant 0 : i32
    %c0_i32_0 = arith.constant 0 : i32
    return %c0_i32, %arg0 : i32, i32
  }
  func.func @transform_3(%arg0: i32) -> (i32, i32) {
    %c0_i32 = arith.constant 0 : i32
    %c0_i32_0 = arith.constant 0 : i32
    %c0_i32_1 = arith.constant 0 : i32
    return %c0_i32, %c0_i32_0 : i32, i32
  }
  func.func @transform_4(%arg0: i32) -> (i32, i32) {
    %c0_i32 = arith.constant 0 : i32
    %c0_i32_0 = arith.constant 0 : i32
    %c0_i32_1 = arith.constant 0 : i32
    return %c0_i32, %c0_i32_0 : i32, i32
  }
  func.func @transform_5(%arg0: i32) -> (i32, i32) {
    %c0_i32 = arith.constant 0 : i32
    %c0_i32_0 = arith.constant 0 : i32
    %c0_i32_1 = arith.constant 0 : i32
    return %c0_i32, %c0_i32_0 : i32, i32
  }
  func.func @transform_6(%arg0: i32) -> (i32, i32, i32) {
    %c0_i32 = arith.constant 0 : i32
    %c0_i32_0 = arith.constant 0 : i32
    %c0_i32_1 = arith.constant 0 : i32
    return %c0_i32, %c0_i32_0, %arg0 : i32, i32, i32
  }
  func.func @transform_7(%arg0: i32) -> (i32, i32, i32) {
    %c0_i32 = arith.constant 0 : i32
    %c0_i32_0 = arith.constant 0 : i32
    %c0_i32_1 = arith.constant 0 : i32
    %c0_i32_2 = arith.constant 0 : i32
    return %c0_i32, %c0_i32_0, %c0_i32_1 : i32, i32, i32
  }
}

</mosaic_0001>

<bundles_post_ra>
// kernel: _lambda_.3
= control target key start
LH: loop header
LB: loop body
LE: loop exit
PB: predicated region body
PF: predicated region fallthrough
CT: control target
= control target key end

     0   :  { %13 = vsyncpa [#allocation5], 0  ;;  %s8722_s24 = smov 0   ;;  %s8724_s25 = smov 0   ;;  %s11486_s0 = inlined_call_operand.vmem [shape: f32[2,3,431], index: 0, kind: input, shape index: {}]   ;;  %s11487_s1 = inlined_call_operand.vmem [shape: bf16[431,8704], index: 1, kind: input, shape index: {}]   ;;  %s11488_s2 = inlined_call_operand.vmem [shape: f32[1,8704], index: 2, kind: input, shape index: {}]   ;;  %s11489_s3 = inlined_call_operand.vmem [shape: f32[3,1], index: 3, kind: input, shape index: {}]   ;;  %s11490_s4 = inlined_call_operand.vmem [shape: f32[431,3], index: 4, kind: input, shape index: {}]   ;;  %s11491_s5 = inlined_call_operand.vmem [shape: f32[1,3], index: 5, kind: input, shape index: {}]   ;;  %s11492_s6 = inlined_call_operand.vmem [shape: f32[2,3,8704], index: 6, kind: output, shape index: {0}]   ;;  %s11493_s7 = inlined_call_operand.hbm [shape: f32[2,1,3], index: 7, kind: output, shape index: {1}]  }
   0x1   :  { %s8726_s26 = smov 0  }
   0x2 LB: > { %s8738_s27 = sadd.s32 4294967295, %s8672_s26   ;;  %s8741_s28 = sadd.s32 1, %s8672_s26   ;;  %s8672_s26 = sphi %s8726_s26, %s11500_s26   ;;  %s8668_s25 = sphi %s8724_s25, %s11499_s25   ;;  %s8664_s24 = sphi %s8722_s24, %s11498_s24  }
   0x3   : > { %s44_s29 = ssub.s32 %s8672_s26, %s8741_s28  ;;  %s47_s30 = sadd.s32 1, %s8668_s25 }
   0x4   : > { %p45_p0 = scmp.eq.s32.totalorder %s44_s29, 0  ;;  %p54_p1 = scmp.ne.s32.totalorder %s8668_s25, %s8664_s24 }
   0x5   : > { %p55_p2 = scmp.eq.s32.totalorder %s8672_s26, 0  ;;  %p173_p3 = scmp.eq.s32.totalorder %s8738_s27, 3 }
   0x6   : > { %s8751_s8 = scalar_select %p45_p0, %s8668_s25, %s47_s30  }
   0x7   : > { %p56_p4 = por %p55_p2, %p54_p1  ;;  %p8755_p5 = por %p173_p3, %p54_p1 }
   0x8   : > { %p6493_p6 = scmp.ge.s32.totalorder %s8672_s26, 4 }
   0xa   : > { %228 = sbr.rel (%p6493_p6) target bundleno = 274 (0x112), region = 32 }
  0x11   : > { %231 = sbr.rel (!%p56_p4) target bundleno = 274 (0x112), region = 36  ;;  %s233_s10 = sand.u32 (%p56_p4), 1, %s8668_s25  }
  0x12   : > { %s7109_s11 = smul.u32 (%p56_p4), 68, %s8672_s26 }
  0x13   : > { %s7453_s12 = smul.u32 (%p56_p4), 3672, %s233_s10 }
  0x14   : > { %s8765_s15 = scalar_lea.vmem (%p56_p4), %s11487_s1, %s7109_s11 }
  0x15   : > { %v253_v0 = vld [vmem:[%s8765_s15] sm:$0xff] (%p56_p4)  ;;  %v255_v1 = vld [vmem:[%s8765_s15 + $0x8] sm:$0xff] (%p56_p4)  ;;  %v257_v2 = vld [vmem:[%s8765_s15 + $0x10] sm:$0xff] (%p56_p4)  ;;  %s8770_s16 = scalar_lea.vmem (%p56_p4), [#allocation2], %s7453_s12 }
  0x16   : > { %254 = vst [vmem:[%s8770_s16] sm:$0xff] (%p56_p4), %v253_v0  ;;  %256 = vst [vmem:[%s8770_s16 + $0x8] sm:$0xff] (%p56_p4), %v255_v1  ;;  %v259_v3 = vld [vmem:[%s8765_s15 + $0x18] sm:$0xff] (%p56_p4)  ;;  %v261_v4 = vld [vmem:[%s8765_s15 + $0x20] sm:$0xff] (%p56_p4) }
  0x17   : > { %258 = vst [vmem:[%s8770_s16 + $0x10] sm:$0xff] (%p56_p4), %v257_v2  ;;  %v263_v5 = vld [vmem:[%s8765_s15 + $0x28] sm:$0xff] (%p56_p4)  ;;  %260 = vst [vmem:[%s8770_s16 + $0x18] sm:$0xff] (%p56_p4), %v259_v3  ;;  %v265_v6 = vld [vmem:[%s8765_s15 + $0x30] sm:$0xff] (%p56_p4) }
  0x18   : > { %262 = vst [vmem:[%s8770_s16 + $0x20] sm:$0xff] %v261_v4  ;;  %264 = vst [vmem:[%s8770_s16 + $0x28] sm:$0xff] %v263_v5  ;;  %v267_v7 = vld [vmem:[%s8765_s15 + $0x38] sm:$0xff]  ;;  %v269_v8 = vld [vmem:[%s8765_s15 + $0x110] sm:$0xff] }
  0x19   : > { %266 = vst [vmem:[%s8770_s16 + $0x30] sm:$0xff] %v265_v6  ;;  %268 = vst [vmem:[%s8770_s16 + $0x38] sm:$0xff] %v267_v7  ;;  %v271_v9 = vld [vmem:[%s8765_s15 + $0x118] sm:$0xff]  ;;  %v273_v10 = vld [vmem:[%s8765_s15 + $0x120] sm:$0xff] }
  0x1a   : > { %270 = vst [vmem:[%s8770_s16 + $0x44] sm:$0xff] %v269_v8  ;;  %v275_v11 = vld [vmem:[%s8765_s15 + $0x128] sm:$0xff]  ;;  %272 = vst [vmem:[%s8770_s16 + $0x4c] sm:$0xff] %v271_v9  ;;  %v277_v12 = vld [vmem:[%s8765_s15 + $0x130] sm:$0xff] }
  0x1b   : > { %274 = vst [vmem:[%s8770_s16 + $0x54] sm:$0xff] %v273_v10  ;;  %276 = vst [vmem:[%s8770_s16 + $0x5c] sm:$0xff] %v275_v11  ;;  %v279_v13 = vld [vmem:[%s8765_s15 + $0x138] sm:$0xff]  ;;  %v281_v14 = vld [vmem:[%s8765_s15 + $0x140] sm:$0xff] }
  0x1c   : > { %278 = vst [vmem:[%s8770_s16 + $0x64] sm:$0xff] %v277_v12  ;;  %280 = vst [vmem:[%s8770_s16 + $0x6c] sm:$0xff] %v279_v13  ;;  %v283_v15 = vld [vmem:[%s8765_s15 + $0x148] sm:$0xff]  ;;  %v285_v16 = vld [vmem:[%s8765_s15 + $0x220] sm:$0xff] }
  0x1d   : > { %282 = vst [vmem:[%s8770_s16 + $0x74] sm:$0xff] %v281_v14  ;;  %v287_v17 = vld [vmem:[%s8765_s15 + $0x228] sm:$0xff]  ;;  %284 = vst [vmem:[%s8770_s16 + $0x7c] sm:$0xff] %v283_v15  ;;  %v289_v18 = vld [vmem:[%s8765_s15 + $0x230] sm:$0xff] }
  0x1e   : > { %286 = vst [vmem:[%s8770_s16 + $0x88] sm:$0xff] %v285_v16  ;;  %288 = vst [vmem:[%s8770_s16 + $0x90] sm:$0xff] %v287_v17  ;;  %v291_v19 = vld [vmem:[%s8765_s15 + $0x238] sm:$0xff]  ;;  %v293_v20 = vld [vmem:[%s8765_s15 + $0x240] sm:$0xff] }
  0x1f   : > { %290 = vst [vmem:[%s8770_s16 + $0x98] sm:$0xff] %v289_v18  ;;  %292 = vst [vmem:[%s8770_s16 + $0xa0] sm:$0xff] %v291_v19  ;;  %v295_v21 = vld [vmem:[%s8765_s15 + $0x248] sm:$0xff]  ;;  %v297_v22 = vld [vmem:[%s8765_s15 + $0x250] sm:$0xff] }
  0x20   : > { %294 = vst [vmem:[%s8770_s16 + $0xa8] sm:$0xff] %v293_v20  ;;  %v299_v23 = vld [vmem:[%s8765_s15 + $0x258] sm:$0xff]  ;;  %296 = vst [vmem:[%s8770_s16 + $0xb0] sm:$0xff] %v295_v21  ;;  %v301_v24 = vld [vmem:[%s8765_s15 + $0x330] sm:$0xff] }
  0x21   : > { %298 = vst [vmem:[%s8770_s16 + $0xb8] sm:$0xff] %v297_v22  ;;  %300 = vst [vmem:[%s8770_s16 + $0xc0] sm:$0xff] %v299_v23  ;;  %v303_v25 = vld [vmem:[%s8765_s15 + $0x338] sm:$0xff]  ;;  %v305_v26 = vld [vmem:[%s8765_s15 + $0x340] sm:$0xff] }
  0x22   : > { %302 = vst [vmem:[%s8770_s16 + $0xcc] sm:$0xff] %v301_v24  ;;  %304 = vst [vmem:[%s8770_s16 + $0xd4] sm:$0xff] %v303_v25  ;;  %v307_v27 = vld [vmem:[%s8765_s15 + $0x348] sm:$0xff]  ;;  %v309_v28 = vld [vmem:[%s8765_s15 + $0x350] sm:$0xff] }
  0x23   : > { %306 = vst [vmem:[%s8770_s16 + $0xdc] sm:$0xff] %v305_v26  ;;  %v311_v29 = vld [vmem:[%s8765_s15 + $0x358] sm:$0xff]  ;;  %308 = vst [vmem:[%s8770_s16 + $0xe4] sm:$0xff] %v307_v27  ;;  %v313_v30 = vld [vmem:[%s8765_s15 + $0x360] sm:$0xff] }
  0x24   : > { %310 = vst [vmem:[%s8770_s16 + $0xec] sm:$0xff] %v309_v28  ;;  %312 = vst [vmem:[%s8770_s16 + $0xf4] sm:$0xff] %v311_v29  ;;  %v315_v31 = vld [vmem:[%s8765_s15 + $0x368] sm:$0xff]  ;;  %v317_v32 = vld [vmem:[%s8765_s15 + $0x440] sm:$0xff] }
  0x25   : > { %314 = vst [vmem:[%s8770_s16 + $0xfc] sm:$0xff] %v313_v30  ;;  %316 = vst [vmem:[%s8770_s16 + $0x104] sm:$0xff] %v315_v31  ;;  %v319_v33 = vld [vmem:[%s8765_s15 + $0x448] sm:$0xff]  ;;  %v321_v34 = vld [vmem:[%s8765_s15 + $0x450] sm:$0xff] }
  0x26   : > { %318 = vst [vmem:[%s8770_s16 + $0x110] sm:$0xff] %v317_v32  ;;  %v323_v35 = vld [vmem:[%s8765_s15 + $0x458] sm:$0xff]  ;;  %320 = vst [vmem:[%s8770_s16 + $0x118] sm:$0xff] %v319_v33  ;;  %v325_v36 = vld [vmem:[%s8765_s15 + $0x460] sm:$0xff] }
  0x27   : > { %322 = vst [vmem:[%s8770_s16 + $0x120] sm:$0xff] %v321_v34  ;;  %324 = vst [vmem:[%s8770_s16 + $0x128] sm:$0xff] %v323_v35  ;;  %v327_v37 = vld [vmem:[%s8765_s15 + $0x468] sm:$0xff]  ;;  %v329_v38 = vld [vmem:[%s8765_s15 + $0x470] sm:$0xff] }
  0x28   : > { %326 = vst [vmem:[%s8770_s16 + $0x130] sm:$0xff] %v325_v36  ;;  %328 = vst [vmem:[%s8770_s16 + $0x138] sm:$0xff] %v327_v37  ;;  %v331_v39 = vld [vmem:[%s8765_s15 + $0x478] sm:$0xff]  ;;  %v333_v40 = vld [vmem:[%s8765_s15 + $0x550] sm:$0xff] }
  0x29   : > { %330 = vst [vmem:[%s8770_s16 + $0x140] sm:$0xff] %v329_v38  ;;  %v335_v41 = vld [vmem:[%s8765_s15 + $0x558] sm:$0xff]  ;;  %332 = vst [vmem:[%s8770_s16 + $0x148] sm:$0xff] %v331_v39  ;;  %v337_v42 = vld [vmem:[%s8765_s15 + $0x560] sm:$0xff] }
  0x2a   : > { %334 = vst [vmem:[%s8770_s16 + $0x154] sm:$0xff] %v333_v40  ;;  %336 = vst [vmem:[%s8770_s16 + $0x15c] sm:$0xff] %v335_v41  ;;  %v339_v43 = vld [vmem:[%s8765_s15 + $0x568] sm:$0xff]  ;;  %v341_v44 = vld [vmem:[%s8765_s15 + $0x570] sm:$0xff] }
  0x2b   : > { %338 = vst [vmem:[%s8770_s16 + $0x164] sm:$0xff] %v337_v42  ;;  %340 = vst [vmem:[%s8770_s16 + $0x16c] sm:$0xff] %v339_v43  ;;  %v343_v45 = vld [vmem:[%s8765_s15 + $0x578] sm:$0xff]  ;;  %v345_v46 = vld [vmem:[%s8765_s15 + $0x580] sm:$0xff] }
  0x2c   : > { %342 = vst [vmem:[%s8770_s16 + $0x174] sm:$0xff] %v341_v44  ;;  %v347_v47 = vld [vmem:[%s8765_s15 + $0x588] sm:$0xff]  ;;  %344 = vst [vmem:[%s8770_s16 + $0x17c] sm:$0xff] %v343_v45  ;;  %v349_v48 = vld [vmem:[%s8765_s15 + $0x660] sm:$0xff] }
  0x2d   : > { %346 = vst [vmem:[%s8770_s16 + $0x184] sm:$0xff] %v345_v46  ;;  %348 = vst [vmem:[%s8770_s16 + $0x18c] sm:$0xff] %v347_v47  ;;  %v351_v49 = vld [vmem:[%s8765_s15 + $0x668] sm:$0xff]  ;;  %v353_v50 = vld [vmem:[%s8765_s15 + $0x670] sm:$0xff] }
  0x2e   : > { %350 = vst [vmem:[%s8770_s16 + $0x198] sm:$0xff] %v349_v48  ;;  %352 = vst [vmem:[%s8770_s16 + $0x1a0] sm:$0xff] %v351_v49  ;;  %v355_v51 = vld [vmem:[%s8765_s15 + $0x678] sm:$0xff]  ;;  %v357_v52 = vld [vmem:[%s8765_s15 + $0x680] sm:$0xff] }
  0x2f   : > { %354 = vst [vmem:[%s8770_s16 + $0x1a8] sm:$0xff] %v353_v50  ;;  %v359_v53 = vld [vmem:[%s8765_s15 + $0x688] sm:$0xff]  ;;  %356 = vst [vmem:[%s8770_s16 + $0x1b0] sm:$0xff] %v355_v51  ;;  %v361_v54 = vld [vmem:[%s8765_s15 + $0x690] sm:$0xff] }
  0x30   : > { %358 = vst [vmem:[%s8770_s16 + $0x1b8] sm:$0xff] %v357_v52  ;;  %360 = vst [vmem:[%s8770_s16 + $0x1c0] sm:$0xff] %v359_v53  ;;  %v363_v55 = vld [vmem:[%s8765_s15 + $0x698] sm:$0xff]  ;;  %v365_v56 = vld [vmem:[%s8765_s15 + $0x770] sm:$0xff] }
  0x31   : > { %362 = vst [vmem:[%s8770_s16 + $0x1c8] sm:$0xff] %v361_v54  ;;  %364 = vst [vmem:[%s8770_s16 + $0x1d0] sm:$0xff] %v363_v55  ;;  %v367_v57 = vld [vmem:[%s8765_s15 + $0x778] sm:$0xff]  ;;  %v369_v58 = vld [vmem:[%s8765_s15 + $0x780] sm:$0xff] }
  0x32   : > { %366 = vst [vmem:[%s8770_s16 + $0x1dc] sm:$0xff] %v365_v56  ;;  %v371_v59 = vld [vmem:[%s8765_s15 + $0x788] sm:$0xff]  ;;  %368 = vst [vmem:[%s8770_s16 + $0x1e4] sm:$0xff] %v367_v57  ;;  %v373_v60 = vld [vmem:[%s8765_s15 + $0x790] sm:$0xff] }
  0x33   : > { %370 = vst [vmem:[%s8770_s16 + $0x1ec] sm:$0xff] %v369_v58  ;;  %372 = vst [vmem:[%s8770_s16 + $0x1f4] sm:$0xff] %v371_v59  ;;  %v375_v61 = vld [vmem:[%s8765_s15 + $0x798] sm:$0xff]  ;;  %v377_v62 = vld [vmem:[%s8765_s15 + $0x7a0] sm:$0xff] }
  0x34   : > { %374 = vst [vmem:[%s8770_s16 + $0x1fc] sm:$0xff] %v373_v60  ;;  %376 = vst [vmem:[%s8770_s16 + $0x204] sm:$0xff] %v375_v61  ;;  %v379_v63 = vld [vmem:[%s8765_s15 + $0x7a8] sm:$0xff]  ;;  %v381_v0 = vld [vmem:[%s8765_s15 + $0x880] sm:$0xff] }
  0x35   : > { %378 = vst [vmem:[%s8770_s16 + $0x20c] sm:$0xff] %v377_v62  ;;  %v383_v1 = vld [vmem:[%s8765_s15 + $0x888] sm:$0xff]  ;;  %380 = vst [vmem:[%s8770_s16 + $0x214] sm:$0xff] %v379_v63  ;;  %v385_v2 = vld [vmem:[%s8765_s15 + $0x890] sm:$0xff] }
  0x36   : > { %382 = vst [vmem:[%s8770_s16 + $0x220] sm:$0xff] %v381_v0  ;;  %384 = vst [vmem:[%s8770_s16 + $0x228] sm:$0xff] %v383_v1  ;;  %v387_v3 = vld [vmem:[%s8765_s15 + $0x898] sm:$0xff]  ;;  %v389_v4 = vld [vmem:[%s8765_s15 + $0x8a0] sm:$0xff] }
  0x37   : > { %386 = vst [vmem:[%s8770_s16 + $0x230] sm:$0xff] %v385_v2  ;;  %388 = vst [vmem:[%s8770_s16 + $0x238] sm:$0xff] %v387_v3  ;;  %v391_v5 = vld [vmem:[%s8765_s15 + $0x8a8] sm:$0xff]  ;;  %v393_v6 = vld [vmem:[%s8765_s15 + $0x8b0] sm:$0xff] }
  0x38   : > { %390 = vst [vmem:[%s8770_s16 + $0x240] sm:$0xff] %v389_v4  ;;  %v395_v7 = vld [vmem:[%s8765_s15 + $0x8b8] sm:$0xff]  ;;  %392 = vst [vmem:[%s8770_s16 + $0x248] sm:$0xff] %v391_v5  ;;  %v397_v8 = vld [vmem:[%s8765_s15 + $0x990] sm:$0xff] }
  0x39   : > { %394 = vst [vmem:[%s8770_s16 + $0x250] sm:$0xff] %v393_v6  ;;  %396 = vst [vmem:[%s8770_s16 + $0x258] sm:$0xff] %v395_v7  ;;  %v399_v9 = vld [vmem:[%s8765_s15 + $0x998] sm:$0xff]  ;;  %v401_v10 = vld [vmem:[%s8765_s15 + $0x9a0] sm:$0xff] }
  0x3a   : > { %398 = vst [vmem:[%s8770_s16 + $0x264] sm:$0xff] %v397_v8  ;;  %400 = vst [vmem:[%s8770_s16 + $0x26c] sm:$0xff] %v399_v9  ;;  %v403_v11 = vld [vmem:[%s8765_s15 + $0x9a8] sm:$0xff]  ;;  %v405_v12 = vld [vmem:[%s8765_s15 + $0x9b0] sm:$0xff] }
  0x3b   : > { %402 = vst [vmem:[%s8770_s16 + $0x274] sm:$0xff] %v401_v10  ;;  %v407_v13 = vld [vmem:[%s8765_s15 + $0x9b8] sm:$0xff]  ;;  %404 = vst [vmem:[%s8770_s16 + $0x27c] sm:$0xff] %v403_v11  ;;  %v409_v14 = vld [vmem:[%s8765_s15 + $0x9c0] sm:$0xff] }
  0x3c   : > { %406 = vst [vmem:[%s8770_s16 + $0x284] sm:$0xff] %v405_v12  ;;  %408 = vst [vmem:[%s8770_s16 + $0x28c] sm:$0xff] %v407_v13  ;;  %v411_v15 = vld [vmem:[%s8765_s15 + $0x9c8] sm:$0xff]  ;;  %v413_v16 = vld [vmem:[%s8765_s15 + $0xaa0] sm:$0xff] }
  0x3d   : > { %410 = vst [vmem:[%s8770_s16 + $0x294] sm:$0xff] %v409_v14  ;;  %412 = vst [vmem:[%s8770_s16 + $0x29c] sm:$0xff] %v411_v15  ;;  %v415_v17 = vld [vmem:[%s8765_s15 + $0xaa8] sm:$0xff]  ;;  %v417_v18 = vld [vmem:[%s8765_s15 + $0xab0] sm:$0xff] }
  0x3e   : > { %414 = vst [vmem:[%s8770_s16 + $0x2a8] sm:$0xff] %v413_v16  ;;  %v419_v19 = vld [vmem:[%s8765_s15 + $0xab8] sm:$0xff]  ;;  %416 = vst [vmem:[%s8770_s16 + $0x2b0] sm:$0xff] %v415_v17  ;;  %v421_v20 = vld [vmem:[%s8765_s15 + $0xac0] sm:$0xff] }
  0x3f   : > { %418 = vst [vmem:[%s8770_s16 + $0x2b8] sm:$0xff] %v417_v18  ;;  %420 = vst [vmem:[%s8770_s16 + $0x2c0] sm:$0xff] %v419_v19  ;;  %v423_v21 = vld [vmem:[%s8765_s15 + $0xac8] sm:$0xff]  ;;  %v425_v22 = vld [vmem:[%s8765_s15 + $0xad0] sm:$0xff] }
  0x40   : > { %422 = vst [vmem:[%s8770_s16 + $0x2c8] sm:$0xff] %v421_v20  ;;  %424 = vst [vmem:[%s8770_s16 + $0x2d0] sm:$0xff] %v423_v21  ;;  %v427_v23 = vld [vmem:[%s8765_s15 + $0xad8] sm:$0xff]  ;;  %v429_v24 = vld [vmem:[%s8765_s15 + $0xbb0] sm:$0xff] }
  0x41   : > { %426 = vst [vmem:[%s8770_s16 + $0x2d8] sm:$0xff] %v425_v22  ;;  %v431_v25 = vld [vmem:[%s8765_s15 + $0xbb8] sm:$0xff]  ;;  %428 = vst [vmem:[%s8770_s16 + $0x2e0] sm:$0xff] %v427_v23  ;;  %v433_v26 = vld [vmem:[%s8765_s15 + $0xbc0] sm:$0xff] }
  0x42   : > { %430 = vst [vmem:[%s8770_s16 + $0x2ec] sm:$0xff] %v429_v24  ;;  %432 = vst [vmem:[%s8770_s16 + $0x2f4] sm:$0xff] %v431_v25  ;;  %v435_v27 = vld [vmem:[%s8765_s15 + $0xbc8] sm:$0xff]  ;;  %v437_v28 = vld [vmem:[%s8765_s15 + $0xbd0] sm:$0xff] }
  0x43   : > { %434 = vst [vmem:[%s8770_s16 + $0x2fc] sm:$0xff] %v433_v26  ;;  %436 = vst [vmem:[%s8770_s16 + $0x304] sm:$0xff] %v435_v27  ;;  %v439_v29 = vld [vmem:[%s8765_s15 + $0xbd8] sm:$0xff]  ;;  %v441_v30 = vld [vmem:[%s8765_s15 + $0xbe0] sm:$0xff] }
  0x44   : > { %438 = vst [vmem:[%s8770_s16 + $0x30c] sm:$0xff] %v437_v28  ;;  %v443_v31 = vld [vmem:[%s8765_s15 + $0xbe8] sm:$0xff]  ;;  %440 = vst [vmem:[%s8770_s16 + $0x314] sm:$0xff] %v439_v29  ;;  %v445_v32 = vld [vmem:[%s8765_s15 + $0xcc0] sm:$0xff] }
  0x45   : > { %442 = vst [vmem:[%s8770_s16 + $0x31c] sm:$0xff] %v441_v30  ;;  %444 = vst [vmem:[%s8770_s16 + $0x324] sm:$0xff] %v443_v31  ;;  %v447_v33 = vld [vmem:[%s8765_s15 + $0xcc8] sm:$0xff]  ;;  %v449_v34 = vld [vmem:[%s8765_s15 + $0xcd0] sm:$0xff] }
  0x46   : > { %446 = vst [vmem:[%s8770_s16 + $0x330] sm:$0xff] %v445_v32  ;;  %448 = vst [vmem:[%s8770_s16 + $0x338] sm:$0xff] %v447_v33  ;;  %v451_v35 = vld [vmem:[%s8765_s15 + $0xcd8] sm:$0xff]  ;;  %v453_v36 = vld [vmem:[%s8765_s15 + $0xce0] sm:$0xff] }
  0x47   : > { %450 = vst [vmem:[%s8770_s16 + $0x340] sm:$0xff] %v449_v34  ;;  %v455_v37 = vld [vmem:[%s8765_s15 + $0xce8] sm:$0xff]  ;;  %452 = vst [vmem:[%s8770_s16 + $0x348] sm:$0xff] %v451_v35  ;;  %v457_v38 = vld [vmem:[%s8765_s15 + $0xcf0] sm:$0xff] }
  0x48   : > { %454 = vst [vmem:[%s8770_s16 + $0x350] sm:$0xff] %v453_v36  ;;  %456 = vst [vmem:[%s8770_s16 + $0x358] sm:$0xff] %v455_v37  ;;  %v459_v39 = vld [vmem:[%s8765_s15 + $0xcf8] sm:$0xff]  ;;  %v461_v40 = vld [vmem:[%s8765_s15 + $0xdd0] sm:$0xff] }
  0x49   : > { %458 = vst [vmem:[%s8770_s16 + $0x360] sm:$0xff] %v457_v38  ;;  %460 = vst [vmem:[%s8770_s16 + $0x368] sm:$0xff] %v459_v39  ;;  %v463_v41 = vld [vmem:[%s8765_s15 + $0xdd8] sm:$0xff]  ;;  %v465_v42 = vld [vmem:[%s8765_s15 + $0xde0] sm:$0xff] }
  0x4a   : > { %462 = vst [vmem:[%s8770_s16 + $0x374] sm:$0xff] %v461_v40  ;;  %v467_v43 = vld [vmem:[%s8765_s15 + $0xde8] sm:$0xff]  ;;  %464 = vst [vmem:[%s8770_s16 + $0x37c] sm:$0xff] %v463_v41  ;;  %v469_v44 = vld [vmem:[%s8765_s15 + $0xdf0] sm:$0xff] }
  0x4b   : > { %466 = vst [vmem:[%s8770_s16 + $0x384] sm:$0xff] %v465_v42  ;;  %468 = vst [vmem:[%s8770_s16 + $0x38c] sm:$0xff] %v467_v43  ;;  %v471_v45 = vld [vmem:[%s8765_s15 + $0xdf8] sm:$0xff]  ;;  %v473_v46 = vld [vmem:[%s8765_s15 + $0xe00] sm:$0xff] }
  0x4c   : > { %470 = vst [vmem:[%s8770_s16 + $0x394] sm:$0xff] %v469_v44  ;;  %472 = vst [vmem:[%s8770_s16 + $0x39c] sm:$0xff] %v471_v45  ;;  %v475_v47 = vld [vmem:[%s8765_s15 + $0xe08] sm:$0xff]  ;;  %v477_v48 = vld [vmem:[%s8765_s15 + $0xee0] sm:$0xff] }
  0x4d   : > { %474 = vst [vmem:[%s8770_s16 + $0x3a4] sm:$0xff] %v473_v46  ;;  %v479_v49 = vld [vmem:[%s8765_s15 + $0xee8] sm:$0xff]  ;;  %476 = vst [vmem:[%s8770_s16 + $0x3ac] sm:$0xff] %v475_v47  ;;  %v481_v50 = vld [vmem:[%s8765_s15 + $0xef0] sm:$0xff] }
  0x4e   : > { %478 = vst [vmem:[%s8770_s16 + $0x3b8] sm:$0xff] %v477_v48  ;;  %480 = vst [vmem:[%s8770_s16 + $0x3c0] sm:$0xff] %v479_v49  ;;  %v483_v51 = vld [vmem:[%s8765_s15 + $0xef8] sm:$0xff]  ;;  %v485_v52 = vld [vmem:[%s8765_s15 + $0xf00] sm:$0xff] }
  0x4f   : > { %482 = vst [vmem:[%s8770_s16 + $0x3c8] sm:$0xff] %v481_v50  ;;  %484 = vst [vmem:[%s8770_s16 + $0x3d0] sm:$0xff] %v483_v51  ;;  %v487_v53 = vld [vmem:[%s8765_s15 + $0xf08] sm:$0xff]  ;;  %v489_v54 = vld [vmem:[%s8765_s15 + $0xf10] sm:$0xff] }
  0x50   : > { %486 = vst [vmem:[%s8770_s16 + $0x3d8] sm:$0xff] %v485_v52  ;;  %v491_v55 = vld [vmem:[%s8765_s15 + $0xf18] sm:$0xff]  ;;  %488 = vst [vmem:[%s8770_s16 + $0x3e0] sm:$0xff] %v487_v53  ;;  %v493_v56 = vld [vmem:[%s8765_s15 + $0xff0] sm:$0xff] }
  0x51   : > { %490 = vst [vmem:[%s8770_s16 + $0x3e8] sm:$0xff] %v489_v54  ;;  %492 = vst [vmem:[%s8770_s16 + $0x3f0] sm:$0xff] %v491_v55  ;;  %v495_v57 = vld [vmem:[%s8765_s15 + $0xff8] sm:$0xff]  ;;  %v497_v58 = vld [vmem:[%s8765_s15 + $0x1000] sm:$0xff] }
  0x52   : > { %494 = vst [vmem:[%s8770_s16 + $0x3fc] sm:$0xff] %v493_v56  ;;  %496 = vst [vmem:[%s8770_s16 + $0x404] sm:$0xff] %v495_v57  ;;  %v499_v59 = vld [vmem:[%s8765_s15 + $0x1008] sm:$0xff]  ;;  %v501_v60 = vld [vmem:[%s8765_s15 + $0x1010] sm:$0xff] }
  0x53   : > { %498 = vst [vmem:[%s8770_s16 + $0x40c] sm:$0xff] %v497_v58  ;;  %v503_v61 = vld [vmem:[%s8765_s15 + $0x1018] sm:$0xff]  ;;  %500 = vst [vmem:[%s8770_s16 + $0x414] sm:$0xff] %v499_v59  ;;  %v505_v62 = vld [vmem:[%s8765_s15 + $0x1020] sm:$0xff] }
  0x54   : > { %502 = vst [vmem:[%s8770_s16 + $0x41c] sm:$0xff] %v501_v60  ;;  %504 = vst [vmem:[%s8770_s16 + $0x424] sm:$0xff] %v503_v61  ;;  %v507_v63 = vld [vmem:[%s8765_s15 + $0x1028] sm:$0xff]  ;;  %v509_v0 = vld [vmem:[%s8765_s15 + $0x1100] sm:$0xff] }
  0x55   : > { %506 = vst [vmem:[%s8770_s16 + $0x42c] sm:$0xff] %v505_v62  ;;  %508 = vst [vmem:[%s8770_s16 + $0x434] sm:$0xff] %v507_v63  ;;  %v511_v1 = vld [vmem:[%s8765_s15 + $0x1108] sm:$0xff]  ;;  %v513_v2 = vld [vmem:[%s8765_s15 + $0x1110] sm:$0xff] }
  0x56   : > { %510 = vst [vmem:[%s8770_s16 + $0x440] sm:$0xff] %v509_v0  ;;  %v515_v3 = vld [vmem:[%s8765_s15 + $0x1118] sm:$0xff]  ;;  %512 = vst [vmem:[%s8770_s16 + $0x448] sm:$0xff] %v511_v1  ;;  %v517_v4 = vld [vmem:[%s8765_s15 + $0x1120] sm:$0xff] }
  0x57   : > { %514 = vst [vmem:[%s8770_s16 + $0x450] sm:$0xff] %v513_v2  ;;  %516 = vst [vmem:[%s8770_s16 + $0x458] sm:$0xff] %v515_v3  ;;  %v519_v5 = vld [vmem:[%s8765_s15 + $0x1128] sm:$0xff]  ;;  %v521_v6 = vld [vmem:[%s8765_s15 + $0x1130] sm:$0xff] }
  0x58   : > { %518 = vst [vmem:[%s8770_s16 + $0x460] sm:$0xff] %v517_v4  ;;  %520 = vst [vmem:[%s8770_s16 + $0x468] sm:$0xff] %v519_v5  ;;  %v523_v7 = vld [vmem:[%s8765_s15 + $0x1138] sm:$0xff]  ;;  %v525_v8 = vld [vmem:[%s8765_s15 + $0x1210] sm:$0xff] }
  0x59   : > { %522 = vst [vmem:[%s8770_s16 + $0x470] sm:$0xff] %v521_v6  ;;  %v527_v9 = vld [vmem:[%s8765_s15 + $0x1218] sm:$0xff]  ;;  %524 = vst [vmem:[%s8770_s16 + $0x478] sm:$0xff] %v523_v7  ;;  %v529_v10 = vld [vmem:[%s8765_s15 + $0x1220] sm:$0xff] }
  0x5a   : > { %526 = vst [vmem:[%s8770_s16 + $0x484] sm:$0xff] %v525_v8  ;;  %528 = vst [vmem:[%s8770_s16 + $0x48c] sm:$0xff] %v527_v9  ;;  %v531_v11 = vld [vmem:[%s8765_s15 + $0x1228] sm:$0xff]  ;;  %v533_v12 = vld [vmem:[%s8765_s15 + $0x1230] sm:$0xff] }
  0x5b   : > { %530 = vst [vmem:[%s8770_s16 + $0x494] sm:$0xff] %v529_v10  ;;  %532 = vst [vmem:[%s8770_s16 + $0x49c] sm:$0xff] %v531_v11  ;;  %v535_v13 = vld [vmem:[%s8765_s15 + $0x1238] sm:$0xff]  ;;  %v537_v14 = vld [vmem:[%s8765_s15 + $0x1240] sm:$0xff] }
  0x5c   : > { %534 = vst [vmem:[%s8770_s16 + $0x4a4] sm:$0xff] %v533_v12  ;;  %v539_v15 = vld [vmem:[%s8765_s15 + $0x1248] sm:$0xff]  ;;  %536 = vst [vmem:[%s8770_s16 + $0x4ac] sm:$0xff] %v535_v13  ;;  %v541_v16 = vld [vmem:[%s8765_s15 + $0x1320] sm:$0xff] }
  0x5d   : > { %538 = vst [vmem:[%s8770_s16 + $0x4b4] sm:$0xff] %v537_v14  ;;  %540 = vst [vmem:[%s8770_s16 + $0x4bc] sm:$0xff] %v539_v15  ;;  %v543_v17 = vld [vmem:[%s8765_s15 + $0x1328] sm:$0xff]  ;;  %v545_v18 = vld [vmem:[%s8765_s15 + $0x1330] sm:$0xff] }
  0x5e   : > { %542 = vst [vmem:[%s8770_s16 + $0x4c8] sm:$0xff] %v541_v16  ;;  %544 = vst [vmem:[%s8770_s16 + $0x4d0] sm:$0xff] %v543_v17  ;;  %v547_v19 = vld [vmem:[%s8765_s15 + $0x1338] sm:$0xff]  ;;  %v549_v20 = vld [vmem:[%s8765_s15 + $0x1340] sm:$0xff] }
  0x5f   : > { %546 = vst [vmem:[%s8770_s16 + $0x4d8] sm:$0xff] %v545_v18  ;;  %v551_v21 = vld [vmem:[%s8765_s15 + $0x1348] sm:$0xff]  ;;  %548 = vst [vmem:[%s8770_s16 + $0x4e0] sm:$0xff] %v547_v19  ;;  %v553_v22 = vld [vmem:[%s8765_s15 + $0x1350] sm:$0xff] }
  0x60   : > { %550 = vst [vmem:[%s8770_s16 + $0x4e8] sm:$0xff] %v549_v20  ;;  %552 = vst [vmem:[%s8770_s16 + $0x4f0] sm:$0xff] %v551_v21  ;;  %v555_v23 = vld [vmem:[%s8765_s15 + $0x1358] sm:$0xff]  ;;  %v557_v24 = vld [vmem:[%s8765_s15 + $0x1430] sm:$0xff] }
  0x61   : > { %554 = vst [vmem:[%s8770_s16 + $0x4f8] sm:$0xff] %v553_v22  ;;  %556 = vst [vmem:[%s8770_s16 + $0x500] sm:$0xff] %v555_v23  ;;  %v559_v25 = vld [vmem:[%s8765_s15 + $0x1438] sm:$0xff]  ;;  %v561_v26 = vld [vmem:[%s8765_s15 + $0x1440] sm:$0xff] }
  0x62   : > { %558 = vst [vmem:[%s8770_s16 + $0x50c] sm:$0xff] %v557_v24  ;;  %v563_v27 = vld [vmem:[%s8765_s15 + $0x1448] sm:$0xff]  ;;  %560 = vst [vmem:[%s8770_s16 + $0x514] sm:$0xff] %v559_v25  ;;  %v565_v28 = vld [vmem:[%s8765_s15 + $0x1450] sm:$0xff] }
  0x63   : > { %562 = vst [vmem:[%s8770_s16 + $0x51c] sm:$0xff] %v561_v26  ;;  %564 = vst [vmem:[%s8770_s16 + $0x524] sm:$0xff] %v563_v27  ;;  %v567_v29 = vld [vmem:[%s8765_s15 + $0x1458] sm:$0xff]  ;;  %v569_v30 = vld [vmem:[%s8765_s15 + $0x1460] sm:$0xff] }
  0x64   : > { %566 = vst [vmem:[%s8770_s16 + $0x52c] sm:$0xff] %v565_v28  ;;  %568 = vst [vmem:[%s8770_s16 + $0x534] sm:$0xff] %v567_v29  ;;  %v571_v31 = vld [vmem:[%s8765_s15 + $0x1468] sm:$0xff]  ;;  %v573_v32 = vld [vmem:[%s8765_s15 + $0x1540] sm:$0xff] }
  0x65   : > { %570 = vst [vmem:[%s8770_s16 + $0x53c] sm:$0xff] %v569_v30  ;;  %v575_v33 = vld [vmem:[%s8765_s15 + $0x1548] sm:$0xff]  ;;  %572 = vst [vmem:[%s8770_s16 + $0x544] sm:$0xff] %v571_v31  ;;  %v577_v34 = vld [vmem:[%s8765_s15 + $0x1550] sm:$0xff] }
  0x66   : > { %574 = vst [vmem:[%s8770_s16 + $0x550] sm:$0xff] %v573_v32  ;;  %576 = vst [vmem:[%s8770_s16 + $0x558] sm:$0xff] %v575_v33  ;;  %v579_v35 = vld [vmem:[%s8765_s15 + $0x1558] sm:$0xff]  ;;  %v581_v36 = vld [vmem:[%s8765_s15 + $0x1560] sm:$0xff] }
  0x67   : > { %578 = vst [vmem:[%s8770_s16 + $0x560] sm:$0xff] %v577_v34  ;;  %580 = vst [vmem:[%s8770_s16 + $0x568] sm:$0xff] %v579_v35  ;;  %v583_v37 = vld [vmem:[%s8765_s15 + $0x1568] sm:$0xff]  ;;  %v585_v38 = vld [vmem:[%s8765_s15 + $0x1570] sm:$0xff] }
  0x68   : > { %582 = vst [vmem:[%s8770_s16 + $0x570] sm:$0xff] %v581_v36  ;;  %v587_v39 = vld [vmem:[%s8765_s15 + $0x1578] sm:$0xff]  ;;  %584 = vst [vmem:[%s8770_s16 + $0x578] sm:$0xff] %v583_v37  ;;  %v589_v40 = vld [vmem:[%s8765_s15 + $0x1650] sm:$0xff] }
  0x69   : > { %586 = vst [vmem:[%s8770_s16 + $0x580] sm:$0xff] %v585_v38  ;;  %588 = vst [vmem:[%s8770_s16 + $0x588] sm:$0xff] %v587_v39  ;;  %v591_v41 = vld [vmem:[%s8765_s15 + $0x1658] sm:$0xff]  ;;  %v593_v42 = vld [vmem:[%s8765_s15 + $0x1660] sm:$0xff] }
  0x6a   : > { %590 = vst [vmem:[%s8770_s16 + $0x594] sm:$0xff] %v589_v40  ;;  %592 = vst [vmem:[%s8770_s16 + $0x59c] sm:$0xff] %v591_v41  ;;  %v595_v43 = vld [vmem:[%s8765_s15 + $0x1668] sm:$0xff]  ;;  %v597_v44 = vld [vmem:[%s8765_s15 + $0x1670] sm:$0xff] }
  0x6b   : > { %594 = vst [vmem:[%s8770_s16 + $0x5a4] sm:$0xff] %v593_v42  ;;  %v599_v45 = vld [vmem:[%s8765_s15 + $0x1678] sm:$0xff]  ;;  %596 = vst [vmem:[%s8770_s16 + $0x5ac] sm:$0xff] %v595_v43  ;;  %v601_v46 = vld [vmem:[%s8765_s15 + $0x1680] sm:$0xff] }
  0x6c   : > { %598 = vst [vmem:[%s8770_s16 + $0x5b4] sm:$0xff] %v597_v44  ;;  %600 = vst [vmem:[%s8770_s16 + $0x5bc] sm:$0xff] %v599_v45  ;;  %v603_v47 = vld [vmem:[%s8765_s15 + $0x1688] sm:$0xff]  ;;  %v605_v48 = vld [vmem:[%s8765_s15 + $0x1760] sm:$0xff] }
  0x6d   : > { %602 = vst [vmem:[%s8770_s16 + $0x5c4] sm:$0xff] %v601_v46  ;;  %604 = vst [vmem:[%s8770_s16 + $0x5cc] sm:$0xff] %v603_v47  ;;  %v607_v49 = vld [vmem:[%s8765_s15 + $0x1768] sm:$0xff]  ;;  %v609_v50 = vld [vmem:[%s8765_s15 + $0x1770] sm:$0xff] }
  0x6e   : > { %606 = vst [vmem:[%s8770_s16 + $0x5d8] sm:$0xff] %v605_v48  ;;  %v611_v51 = vld [vmem:[%s8765_s15 + $0x1778] sm:$0xff]  ;;  %608 = vst [vmem:[%s8770_s16 + $0x5e0] sm:$0xff] %v607_v49  ;;  %v613_v52 = vld [vmem:[%s8765_s15 + $0x1780] sm:$0xff] }
  0x6f   : > { %610 = vst [vmem:[%s8770_s16 + $0x5e8] sm:$0xff] %v609_v50  ;;  %612 = vst [vmem:[%s8770_s16 + $0x5f0] sm:$0xff] %v611_v51  ;;  %v615_v53 = vld [vmem:[%s8765_s15 + $0x1788] sm:$0xff]  ;;  %v617_v54 = vld [vmem:[%s8765_s15 + $0x1790] sm:$0xff] }
  0x70   : > { %614 = vst [vmem:[%s8770_s16 + $0x5f8] sm:$0xff] %v613_v52  ;;  %616 = vst [vmem:[%s8770_s16 + $0x600] sm:$0xff] %v615_v53  ;;  %v619_v55 = vld [vmem:[%s8765_s15 + $0x1798] sm:$0xff]  ;;  %v621_v56 = vld [vmem:[%s8765_s15 + $0x1870] sm:$0xff] }
  0x71   : > { %618 = vst [vmem:[%s8770_s16 + $0x608] sm:$0xff] %v617_v54  ;;  %v623_v57 = vld [vmem:[%s8765_s15 + $0x1878] sm:$0xff]  ;;  %620 = vst [vmem:[%s8770_s16 + $0x610] sm:$0xff] %v619_v55  ;;  %v625_v58 = vld [vmem:[%s8765_s15 + $0x1880] sm:$0xff] }
  0x72   : > { %622 = vst [vmem:[%s8770_s16 + $0x61c] sm:$0xff] %v621_v56  ;;  %624 = vst [vmem:[%s8770_s16 + $0x624] sm:$0xff] %v623_v57  ;;  %v627_v59 = vld [vmem:[%s8765_s15 + $0x1888] sm:$0xff]  ;;  %v629_v60 = vld [vmem:[%s8765_s15 + $0x1890] sm:$0xff] }
  0x73   : > { %626 = vst [vmem:[%s8770_s16 + $0x62c] sm:$0xff] %v625_v58  ;;  %628 = vst [vmem:[%s8770_s16 + $0x634] sm:$0xff] %v627_v59  ;;  %v631_v61 = vld [vmem:[%s8765_s15 + $0x1898] sm:$0xff]  ;;  %v633_v62 = vld [vmem:[%s8765_s15 + $0x18a0] sm:$0xff] }
  0x74   : > { %630 = vst [vmem:[%s8770_s16 + $0x63c] sm:$0xff] %v629_v60  ;;  %v635_v63 = vld [vmem:[%s8765_s15 + $0x18a8] sm:$0xff]  ;;  %632 = vst [vmem:[%s8770_s16 + $0x644] sm:$0xff] %v631_v61  ;;  %v637_v0 = vld [vmem:[%s8765_s15 + $0x1980] sm:$0xff] }
  0x75   : > { %634 = vst [vmem:[%s8770_s16 + $0x64c] sm:$0xff] %v633_v62  ;;  %636 = vst [vmem:[%s8770_s16 + $0x654] sm:$0xff] %v635_v63  ;;  %v639_v1 = vld [vmem:[%s8765_s15 + $0x1988] sm:$0xff]  ;;  %v641_v2 = vld [vmem:[%s8765_s15 + $0x1990] sm:$0xff] }
  0x76   : > { %638 = vst [vmem:[%s8770_s16 + $0x660] sm:$0xff] %v637_v0  ;;  %640 = vst [vmem:[%s8770_s16 + $0x668] sm:$0xff] %v639_v1  ;;  %v643_v3 = vld [vmem:[%s8765_s15 + $0x1998] sm:$0xff]  ;;  %v645_v4 = vld [vmem:[%s8765_s15 + $0x19a0] sm:$0xff] }
  0x77   : > { %642 = vst [vmem:[%s8770_s16 + $0x670] sm:$0xff] %v641_v2  ;;  %v647_v5 = vld [vmem:[%s8765_s15 + $0x19a8] sm:$0xff]  ;;  %644 = vst [vmem:[%s8770_s16 + $0x678] sm:$0xff] %v643_v3  ;;  %v649_v6 = vld [vmem:[%s8765_s15 + $0x19b0] sm:$0xff] }
  0x78   : > { %646 = vst [vmem:[%s8770_s16 + $0x680] sm:$0xff] %v645_v4  ;;  %648 = vst [vmem:[%s8770_s16 + $0x688] sm:$0xff] %v647_v5  ;;  %v651_v7 = vld [vmem:[%s8765_s15 + $0x19b8] sm:$0xff]  ;;  %v653_v8 = vld [vmem:[%s8765_s15 + $0x1a90] sm:$0xff] }
  0x79   : > { %650 = vst [vmem:[%s8770_s16 + $0x690] sm:$0xff] %v649_v6  ;;  %652 = vst [vmem:[%s8770_s16 + $0x698] sm:$0xff] %v651_v7  ;;  %v655_v9 = vld [vmem:[%s8765_s15 + $0x1a98] sm:$0xff]  ;;  %v657_v10 = vld [vmem:[%s8765_s15 + $0x1aa0] sm:$0xff] }
  0x7a   : > { %654 = vst [vmem:[%s8770_s16 + $0x6a4] sm:$0xff] %v653_v8  ;;  %v659_v11 = vld [vmem:[%s8765_s15 + $0x1aa8] sm:$0xff]  ;;  %656 = vst [vmem:[%s8770_s16 + $0x6ac] sm:$0xff] %v655_v9  ;;  %v661_v12 = vld [vmem:[%s8765_s15 + $0x1ab0] sm:$0xff] }
  0x7b   : > { %658 = vst [vmem:[%s8770_s16 + $0x6b4] sm:$0xff] %v657_v10  ;;  %660 = vst [vmem:[%s8770_s16 + $0x6bc] sm:$0xff] %v659_v11  ;;  %v663_v13 = vld [vmem:[%s8765_s15 + $0x1ab8] sm:$0xff]  ;;  %v665_v14 = vld [vmem:[%s8765_s15 + $0x1ac0] sm:$0xff] }
  0x7c   : > { %662 = vst [vmem:[%s8770_s16 + $0x6c4] sm:$0xff] %v661_v12  ;;  %664 = vst [vmem:[%s8770_s16 + $0x6cc] sm:$0xff] %v663_v13  ;;  %v667_v15 = vld [vmem:[%s8765_s15 + $0x1ac8] sm:$0xff]  ;;  %v669_v16 = vld [vmem:[%s8765_s15 + $0x1ba0] sm:$0xff] }
  0x7d   : > { %666 = vst [vmem:[%s8770_s16 + $0x6d4] sm:$0xff] %v665_v14  ;;  %v671_v17 = vld [vmem:[%s8765_s15 + $0x1ba8] sm:$0xff]  ;;  %668 = vst [vmem:[%s8770_s16 + $0x6dc] sm:$0xff] %v667_v15  ;;  %v673_v18 = vld [vmem:[%s8765_s15 + $0x1bb0] sm:$0xff] }
  0x7e   : > { %670 = vst [vmem:[%s8770_s16 + $0x6e8] sm:$0xff] %v669_v16  ;;  %672 = vst [vmem:[%s8770_s16 + $0x6f0] sm:$0xff] %v671_v17  ;;  %v675_v19 = vld [vmem:[%s8765_s15 + $0x1bb8] sm:$0xff]  ;;  %v677_v20 = vld [vmem:[%s8765_s15 + $0x1bc0] sm:$0xff] }
  0x7f   : > { %674 = vst [vmem:[%s8770_s16 + $0x6f8] sm:$0xff] %v673_v18  ;;  %676 = vst [vmem:[%s8770_s16 + $0x700] sm:$0xff] %v675_v19  ;;  %v679_v21 = vld [vmem:[%s8765_s15 + $0x1bc8] sm:$0xff]  ;;  %v681_v22 = vld [vmem:[%s8765_s15 + $0x1bd0] sm:$0xff] }
  0x80   : > { %678 = vst [vmem:[%s8770_s16 + $0x708] sm:$0xff] %v677_v20  ;;  %v683_v23 = vld [vmem:[%s8765_s15 + $0x1bd8] sm:$0xff]  ;;  %680 = vst [vmem:[%s8770_s16 + $0x710] sm:$0xff] %v679_v21  ;;  %v685_v24 = vld [vmem:[%s8765_s15 + $0x1cb0] sm:$0xff] }
  0x81   : > { %682 = vst [vmem:[%s8770_s16 + $0x718] sm:$0xff] %v681_v22  ;;  %684 = vst [vmem:[%s8770_s16 + $0x720] sm:$0xff] %v683_v23  ;;  %v687_v25 = vld [vmem:[%s8765_s15 + $0x1cb8] sm:$0xff]  ;;  %v689_v26 = vld [vmem:[%s8765_s15 + $0x1cc0] sm:$0xff] }
  0x82   : > { %686 = vst [vmem:[%s8770_s16 + $0x72c] sm:$0xff] %v685_v24  ;;  %688 = vst [vmem:[%s8770_s16 + $0x734] sm:$0xff] %v687_v25  ;;  %v691_v27 = vld [vmem:[%s8765_s15 + $0x1cc8] sm:$0xff]  ;;  %v693_v28 = vld [vmem:[%s8765_s15 + $0x1cd0] sm:$0xff] }
  0x83   : > { %690 = vst [vmem:[%s8770_s16 + $0x73c] sm:$0xff] %v689_v26  ;;  %v695_v29 = vld [vmem:[%s8765_s15 + $0x1cd8] sm:$0xff]  ;;  %692 = vst [vmem:[%s8770_s16 + $0x744] sm:$0xff] %v691_v27  ;;  %v697_v30 = vld [vmem:[%s8765_s15 + $0x1ce0] sm:$0xff] }
  0x84   : > { %694 = vst [vmem:[%s8770_s16 + $0x74c] sm:$0xff] %v693_v28  ;;  %696 = vst [vmem:[%s8770_s16 + $0x754] sm:$0xff] %v695_v29  ;;  %v699_v31 = vld [vmem:[%s8765_s15 + $0x1ce8] sm:$0xff]  ;;  %v701_v32 = vld [vmem:[%s8765_s15 + $0x1dc0] sm:$0xff] }
  0x85   : > { %698 = vst [vmem:[%s8770_s16 + $0x75c] sm:$0xff] %v697_v30  ;;  %700 = vst [vmem:[%s8770_s16 + $0x764] sm:$0xff] %v699_v31  ;;  %v703_v33 = vld [vmem:[%s8765_s15 + $0x1dc8] sm:$0xff]  ;;  %v705_v34 = vld [vmem:[%s8765_s15 + $0x1dd0] sm:$0xff] }
  0x86   : > { %702 = vst [vmem:[%s8770_s16 + $0x770] sm:$0xff] %v701_v32  ;;  %v707_v35 = vld [vmem:[%s8765_s15 + $0x1dd8] sm:$0xff]  ;;  %704 = vst [vmem:[%s8770_s16 + $0x778] sm:$0xff] %v703_v33  ;;  %v709_v36 = vld [vmem:[%s8765_s15 + $0x1de0] sm:$0xff] }
  0x87   : > { %706 = vst [vmem:[%s8770_s16 + $0x780] sm:$0xff] %v705_v34  ;;  %708 = vst [vmem:[%s8770_s16 + $0x788] sm:$0xff] %v707_v35  ;;  %v711_v37 = vld [vmem:[%s8765_s15 + $0x1de8] sm:$0xff]  ;;  %v713_v38 = vld [vmem:[%s8765_s15 + $0x1df0] sm:$0xff] }
  0x88   : > { %710 = vst [vmem:[%s8770_s16 + $0x790] sm:$0xff] %v709_v36  ;;  %712 = vst [vmem:[%s8770_s16 + $0x798] sm:$0xff] %v711_v37  ;;  %v715_v39 = vld [vmem:[%s8765_s15 + $0x1df8] sm:$0xff]  ;;  %v717_v40 = vld [vmem:[%s8765_s15 + $0x1ed0] sm:$0xff] }
  0x89   : > { %714 = vst [vmem:[%s8770_s16 + $0x7a0] sm:$0xff] %v713_v38  ;;  %v719_v41 = vld [vmem:[%s8765_s15 + $0x1ed8] sm:$0xff]  ;;  %716 = vst [vmem:[%s8770_s16 + $0x7a8] sm:$0xff] %v715_v39  ;;  %v721_v42 = vld [vmem:[%s8765_s15 + $0x1ee0] sm:$0xff] }
  0x8a   : > { %718 = vst [vmem:[%s8770_s16 + $0x7b4] sm:$0xff] %v717_v40  ;;  %720 = vst [vmem:[%s8770_s16 + $0x7bc] sm:$0xff] %v719_v41  ;;  %v723_v43 = vld [vmem:[%s8765_s15 + $0x1ee8] sm:$0xff]  ;;  %v725_v44 = vld [vmem:[%s8765_s15 + $0x1ef0] sm:$0xff] }
  0x8b   : > { %722 = vst [vmem:[%s8770_s16 + $0x7c4] sm:$0xff] %v721_v42  ;;  %724 = vst [vmem:[%s8770_s16 + $0x7cc] sm:$0xff] %v723_v43  ;;  %v727_v45 = vld [vmem:[%s8765_s15 + $0x1ef8] sm:$0xff]  ;;  %v729_v46 = vld [vmem:[%s8765_s15 + $0x1f00] sm:$0xff] }
  0x8c   : > { %726 = vst [vmem:[%s8770_s16 + $0x7d4] sm:$0xff] %v725_v44  ;;  %v731_v47 = vld [vmem:[%s8765_s15 + $0x1f08] sm:$0xff]  ;;  %728 = vst [vmem:[%s8770_s16 + $0x7dc] sm:$0xff] %v727_v45  ;;  %v733_v48 = vld [vmem:[%s8765_s15 + $0x1fe0] sm:$0xff] }
  0x8d   : > { %730 = vst [vmem:[%s8770_s16 + $0x7e4] sm:$0xff] %v729_v46  ;;  %732 = vst [vmem:[%s8770_s16 + $0x7ec] sm:$0xff] %v731_v47  ;;  %v735_v49 = vld [vmem:[%s8765_s15 + $0x1fe8] sm:$0xff]  ;;  %v737_v50 = vld [vmem:[%s8765_s15 + $0x1ff0] sm:$0xff] }
  0x8e   : > { %734 = vst [vmem:[%s8770_s16 + $0x7f8] sm:$0xff] %v733_v48  ;;  %736 = vst [vmem:[%s8770_s16 + $0x800] sm:$0xff] %v735_v49  ;;  %v739_v51 = vld [vmem:[%s8765_s15 + $0x1ff8] sm:$0xff]  ;;  %v741_v52 = vld [vmem:[%s8765_s15 + $0x2000] sm:$0xff] }
  0x8f   : > { %738 = vst [vmem:[%s8770_s16 + $0x808] sm:$0xff] %v737_v50  ;;  %v743_v53 = vld [vmem:[%s8765_s15 + $0x2008] sm:$0xff]  ;;  %740 = vst [vmem:[%s8770_s16 + $0x810] sm:$0xff] %v739_v51  ;;  %v745_v54 = vld [vmem:[%s8765_s15 + $0x2010] sm:$0xff] }
  0x90   : > { %742 = vst [vmem:[%s8770_s16 + $0x818] sm:$0xff] %v741_v52  ;;  %744 = vst [vmem:[%s8770_s16 + $0x820] sm:$0xff] %v743_v53  ;;  %v747_v55 = vld [vmem:[%s8765_s15 + $0x2018] sm:$0xff]  ;;  %v749_v56 = vld [vmem:[%s8765_s15 + $0x20f0] sm:$0xff] }
  0x91   : > { %746 = vst [vmem:[%s8770_s16 + $0x828] sm:$0xff] %v745_v54  ;;  %748 = vst [vmem:[%s8770_s16 + $0x830] sm:$0xff] %v747_v55  ;;  %v751_v57 = vld [vmem:[%s8765_s15 + $0x20f8] sm:$0xff]  ;;  %v753_v58 = vld [vmem:[%s8765_s15 + $0x2100] sm:$0xff] }
  0x92   : > { %750 = vst [vmem:[%s8770_s16 + $0x83c] sm:$0xff] %v749_v56  ;;  %v755_v59 = vld [vmem:[%s8765_s15 + $0x2108] sm:$0xff]  ;;  %752 = vst [vmem:[%s8770_s16 + $0x844] sm:$0xff] %v751_v57  ;;  %v757_v60 = vld [vmem:[%s8765_s15 + $0x2110] sm:$0xff] }
  0x93   : > { %754 = vst [vmem:[%s8770_s16 + $0x84c] sm:$0xff] %v753_v58  ;;  %756 = vst [vmem:[%s8770_s16 + $0x854] sm:$0xff] %v755_v59  ;;  %v759_v61 = vld [vmem:[%s8765_s15 + $0x2118] sm:$0xff]  ;;  %v761_v62 = vld [vmem:[%s8765_s15 + $0x2120] sm:$0xff] }
  0x94   : > { %758 = vst [vmem:[%s8770_s16 + $0x85c] sm:$0xff] %v757_v60  ;;  %760 = vst [vmem:[%s8770_s16 + $0x864] sm:$0xff] %v759_v61  ;;  %v763_v63 = vld [vmem:[%s8765_s15 + $0x2128] sm:$0xff]  ;;  %v765_v0 = vld [vmem:[%s8765_s15 + $0x2200] sm:$0xff] }
  0x95   : > { %762 = vst [vmem:[%s8770_s16 + $0x86c] sm:$0xff] %v761_v62  ;;  %v767_v1 = vld [vmem:[%s8765_s15 + $0x2208] sm:$0xff]  ;;  %764 = vst [vmem:[%s8770_s16 + $0x874] sm:$0xff] %v763_v63  ;;  %v769_v2 = vld [vmem:[%s8765_s15 + $0x2210] sm:$0xff] }
  0x96   : > { %766 = vst [vmem:[%s8770_s16 + $0x880] sm:$0xff] %v765_v0  ;;  %768 = vst [vmem:[%s8770_s16 + $0x888] sm:$0xff] %v767_v1  ;;  %v771_v3 = vld [vmem:[%s8765_s15 + $0x2218] sm:$0xff]  ;;  %v773_v4 = vld [vmem:[%s8765_s15 + $0x2220] sm:$0xff] }
  0x97   : > { %770 = vst [vmem:[%s8770_s16 + $0x890] sm:$0xff] %v769_v2  ;;  %772 = vst [vmem:[%s8770_s16 + $0x898] sm:$0xff] %v771_v3  ;;  %v775_v5 = vld [vmem:[%s8765_s15 + $0x2228] sm:$0xff]  ;;  %v777_v6 = vld [vmem:[%s8765_s15 + $0x2230] sm:$0xff] }
  0x98   : > { %774 = vst [vmem:[%s8770_s16 + $0x8a0] sm:$0xff] %v773_v4  ;;  %v779_v7 = vld [vmem:[%s8765_s15 + $0x2238] sm:$0xff]  ;;  %776 = vst [vmem:[%s8770_s16 + $0x8a8] sm:$0xff] %v775_v5  ;;  %v781_v8 = vld [vmem:[%s8765_s15 + $0x2310] sm:$0xff] }
  0x99   : > { %778 = vst [vmem:[%s8770_s16 + $0x8b0] sm:$0xff] %v777_v6  ;;  %780 = vst [vmem:[%s8770_s16 + $0x8b8] sm:$0xff] %v779_v7  ;;  %v783_v9 = vld [vmem:[%s8765_s15 + $0x2318] sm:$0xff]  ;;  %v785_v10 = vld [vmem:[%s8765_s15 + $0x2320] sm:$0xff] }
  0x9a   : > { %782 = vst [vmem:[%s8770_s16 + $0x8c4] sm:$0xff] %v781_v8  ;;  %784 = vst [vmem:[%s8770_s16 + $0x8cc] sm:$0xff] %v783_v9  ;;  %v787_v11 = vld [vmem:[%s8765_s15 + $0x2328] sm:$0xff]  ;;  %v789_v12 = vld [vmem:[%s8765_s15 + $0x2330] sm:$0xff] }
  0x9b   : > { %786 = vst [vmem:[%s8770_s16 + $0x8d4] sm:$0xff] %v785_v10  ;;  %v791_v13 = vld [vmem:[%s8765_s15 + $0x2338] sm:$0xff]  ;;  %788 = vst [vmem:[%s8770_s16 + $0x8dc] sm:$0xff] %v787_v11  ;;  %v793_v14 = vld [vmem:[%s8765_s15 + $0x2340] sm:$0xff] }
  0x9c   : > { %790 = vst [vmem:[%s8770_s16 + $0x8e4] sm:$0xff] %v789_v12  ;;  %792 = vst [vmem:[%s8770_s16 + $0x8ec] sm:$0xff] %v791_v13  ;;  %v795_v15 = vld [vmem:[%s8765_s15 + $0x2348] sm:$0xff]  ;;  %v797_v16 = vld [vmem:[%s8765_s15 + $0x2420] sm:$0xff] }
  0x9d   : > { %794 = vst [vmem:[%s8770_s16 + $0x8f4] sm:$0xff] %v793_v14  ;;  %796 = vst [vmem:[%s8770_s16 + $0x8fc] sm:$0xff] %v795_v15  ;;  %v799_v17 = vld [vmem:[%s8765_s15 + $0x2428] sm:$0xff]  ;;  %v801_v18 = vld [vmem:[%s8765_s15 + $0x2430] sm:$0xff] }
  0x9e   : > { %798 = vst [vmem:[%s8770_s16 + $0x908] sm:$0xff] %v797_v16  ;;  %v803_v19 = vld [vmem:[%s8765_s15 + $0x2438] sm:$0xff]  ;;  %800 = vst [vmem:[%s8770_s16 + $0x910] sm:$0xff] %v799_v17  ;;  %v805_v20 = vld [vmem:[%s8765_s15 + $0x2440] sm:$0xff] }
  0x9f   : > { %802 = vst [vmem:[%s8770_s16 + $0x918] sm:$0xff] %v801_v18  ;;  %804 = vst [vmem:[%s8770_s16 + $0x920] sm:$0xff] %v803_v19  ;;  %v807_v21 = vld [vmem:[%s8765_s15 + $0x2448] sm:$0xff]  ;;  %v809_v22 = vld [vmem:[%s8765_s15 + $0x2450] sm:$0xff] }
  0xa0   : > { %806 = vst [vmem:[%s8770_s16 + $0x928] sm:$0xff] %v805_v20  ;;  %808 = vst [vmem:[%s8770_s16 + $0x930] sm:$0xff] %v807_v21  ;;  %v811_v23 = vld [vmem:[%s8765_s15 + $0x2458] sm:$0xff]  ;;  %v813_v24 = vld [vmem:[%s8765_s15 + $0x2530] sm:$0xff] }
  0xa1   : > { %810 = vst [vmem:[%s8770_s16 + $0x938] sm:$0xff] %v809_v22  ;;  %v815_v25 = vld [vmem:[%s8765_s15 + $0x2538] sm:$0xff]  ;;  %812 = vst [vmem:[%s8770_s16 + $0x940] sm:$0xff] %v811_v23  ;;  %v817_v26 = vld [vmem:[%s8765_s15 + $0x2540] sm:$0xff] }
  0xa2   : > { %814 = vst [vmem:[%s8770_s16 + $0x94c] sm:$0xff] %v813_v24  ;;  %816 = vst [vmem:[%s8770_s16 + $0x954] sm:$0xff] %v815_v25  ;;  %v819_v27 = vld [vmem:[%s8765_s15 + $0x2548] sm:$0xff]  ;;  %v821_v28 = vld [vmem:[%s8765_s15 + $0x2550] sm:$0xff] }
  0xa3   : > { %818 = vst [vmem:[%s8770_s16 + $0x95c] sm:$0xff] %v817_v26  ;;  %820 = vst [vmem:[%s8770_s16 + $0x964] sm:$0xff] %v819_v27  ;;  %v823_v29 = vld [vmem:[%s8765_s15 + $0x2558] sm:$0xff]  ;;  %v825_v30 = vld [vmem:[%s8765_s15 + $0x2560] sm:$0xff] }
  0xa4   : > { %822 = vst [vmem:[%s8770_s16 + $0x96c] sm:$0xff] %v821_v28  ;;  %v827_v31 = vld [vmem:[%s8765_s15 + $0x2568] sm:$0xff]  ;;  %824 = vst [vmem:[%s8770_s16 + $0x974] sm:$0xff] %v823_v29  ;;  %v829_v32 = vld [vmem:[%s8765_s15 + $0x2640] sm:$0xff] }
  0xa5   : > { %826 = vst [vmem:[%s8770_s16 + $0x97c] sm:$0xff] %v825_v30  ;;  %828 = vst [vmem:[%s8770_s16 + $0x984] sm:$0xff] %v827_v31  ;;  %v831_v33 = vld [vmem:[%s8765_s15 + $0x2648] sm:$0xff]  ;;  %v833_v34 = vld [vmem:[%s8765_s15 + $0x2650] sm:$0xff] }
  0xa6   : > { %830 = vst [vmem:[%s8770_s16 + $0x990] sm:$0xff] %v829_v32  ;;  %832 = vst [vmem:[%s8770_s16 + $0x998] sm:$0xff] %v831_v33  ;;  %v835_v35 = vld [vmem:[%s8765_s15 + $0x2658] sm:$0xff]  ;;  %v837_v36 = vld [vmem:[%s8765_s15 + $0x2660] sm:$0xff] }
  0xa7   : > { %834 = vst [vmem:[%s8770_s16 + $0x9a0] sm:$0xff] %v833_v34  ;;  %v839_v37 = vld [vmem:[%s8765_s15 + $0x2668] sm:$0xff]  ;;  %836 = vst [vmem:[%s8770_s16 + $0x9a8] sm:$0xff] %v835_v35  ;;  %v841_v38 = vld [vmem:[%s8765_s15 + $0x2670] sm:$0xff] }
  0xa8   : > { %838 = vst [vmem:[%s8770_s16 + $0x9b0] sm:$0xff] %v837_v36  ;;  %840 = vst [vmem:[%s8770_s16 + $0x9b8] sm:$0xff] %v839_v37  ;;  %v843_v39 = vld [vmem:[%s8765_s15 + $0x2678] sm:$0xff]  ;;  %v845_v40 = vld [vmem:[%s8765_s15 + $0x2750] sm:$0xff] }
  0xa9   : > { %842 = vst [vmem:[%s8770_s16 + $0x9c0] sm:$0xff] %v841_v38  ;;  %844 = vst [vmem:[%s8770_s16 + $0x9c8] sm:$0xff] %v843_v39  ;;  %v847_v41 = vld [vmem:[%s8765_s15 + $0x2758] sm:$0xff]  ;;  %v849_v42 = vld [vmem:[%s8765_s15 + $0x2760] sm:$0xff] }
  0xaa   : > { %846 = vst [vmem:[%s8770_s16 + $0x9d4] sm:$0xff] %v845_v40  ;;  %v851_v43 = vld [vmem:[%s8765_s15 + $0x2768] sm:$0xff]  ;;  %848 = vst [vmem:[%s8770_s16 + $0x9dc] sm:$0xff] %v847_v41  ;;  %v853_v44 = vld [vmem:[%s8765_s15 + $0x2770] sm:$0xff] }
  0xab   : > { %850 = vst [vmem:[%s8770_s16 + $0x9e4] sm:$0xff] %v849_v42  ;;  %852 = vst [vmem:[%s8770_s16 + $0x9ec] sm:$0xff] %v851_v43  ;;  %v855_v45 = vld [vmem:[%s8765_s15 + $0x2778] sm:$0xff]  ;;  %v857_v46 = vld [vmem:[%s8765_s15 + $0x2780] sm:$0xff] }
  0xac   : > { %854 = vst [vmem:[%s8770_s16 + $0x9f4] sm:$0xff] %v853_v44  ;;  %856 = vst [vmem:[%s8770_s16 + $0x9fc] sm:$0xff] %v855_v45  ;;  %v859_v47 = vld [vmem:[%s8765_s15 + $0x2788] sm:$0xff]  ;;  %v861_v48 = vld [vmem:[%s8765_s15 + $0x2860] sm:$0xff] }
  0xad   : > { %858 = vst [vmem:[%s8770_s16 + $0xa04] sm:$0xff] %v857_v46  ;;  %v863_v49 = vld [vmem:[%s8765_s15 + $0x2868] sm:$0xff]  ;;  %860 = vst [vmem:[%s8770_s16 + $0xa0c] sm:$0xff] %v859_v47  ;;  %v865_v50 = vld [vmem:[%s8765_s15 + $0x2870] sm:$0xff] }
  0xae   : > { %862 = vst [vmem:[%s8770_s16 + $0xa18] sm:$0xff] %v861_v48  ;;  %864 = vst [vmem:[%s8770_s16 + $0xa20] sm:$0xff] %v863_v49  ;;  %v867_v51 = vld [vmem:[%s8765_s15 + $0x2878] sm:$0xff]  ;;  %v869_v52 = vld [vmem:[%s8765_s15 + $0x2880] sm:$0xff] }
  0xaf   : > { %866 = vst [vmem:[%s8770_s16 + $0xa28] sm:$0xff] %v865_v50  ;;  %868 = vst [vmem:[%s8770_s16 + $0xa30] sm:$0xff] %v867_v51  ;;  %v871_v53 = vld [vmem:[%s8765_s15 + $0x2888] sm:$0xff]  ;;  %v873_v54 = vld [vmem:[%s8765_s15 + $0x2890] sm:$0xff] }
  0xb0   : > { %870 = vst [vmem:[%s8770_s16 + $0xa38] sm:$0xff] %v869_v52  ;;  %v875_v55 = vld [vmem:[%s8765_s15 + $0x2898] sm:$0xff]  ;;  %872 = vst [vmem:[%s8770_s16 + $0xa40] sm:$0xff] %v871_v53  ;;  %v877_v56 = vld [vmem:[%s8765_s15 + $0x2970] sm:$0xff] }
  0xb1   : > { %874 = vst [vmem:[%s8770_s16 + $0xa48] sm:$0xff] %v873_v54  ;;  %876 = vst [vmem:[%s8770_s16 + $0xa50] sm:$0xff] %v875_v55  ;;  %v879_v57 = vld [vmem:[%s8765_s15 + $0x2978] sm:$0xff]  ;;  %v881_v58 = vld [vmem:[%s8765_s15 + $0x2980] sm:$0xff] }
  0xb2   : > { %878 = vst [vmem:[%s8770_s16 + $0xa5c] sm:$0xff] %v877_v56  ;;  %880 = vst [vmem:[%s8770_s16 + $0xa64] sm:$0xff] %v879_v57  ;;  %v883_v59 = vld [vmem:[%s8765_s15 + $0x2988] sm:$0xff]  ;;  %v885_v60 = vld [vmem:[%s8765_s15 + $0x2990] sm:$0xff] }
  0xb3   : > { %882 = vst [vmem:[%s8770_s16 + $0xa6c] sm:$0xff] %v881_v58  ;;  %v887_v61 = vld [vmem:[%s8765_s15 + $0x2998] sm:$0xff]  ;;  %884 = vst [vmem:[%s8770_s16 + $0xa74] sm:$0xff] %v883_v59  ;;  %v889_v62 = vld [vmem:[%s8765_s15 + $0x29a0] sm:$0xff] }
  0xb4   : > { %886 = vst [vmem:[%s8770_s16 + $0xa7c] sm:$0xff] %v885_v60  ;;  %888 = vst [vmem:[%s8770_s16 + $0xa84] sm:$0xff] %v887_v61  ;;  %v891_v63 = vld [vmem:[%s8765_s15 + $0x29a8] sm:$0xff]  ;;  %v893_v0 = vld [vmem:[%s8765_s15 + $0x2a80] sm:$0xff] }
  0xb5   : > { %890 = vst [vmem:[%s8770_s16 + $0xa8c] sm:$0xff] %v889_v62  ;;  %892 = vst [vmem:[%s8770_s16 + $0xa94] sm:$0xff] %v891_v63  ;;  %v895_v1 = vld [vmem:[%s8765_s15 + $0x2a88] sm:$0xff]  ;;  %v897_v2 = vld [vmem:[%s8765_s15 + $0x2a90] sm:$0xff] }
  0xb6   : > { %894 = vst [vmem:[%s8770_s16 + $0xaa0] sm:$0xff] %v893_v0  ;;  %v899_v3 = vld [vmem:[%s8765_s15 + $0x2a98] sm:$0xff]  ;;  %896 = vst [vmem:[%s8770_s16 + $0xaa8] sm:$0xff] %v895_v1  ;;  %v901_v4 = vld [vmem:[%s8765_s15 + $0x2aa0] sm:$0xff] }
  0xb7   : > { %898 = vst [vmem:[%s8770_s16 + $0xab0] sm:$0xff] %v897_v2  ;;  %900 = vst [vmem:[%s8770_s16 + $0xab8] sm:$0xff] %v899_v3  ;;  %v903_v5 = vld [vmem:[%s8765_s15 + $0x2aa8] sm:$0xff]  ;;  %v905_v6 = vld [vmem:[%s8765_s15 + $0x2ab0] sm:$0xff] }
  0xb8   : > { %902 = vst [vmem:[%s8770_s16 + $0xac0] sm:$0xff] %v901_v4  ;;  %904 = vst [vmem:[%s8770_s16 + $0xac8] sm:$0xff] %v903_v5  ;;  %v907_v7 = vld [vmem:[%s8765_s15 + $0x2ab8] sm:$0xff]  ;;  %v909_v8 = vld [vmem:[%s8765_s15 + $0x2b90] sm:$0xff] }
  0xb9   : > { %906 = vst [vmem:[%s8770_s16 + $0xad0] sm:$0xff] %v905_v6  ;;  %v911_v9 = vld [vmem:[%s8765_s15 + $0x2b98] sm:$0xff]  ;;  %908 = vst [vmem:[%s8770_s16 + $0xad8] sm:$0xff] %v907_v7  ;;  %v913_v10 = vld [vmem:[%s8765_s15 + $0x2ba0] sm:$0xff] }
  0xba   : > { %910 = vst [vmem:[%s8770_s16 + $0xae4] sm:$0xff] %v909_v8  ;;  %912 = vst [vmem:[%s8770_s16 + $0xaec] sm:$0xff] %v911_v9  ;;  %v915_v11 = vld [vmem:[%s8765_s15 + $0x2ba8] sm:$0xff]  ;;  %v917_v12 = vld [vmem:[%s8765_s15 + $0x2bb0] sm:$0xff] }
  0xbb   : > { %914 = vst [vmem:[%s8770_s16 + $0xaf4] sm:$0xff] %v913_v10  ;;  %916 = vst [vmem:[%s8770_s16 + $0xafc] sm:$0xff] %v915_v11  ;;  %v919_v13 = vld [vmem:[%s8765_s15 + $0x2bb8] sm:$0xff]  ;;  %v921_v14 = vld [vmem:[%s8765_s15 + $0x2bc0] sm:$0xff] }
  0xbc   : > { %918 = vst [vmem:[%s8770_s16 + $0xb04] sm:$0xff] %v917_v12  ;;  %v923_v15 = vld [vmem:[%s8765_s15 + $0x2bc8] sm:$0xff]  ;;  %920 = vst [vmem:[%s8770_s16 + $0xb0c] sm:$0xff] %v919_v13  ;;  %v925_v16 = vld [vmem:[%s8765_s15 + $0x2ca0] sm:$0xff] }
  0xbd   : > { %922 = vst [vmem:[%s8770_s16 + $0xb14] sm:$0xff] %v921_v14  ;;  %924 = vst [vmem:[%s8770_s16 + $0xb1c] sm:$0xff] %v923_v15  ;;  %v927_v17 = vld [vmem:[%s8765_s15 + $0x2ca8] sm:$0xff]  ;;  %v929_v18 = vld [vmem:[%s8765_s15 + $0x2cb0] sm:$0xff] }
  0xbe   : > { %926 = vst [vmem:[%s8770_s16 + $0xb28] sm:$0xff] %v925_v16  ;;  %928 = vst [vmem:[%s8770_s16 + $0xb30] sm:$0xff] %v927_v17  ;;  %v931_v19 = vld [vmem:[%s8765_s15 + $0x2cb8] sm:$0xff]  ;;  %v933_v20 = vld [vmem:[%s8765_s15 + $0x2cc0] sm:$0xff] }
  0xbf   : > { %930 = vst [vmem:[%s8770_s16 + $0xb38] sm:$0xff] %v929_v18  ;;  %v935_v21 = vld [vmem:[%s8765_s15 + $0x2cc8] sm:$0xff]  ;;  %932 = vst [vmem:[%s8770_s16 + $0xb40] sm:$0xff] %v931_v19  ;;  %v937_v22 = vld [vmem:[%s8765_s15 + $0x2cd0] sm:$0xff] }
  0xc0   : > { %934 = vst [vmem:[%s8770_s16 + $0xb48] sm:$0xff] %v933_v20  ;;  %936 = vst [vmem:[%s8770_s16 + $0xb50] sm:$0xff] %v935_v21  ;;  %v939_v23 = vld [vmem:[%s8765_s15 + $0x2cd8] sm:$0xff]  ;;  %v941_v24 = vld [vmem:[%s8765_s15 + $0x2db0] sm:$0xff] }
  0xc1   : > { %938 = vst [vmem:[%s8770_s16 + $0xb58] sm:$0xff] %v937_v22  ;;  %940 = vst [vmem:[%s8770_s16 + $0xb60] sm:$0xff] %v939_v23  ;;  %v943_v25 = vld [vmem:[%s8765_s15 + $0x2db8] sm:$0xff]  ;;  %v945_v26 = vld [vmem:[%s8765_s15 + $0x2dc0] sm:$0xff] }
  0xc2   : > { %942 = vst [vmem:[%s8770_s16 + $0xb6c] sm:$0xff] %v941_v24  ;;  %v947_v27 = vld [vmem:[%s8765_s15 + $0x2dc8] sm:$0xff]  ;;  %944 = vst [vmem:[%s8770_s16 + $0xb74] sm:$0xff] %v943_v25  ;;  %v949_v28 = vld [vmem:[%s8765_s15 + $0x2dd0] sm:$0xff] }
  0xc3   : > { %946 = vst [vmem:[%s8770_s16 + $0xb7c] sm:$0xff] %v945_v26  ;;  %948 = vst [vmem:[%s8770_s16 + $0xb84] sm:$0xff] %v947_v27  ;;  %v951_v29 = vld [vmem:[%s8765_s15 + $0x2dd8] sm:$0xff]  ;;  %v953_v30 = vld [vmem:[%s8765_s15 + $0x2de0] sm:$0xff] }
  0xc4   : > { %950 = vst [vmem:[%s8770_s16 + $0xb8c] sm:$0xff] %v949_v28  ;;  %952 = vst [vmem:[%s8770_s16 + $0xb94] sm:$0xff] %v951_v29  ;;  %v955_v31 = vld [vmem:[%s8765_s15 + $0x2de8] sm:$0xff]  ;;  %v957_v32 = vld [vmem:[%s8765_s15 + $0x2ec0] sm:$0xff] }
  0xc5   : > { %954 = vst [vmem:[%s8770_s16 + $0xb9c] sm:$0xff] %v953_v30  ;;  %v959_v33 = vld [vmem:[%s8765_s15 + $0x2ec8] sm:$0xff]  ;;  %956 = vst [vmem:[%s8770_s16 + $0xba4] sm:$0xff] %v955_v31  ;;  %v961_v34 = vld [vmem:[%s8765_s15 + $0x2ed0] sm:$0xff] }
  0xc6   : > { %958 = vst [vmem:[%s8770_s16 + $0xbb0] sm:$0xff] %v957_v32  ;;  %960 = vst [vmem:[%s8770_s16 + $0xbb8] sm:$0xff] %v959_v33  ;;  %v963_v35 = vld [vmem:[%s8765_s15 + $0x2ed8] sm:$0xff]  ;;  %v965_v36 = vld [vmem:[%s8765_s15 + $0x2ee0] sm:$0xff] }
  0xc7   : > { %962 = vst [vmem:[%s8770_s16 + $0xbc0] sm:$0xff] %v961_v34  ;;  %964 = vst [vmem:[%s8770_s16 + $0xbc8] sm:$0xff] %v963_v35  ;;  %v967_v37 = vld [vmem:[%s8765_s15 + $0x2ee8] sm:$0xff]  ;;  %v969_v38 = vld [vmem:[%s8765_s15 + $0x2ef0] sm:$0xff] }
  0xc8   : > { %966 = vst [vmem:[%s8770_s16 + $0xbd0] sm:$0xff] %v965_v36  ;;  %v971_v39 = vld [vmem:[%s8765_s15 + $0x2ef8] sm:$0xff]  ;;  %968 = vst [vmem:[%s8770_s16 + $0xbd8] sm:$0xff] %v967_v37  ;;  %v973_v40 = vld [vmem:[%s8765_s15 + $0x2fd0] sm:$0xff] }
  0xc9   : > { %970 = vst [vmem:[%s8770_s16 + $0xbe0] sm:$0xff] %v969_v38  ;;  %972 = vst [vmem:[%s8770_s16 + $0xbe8] sm:$0xff] %v971_v39  ;;  %v975_v41 = vld [vmem:[%s8765_s15 + $0x2fd8] sm:$0xff]  ;;  %v977_v42 = vld [vmem:[%s8765_s15 + $0x2fe0] sm:$0xff] }
  0xca   : > { %974 = vst [vmem:[%s8770_s16 + $0xbf4] sm:$0xff] %v973_v40  ;;  %976 = vst [vmem:[%s8770_s16 + $0xbfc] sm:$0xff] %v975_v41  ;;  %v979_v43 = vld [vmem:[%s8765_s15 + $0x2fe8] sm:$0xff]  ;;  %v981_v44 = vld [vmem:[%s8765_s15 + $0x2ff0] sm:$0xff] }
  0xcb   : > { %978 = vst [vmem:[%s8770_s16 + $0xc04] sm:$0xff] %v977_v42  ;;  %v983_v45 = vld [vmem:[%s8765_s15 + $0x2ff8] sm:$0xff]  ;;  %980 = vst [vmem:[%s8770_s16 + $0xc0c] sm:$0xff] %v979_v43  ;;  %v985_v46 = vld [vmem:[%s8765_s15 + $0x3000] sm:$0xff] }
  0xcc   : > { %982 = vst [vmem:[%s8770_s16 + $0xc14] sm:$0xff] %v981_v44  ;;  %984 = vst [vmem:[%s8770_s16 + $0xc1c] sm:$0xff] %v983_v45  ;;  %v987_v47 = vld [vmem:[%s8765_s15 + $0x3008] sm:$0xff]  ;;  %v989_v48 = vld [vmem:[%s8765_s15 + $0x30e0] sm:$0xff] }
  0xcd   : > { %986 = vst [vmem:[%s8770_s16 + $0xc24] sm:$0xff] %v985_v46  ;;  %988 = vst [vmem:[%s8770_s16 + $0xc2c] sm:$0xff] %v987_v47  ;;  %v991_v49 = vld [vmem:[%s8765_s15 + $0x30e8] sm:$0xff]  ;;  %v993_v50 = vld [vmem:[%s8765_s15 + $0x30f0] sm:$0xff] }
  0xce   : > { %990 = vst [vmem:[%s8770_s16 + $0xc38] sm:$0xff] %v989_v48  ;;  %v995_v51 = vld [vmem:[%s8765_s15 + $0x30f8] sm:$0xff]  ;;  %992 = vst [vmem:[%s8770_s16 + $0xc40] sm:$0xff] %v991_v49  ;;  %v997_v52 = vld [vmem:[%s8765_s15 + $0x3100] sm:$0xff] }
  0xcf   : > { %994 = vst [vmem:[%s8770_s16 + $0xc48] sm:$0xff] %v993_v50  ;;  %996 = vst [vmem:[%s8770_s16 + $0xc50] sm:$0xff] %v995_v51  ;;  %v999_v53 = vld [vmem:[%s8765_s15 + $0x3108] sm:$0xff]  ;;  %v1001_v54 = vld [vmem:[%s8765_s15 + $0x3110] sm:$0xff] }
  0xd0   : > { %998 = vst [vmem:[%s8770_s16 + $0xc58] sm:$0xff] %v997_v52  ;;  %1000 = vst [vmem:[%s8770_s16 + $0xc60] sm:$0xff] %v999_v53  ;;  %v1003_v55 = vld [vmem:[%s8765_s15 + $0x3118] sm:$0xff]  ;;  %v1005_v56 = vld [vmem:[%s8765_s15 + $0x31f0] sm:$0xff] }
  0xd1   : > { %1002 = vst [vmem:[%s8770_s16 + $0xc68] sm:$0xff] %v1001_v54  ;;  %v1007_v57 = vld [vmem:[%s8765_s15 + $0x31f8] sm:$0xff]  ;;  %1004 = vst [vmem:[%s8770_s16 + $0xc70] sm:$0xff] %v1003_v55  ;;  %v1009_v58 = vld [vmem:[%s8765_s15 + $0x3200] sm:$0xff] }
  0xd2   : > { %1006 = vst [vmem:[%s8770_s16 + $0xc7c] sm:$0xff] %v1005_v56  ;;  %1008 = vst [vmem:[%s8770_s16 + $0xc84] sm:$0xff] %v1007_v57  ;;  %v1011_v59 = vld [vmem:[%s8765_s15 + $0x3208] sm:$0xff]  ;;  %v1013_v60 = vld [vmem:[%s8765_s15 + $0x3210] sm:$0xff] }
  0xd3   : > { %1010 = vst [vmem:[%s8770_s16 + $0xc8c] sm:$0xff] %v1009_v58  ;;  %1012 = vst [vmem:[%s8770_s16 + $0xc94] sm:$0xff] %v1011_v59  ;;  %v1015_v61 = vld [vmem:[%s8765_s15 + $0x3218] sm:$0xff]  ;;  %v1017_v62 = vld [vmem:[%s8765_s15 + $0x3220] sm:$0xff] }
  0xd4   : > { %1014 = vst [vmem:[%s8770_s16 + $0xc9c] sm:$0xff] %v1013_v60  ;;  %v1019_v63 = vld [vmem:[%s8765_s15 + $0x3228] sm:$0xff]  ;;  %1016 = vst [vmem:[%s8770_s16 + $0xca4] sm:$0xff] %v1015_v61  ;;  %v1021_v0 = vld [vmem:[%s8765_s15 + $0x3300] sm:$0xff] }
  0xd5   : > { %1018 = vst [vmem:[%s8770_s16 + $0xcac] sm:$0xff] %v1017_v62  ;;  %1020 = vst [vmem:[%s8770_s16 + $0xcb4] sm:$0xff] %v1019_v63  ;;  %v1023_v1 = vld [vmem:[%s8765_s15 + $0x3308] sm:$0xff]  ;;  %v1025_v2 = vld [vmem:[%s8765_s15 + $0x3310] sm:$0xff] }
  0xd6   : > { %1022 = vst [vmem:[%s8770_s16 + $0xcc0] sm:$0xff] %v1021_v0  ;;  %1024 = vst [vmem:[%s8770_s16 + $0xcc8] sm:$0xff] %v1023_v1  ;;  %v1027_v3 = vld [vmem:[%s8765_s15 + $0x3318] sm:$0xff]  ;;  %v1029_v4 = vld [vmem:[%s8765_s15 + $0x3320] sm:$0xff] }
  0xd7   : > { %1026 = vst [vmem:[%s8770_s16 + $0xcd0] sm:$0xff] %v1025_v2  ;;  %v1031_v5 = vld [vmem:[%s8765_s15 + $0x3328] sm:$0xff]  ;;  %1028 = vst [vmem:[%s8770_s16 + $0xcd8] sm:$0xff] %v1027_v3  ;;  %v1033_v6 = vld [vmem:[%s8765_s15 + $0x3330] sm:$0xff] }
  0xd8   : > { %1030 = vst [vmem:[%s8770_s16 + $0xce0] sm:$0xff] %v1029_v4  ;;  %1032 = vst [vmem:[%s8770_s16 + $0xce8] sm:$0xff] %v1031_v5  ;;  %v1035_v7 = vld [vmem:[%s8765_s15 + $0x3338] sm:$0xff]  ;;  %v1037_v8 = vld [vmem:[%s8765_s15 + $0x3410] sm:$0xff] }
  0xd9   : > { %1034 = vst [vmem:[%s8770_s16 + $0xcf0] sm:$0xff] %v1033_v6  ;;  %1036 = vst [vmem:[%s8770_s16 + $0xcf8] sm:$0xff] %v1035_v7  ;;  %v1039_v9 = vld [vmem:[%s8765_s15 + $0x3418] sm:$0xff]  ;;  %v1041_v10 = vld [vmem:[%s8765_s15 + $0x3420] sm:$0xff] }
  0xda   : > { %1038 = vst [vmem:[%s8770_s16 + $0xd04] sm:$0xff] %v1037_v8  ;;  %v1043_v11 = vld [vmem:[%s8765_s15 + $0x3428] sm:$0xff]  ;;  %1040 = vst [vmem:[%s8770_s16 + $0xd0c] sm:$0xff] %v1039_v9  ;;  %v1045_v12 = vld [vmem:[%s8765_s15 + $0x3430] sm:$0xff] }
  0xdb   : > { %1042 = vst [vmem:[%s8770_s16 + $0xd14] sm:$0xff] %v1041_v10  ;;  %1044 = vst [vmem:[%s8770_s16 + $0xd1c] sm:$0xff] %v1043_v11  ;;  %v1047_v13 = vld [vmem:[%s8765_s15 + $0x3438] sm:$0xff]  ;;  %v1049_v14 = vld [vmem:[%s8765_s15 + $0x3440] sm:$0xff] }
  0xdc   : > { %1046 = vst [vmem:[%s8770_s16 + $0xd24] sm:$0xff] %v1045_v12  ;;  %1048 = vst [vmem:[%s8770_s16 + $0xd2c] sm:$0xff] %v1047_v13  ;;  %v1051_v15 = vld [vmem:[%s8765_s15 + $0x3448] sm:$0xff]  ;;  %v1053_v16 = vld [vmem:[%s8765_s15 + $0x3520] sm:$0xff] }
  0xdd   : > { %1050 = vst [vmem:[%s8770_s16 + $0xd34] sm:$0xff] %v1049_v14  ;;  %v1055_v17 = vld [vmem:[%s8765_s15 + $0x3528] sm:$0xff]  ;;  %1052 = vst [vmem:[%s8770_s16 + $0xd3c] sm:$0xff] %v1051_v15  ;;  %v1057_v18 = vld [vmem:[%s8765_s15 + $0x3530] sm:$0xff] }
  0xde   : > { %1054 = vst [vmem:[%s8770_s16 + $0xd48] sm:$0xff] %v1053_v16  ;;  %1056 = vst [vmem:[%s8770_s16 + $0xd50] sm:$0xff] %v1055_v17  ;;  %v1059_v19 = vld [vmem:[%s8765_s15 + $0x3538] sm:$0xff]  ;;  %v1061_v20 = vld [vmem:[%s8765_s15 + $0x3540] sm:$0xff] }
  0xdf   : > { %1058 = vst [vmem:[%s8770_s16 + $0xd58] sm:$0xff] %v1057_v18  ;;  %1060 = vst [vmem:[%s8770_s16 + $0xd60] sm:$0xff] %v1059_v19  ;;  %v1063_v21 = vld [vmem:[%s8765_s15 + $0x3548] sm:$0xff]  ;;  %v1065_v22 = vld [vmem:[%s8765_s15 + $0x3550] sm:$0xff] }
  0xe0   : > { %1062 = vst [vmem:[%s8770_s16 + $0xd68] sm:$0xff] %v1061_v20  ;;  %v1067_v23 = vld [vmem:[%s8765_s15 + $0x3558] sm:$0xff]  ;;  %1064 = vst [vmem:[%s8770_s16 + $0xd70] sm:$0xff] %v1063_v21  ;;  %v1069_v24 = vld [vmem:[%s8765_s15 + $0x3630] sm:$0xff] }
  0xe1   : > { %1066 = vst [vmem:[%s8770_s16 + $0xd78] sm:$0xff] %v1065_v22  ;;  %1068 = vst [vmem:[%s8770_s16 + $0xd80] sm:$0xff] %v1067_v23  ;;  %v1071_v25 = vld [vmem:[%s8765_s15 + $0x3638] sm:$0xff]  ;;  %v1073_v26 = vld [vmem:[%s8765_s15 + $0x3640] sm:$0xff] }
  0xe2   : > { %1070 = vst [vmem:[%s8770_s16 + $0xd8c] sm:$0xff] %v1069_v24  ;;  %1072 = vst [vmem:[%s8770_s16 + $0xd94] sm:$0xff] %v1071_v25  ;;  %v1075_v27 = vld [vmem:[%s8765_s15 + $0x3648] sm:$0xff]  ;;  %v1077_v28 = vld [vmem:[%s8765_s15 + $0x3650] sm:$0xff] }
  0xe3   : > { %1074 = vst [vmem:[%s8770_s16 + $0xd9c] sm:$0xff] %v1073_v26  ;;  %v1079_v29 = vld [vmem:[%s8765_s15 + $0x3658] sm:$0xff]  ;;  %1076 = vst [vmem:[%s8770_s16 + $0xda4] sm:$0xff] %v1075_v27  ;;  %v1081_v30 = vld [vmem:[%s8765_s15 + $0x3660] sm:$0xff] }
  0xe4   : > { %1078 = vst [vmem:[%s8770_s16 + $0xdac] sm:$0xff] %v1077_v28  ;;  %1080 = vst [vmem:[%s8770_s16 + $0xdb4] sm:$0xff] %v1079_v29  ;;  %v1083_v31 = vld [vmem:[%s8765_s15 + $0x3668] sm:$0xff]  ;;  %v1085_v32 = vld [vmem:[%s8765_s15 + $0x3740] sm:$0xff] }
  0xe5   : > { %1082 = vst [vmem:[%s8770_s16 + $0xdbc] sm:$0xff] %v1081_v30  ;;  %1084 = vst [vmem:[%s8770_s16 + $0xdc4] sm:$0xff] %v1083_v31  ;;  %v1087_v33 = vld [vmem:[%s8765_s15 + $0x3748] sm:$0xff]  ;;  %v1089_v34 = vld [vmem:[%s8765_s15 + $0x3750] sm:$0xff] }
  0xe6   : > { %1086 = vst [vmem:[%s8770_s16 + $0xdd0] sm:$0xff] %v1085_v32  ;;  %v1091_v35 = vld [vmem:[%s8765_s15 + $0x3758] sm:$0xff]  ;;  %1088 = vst [vmem:[%s8770_s16 + $0xdd8] sm:$0xff] %v1087_v33  ;;  %v1093_v36 = vld [vmem:[%s8765_s15 + $0x3760] sm:$0xff] }
  0xe7   : > { %1090 = vst [vmem:[%s8770_s16 + $0xde0] sm:$0xff] %v1089_v34  ;;  %1092 = vst [vmem:[%s8770_s16 + $0xde8] sm:$0xff] %v1091_v35  ;;  %v1095_v37 = vld [vmem:[%s8765_s15 + $0x3768] sm:$0xff]  ;;  %v1097_v38 = vld [vmem:[%s8765_s15 + $0x3770] sm:$0xff] }
  0xe8   : > { %1094 = vst [vmem:[%s8770_s16 + $0xdf0] sm:$0xff] %v1093_v36  ;;  %1096 = vst [vmem:[%s8770_s16 + $0xdf8] sm:$0xff] %v1095_v37  ;;  %v1099_v39 = vld [vmem:[%s8765_s15 + $0x3778] sm:$0xff]  ;;  %v1101_v40 = vld [vmem:[%s8765_s15 + $0x3850] sm:$0xff] }
  0xe9   : > { %1098 = vst [vmem:[%s8770_s16 + $0xe00] sm:$0xff] %v1097_v38  ;;  %v1103_v41 = vld [vmem:[%s8765_s15 + $0x3858] sm:$0xff]  ;;  %1100 = vst [vmem:[%s8770_s16 + $0xe08] sm:$0xff] %v1099_v39  ;;  %v1105_v42 = vld [vmem:[%s8765_s15 + $0x3860] sm:$0xff] }
  0xea   : > { %1102 = vst [vmem:[%s8770_s16 + $0xe14] sm:$0xff] %v1101_v40  ;;  %1104 = vst [vmem:[%s8770_s16 + $0xe1c] sm:$0xff] %v1103_v41  ;;  %v1107_v43 = vld [vmem:[%s8765_s15 + $0x3868] sm:$0xff]  ;;  %v1109_v44 = vld [vmem:[%s8765_s15 + $0x3870] sm:$0xff] }
  0xeb   : > { %1106 = vst [vmem:[%s8770_s16 + $0xe24] sm:$0xff] %v1105_v42  ;;  %1108 = vst [vmem:[%s8770_s16 + $0xe2c] sm:$0xff] %v1107_v43  ;;  %v1111_v45 = vld [vmem:[%s8765_s15 + $0x3878] sm:$0xff]  ;;  %v1113_v46 = vld [vmem:[%s8765_s15 + $0x3880] sm:$0xff] }
  0xec   : > { %1110 = vst [vmem:[%s8770_s16 + $0xe34] sm:$0xff] %v1109_v44  ;;  %v1115_v47 = vld [vmem:[%s8765_s15 + $0x3888] sm:$0xff]  ;;  %1112 = vst [vmem:[%s8770_s16 + $0xe3c] sm:$0xff] %v1111_v45  ;;  %v6495_v48 = vld [vmem:[%s8765_s15 + $0x40] sm:$0xf] }
  0xed   : > { %1114 = vst [vmem:[%s8770_s16 + $0xe44] sm:$0xff] %v1113_v46  ;;  %1116 = vst [vmem:[%s8770_s16 + $0xe4c] sm:$0xff] %v1115_v47  ;;  %v6497_v49 = vld [vmem:[%s8765_s15 + $0x150] sm:$0xf]  ;;  %v6499_v50 = vld [vmem:[%s8765_s15 + $0x260] sm:$0xf] }
  0xee   : > { %6496 = vst [vmem:[%s8770_s16 + $0x40] sm:$0xf] %v6495_v48  ;;  %6498 = vst [vmem:[%s8770_s16 + $0x84] sm:$0xf] %v6497_v49  ;;  %v6501_v51 = vld [vmem:[%s8765_s15 + $0x370] sm:$0xf] }
  0xef   : > { %6500 = vst [vmem:[%s8770_s16 + $0xc8] sm:$0xf] %v6499_v50  ;;  %v6503_v52 = vld [vmem:[%s8765_s15 + $0x480] sm:$0xf]  ;;  %v6505_v53 = vld [vmem:[%s8765_s15 + $0x590] sm:$0xf] }
  0xf0   : > { %6502 = vst [vmem:[%s8770_s16 + $0x10c] sm:$0xf] %v6501_v51  ;;  %6504 = vst [vmem:[%s8770_s16 + $0x150] sm:$0xf] %v6503_v52  ;;  %v6507_v54 = vld [vmem:[%s8765_s15 + $0x6a0] sm:$0xf] }
  0xf1   : > { %6506 = vst [vmem:[%s8770_s16 + $0x194] sm:$0xf] %v6505_v53  ;;  %v6509_v55 = vld [vmem:[%s8765_s15 + $0x7b0] sm:$0xf]  ;;  %v6511_v56 = vld [vmem:[%s8765_s15 + $0x8c0] sm:$0xf] }
  0xf2   : > { %6508 = vst [vmem:[%s8770_s16 + $0x1d8] sm:$0xf] %v6507_v54  ;;  %6510 = vst [vmem:[%s8770_s16 + $0x21c] sm:$0xf] %v6509_v55  ;;  %v6513_v57 = vld [vmem:[%s8765_s15 + $0x9d0] sm:$0xf] }
  0xf3   : > { %6512 = vst [vmem:[%s8770_s16 + $0x260] sm:$0xf] %v6511_v56  ;;  %v6515_v58 = vld [vmem:[%s8765_s15 + $0xae0] sm:$0xf]  ;;  %v6517_v59 = vld [vmem:[%s8765_s15 + $0xbf0] sm:$0xf] }
  0xf4   : > { %6514 = vst [vmem:[%s8770_s16 + $0x2a4] sm:$0xf] %v6513_v57  ;;  %6516 = vst [vmem:[%s8770_s16 + $0x2e8] sm:$0xf] %v6515_v58  ;;  %v6519_v60 = vld [vmem:[%s8765_s15 + $0xd00] sm:$0xf] }
  0xf5   : > { %6518 = vst [vmem:[%s8770_s16 + $0x32c] sm:$0xf] %v6517_v59  ;;  %v6521_v61 = vld [vmem:[%s8765_s15 + $0xe10] sm:$0xf]  ;;  %v6523_v62 = vld [vmem:[%s8765_s15 + $0xf20] sm:$0xf] }
  0xf6   : > { %6520 = vst [vmem:[%s8770_s16 + $0x370] sm:$0xf] %v6519_v60  ;;  %6522 = vst [vmem:[%s8770_s16 + $0x3b4] sm:$0xf] %v6521_v61  ;;  %v6525_v63 = vld [vmem:[%s8765_s15 + $0x1030] sm:$0xf] }
  0xf7   : > { %6524 = vst [vmem:[%s8770_s16 + $0x3f8] sm:$0xf] %v6523_v62  ;;  %v6527_v0 = vld [vmem:[%s8765_s15 + $0x1140] sm:$0xf]  ;;  %v6529_v1 = vld [vmem:[%s8765_s15 + $0x1250] sm:$0xf] }
  0xf8   : > { %6526 = vst [vmem:[%s8770_s16 + $0x43c] sm:$0xf] %v6525_v63  ;;  %6528 = vst [vmem:[%s8770_s16 + $0x480] sm:$0xf] %v6527_v0  ;;  %v6531_v2 = vld [vmem:[%s8765_s15 + $0x1360] sm:$0xf] }
  0xf9   : > { %6530 = vst [vmem:[%s8770_s16 + $0x4c4] sm:$0xf] %v6529_v1  ;;  %v6533_v3 = vld [vmem:[%s8765_s15 + $0x1470] sm:$0xf]  ;;  %v6535_v4 = vld [vmem:[%s8765_s15 + $0x1580] sm:$0xf] }
  0xfa   : > { %6532 = vst [vmem:[%s8770_s16 + $0x508] sm:$0xf] %v6531_v2  ;;  %6534 = vst [vmem:[%s8770_s16 + $0x54c] sm:$0xf] %v6533_v3  ;;  %v6537_v5 = vld [vmem:[%s8765_s15 + $0x1690] sm:$0xf] }
  0xfb   : > { %6536 = vst [vmem:[%s8770_s16 + $0x590] sm:$0xf] %v6535_v4  ;;  %v6539_v6 = vld [vmem:[%s8765_s15 + $0x17a0] sm:$0xf]  ;;  %v6541_v7 = vld [vmem:[%s8765_s15 + $0x18b0] sm:$0xf] }
  0xfc   : > { %6538 = vst [vmem:[%s8770_s16 + $0x5d4] sm:$0xf] %v6537_v5  ;;  %6540 = vst [vmem:[%s8770_s16 + $0x618] sm:$0xf] %v6539_v6  ;;  %v6543_v8 = vld [vmem:[%s8765_s15 + $0x19c0] sm:$0xf] }
  0xfd   : > { %6542 = vst [vmem:[%s8770_s16 + $0x65c] sm:$0xf] %v6541_v7  ;;  %v6545_v9 = vld [vmem:[%s8765_s15 + $0x1ad0] sm:$0xf]  ;;  %v6547_v10 = vld [vmem:[%s8765_s15 + $0x1be0] sm:$0xf] }
  0xfe   : > { %6544 = vst [vmem:[%s8770_s16 + $0x6a0] sm:$0xf] %v6543_v8  ;;  %6546 = vst [vmem:[%s8770_s16 + $0x6e4] sm:$0xf] %v6545_v9  ;;  %v6549_v11 = vld [vmem:[%s8765_s15 + $0x1cf0] sm:$0xf] }
  0xff   : > { %6548 = vst [vmem:[%s8770_s16 + $0x728] sm:$0xf] %v6547_v10  ;;  %v6551_v12 = vld [vmem:[%s8765_s15 + $0x1e00] sm:$0xf]  ;;  %v6553_v13 = vld [vmem:[%s8765_s15 + $0x1f10] sm:$0xf] }
 0x100   : > { %6550 = vst [vmem:[%s8770_s16 + $0x76c] sm:$0xf] %v6549_v11  ;;  %6552 = vst [vmem:[%s8770_s16 + $0x7b0] sm:$0xf] %v6551_v12  ;;  %v6555_v14 = vld [vmem:[%s8765_s15 + $0x2020] sm:$0xf] }
 0x101   : > { %6554 = vst [vmem:[%s8770_s16 + $0x7f4] sm:$0xf] %v6553_v13  ;;  %v6557_v15 = vld [vmem:[%s8765_s15 + $0x2130] sm:$0xf]  ;;  %v6559_v16 = vld [vmem:[%s8765_s15 + $0x2240] sm:$0xf] }
 0x102   : > { %6556 = vst [vmem:[%s8770_s16 + $0x838] sm:$0xf] %v6555_v14  ;;  %6558 = vst [vmem:[%s8770_s16 + $0x87c] sm:$0xf] %v6557_v15  ;;  %v6561_v17 = vld [vmem:[%s8765_s15 + $0x2350] sm:$0xf] }
 0x103   : > { %6560 = vst [vmem:[%s8770_s16 + $0x8c0] sm:$0xf] %v6559_v16  ;;  %v6563_v18 = vld [vmem:[%s8765_s15 + $0x2460] sm:$0xf]  ;;  %v6565_v19 = vld [vmem:[%s8765_s15 + $0x2570] sm:$0xf] }
 0x104   : > { %6562 = vst [vmem:[%s8770_s16 + $0x904] sm:$0xf] %v6561_v17  ;;  %6564 = vst [vmem:[%s8770_s16 + $0x948] sm:$0xf] %v6563_v18  ;;  %v6567_v20 = vld [vmem:[%s8765_s15 + $0x2680] sm:$0xf] }
 0x105   : > { %6566 = vst [vmem:[%s8770_s16 + $0x98c] sm:$0xf] %v6565_v19  ;;  %v6569_v21 = vld [vmem:[%s8765_s15 + $0x2790] sm:$0xf]  ;;  %v6571_v22 = vld [vmem:[%s8765_s15 + $0x28a0] sm:$0xf] }
 0x106   : > { %6568 = vst [vmem:[%s8770_s16 + $0x9d0] sm:$0xf] %v6567_v20  ;;  %6570 = vst [vmem:[%s8770_s16 + $0xa14] sm:$0xf] %v6569_v21  ;;  %v6573_v23 = vld [vmem:[%s8765_s15 + $0x29b0] sm:$0xf] }
 0x107   : > { %6572 = vst [vmem:[%s8770_s16 + $0xa58] sm:$0xf] %v6571_v22  ;;  %v6575_v24 = vld [vmem:[%s8765_s15 + $0x2ac0] sm:$0xf]  ;;  %v6577_v25 = vld [vmem:[%s8765_s15 + $0x2bd0] sm:$0xf] }
 0x108   : > { %6574 = vst [vmem:[%s8770_s16 + $0xa9c] sm:$0xf] %v6573_v23  ;;  %6576 = vst [vmem:[%s8770_s16 + $0xae0] sm:$0xf] %v6575_v24  ;;  %v6579_v26 = vld [vmem:[%s8765_s15 + $0x2ce0] sm:$0xf] }
 0x109   : > { %6578 = vst [vmem:[%s8770_s16 + $0xb24] sm:$0xf] %v6577_v25  ;;  %v6581_v27 = vld [vmem:[%s8765_s15 + $0x2df0] sm:$0xf]  ;;  %v6583_v28 = vld [vmem:[%s8765_s15 + $0x2f00] sm:$0xf] }
 0x10a   : > { %6580 = vst [vmem:[%s8770_s16 + $0xb68] sm:$0xf] %v6579_v26  ;;  %6582 = vst [vmem:[%s8770_s16 + $0xbac] sm:$0xf] %v6581_v27  ;;  %v6585_v29 = vld [vmem:[%s8765_s15 + $0x3010] sm:$0xf] }
 0x10b   : > { %6584 = vst [vmem:[%s8770_s16 + $0xbf0] sm:$0xf] %v6583_v28  ;;  %v6587_v30 = vld [vmem:[%s8765_s15 + $0x3120] sm:$0xf]  ;;  %v6589_v31 = vld [vmem:[%s8765_s15 + $0x3230] sm:$0xf] }
 0x10c   : > { %6586 = vst [vmem:[%s8770_s16 + $0xc34] sm:$0xf] %v6585_v29  ;;  %6588 = vst [vmem:[%s8770_s16 + $0xc78] sm:$0xf] %v6587_v30  ;;  %v6591_v32 = vld [vmem:[%s8765_s15 + $0x3340] sm:$0xf] }
 0x10d   : > { %6590 = vst [vmem:[%s8770_s16 + $0xcbc] sm:$0xf] %v6589_v31  ;;  %v6593_v33 = vld [vmem:[%s8765_s15 + $0x3450] sm:$0xf]  ;;  %v6595_v34 = vld [vmem:[%s8765_s15 + $0x3560] sm:$0xf] }
 0x10e   : > { %6592 = vst [vmem:[%s8770_s16 + $0xd00] sm:$0xf] %v6591_v32  ;;  %6594 = vst [vmem:[%s8770_s16 + $0xd44] sm:$0xf] %v6593_v33  ;;  %v6597_v35 = vld [vmem:[%s8765_s15 + $0x3670] sm:$0xf] }
 0x10f   : > { %6596 = vst [vmem:[%s8770_s16 + $0xd88] sm:$0xf] %v6595_v34  ;;  %v6599_v36 = vld [vmem:[%s8765_s15 + $0x3780] sm:$0xf]  ;;  %v6601_v37 = vld [vmem:[%s8765_s15 + $0x3890] sm:$0xf] }
 0x110   : > { %6598 = vst [vmem:[%s8770_s16 + $0xdcc] sm:$0xf] %v6597_v35  ;;  %6600 = vst [vmem:[%s8770_s16 + $0xe10] sm:$0xf] %v6599_v36 }
 0x111   : > { %6602 = vst [vmem:[%s8770_s16 + $0xe54] sm:$0xf] %v6601_v37 }
 0x112 PF: > { %p6603_p7 = scmp.ge.s32.totalorder %s8672_s26, 1  ;;  %p1244_p8 = scmp.lt.s32.totalorder %s8672_s26, 5 }
 0x114   : > { %p1245_p9 = pnand %p6603_p7, %p1244_p8 }
 0x115   : > { %s1251_s17 = sand.u32 (!%p1245_p9), 1, %s8664_s24   ;;  %v9747_v38 = vld [vmem:[%s11486_s0] sm:$0x77] (!%p1245_p9)  ;;  %vm4187_vm0 = vcmask (!%p1245_p9), 384000   ;;  %vm4191_vm1 = vcmask (!%p1245_p9), 1046528   ;;  %vm4192_vm2 = vcmask (!%p1245_p9), 1047552  }
 0x116   : > { %1248 = sbr.rel (%p1245_p9) target bundleno = 1847 (0x737), region = 66  ;;  %v1786_v39 = vcombine.high (!%p1245_p9), %v9747_v38, %v9747_v38  ;;  %p7093_p11 = scmp.ne.s32.totalorder (!%p1245_p9), %s8738_s27, 0 }
 0x117   : > { %s7454_s20 = smul.u32 (!%p1245_p9), 3672, %s1251_s17 }
 0x118   : > { %v9753_v40 = vpack.c.bf16 (!%p1245_p9), %v1786_v39, %v1786_v39  ;;  %s1286_s26 = smul.u32 (!%p1245_p9), 17, %s8738_s27 }
 0x119   : > { %s9755_s21 = scalar_lea.vmem (!%p1245_p9), [#allocation2], %s7454_s20  ;;  %s10204_s12 = smul.u32 (!%p1245_p9), 136, %s1251_s17 }
 0x11a   : > { %v7494_v41 = vld [vmem:[%s9755_s21 + $0x4] ss:$68 sps:$4 sm:$0xff] (!%p1245_p9)   ;;  %v7496_v42 = vld [vmem:[%s9755_s21 + $0xc] ss:$68 sps:$4 sm:$0xff] (!%p1245_p9)   ;;  %4278 = vmatprep.mubr.bf16.mxu0 (!%p1245_p9), %v9753_v40  ;;  %4360 = vmatprep.mubr.bf16.mxu1 (!%p1245_p9), %v9753_v40  ;;  %v7502_v46 = vld [vmem:[%s9755_s21 + $0x94] ss:$68 sps:$4 sm:$0xff] (!%p1245_p9)  }
 0x11b   : > { %4246 = vmatprep.subr.bf16.mxu0 (!%p1245_p9), %v7494_v41  ;;  %v7498_v43 = vld [vmem:[%s9755_s21] ss:$68 sps:$4 sm:$0xff] (!%p1245_p9)   ;;  %v7499_v44 = vld [vmem:[%s9755_s21 + $0x8] ss:$68 sps:$4 sm:$0xff] (!%p1245_p9)   ;;  %4328 = vmatprep.subr.bf16.mxu1 (!%p1245_p9), %v7496_v42  ;;  %v7505_v48 = vld [vmem:[%s9755_s21 + $0x90] ss:$68 sps:$4 sm:$0xff] (!%p1245_p9)  }
 0x11c   : > { %v7500_v45 = vld [vmem:[%s9755_s21 + $0x8c] ss:$68 sps:$4 sm:$0xff] (!%p1245_p9)   ;;  %4247 = vmatpush1.bf16.msra.mxu0 (!%p1245_p9), %v7498_v43  ;;  %4329 = vmatpush1.bf16.msra.mxu1 (!%p1245_p9), %v7499_v44  ;;  %v7506_v49 = vld [vmem:[%s9755_s21 + $0x114] ss:$68 sps:$4 sm:$0xff] (!%p1245_p9)   ;;  %v7508_v50 = vld [vmem:[%s9755_s21 + $0x11c] ss:$68 sps:$4 sm:$0xff] (!%p1245_p9)  }
 0x11d   : > { %v7504_v47 = vld [vmem:[%s9755_s21 + $0x88] ss:$68 sps:$4 sm:$0xff]   ;;  %4248 = vmatprep.subr.bf16.mxu0 %v7500_v45  ;;  %4330 = vmatprep.subr.bf16.mxu1 %v7502_v46  ;;  %v7510_v51 = vld [vmem:[%s9755_s21 + $0x110] ss:$68 sps:$4 sm:$0xff]   ;;  %v7511_v52 = vld [vmem:[%s9755_s21 + $0x118] ss:$68 sps:$4 sm:$0xff]  }
 0x11e   : > { %v7512_v53 = vld [vmem:[%s9755_s21 + $0x19c] ss:$68 sps:$4 sm:$0xff]   ;;  %v7514_v54 = vld [vmem:[%s9755_s21 + $0x1a4] ss:$68 sps:$4 sm:$0xff]   ;;  %v7520_v58 = vld [vmem:[%s9755_s21 + $0x22c] ss:$68 sps:$4 sm:$0xff]  }
 0x11f   : > { %v7516_v55 = vld [vmem:[%s9755_s21 + $0x198] ss:$68 sps:$4 sm:$0xff]   ;;  %v7517_v56 = vld [vmem:[%s9755_s21 + $0x1a0] ss:$68 sps:$4 sm:$0xff]   ;;  %v7523_v60 = vld [vmem:[%s9755_s21 + $0x228] ss:$68 sps:$4 sm:$0xff]  }
 0x120   : > { %4249 = vmatpush1.bf16.msra.mxu0 %v7504_v47  ;;  %4331 = vmatpush1.bf16.msra.mxu1 %v7505_v48  ;;  %v7518_v57 = vld [vmem:[%s9755_s21 + $0x224] ss:$68 sps:$4 sm:$0xff]   ;;  %v7524_v61 = vld [vmem:[%s9755_s21 + $0x2ac] ss:$68 sps:$4 sm:$0xff]   ;;  %v7526_v62 = vld [vmem:[%s9755_s21 + $0x2b4] ss:$68 sps:$4 sm:$0xff]  }
 0x121   : > { %4250 = vmatprep.subr.bf16.mxu0 %v7506_v49  ;;  %4332 = vmatprep.subr.bf16.mxu1 %v7508_v50  ;;  %v7522_v59 = vld [vmem:[%s9755_s21 + $0x220] ss:$68 sps:$4 sm:$0xff]   ;;  %v7528_v63 = vld [vmem:[%s9755_s21 + $0x2a8] ss:$68 sps:$4 sm:$0xff]   ;;  %v7529_v0 = vld [vmem:[%s9755_s21 + $0x2b0] ss:$68 sps:$4 sm:$0xff]   ;;  %v9836_v49 = vpack.c.bf16 %v9747_v38, %v9747_v38 }
 0x122   : > { %v7530_v1 = vld [vmem:[%s9755_s21 + $0x334] ss:$68 sps:$4 sm:$0xff]   ;;  %v7532_v2 = vld [vmem:[%s9755_s21 + $0x33c] ss:$68 sps:$4 sm:$0xff]   ;;  %v7538_v6 = vld [vmem:[%s9755_s21 + $0x3c4] ss:$68 sps:$4 sm:$0xff]  }
 0x123   : > { %v7534_v3 = vld [vmem:[%s9755_s21 + $0x330] ss:$68 sps:$4 sm:$0xff]   ;;  %v7535_v4 = vld [vmem:[%s9755_s21 + $0x338] ss:$68 sps:$4 sm:$0xff]   ;;  %v7541_v8 = vld [vmem:[%s9755_s21 + $0x3c0] ss:$68 sps:$4 sm:$0xff]  }
 0x124   : > { %4251 = vmatpush1.bf16.msra.mxu0 %v7510_v51  ;;  %4333 = vmatpush1.bf16.msra.mxu1 %v7511_v52  ;;  %v7536_v5 = vld [vmem:[%s9755_s21 + $0x3bc] ss:$68 sps:$4 sm:$0xff]   ;;  %v7542_v9 = vld [vmem:[%s9755_s21 + $0x444] ss:$68 sps:$4 sm:$0xff]   ;;  %v7544_v10 = vld [vmem:[%s9755_s21 + $0x44c] ss:$68 sps:$4 sm:$0xff]  }
 0x125   : > { %4252 = vmatprep.subr.bf16.mxu0 %v7512_v53  ;;  %4334 = vmatprep.subr.bf16.mxu1 %v7514_v54  ;;  %v7540_v7 = vld [vmem:[%s9755_s21 + $0x3b8] ss:$68 sps:$4 sm:$0xff]   ;;  %v7546_v11 = vld [vmem:[%s9755_s21 + $0x440] ss:$68 sps:$4 sm:$0xff]   ;;  %v7547_v12 = vld [vmem:[%s9755_s21 + $0x448] ss:$68 sps:$4 sm:$0xff]  }
 0x126   : > { %v7548_v13 = vld [vmem:[%s9755_s21 + $0x4cc] ss:$68 sps:$4 sm:$0xff]   ;;  %v7550_v14 = vld [vmem:[%s9755_s21 + $0x4d4] ss:$68 sps:$4 sm:$0xff]   ;;  %v7556_v18 = vld [vmem:[%s9755_s21 + $0x55c] ss:$68 sps:$4 sm:$0xff]  }
 0x127   : > { %v7552_v15 = vld [vmem:[%s9755_s21 + $0x4c8] ss:$68 sps:$4 sm:$0xff]   ;;  %v7553_v16 = vld [vmem:[%s9755_s21 + $0x4d0] ss:$68 sps:$4 sm:$0xff]   ;;  %v7559_v20 = vld [vmem:[%s9755_s21 + $0x558] ss:$68 sps:$4 sm:$0xff]  }
 0x128   : > { %4253 = vmatpush1.bf16.msra.mxu0 %v7516_v55  ;;  %4335 = vmatpush1.bf16.msra.mxu1 %v7517_v56  ;;  %v7554_v17 = vld [vmem:[%s9755_s21 + $0x554] ss:$68 sps:$4 sm:$0xff]   ;;  %v7560_v21 = vld [vmem:[%s9755_s21 + $0x5dc] ss:$68 sps:$4 sm:$0xff]   ;;  %v7562_v22 = vld [vmem:[%s9755_s21 + $0x5e4] ss:$68 sps:$4 sm:$0xff]  }
 0x129   : > { %4254 = vmatprep.subr.bf16.mxu0 %v7518_v57  ;;  %4336 = vmatprep.subr.bf16.mxu1 %v7520_v58  ;;  %v7558_v19 = vld [vmem:[%s9755_s21 + $0x550] ss:$68 sps:$4 sm:$0xff]   ;;  %v7564_v23 = vld [vmem:[%s9755_s21 + $0x5d8] ss:$68 sps:$4 sm:$0xff]   ;;  %v7565_v24 = vld [vmem:[%s9755_s21 + $0x5e0] ss:$68 sps:$4 sm:$0xff]  }
 0x12a   : > { %v7566_v25 = vld [vmem:[%s9755_s21 + $0x664] ss:$68 sps:$4 sm:$0xff]   ;;  %v7568_v26 = vld [vmem:[%s9755_s21 + $0x66c] ss:$68 sps:$4 sm:$0xff]   ;;  %v7574_v30 = vld [vmem:[%s9755_s21 + $0x6f4] ss:$68 sps:$4 sm:$0xff]  }
 0x12b   : > { %v7570_v27 = vld [vmem:[%s9755_s21 + $0x660] ss:$68 sps:$4 sm:$0xff]   ;;  %v7571_v28 = vld [vmem:[%s9755_s21 + $0x668] ss:$68 sps:$4 sm:$0xff]   ;;  %v7577_v32 = vld [vmem:[%s9755_s21 + $0x6f0] ss:$68 sps:$4 sm:$0xff]  }
 0x12c   : > { %4255 = vmatpush1.bf16.msra.mxu0 %v7522_v59  ;;  %4337 = vmatpush1.bf16.msra.mxu1 %v7523_v60  ;;  %v7572_v29 = vld [vmem:[%s9755_s21 + $0x6ec] ss:$68 sps:$4 sm:$0xff]   ;;  %v7578_v33 = vld [vmem:[%s9755_s21 + $0x774] ss:$68 sps:$4 sm:$0xff]   ;;  %v7580_v34 = vld [vmem:[%s9755_s21 + $0x77c] ss:$68 sps:$4 sm:$0xff]  }
 0x12d   : > { %4256 = vmatprep.subr.bf16.mxu0 %v7524_v61  ;;  %4338 = vmatprep.subr.bf16.mxu1 %v7526_v62  ;;  %v7576_v31 = vld [vmem:[%s9755_s21 + $0x6e8] ss:$68 sps:$4 sm:$0xff]   ;;  %v7582_v35 = vld [vmem:[%s9755_s21 + $0x770] ss:$68 sps:$4 sm:$0xff]   ;;  %v7583_v36 = vld [vmem:[%s9755_s21 + $0x778] ss:$68 sps:$4 sm:$0xff]  }
 0x12e   : > { %v7584_v37 = vld [vmem:[%s9755_s21 + $0x7fc] ss:$68 sps:$4 sm:$0xff]   ;;  %v7586_v39 = vld [vmem:[%s9755_s21 + $0x804] ss:$68 sps:$4 sm:$0xff]   ;;  %v7596_v45 = vld [vmem:[%s9755_s21 + $0x88c] ss:$68 sps:$4 sm:$0xff]  }
 0x12f   : > { %v9824_v41 = vld [vmem:[%s11486_s0 + $0x8] sm:$0x77]  ;;  %v7588_v42 = vld [vmem:[%s9755_s21 + $0x7f8] ss:$68 sps:$4 sm:$0xff]   ;;  %v7589_v43 = vld [vmem:[%s9755_s21 + $0x800] ss:$68 sps:$4 sm:$0xff]  }
 0x130   : > { %4257 = vmatpush1.bf16.msra.mxu0 %v7528_v63  ;;  %4339 = vmatpush1.bf16.msra.mxu1 %v7529_v0  ;;  %v7593_v44 = vld [vmem:[%s9755_s21 + $0x884] ss:$68 sps:$4 sm:$0xff]   ;;  %v1787_v46 = vcombine.high %v9824_v41, %v9824_v41  ;;  %v7599_v50 = vld [vmem:[%s9755_s21 + $0x90c] ss:$68 sps:$4 sm:$0xff]   ;;  %v7602_v51 = vld [vmem:[%s9755_s21 + $0x914] ss:$68 sps:$4 sm:$0xff]  }
 0x131   : > { %4258 = vmatprep.subr.bf16.mxu0 %v7530_v1  ;;  %4340 = vmatprep.subr.bf16.mxu1 %v7532_v2  ;;  %v7591_v47 = vld [vmem:[%s9755_s21 + $0x880] ss:$68 sps:$4 sm:$0xff]   ;;  %v7594_v48 = vld [vmem:[%s9755_s21 + $0x888] ss:$68 sps:$4 sm:$0xff]   ;;  %v7600_v54 = vld [vmem:[%s9755_s21 + $0x910] ss:$68 sps:$4 sm:$0xff]  }
 0x132   : > { %v9840_v52 = vpack.c.bf16 %v1787_v46, %v1787_v46  ;;  %v7597_v53 = vld [vmem:[%s9755_s21 + $0x908] ss:$68 sps:$4 sm:$0xff]   ;;  %v7605_v38 = vld [vmem:[%s9755_s21 + $0x994] ss:$68 sps:$4 sm:$0xff]   ;;  %v7608_v55 = vld [vmem:[%s9755_s21 + $0x99c] ss:$68 sps:$4 sm:$0xff]  }
 0x133   : > { %v7603_v56 = vld [vmem:[%s9755_s21 + $0x990] ss:$68 sps:$4 sm:$0xff]   ;;  %v7606_v57 = vld [vmem:[%s9755_s21 + $0x998] ss:$68 sps:$4 sm:$0xff]   ;;  %v7614_v59 = vld [vmem:[%s9755_s21 + $0xa24] ss:$68 sps:$4 sm:$0xff]  }
 0x134   : > { %4259 = vmatpush1.bf16.msra.mxu0 %v7534_v3  ;;  %4341 = vmatpush1.bf16.msra.mxu1 %v7535_v4  ;;  %v7611_v58 = vld [vmem:[%s9755_s21 + $0xa1c] ss:$68 sps:$4 sm:$0xff]   ;;  %v7617_v62 = vld [vmem:[%s9755_s21 + $0xaa4] ss:$68 sps:$4 sm:$0xff]   ;;  %v7620_v63 = vld [vmem:[%s9755_s21 + $0xaac] ss:$68 sps:$4 sm:$0xff]  }
 0x135   : > { %4260 = vmatprep.subr.bf16.mxu0 %v7536_v5  ;;  %4342 = vmatprep.subr.bf16.mxu1 %v7538_v6  ;;  %v7609_v60 = vld [vmem:[%s9755_s21 + $0xa18] ss:$68 sps:$4 sm:$0xff]   ;;  %v7612_v61 = vld [vmem:[%s9755_s21 + $0xa20] ss:$68 sps:$4 sm:$0xff]   ;;  %v7618_v1 = vld [vmem:[%s9755_s21 + $0xaa8] ss:$68 sps:$4 sm:$0xff]  }
 0x136   : > { %v7615_v0 = vld [vmem:[%s9755_s21 + $0xaa0] ss:$68 sps:$4 sm:$0xff]   ;;  %v7623_v2 = vld [vmem:[%s9755_s21 + $0xb2c] ss:$68 sps:$4 sm:$0xff]   ;;  %v7626_v3 = vld [vmem:[%s9755_s21 + $0xb34] ss:$68 sps:$4 sm:$0xff]  }
 0x137   : > { %v7621_v4 = vld [vmem:[%s9755_s21 + $0xb28] ss:$68 sps:$4 sm:$0xff]   ;;  %v7624_v5 = vld [vmem:[%s9755_s21 + $0xb30] ss:$68 sps:$4 sm:$0xff]   ;;  %v7670_v46 = vld [vmem:[%s9755_s21 + $0x120] ss:$68 sps:$4 sm:$0xff]  }
 0x138   : > { %4261 = vmatpush1.bf16.msra.mxu0 %v7540_v7  ;;  %4343 = vmatpush1.bf16.msra.mxu1 %v7541_v8  ;;  %v7629_v6 = vld [vmem:[%s9755_s21 + $0xbb4] ss:$68 sps:$4 sm:$0xff]   ;;  %v7632_v7 = vld [vmem:[%s9755_s21 + $0xbbc] ss:$68 sps:$4 sm:$0xff]   ;;  %p10143_p10 = scmp.lt.s32.totalorder %s1286_s26, 67  ;;  %s10239_s24 = scalar_lea.vmem [#allocation3], %s10204_s12 }
 0x139   : > { %4262 = vmatprep.subr.bf16.mxu0 %v7542_v9  ;;  %4344 = vmatprep.subr.bf16.mxu1 %v7544_v10  ;;  %v7627_v8 = vld [vmem:[%s9755_s21 + $0xbb0] ss:$68 sps:$4 sm:$0xff]   ;;  %v7630_v9 = vld [vmem:[%s9755_s21 + $0xbb8] ss:$68 sps:$4 sm:$0xff]   ;;  %vm8678_vm3 = vmmov (!%p7093_p11), 1   ;;  %vm5839_vm5 = vcmask (!%p7093_p11), 1042432  }
 0x13a   : > { %v7635_v10 = vld [vmem:[%s9755_s21 + $0xc3c] ss:$68 sps:$4 sm:$0xff]   ;;  %s11502_s26 = smov (!%p10143_p10, %s1286_s26), 67  ;;  %vm11338_vm4 = vmpackc.low (!%p7093_p11), %vm4191_vm1, %vm8678_vm3  ;;  %vm5861_vm6 = vcmask (!%p7093_p11), 378880   ;;  %vm6070_vm7 = vcmask (!%p7093_p11), 16384  }
 0x13b   : > { %s10171_s11 = scalar_lea.vmem %s11488_s2, %s11502_s26 }
 0x13c   : > { %4263 = vmatpush1.bf16.msra.mxu0 %v7546_v11  ;;  %4345 = vmatpush1.bf16.msra.mxu1 %v7547_v12  ;;  %v7638_v11 = vld [vmem:[%s9755_s21 + $0xc44] ss:$68 sps:$4 sm:$0xff]   ;;  %v7633_v12 = vld [vmem:[%s9755_s21 + $0xc38] ss:$68 sps:$4 sm:$0xff]  }
 0x13d   : > { %4264 = vmatprep.subr.bf16.mxu0 %v7548_v13  ;;  %4346 = vmatprep.subr.bf16.mxu1 %v7550_v14  ;;  %v7636_v13 = vld [vmem:[%s9755_s21 + $0xc40] ss:$68 sps:$4 sm:$0xff]  }
 0x13e   : > { %v7641_v14 = vld [vmem:[%s9755_s21 + $0xcc4] ss:$68 sps:$4 sm:$0xff]  }
 0x140   : > { %4265 = vmatpush1.bf16.msra.mxu0 %v7552_v15  ;;  %4347 = vmatpush1.bf16.msra.mxu1 %v7553_v16  ;;  %v7644_v15 = vld [vmem:[%s9755_s21 + $0xccc] ss:$68 sps:$4 sm:$0xff]   ;;  %v7639_v16 = vld [vmem:[%s9755_s21 + $0xcc0] ss:$68 sps:$4 sm:$0xff]  }
 0x141   : > { %4266 = vmatprep.subr.bf16.mxu0 %v7554_v17  ;;  %4348 = vmatprep.subr.bf16.mxu1 %v7556_v18  ;;  %v7642_v17 = vld [vmem:[%s9755_s21 + $0xcc8] ss:$68 sps:$4 sm:$0xff]  }
 0x142   : > { %v7647_v18 = vld [vmem:[%s9755_s21 + $0xd4c] ss:$68 sps:$4 sm:$0xff]  }
 0x144   : > { %4267 = vmatpush1.bf16.msra.mxu0 %v7558_v19  ;;  %4349 = vmatpush1.bf16.msra.mxu1 %v7559_v20  ;;  %v7650_v19 = vld [vmem:[%s9755_s21 + $0xd54] ss:$68 sps:$4 sm:$0xff]   ;;  %v8674_v20 = vmov 65535  }
 0x145   : > { %4268 = vmatprep.subr.bf16.mxu0 %v7560_v21  ;;  %4350 = vmatprep.subr.bf16.mxu1 %v7562_v22  ;;  %v4193_v21 = vsel %vm4191_vm1, 4294967295, %v8674_v20  ;;  %v7653_v22 = vld [vmem:[%s9755_s21 + $0xdd4] ss:$68 sps:$4 sm:$0xff]  }
 0x146   : > { %v7727_v20 = vld [vmem:[%s9755_s21 + $0x5f0] ss:$68 sps:$4 sm:$0xff]  }
 0x148   : > { %4269 = vmatpush1.bf16.msra.mxu0 %v7564_v23  ;;  %4351 = vmatpush1.bf16.msra.mxu1 %v7565_v24  ;;  %v7656_v23 = vld [vmem:[%s9755_s21 + $0xddc] ss:$68 sps:$4 sm:$0xff]   ;;  %v7645_v24 = vld [vmem:[%s9755_s21 + $0xd48] ss:$68 sps:$4 sm:$0xff]  }
 0x149   : > { %4270 = vmatprep.subr.bf16.mxu0 %v7566_v25  ;;  %4352 = vmatprep.subr.bf16.mxu1 %v7568_v26  ;;  %v9884_v25 = vsel %vm4192_vm2, %v4193_v21, 0  ;;  %v7648_v26 = vld [vmem:[%s9755_s21 + $0xd50] ss:$68 sps:$4 sm:$0xff]  }
 0x14a   : > { %v7732_v21 = vld [vmem:[%s9755_s21 + $0x674] ss:$68 sps:$4 sm:$0xff]  }
 0x14c   : > { %4271 = vmatpush1.bf16.msra.mxu0 %v7570_v27  ;;  %4353 = vmatpush1.bf16.msra.mxu1 %v7571_v28  ;;  %v7651_v27 = vld [vmem:[%s9755_s21 + $0xdd0] ss:$68 sps:$4 sm:$0xff]   ;;  %v7654_v28 = vld [vmem:[%s9755_s21 + $0xdd8] ss:$68 sps:$4 sm:$0xff]  }
 0x14d   : > { %4272 = vmatprep.subr.bf16.mxu0 %v7572_v29  ;;  %4354 = vmatprep.subr.bf16.mxu1 %v7574_v30  ;;  %v9890_v29 = vand.u32 %v7653_v22, %v9884_v25  ;;  %v9893_v30 = vand.u32 %v7656_v23, %v9884_v25  ;;  %v7735_v22 = vld [vmem:[%s9755_s21 + $0x67c] ss:$68 sps:$4 sm:$0xff]   ;;  %v7730_v23 = vld [vmem:[%s9755_s21 + $0x670] ss:$68 sps:$4 sm:$0xff]  }
 0x150   : > { %4273 = vmatpush1.bf16.msra.mxu0 %v7576_v31  ;;  %4355 = vmatpush1.bf16.msra.mxu1 %v7577_v32  ;;  %v9896_v31 = vand.u32 %v7651_v27, %v9884_v25  ;;  %v9899_v32 = vand.u32 %v7654_v28, %v9884_v25  ;;  %v7741_v27 = vld [vmem:[%s9755_s21 + $0x704] ss:$68 sps:$4 sm:$0xff]   ;;  %v7736_v28 = vld [vmem:[%s9755_s21 + $0x6f8] ss:$68 sps:$4 sm:$0xff]  }
 0x151   : > { %4274 = vmatprep.subr.bf16.mxu0 %v7578_v33  ;;  %4356 = vmatprep.subr.bf16.mxu1 %v7580_v34  ;;  %v7660_v33 = vld [vmem:[%s9755_s21 + $0x14] ss:$68 sps:$4 sm:$0xff]   ;;  %v7663_v34 = vld [vmem:[%s9755_s21 + $0x1c] ss:$68 sps:$4 sm:$0xff]  }
 0x154   : > { %4275 = vmatpush1.bf16.msra.mxu0 %v7582_v35  ;;  %4357 = vmatpush1.bf16.msra.mxu1 %v7583_v36  ;;  %v9907_v35 = vpack.c.bf16 %v9824_v41, %v9824_v41  ;;  %v7658_v36 = vld [vmem:[%s9755_s21 + $0x10] ss:$68 sps:$4 sm:$0xff]   ;;  %v7664_v41 = vld [vmem:[%s9755_s21 + $0x98] ss:$68 sps:$4 sm:$0xff]  }
 0x155   : > { %4276 = vmatprep.subr.bf16.mxu0 %v7584_v37  ;;  %4358 = vmatprep.subr.bf16.mxu1 %v7586_v39  ;;  %v7661_v37 = vld [vmem:[%s9755_s21 + $0x18] ss:$68 sps:$4 sm:$0xff]  }
 0x156   : > { %v7666_v39 = vld [vmem:[%s9755_s21 + $0x9c] ss:$68 sps:$4 sm:$0xff]  }
 0x158   : > { %4277 = vmatpush1.bf16.msra.mxu0 %v7588_v42  ;;  %4359 = vmatpush1.bf16.msra.mxu1 %v7589_v43  ;;  %v7669_v42 = vld [vmem:[%s9755_s21 + $0xa4] ss:$68 sps:$4 sm:$0xff]  }
 0x159   : > { %4287 = vmatprep.subr.bf16.mxu0 %v7593_v44  ;;  %4369 = vmatprep.subr.bf16.mxu1 %v7596_v45  ;;  %v7667_v43 = vld [vmem:[%s9755_s21 + $0xa0] ss:$68 sps:$4 sm:$0xff]   ;;  %v7675_v45 = vld [vmem:[%s9755_s21 + $0x12c] ss:$68 sps:$4 sm:$0xff]  }
 0x15a   : > { %v7672_v44 = vld [vmem:[%s9755_s21 + $0x124] ss:$68 sps:$4 sm:$0xff]  }
 0x15b   : > { %4279 = vmatmul.mubr.bf16.vlgmr.msra.gmra.mrb[0].mxu0 %v9836_v49  ;;  %4361 = vmatmul.mubr.bf16.vlgmr.msra.gmra.mrb[0].mxu1 %v9836_v49 }
 0x15c   : > { %4288 = vmatpush1.bf16.msra.mxu0 %v7591_v47  ;;  %4370 = vmatpush1.bf16.msra.mxu1 %v7594_v48  ;;  %v7673_v47 = vld [vmem:[%s9755_s21 + $0x128] ss:$68 sps:$4 sm:$0xff]  }
 0x15d   : > { %4289 = vmatprep.subr.bf16.mxu0 %v7599_v50  ;;  %4371 = vmatprep.subr.bf16.mxu1 %v7602_v51  ;;  %v7678_v48 = vld [vmem:[%s9755_s21 + $0x1ac] ss:$68 sps:$4 sm:$0xff]   ;;  %v7681_v50 = vld [vmem:[%s9755_s21 + $0x1b4] ss:$68 sps:$4 sm:$0xff]  }
 0x15e   : > { %7064 = vmatprep.mubr.msk.bf16.mxu0 %vm4187_vm0, %v9840_v52  ;;  %7065 = vmatprep.mubr.msk.bf16.mxu1 %vm4187_vm0, %v9840_v52  ;;  %v7676_v51 = vld [vmem:[%s9755_s21 + $0x1a8] ss:$68 sps:$4 sm:$0xff]  }
 0x160   : > { %4290 = vmatpush1.bf16.msra.mxu0 %v7597_v53  ;;  %4372 = vmatpush1.bf16.msra.mxu1 %v7600_v54  ;;  %v7679_v53 = vld [vmem:[%s9755_s21 + $0x1b0] ss:$68 sps:$4 sm:$0xff]  }
 0x161   : > { %4291 = vmatprep.subr.bf16.mxu0 %v7605_v38  ;;  %4373 = vmatprep.subr.bf16.mxu1 %v7608_v55  ;;  %v7684_v54 = vld [vmem:[%s9755_s21 + $0x234] ss:$68 sps:$4 sm:$0xff]   ;;  %v7687_v38 = vld [vmem:[%s9755_s21 + $0x23c] ss:$68 sps:$4 sm:$0xff]  }
 0x162   : > { %v7682_v55 = vld [vmem:[%s9755_s21 + $0x230] ss:$68 sps:$4 sm:$0xff]  }
 0x164   : > { %4292 = vmatpush1.bf16.msra.mxu0 %v7603_v56  ;;  %4374 = vmatpush1.bf16.msra.mxu1 %v7606_v57  ;;  %v7685_v56 = vld [vmem:[%s9755_s21 + $0x238] ss:$68 sps:$4 sm:$0xff]  }
 0x165   : > { %4293 = vmatprep.subr.bf16.mxu0 %v7611_v58  ;;  %4375 = vmatprep.subr.bf16.mxu1 %v7614_v59  ;;  %v7690_v57 = vld [vmem:[%s9755_s21 + $0x2bc] ss:$68 sps:$4 sm:$0xff]   ;;  %v7693_v58 = vld [vmem:[%s9755_s21 + $0x2c4] ss:$68 sps:$4 sm:$0xff]  }
 0x166   : > { %v7688_v59 = vld [vmem:[%s9755_s21 + $0x2b8] ss:$68 sps:$4 sm:$0xff]  }
 0x168   : > { %4294 = vmatpush1.bf16.msra.mxu0 %v7609_v60  ;;  %4376 = vmatpush1.bf16.msra.mxu1 %v7612_v61  ;;  %v7691_v60 = vld [vmem:[%s9755_s21 + $0x2c0] ss:$68 sps:$4 sm:$0xff]  }
 0x169   : > { %4295 = vmatprep.subr.bf16.mxu0 %v7617_v62  ;;  %4377 = vmatprep.subr.bf16.mxu1 %v7620_v63  ;;  %v7696_v61 = vld [vmem:[%s9755_s21 + $0x344] ss:$68 sps:$4 sm:$0xff]   ;;  %v7699_v62 = vld [vmem:[%s9755_s21 + $0x34c] ss:$68 sps:$4 sm:$0xff]  }
 0x16a   : > { %v7694_v63 = vld [vmem:[%s9755_s21 + $0x340] ss:$68 sps:$4 sm:$0xff]  }
 0x16c   : > { %4296 = vmatpush1.bf16.msra.mxu0 %v7615_v0  ;;  %4378 = vmatpush1.bf16.msra.mxu1 %v7618_v1  ;;  %v7697_v0 = vld [vmem:[%s9755_s21 + $0x348] ss:$68 sps:$4 sm:$0xff]  }
 0x16d   : > { %4297 = vmatprep.subr.bf16.mxu0 %v7623_v2  ;;  %4379 = vmatprep.subr.bf16.mxu1 %v7626_v3  ;;  %v7702_v1 = vld [vmem:[%s9755_s21 + $0x3cc] ss:$68 sps:$4 sm:$0xff]   ;;  %v7705_v2 = vld [vmem:[%s9755_s21 + $0x3d4] ss:$68 sps:$4 sm:$0xff]  }
 0x16e   : > { %v7700_v3 = vld [vmem:[%s9755_s21 + $0x3c8] ss:$68 sps:$4 sm:$0xff]  }
 0x170   : > { %4298 = vmatpush1.bf16.msra.mxu0 %v7621_v4  ;;  %4380 = vmatpush1.bf16.msra.mxu1 %v7624_v5  ;;  %v7703_v4 = vld [vmem:[%s9755_s21 + $0x3d0] ss:$68 sps:$4 sm:$0xff]  }
 0x171   : > { %4299 = vmatprep.subr.bf16.mxu0 %v7629_v6  ;;  %4381 = vmatprep.subr.bf16.mxu1 %v7632_v7  ;;  %v7708_v5 = vld [vmem:[%s9755_s21 + $0x454] ss:$68 sps:$4 sm:$0xff]   ;;  %v7711_v6 = vld [vmem:[%s9755_s21 + $0x45c] ss:$68 sps:$4 sm:$0xff]  }
 0x172   : > { %v7706_v7 = vld [vmem:[%s9755_s21 + $0x450] ss:$68 sps:$4 sm:$0xff]  }
 0x174   : > { %4300 = vmatpush1.bf16.msra.mxu0 %v7627_v8  ;;  %4382 = vmatpush1.bf16.msra.mxu1 %v7630_v9  ;;  %v7709_v8 = vld [vmem:[%s9755_s21 + $0x458] ss:$68 sps:$4 sm:$0xff]  }
 0x175   : > { %4301 = vmatprep.subr.bf16.mxu0 %v7635_v10  ;;  %4383 = vmatprep.subr.bf16.mxu1 %v7638_v11  ;;  %v7714_v9 = vld [vmem:[%s9755_s21 + $0x4dc] ss:$68 sps:$4 sm:$0xff]   ;;  %v7717_v10 = vld [vmem:[%s9755_s21 + $0x4e4] ss:$68 sps:$4 sm:$0xff]  }
 0x176   : > { %v7712_v11 = vld [vmem:[%s9755_s21 + $0x4d8] ss:$68 sps:$4 sm:$0xff]  }
 0x178   : > { %4302 = vmatpush1.bf16.msra.mxu0 %v7633_v12  ;;  %4384 = vmatpush1.bf16.msra.mxu1 %v7636_v13  ;;  %v7715_v12 = vld [vmem:[%s9755_s21 + $0x4e0] ss:$68 sps:$4 sm:$0xff]  }
 0x179   : > { %4303 = vmatprep.subr.bf16.mxu0 %v7641_v14  ;;  %4385 = vmatprep.subr.bf16.mxu1 %v7644_v15  ;;  %v7720_v13 = vld [vmem:[%s9755_s21 + $0x564] ss:$68 sps:$4 sm:$0xff]   ;;  %v7723_v14 = vld [vmem:[%s9755_s21 + $0x56c] ss:$68 sps:$4 sm:$0xff]  }
 0x17a   : > { %v7718_v15 = vld [vmem:[%s9755_s21 + $0x560] ss:$68 sps:$4 sm:$0xff]  }
 0x17c   : > { %4304 = vmatpush1.bf16.msra.mxu0 %v7639_v16  ;;  %4386 = vmatpush1.bf16.msra.mxu1 %v7642_v17  ;;  %v7721_v16 = vld [vmem:[%s9755_s21 + $0x568] ss:$68 sps:$4 sm:$0xff]  }
 0x17d   : > { %4305 = vmatprep.subr.bf16.mxu0 %v7647_v18  ;;  %4387 = vmatprep.subr.bf16.mxu1 %v7650_v19  ;;  %v7726_v17 = vld [vmem:[%s9755_s21 + $0x5ec] ss:$68 sps:$4 sm:$0xff]   ;;  %v7729_v18 = vld [vmem:[%s9755_s21 + $0x5f4] ss:$68 sps:$4 sm:$0xff]  }
 0x17e   : > { %v7724_v19 = vld [vmem:[%s9755_s21 + $0x5e8] ss:$68 sps:$4 sm:$0xff]  }
 0x180   : > { %4306 = vmatpush1.bf16.msra.mxu0 %v7645_v24  ;;  %4388 = vmatpush1.bf16.msra.mxu1 %v7648_v26  ;;  %v7733_v24 = vld [vmem:[%s9755_s21 + $0x678] ss:$68 sps:$4 sm:$0xff]  }
 0x181   : > { %4307 = vmatprep.subr.bf16.mxu0 %v9890_v29  ;;  %4389 = vmatprep.subr.bf16.mxu1 %v9893_v30  ;;  %v7738_v26 = vld [vmem:[%s9755_s21 + $0x6fc] ss:$68 sps:$4 sm:$0xff]  }
 0x184   : > { %4308 = vmatpush1.bf16.msra.mxu0 %v9896_v31  ;;  %4390 = vmatpush1.bf16.msra.mxu1 %v9899_v32 }
 0x185   : > { %4410 = vmatprep.subr.bf16.mxu0 %v7660_v33  ;;  %4492 = vmatprep.subr.bf16.mxu1 %v7663_v34  ;;  %v7739_v33 = vld [vmem:[%s9755_s21 + $0x700] ss:$68 sps:$4 sm:$0xff]  }
 0x186   : > { %v7744_v34 = vld [vmem:[%s9755_s21 + $0x784] ss:$68 sps:$4 sm:$0xff]  }
 0x187   : > { %4320 = vmatmul.mubr.bf16.vlgmr.msra.gmra.mrb[0].mxu0 %v9907_v35  ;;  %4402 = vmatmul.mubr.bf16.vlgmr.msra.gmra.mrb[0].mxu1 %v9907_v35 }
 0x188   : > { %4411 = vmatpush1.bf16.msra.mxu0 %v7658_v36  ;;  %4493 = vmatpush1.bf16.msra.mxu1 %v7661_v37  ;;  %v7747_v36 = vld [vmem:[%s9755_s21 + $0x78c] ss:$68 sps:$4 sm:$0xff]   ;;  %v7742_v37 = vld [vmem:[%s9755_s21 + $0x780] ss:$68 sps:$4 sm:$0xff]  }
 0x189   : > { %4412 = vmatprep.subr.bf16.mxu0 %v7666_v39  ;;  %4494 = vmatprep.subr.bf16.mxu1 %v7669_v42  ;;  %v7745_v39 = vld [vmem:[%s9755_s21 + $0x788] ss:$68 sps:$4 sm:$0xff]  }
 0x18a   : > { %4442 = vmatprep.mubr.bf16.mxu0 %v9753_v40  ;;  %4524 = vmatprep.mubr.bf16.mxu1 %v9753_v40  ;;  %v7750_v42 = vld [vmem:[%s9755_s21 + $0x80c] ss:$68 sps:$4 sm:$0xff]  }
 0x18c   : > { %4413 = vmatpush1.bf16.msra.mxu0 %v7664_v41  ;;  %4495 = vmatpush1.bf16.msra.mxu1 %v7667_v43  ;;  %v7753_v41 = vld [vmem:[%s9755_s21 + $0x814] ss:$68 sps:$4 sm:$0xff]   ;;  %v7748_v43 = vld [vmem:[%s9755_s21 + $0x808] ss:$68 sps:$4 sm:$0xff]  }
 0x18d   : > { %4414 = vmatprep.subr.bf16.mxu0 %v7672_v44  ;;  %4496 = vmatprep.subr.bf16.mxu1 %v7675_v45  ;;  %v7751_v44 = vld [vmem:[%s9755_s21 + $0x810] ss:$68 sps:$4 sm:$0xff]  }
 0x18e   : > { %v7756_v45 = vld [vmem:[%s9755_s21 + $0x894] ss:$68 sps:$4 sm:$0xff]  }
 0x190   : > { %4415 = vmatpush1.bf16.msra.mxu0 %v7670_v46  ;;  %4497 = vmatpush1.bf16.msra.mxu1 %v7673_v47  ;;  %v7759_v46 = vld [vmem:[%s9755_s21 + $0x89c] ss:$68 sps:$4 sm:$0xff]   ;;  %v7754_v47 = vld [vmem:[%s9755_s21 + $0x890] ss:$68 sps:$4 sm:$0xff]  }
 0x191   : > { %4416 = vmatprep.subr.bf16.mxu0 %v7678_v48  ;;  %4498 = vmatprep.subr.bf16.mxu1 %v7681_v50  ;;  %v7757_v48 = vld [vmem:[%s9755_s21 + $0x898] ss:$68 sps:$4 sm:$0xff]  }
 0x192   : > { %v7762_v50 = vld [vmem:[%s9755_s21 + $0x91c] ss:$68 sps:$4 sm:$0xff]  }
 0x194   : > { %4417 = vmatpush1.bf16.msra.mxu0 %v7676_v51  ;;  %4499 = vmatpush1.bf16.msra.mxu1 %v7679_v53  ;;  %v7765_v51 = vld [vmem:[%s9755_s21 + $0x924] ss:$68 sps:$4 sm:$0xff]   ;;  %v7760_v53 = vld [vmem:[%s9755_s21 + $0x918] ss:$68 sps:$4 sm:$0xff]  }
 0x195   : > { %4418 = vmatprep.subr.bf16.mxu0 %v7684_v54  ;;  %4500 = vmatprep.subr.bf16.mxu1 %v7687_v38  ;;  %v7763_v54 = vld [vmem:[%s9755_s21 + $0x920] ss:$68 sps:$4 sm:$0xff]  }
 0x196   : > { %v7768_v38 = vld [vmem:[%s9755_s21 + $0x9a4] ss:$68 sps:$4 sm:$0xff]  }
 0x198   : > { %4419 = vmatpush1.bf16.msra.mxu0 %v7682_v55  ;;  %4501 = vmatpush1.bf16.msra.mxu1 %v7685_v56  ;;  %v7771_v55 = vld [vmem:[%s9755_s21 + $0x9ac] ss:$68 sps:$4 sm:$0xff]   ;;  %v7766_v56 = vld [vmem:[%s9755_s21 + $0x9a0] ss:$68 sps:$4 sm:$0xff]  }
 0x199   : > { %4420 = vmatprep.subr.bf16.mxu0 %v7690_v57  ;;  %4502 = vmatprep.subr.bf16.mxu1 %v7693_v58  ;;  %v7769_v57 = vld [vmem:[%s9755_s21 + $0x9a8] ss:$68 sps:$4 sm:$0xff]  }
 0x19a   : > { %v7774_v58 = vld [vmem:[%s9755_s21 + $0xa2c] ss:$68 sps:$4 sm:$0xff]  }
 0x19c   : > { %4421 = vmatpush1.bf16.msra.mxu0 %v7688_v59  ;;  %4503 = vmatpush1.bf16.msra.mxu1 %v7691_v60  ;;  %v7777_v59 = vld [vmem:[%s9755_s21 + $0xa34] ss:$68 sps:$4 sm:$0xff]   ;;  %v7772_v60 = vld [vmem:[%s9755_s21 + $0xa28] ss:$68 sps:$4 sm:$0xff]  }
 0x19d   : > { %4422 = vmatprep.subr.bf16.mxu0 %v7696_v61  ;;  %4504 = vmatprep.subr.bf16.mxu1 %v7699_v62  ;;  %v7775_v61 = vld [vmem:[%s9755_s21 + $0xa30] ss:$68 sps:$4 sm:$0xff]  }
 0x19e   : > { %v7780_v62 = vld [vmem:[%s9755_s21 + $0xab4] ss:$68 sps:$4 sm:$0xff]  }
 0x1a0   : > { %4423 = vmatpush1.bf16.msra.mxu0 %v7694_v63  ;;  %4505 = vmatpush1.bf16.msra.mxu1 %v7697_v0  ;;  %v7783_v63 = vld [vmem:[%s9755_s21 + $0xabc] ss:$68 sps:$4 sm:$0xff]   ;;  %v7778_v0 = vld [vmem:[%s9755_s21 + $0xab0] ss:$68 sps:$4 sm:$0xff]  }
 0x1a1   : > { %4424 = vmatprep.subr.bf16.mxu0 %v7702_v1  ;;  %4506 = vmatprep.subr.bf16.mxu1 %v7705_v2  ;;  %v7781_v1 = vld [vmem:[%s9755_s21 + $0xab8] ss:$68 sps:$4 sm:$0xff]  }
 0x1a2   : > { %v7786_v2 = vld [vmem:[%s9755_s21 + $0xb3c] ss:$68 sps:$4 sm:$0xff]  }
 0x1a4   : > { %4425 = vmatpush1.bf16.msra.mxu0 %v7700_v3  ;;  %4507 = vmatpush1.bf16.msra.mxu1 %v7703_v4  ;;  %v7789_v3 = vld [vmem:[%s9755_s21 + $0xb44] ss:$68 sps:$4 sm:$0xff]   ;;  %v7784_v4 = vld [vmem:[%s9755_s21 + $0xb38] ss:$68 sps:$4 sm:$0xff]  }
 0x1a5   : > { %4426 = vmatprep.subr.bf16.mxu0 %v7708_v5  ;;  %4508 = vmatprep.subr.bf16.mxu1 %v7711_v6  ;;  %v7787_v5 = vld [vmem:[%s9755_s21 + $0xb40] ss:$68 sps:$4 sm:$0xff]  }
 0x1a6   : > { %v7792_v6 = vld [vmem:[%s9755_s21 + $0xbc4] ss:$68 sps:$4 sm:$0xff]  }
 0x1a8   : > { %4427 = vmatpush1.bf16.msra.mxu0 %v7706_v7  ;;  %4509 = vmatpush1.bf16.msra.mxu1 %v7709_v8  ;;  %v7795_v7 = vld [vmem:[%s9755_s21 + $0xbcc] ss:$68 sps:$4 sm:$0xff]   ;;  %v7790_v8 = vld [vmem:[%s9755_s21 + $0xbc0] ss:$68 sps:$4 sm:$0xff]  }
 0x1a9   : > { %4428 = vmatprep.subr.bf16.mxu0 %v7714_v9  ;;  %4510 = vmatprep.subr.bf16.mxu1 %v7717_v10  ;;  %v7793_v9 = vld [vmem:[%s9755_s21 + $0xbc8] ss:$68 sps:$4 sm:$0xff]  }
 0x1aa   : > { %v7798_v10 = vld [vmem:[%s9755_s21 + $0xc4c] ss:$68 sps:$4 sm:$0xff]  }
 0x1ac   : > { %4429 = vmatpush1.bf16.msra.mxu0 %v7712_v11  ;;  %4511 = vmatpush1.bf16.msra.mxu1 %v7715_v12  ;;  %v7801_v11 = vld [vmem:[%s9755_s21 + $0xc54] ss:$68 sps:$4 sm:$0xff]   ;;  %v7796_v12 = vld [vmem:[%s9755_s21 + $0xc48] ss:$68 sps:$4 sm:$0xff]  }
 0x1ad   : > { %4430 = vmatprep.subr.bf16.mxu0 %v7720_v13  ;;  %4512 = vmatprep.subr.bf16.mxu1 %v7723_v14  ;;  %v7799_v13 = vld [vmem:[%s9755_s21 + $0xc50] ss:$68 sps:$4 sm:$0xff]  }
 0x1ae   : > { %v7804_v14 = vld [vmem:[%s9755_s21 + $0xcd4] ss:$68 sps:$4 sm:$0xff]  }
 0x1b0   : > { %4431 = vmatpush1.bf16.msra.mxu0 %v7718_v15  ;;  %4513 = vmatpush1.bf16.msra.mxu1 %v7721_v16  ;;  %v7807_v15 = vld [vmem:[%s9755_s21 + $0xcdc] ss:$68 sps:$4 sm:$0xff]   ;;  %v7802_v16 = vld [vmem:[%s9755_s21 + $0xcd0] ss:$68 sps:$4 sm:$0xff]  }
 0x1b1   : > { %4432 = vmatprep.subr.bf16.mxu0 %v7726_v17  ;;  %4514 = vmatprep.subr.bf16.mxu1 %v7729_v18  ;;  %v7805_v17 = vld [vmem:[%s9755_s21 + $0xcd8] ss:$68 sps:$4 sm:$0xff]  }
 0x1b2   : > { %v7810_v18 = vld [vmem:[%s9755_s21 + $0xd5c] ss:$68 sps:$4 sm:$0xff]  }
 0x1b4   : > { %4433 = vmatpush1.bf16.msra.mxu0 %v7724_v19  ;;  %4515 = vmatpush1.bf16.msra.mxu1 %v7727_v20  ;;  %v7813_v19 = vld [vmem:[%s9755_s21 + $0xd64] ss:$68 sps:$4 sm:$0xff]  }
 0x1b5   : > { %4434 = vmatprep.subr.bf16.mxu0 %v7732_v21  ;;  %4516 = vmatprep.subr.bf16.mxu1 %v7735_v22  ;;  %v7816_v20 = vld [vmem:[%s9755_s21 + $0xde4] ss:$68 sps:$4 sm:$0xff]   ;;  %v7819_v21 = vld [vmem:[%s9755_s21 + $0xdec] ss:$68 sps:$4 sm:$0xff]   ;;  %v7808_v22 = vld [vmem:[%s9755_s21 + $0xd58] ss:$68 sps:$4 sm:$0xff]  }
 0x1b8   : > { %4435 = vmatpush1.bf16.msra.mxu0 %v7730_v23  ;;  %4517 = vmatpush1.bf16.msra.mxu1 %v7733_v24  ;;  %v7811_v23 = vld [vmem:[%s9755_s21 + $0xd60] ss:$68 sps:$4 sm:$0xff]  }
 0x1b9   : > { %4436 = vmatprep.subr.bf16.mxu0 %v7738_v26  ;;  %4518 = vmatprep.subr.bf16.mxu1 %v7741_v27  ;;  %v7814_v24 = vld [vmem:[%s9755_s21 + $0xde0] ss:$68 sps:$4 sm:$0xff]   ;;  %v7817_v26 = vld [vmem:[%s9755_s21 + $0xde8] ss:$68 sps:$4 sm:$0xff]   ;;  %v10028_v27 = vand.u32 %v7816_v20, %v9884_v25 }
 0x1ba   : > { %v7891_v20 = vld [vmem:[%s9755_s21 + $0x604] ss:$68 sps:$4 sm:$0xff]  }
 0x1bc   : > { %4437 = vmatpush1.bf16.msra.mxu0 %v7736_v28  ;;  %4519 = vmatpush1.bf16.msra.mxu1 %v7739_v33  ;;  %v10031_v28 = vand.u32 %v7819_v21, %v9884_v25  ;;  %v10034_v33 = vand.u32 %v7814_v24, %v9884_v25  ;;  %v7886_v21 = vld [vmem:[%s9755_s21 + $0x5f8] ss:$68 sps:$4 sm:$0xff]   ;;  %v7897_v24 = vld [vmem:[%s9755_s21 + $0x68c] ss:$68 sps:$4 sm:$0xff]  }
 0x1bd   : > { %4438 = vmatprep.subr.bf16.mxu0 %v7744_v34  ;;  %4520 = vmatprep.subr.bf16.mxu1 %v7747_v36  ;;  %v10037_v34 = vand.u32 %v7817_v26, %v9884_v25  ;;  %v7822_v36 = vld [vmem:[%s9755_s21 + $0x24] ss:$68 sps:$4 sm:$0xff]  }
 0x1be   : > { %v7892_v26 = vld [vmem:[%s9755_s21 + $0x680] ss:$68 sps:$4 sm:$0xff]  }
 0x1c0   : > { %4439 = vmatpush1.bf16.msra.mxu0 %v7742_v37  ;;  %4521 = vmatpush1.bf16.msra.mxu1 %v7745_v39  ;;  %v7825_v37 = vld [vmem:[%s9755_s21 + $0x2c] ss:$68 sps:$4 sm:$0xff]   ;;  %v7820_v39 = vld [vmem:[%s9755_s21 + $0x20] ss:$68 sps:$4 sm:$0xff]  }
 0x1c1   : > { %4440 = vmatprep.subr.bf16.mxu0 %v7750_v42  ;;  %4522 = vmatprep.subr.bf16.mxu1 %v7753_v41  ;;  %v7823_v42 = vld [vmem:[%s9755_s21 + $0x28] ss:$68 sps:$4 sm:$0xff]  }
 0x1c2   : > { %v7828_v41 = vld [vmem:[%s9755_s21 + $0xac] ss:$68 sps:$4 sm:$0xff]  }
 0x1c4   : > { %4441 = vmatpush1.bf16.msra.mxu0 %v7748_v43  ;;  %4523 = vmatpush1.bf16.msra.mxu1 %v7751_v44  ;;  %v7831_v43 = vld [vmem:[%s9755_s21 + $0xb4] ss:$68 sps:$4 sm:$0xff]   ;;  %v7826_v44 = vld [vmem:[%s9755_s21 + $0xa8] ss:$68 sps:$4 sm:$0xff]  }
 0x1c5   : > { %4451 = vmatprep.subr.bf16.mxu0 %v7756_v45  ;;  %4533 = vmatprep.subr.bf16.mxu1 %v7759_v46  ;;  %v7829_v45 = vld [vmem:[%s9755_s21 + $0xb0] ss:$68 sps:$4 sm:$0xff]  }
 0x1c6   : > { %v7834_v46 = vld [vmem:[%s9755_s21 + $0x134] ss:$68 sps:$4 sm:$0xff]  }
 0x1c7   : > { %4443 = vmatmul.mubr.bf16.vlgmr.msra.gmra.mrb[4].mxu0 %v9836_v49  ;;  %4525 = vmatmul.mubr.bf16.vlgmr.msra.gmra.mrb[4].mxu1 %v9836_v49 }
 0x1c8   : > { %4452 = vmatpush1.bf16.msra.mxu0 %v7754_v47  ;;  %4534 = vmatpush1.bf16.msra.mxu1 %v7757_v48  ;;  %v7837_v47 = vld [vmem:[%s9755_s21 + $0x13c] ss:$68 sps:$4 sm:$0xff]   ;;  %v7832_v48 = vld [vmem:[%s9755_s21 + $0x130] ss:$68 sps:$4 sm:$0xff]  }
 0x1c9   : > { %4453 = vmatprep.subr.bf16.mxu0 %v7762_v50  ;;  %4535 = vmatprep.subr.bf16.mxu1 %v7765_v51  ;;  %v7835_v50 = vld [vmem:[%s9755_s21 + $0x138] ss:$68 sps:$4 sm:$0xff]  }
 0x1ca   : > { %7066 = vmatprep.mubr.msk.bf16.mxu0 %vm4187_vm0, %v9840_v52  ;;  %7067 = vmatprep.mubr.msk.bf16.mxu1 %vm4187_vm0, %v9840_v52  ;;  %v7840_v51 = vld [vmem:[%s9755_s21 + $0x1bc] ss:$68 sps:$4 sm:$0xff]  }
 0x1cc   : > { %4454 = vmatpush1.bf16.msra.mxu0 %v7760_v53  ;;  %4536 = vmatpush1.bf16.msra.mxu1 %v7763_v54  ;;  %v7843_v53 = vld [vmem:[%s9755_s21 + $0x1c4] ss:$68 sps:$4 sm:$0xff]   ;;  %v7838_v54 = vld [vmem:[%s9755_s21 + $0x1b8] ss:$68 sps:$4 sm:$0xff]  }
 0x1cd   : > { %4455 = vmatprep.subr.bf16.mxu0 %v7768_v38  ;;  %4537 = vmatprep.subr.bf16.mxu1 %v7771_v55  ;;  %v7841_v38 = vld [vmem:[%s9755_s21 + $0x1c0] ss:$68 sps:$4 sm:$0xff]  }
 0x1ce   : > { %v7846_v55 = vld [vmem:[%s9755_s21 + $0x244] ss:$68 sps:$4 sm:$0xff]  }
 0x1d0   : > { %4456 = vmatpush1.bf16.msra.mxu0 %v7766_v56  ;;  %4538 = vmatpush1.bf16.msra.mxu1 %v7769_v57  ;;  %v7849_v56 = vld [vmem:[%s9755_s21 + $0x24c] ss:$68 sps:$4 sm:$0xff]   ;;  %v7844_v57 = vld [vmem:[%s9755_s21 + $0x240] ss:$68 sps:$4 sm:$0xff]  }
 0x1d1   : > { %4457 = vmatprep.subr.bf16.mxu0 %v7774_v58  ;;  %4539 = vmatprep.subr.bf16.mxu1 %v7777_v59  ;;  %v7847_v58 = vld [vmem:[%s9755_s21 + $0x248] ss:$68 sps:$4 sm:$0xff]  }
 0x1d2   : > { %v7852_v59 = vld [vmem:[%s9755_s21 + $0x2cc] ss:$68 sps:$4 sm:$0xff]  }
 0x1d4   : > { %4458 = vmatpush1.bf16.msra.mxu0 %v7772_v60  ;;  %4540 = vmatpush1.bf16.msra.mxu1 %v7775_v61  ;;  %v7855_v60 = vld [vmem:[%s9755_s21 + $0x2d4] ss:$68 sps:$4 sm:$0xff]   ;;  %v7850_v61 = vld [vmem:[%s9755_s21 + $0x2c8] ss:$68 sps:$4 sm:$0xff]  }
 0x1d5   : > { %4459 = vmatprep.subr.bf16.mxu0 %v7780_v62  ;;  %4541 = vmatprep.subr.bf16.mxu1 %v7783_v63  ;;  %v7853_v62 = vld [vmem:[%s9755_s21 + $0x2d0] ss:$68 sps:$4 sm:$0xff]  }
 0x1d6   : > { %v7858_v63 = vld [vmem:[%s9755_s21 + $0x354] ss:$68 sps:$4 sm:$0xff]  }
 0x1d8   : > { %4460 = vmatpush1.bf16.msra.mxu0 %v7778_v0  ;;  %4542 = vmatpush1.bf16.msra.mxu1 %v7781_v1  ;;  %v7861_v0 = vld [vmem:[%s9755_s21 + $0x35c] ss:$68 sps:$4 sm:$0xff]   ;;  %v7856_v1 = vld [vmem:[%s9755_s21 + $0x350] ss:$68 sps:$4 sm:$0xff]  }
 0x1d9   : > { %4461 = vmatprep.subr.bf16.mxu0 %v7786_v2  ;;  %4543 = vmatprep.subr.bf16.mxu1 %v7789_v3  ;;  %v7859_v2 = vld [vmem:[%s9755_s21 + $0x358] ss:$68 sps:$4 sm:$0xff]  }
 0x1da   : > { %v7864_v3 = vld [vmem:[%s9755_s21 + $0x3dc] ss:$68 sps:$4 sm:$0xff]  }
 0x1dc   : > { %4462 = vmatpush1.bf16.msra.mxu0 %v7784_v4  ;;  %4544 = vmatpush1.bf16.msra.mxu1 %v7787_v5  ;;  %v7867_v4 = vld [vmem:[%s9755_s21 + $0x3e4] ss:$68 sps:$4 sm:$0xff]   ;;  %v7862_v5 = vld [vmem:[%s9755_s21 + $0x3d8] ss:$68 sps:$4 sm:$0xff]  }
 0x1dd   : > { %4463 = vmatprep.subr.bf16.mxu0 %v7792_v6  ;;  %4545 = vmatprep.subr.bf16.mxu1 %v7795_v7  ;;  %v7865_v6 = vld [vmem:[%s9755_s21 + $0x3e0] ss:$68 sps:$4 sm:$0xff]  }
 0x1de   : > { %v7870_v7 = vld [vmem:[%s9755_s21 + $0x464] ss:$68 sps:$4 sm:$0xff]  }
 0x1e0   : > { %4464 = vmatpush1.bf16.msra.mxu0 %v7790_v8  ;;  %4546 = vmatpush1.bf16.msra.mxu1 %v7793_v9  ;;  %v7873_v8 = vld [vmem:[%s9755_s21 + $0x46c] ss:$68 sps:$4 sm:$0xff]   ;;  %v7868_v9 = vld [vmem:[%s9755_s21 + $0x460] ss:$68 sps:$4 sm:$0xff]  }
 0x1e1   : > { %4465 = vmatprep.subr.bf16.mxu0 %v7798_v10  ;;  %4547 = vmatprep.subr.bf16.mxu1 %v7801_v11  ;;  %v7871_v10 = vld [vmem:[%s9755_s21 + $0x468] ss:$68 sps:$4 sm:$0xff]  }
 0x1e2   : > { %v7876_v11 = vld [vmem:[%s9755_s21 + $0x4ec] ss:$68 sps:$4 sm:$0xff]  }
 0x1e4   : > { %4466 = vmatpush1.bf16.msra.mxu0 %v7796_v12  ;;  %4548 = vmatpush1.bf16.msra.mxu1 %v7799_v13  ;;  %v7879_v12 = vld [vmem:[%s9755_s21 + $0x4f4] ss:$68 sps:$4 sm:$0xff]   ;;  %v7874_v13 = vld [vmem:[%s9755_s21 + $0x4e8] ss:$68 sps:$4 sm:$0xff]  }
 0x1e5   : > { %4467 = vmatprep.subr.bf16.mxu0 %v7804_v14  ;;  %4549 = vmatprep.subr.bf16.mxu1 %v7807_v15  ;;  %v7877_v14 = vld [vmem:[%s9755_s21 + $0x4f0] ss:$68 sps:$4 sm:$0xff]  }
 0x1e6   : > { %v7882_v15 = vld [vmem:[%s9755_s21 + $0x574] ss:$68 sps:$4 sm:$0xff]  }
 0x1e8   : > { %4468 = vmatpush1.bf16.msra.mxu0 %v7802_v16  ;;  %4550 = vmatpush1.bf16.msra.mxu1 %v7805_v17  ;;  %v7885_v16 = vld [vmem:[%s9755_s21 + $0x57c] ss:$68 sps:$4 sm:$0xff]   ;;  %v7880_v17 = vld [vmem:[%s9755_s21 + $0x570] ss:$68 sps:$4 sm:$0xff]  }
 0x1e9   : > { %4469 = vmatprep.subr.bf16.mxu0 %v7810_v18  ;;  %4551 = vmatprep.subr.bf16.mxu1 %v7813_v19  ;;  %v7883_v18 = vld [vmem:[%s9755_s21 + $0x578] ss:$68 sps:$4 sm:$0xff]  }
 0x1ea   : > { %v7888_v19 = vld [vmem:[%s9755_s21 + $0x5fc] ss:$68 sps:$4 sm:$0xff]  }
 0x1ec   : > { %4470 = vmatpush1.bf16.msra.mxu0 %v7808_v22  ;;  %4552 = vmatpush1.bf16.msra.mxu1 %v7811_v23  ;;  %v7889_v22 = vld [vmem:[%s9755_s21 + $0x600] ss:$68 sps:$4 sm:$0xff]  }
 0x1ed   : > { %4471 = vmatprep.subr.bf16.mxu0 %v10028_v27  ;;  %4553 = vmatprep.subr.bf16.mxu1 %v10031_v28  ;;  %v7894_v23 = vld [vmem:[%s9755_s21 + $0x684] ss:$68 sps:$4 sm:$0xff]  }
 0x1f0   : > { %4472 = vmatpush1.bf16.msra.mxu0 %v10034_v33  ;;  %4554 = vmatpush1.bf16.msra.mxu1 %v10037_v34 }
 0x1f1   : > { %4574 = vmatprep.subr.bf16.mxu0 %v7822_v36  ;;  %4656 = vmatprep.subr.bf16.mxu1 %v7825_v37  ;;  %v7895_v36 = vld [vmem:[%s9755_s21 + $0x688] ss:$68 sps:$4 sm:$0xff]  }
 0x1f2   : > { %v7900_v37 = vld [vmem:[%s9755_s21 + $0x70c] ss:$68 sps:$4 sm:$0xff]  }
 0x1f3   : > { %4484 = vmatmul.mubr.bf16.vlgmr.msra.gmra.mrb[4].mxu0 %v9907_v35  ;;  %4566 = vmatmul.mubr.bf16.vlgmr.msra.gmra.mrb[4].mxu1 %v9907_v35 }
 0x1f4   : > { %4575 = vmatpush1.bf16.msra.mxu0 %v7820_v39  ;;  %4657 = vmatpush1.bf16.msra.mxu1 %v7823_v42  ;;  %v7903_v39 = vld [vmem:[%s9755_s21 + $0x714] ss:$68 sps:$4 sm:$0xff]   ;;  %v7898_v42 = vld [vmem:[%s9755_s21 + $0x708] ss:$68 sps:$4 sm:$0xff]  }
 0x1f5   : > { %4576 = vmatprep.subr.bf16.mxu0 %v7828_v41  ;;  %4658 = vmatprep.subr.bf16.mxu1 %v7831_v43  ;;  %v7901_v41 = vld [vmem:[%s9755_s21 + $0x710] ss:$68 sps:$4 sm:$0xff]  }
 0x1f6   : > { %4606 = vmatprep.mubr.bf16.mxu0 %v9753_v40  ;;  %4688 = vmatprep.mubr.bf16.mxu1 %v9753_v40  ;;  %v7906_v43 = vld [vmem:[%s9755_s21 + $0x794] ss:$68 sps:$4 sm:$0xff]  }
 0x1f8   : > { %4577 = vmatpush1.bf16.msra.mxu0 %v7826_v44  ;;  %4659 = vmatpush1.bf16.msra.mxu1 %v7829_v45  ;;  %v7909_v44 = vld [vmem:[%s9755_s21 + $0x79c] ss:$68 sps:$4 sm:$0xff]   ;;  %v7904_v45 = vld [vmem:[%s9755_s21 + $0x790] ss:$68 sps:$4 sm:$0xff]  }
 0x1f9   : > { %4578 = vmatprep.subr.bf16.mxu0 %v7834_v46  ;;  %4660 = vmatprep.subr.bf16.mxu1 %v7837_v47  ;;  %v7907_v46 = vld [vmem:[%s9755_s21 + $0x798] ss:$68 sps:$4 sm:$0xff]  }
 0x1fa   : > { %v7912_v47 = vld [vmem:[%s9755_s21 + $0x81c] ss:$68 sps:$4 sm:$0xff]  }
 0x1fc   : > { %4579 = vmatpush1.bf16.msra.mxu0 %v7832_v48  ;;  %4661 = vmatpush1.bf16.msra.mxu1 %v7835_v50  ;;  %v7915_v48 = vld [vmem:[%s9755_s21 + $0x824] ss:$68 sps:$4 sm:$0xff]   ;;  %v7910_v50 = vld [vmem:[%s9755_s21 + $0x818] ss:$68 sps:$4 sm:$0xff]  }
 0x1fd   : > { %4580 = vmatprep.subr.bf16.mxu0 %v7840_v51  ;;  %4662 = vmatprep.subr.bf16.mxu1 %v7843_v53  ;;  %v7913_v51 = vld [vmem:[%s9755_s21 + $0x820] ss:$68 sps:$4 sm:$0xff]  }
 0x1fe   : > { %v7918_v53 = vld [vmem:[%s9755_s21 + $0x8a4] ss:$68 sps:$4 sm:$0xff]  }
 0x200   : > { %4581 = vmatpush1.bf16.msra.mxu0 %v7838_v54  ;;  %4663 = vmatpush1.bf16.msra.mxu1 %v7841_v38  ;;  %v7921_v54 = vld [vmem:[%s9755_s21 + $0x8ac] ss:$68 sps:$4 sm:$0xff]   ;;  %v7916_v38 = vld [vmem:[%s9755_s21 + $0x8a0] ss:$68 sps:$4 sm:$0xff]  }
 0x201   : > { %4582 = vmatprep.subr.bf16.mxu0 %v7846_v55  ;;  %4664 = vmatprep.subr.bf16.mxu1 %v7849_v56  ;;  %v7919_v55 = vld [vmem:[%s9755_s21 + $0x8a8] ss:$68 sps:$4 sm:$0xff]  }
 0x202   : > { %v7924_v56 = vld [vmem:[%s9755_s21 + $0x92c] ss:$68 sps:$4 sm:$0xff]  }
 0x204   : > { %4583 = vmatpush1.bf16.msra.mxu0 %v7844_v57  ;;  %4665 = vmatpush1.bf16.msra.mxu1 %v7847_v58  ;;  %v7927_v57 = vld [vmem:[%s9755_s21 + $0x934] ss:$68 sps:$4 sm:$0xff]   ;;  %v7922_v58 = vld [vmem:[%s9755_s21 + $0x928] ss:$68 sps:$4 sm:$0xff]  }
 0x205   : > { %4584 = vmatprep.subr.bf16.mxu0 %v7852_v59  ;;  %4666 = vmatprep.subr.bf16.mxu1 %v7855_v60  ;;  %v7925_v59 = vld [vmem:[%s9755_s21 + $0x930] ss:$68 sps:$4 sm:$0xff]  }
 0x206   : > { %v7930_v60 = vld [vmem:[%s9755_s21 + $0x9b4] ss:$68 sps:$4 sm:$0xff]  }
 0x208   : > { %4585 = vmatpush1.bf16.msra.mxu0 %v7850_v61  ;;  %4667 = vmatpush1.bf16.msra.mxu1 %v7853_v62  ;;  %v7933_v61 = vld [vmem:[%s9755_s21 + $0x9bc] ss:$68 sps:$4 sm:$0xff]   ;;  %v7928_v62 = vld [vmem:[%s9755_s21 + $0x9b0] ss:$68 sps:$4 sm:$0xff]  }
 0x209   : > { %4586 = vmatprep.subr.bf16.mxu0 %v7858_v63  ;;  %4668 = vmatprep.subr.bf16.mxu1 %v7861_v0  ;;  %v7931_v63 = vld [vmem:[%s9755_s21 + $0x9b8] ss:$68 sps:$4 sm:$0xff]  }
 0x20a   : > { %v7936_v0 = vld [vmem:[%s9755_s21 + $0xa3c] ss:$68 sps:$4 sm:$0xff]  }
 0x20c   : > { %4587 = vmatpush1.bf16.msra.mxu0 %v7856_v1  ;;  %4669 = vmatpush1.bf16.msra.mxu1 %v7859_v2  ;;  %v7939_v1 = vld [vmem:[%s9755_s21 + $0xa44] ss:$68 sps:$4 sm:$0xff]   ;;  %v7934_v2 = vld [vmem:[%s9755_s21 + $0xa38] ss:$68 sps:$4 sm:$0xff]  }
 0x20d   : > { %4588 = vmatprep.subr.bf16.mxu0 %v7864_v3  ;;  %4670 = vmatprep.subr.bf16.mxu1 %v7867_v4  ;;  %v7937_v3 = vld [vmem:[%s9755_s21 + $0xa40] ss:$68 sps:$4 sm:$0xff]  }
 0x20e   : > { %v7942_v4 = vld [vmem:[%s9755_s21 + $0xac4] ss:$68 sps:$4 sm:$0xff]  }
 0x210   : > { %4589 = vmatpush1.bf16.msra.mxu0 %v7862_v5  ;;  %4671 = vmatpush1.bf16.msra.mxu1 %v7865_v6  ;;  %v7945_v5 = vld [vmem:[%s9755_s21 + $0xacc] ss:$68 sps:$4 sm:$0xff]   ;;  %v7940_v6 = vld [vmem:[%s9755_s21 + $0xac0] ss:$68 sps:$4 sm:$0xff]  }
 0x211   : > { %4590 = vmatprep.subr.bf16.mxu0 %v7870_v7  ;;  %4672 = vmatprep.subr.bf16.mxu1 %v7873_v8  ;;  %v7943_v7 = vld [vmem:[%s9755_s21 + $0xac8] ss:$68 sps:$4 sm:$0xff]  }
 0x212   : > { %v7948_v8 = vld [vmem:[%s9755_s21 + $0xb4c] ss:$68 sps:$4 sm:$0xff]  }
 0x214   : > { %4591 = vmatpush1.bf16.msra.mxu0 %v7868_v9  ;;  %4673 = vmatpush1.bf16.msra.mxu1 %v7871_v10  ;;  %v7951_v9 = vld [vmem:[%s9755_s21 + $0xb54] ss:$68 sps:$4 sm:$0xff]   ;;  %v7946_v10 = vld [vmem:[%s9755_s21 + $0xb48] ss:$68 sps:$4 sm:$0xff]  }
 0x215   : > { %4592 = vmatprep.subr.bf16.mxu0 %v7876_v11  ;;  %4674 = vmatprep.subr.bf16.mxu1 %v7879_v12  ;;  %v7949_v11 = vld [vmem:[%s9755_s21 + $0xb50] ss:$68 sps:$4 sm:$0xff]  }
 0x216   : > { %v7954_v12 = vld [vmem:[%s9755_s21 + $0xbd4] ss:$68 sps:$4 sm:$0xff]  }
 0x218   : > { %4593 = vmatpush1.bf16.msra.mxu0 %v7874_v13  ;;  %4675 = vmatpush1.bf16.msra.mxu1 %v7877_v14  ;;  %v7957_v13 = vld [vmem:[%s9755_s21 + $0xbdc] ss:$68 sps:$4 sm:$0xff]   ;;  %v7952_v14 = vld [vmem:[%s9755_s21 + $0xbd0] ss:$68 sps:$4 sm:$0xff]  }
 0x219   : > { %4594 = vmatprep.subr.bf16.mxu0 %v7882_v15  ;;  %4676 = vmatprep.subr.bf16.mxu1 %v7885_v16  ;;  %v7955_v15 = vld [vmem:[%s9755_s21 + $0xbd8] ss:$68 sps:$4 sm:$0xff]  }
 0x21a   : > { %v7960_v16 = vld [vmem:[%s9755_s21 + $0xc5c] ss:$68 sps:$4 sm:$0xff]  }
 0x21c   : > { %4595 = vmatpush1.bf16.msra.mxu0 %v7880_v17  ;;  %4677 = vmatpush1.bf16.msra.mxu1 %v7883_v18  ;;  %v7963_v17 = vld [vmem:[%s9755_s21 + $0xc64] ss:$68 sps:$4 sm:$0xff]   ;;  %v1797_v18 = vlaneseq }
 0x21d   : > { %4596 = vmatprep.subr.bf16.mxu0 %v7888_v19  ;;  %4678 = vmatprep.subr.bf16.mxu1 %v7891_v20  ;;  %v7958_v19 = vld [vmem:[%s9755_s21 + $0xc58] ss:$68 sps:$4 sm:$0xff]   ;;  %v7961_v20 = vld [vmem:[%s9755_s21 + $0xc60] ss:$68 sps:$4 sm:$0xff]  }
 0x220   : > { %4597 = vmatpush1.bf16.msra.mxu0 %v7886_v21  ;;  %4679 = vmatpush1.bf16.msra.mxu1 %v7889_v22  ;;  %v7966_v21 = vld [vmem:[%s9755_s21 + $0xce4] ss:$68 sps:$4 sm:$0xff]   ;;  %v7969_v22 = vld [vmem:[%s9755_s21 + $0xcec] ss:$68 sps:$4 sm:$0xff]  }
 0x221   : > { %4598 = vmatprep.subr.bf16.mxu0 %v7894_v23  ;;  %4680 = vmatprep.subr.bf16.mxu1 %v7897_v24  ;;  %v10162_v23 = vshrl.u32 %v1797_v18, 7  ;;  %v7964_v24 = vld [vmem:[%s9755_s21 + $0xce0] ss:$68 sps:$4 sm:$0xff]  }
 0x222   : > { %v7996_v18 = vld [vmem:[%s9755_s21 + $0x144] ss:$68 sps:$4 sm:$0xff]  }
 0x224   : > { %4599 = vmatpush1.bf16.msra.mxu0 %v7892_v26  ;;  %4681 = vmatpush1.bf16.msra.mxu1 %v7895_v36  ;;  %v7967_v26 = vld [vmem:[%s9755_s21 + $0xce8] ss:$68 sps:$4 sm:$0xff]  }
 0x225   : > { %4600 = vmatprep.subr.bf16.mxu0 %v7900_v37  ;;  %4682 = vmatprep.subr.bf16.mxu1 %v7903_v39  ;;  %v7972_v36 = vld [vmem:[%s9755_s21 + $0xd6c] ss:$68 sps:$4 sm:$0xff]   ;;  %v7975_v37 = vld [vmem:[%s9755_s21 + $0xd74] ss:$68 sps:$4 sm:$0xff]  }
 0x226   : > { %v7978_v39 = vld [vmem:[%s9755_s21 + $0xdf4] ss:$68 sps:$4 sm:$0xff]  }
 0x228   : > { %4601 = vmatpush1.bf16.msra.mxu0 %v7898_v42  ;;  %4683 = vmatpush1.bf16.msra.mxu1 %v7901_v41  ;;  %v7981_v42 = vld [vmem:[%s9755_s21 + $0xdfc] ss:$68 sps:$4 sm:$0xff]   ;;  %v1799_v41 = vsub.s32 0, %v10162_v23 }
 0x229   : > { %4602 = vmatprep.subr.bf16.mxu0 %v7906_v43  ;;  %4684 = vmatprep.subr.bf16.mxu1 %v7909_v44  ;;  %v7970_v43 = vld [vmem:[%s9755_s21 + $0xd68] ss:$68 sps:$4 sm:$0xff]   ;;  %v7973_v44 = vld [vmem:[%s9755_s21 + $0xd70] ss:$68 sps:$4 sm:$0xff]  }
 0x22c   : > { %4603 = vmatpush1.bf16.msra.mxu0 %v7904_v45  ;;  %4685 = vmatpush1.bf16.msra.mxu1 %v7907_v46  ;;  %v1807_v45 = vsub.s32 2, %v10162_v23  ;;  %v1803_v46 = vsub.s32 1, %v10162_v23 }
 0x22d   : > { %4604 = vmatprep.subr.bf16.mxu0 %v7912_v47  ;;  %4686 = vmatprep.subr.bf16.mxu1 %v7915_v48  ;;  %v10181_v47 = vld [vmem:[%s10171_s11] sm:$0xff]  ;;  %v1811_v48 = vsub.s32 3, %v10162_v23 }
 0x230   : > { %4605 = vmatpush1.bf16.msra.mxu0 %v7910_v50  ;;  %4687 = vmatpush1.bf16.msra.mxu1 %v7913_v51  ;;  %v7976_v50 = vld [vmem:[%s9755_s21 + $0xdf0] ss:$68 sps:$4 sm:$0xff]   ;;  %v7979_v51 = vld [vmem:[%s9755_s21 + $0xdf8] ss:$68 sps:$4 sm:$0xff]  }
 0x231   : > { %4615 = vmatprep.subr.bf16.mxu0 %v7918_v53  ;;  %4697 = vmatprep.subr.bf16.mxu1 %v7921_v54  ;;  %v10187_v53 = vand.u32 %v7978_v39, %v9884_v25  ;;  %v10190_v54 = vand.u32 %v7981_v42, %v9884_v25  ;;  %v8011_v39 = vld [vmem:[%s9755_s21 + $0x25c] ss:$68 sps:$4 sm:$0xff]   ;;  %v8006_v42 = vld [vmem:[%s9755_s21 + $0x250] ss:$68 sps:$4 sm:$0xff]  }
 0x233   : > { %4607 = vmatmul.mubr.bf16.vlgmr.msra.gmra.mrb[8].mxu0 %v9836_v49  ;;  %4689 = vmatmul.mubr.bf16.vlgmr.msra.gmra.mrb[8].mxu1 %v9836_v49 }
 0x234   : > { %4616 = vmatpush1.bf16.msra.mxu0 %v7916_v38  ;;  %4698 = vmatpush1.bf16.msra.mxu1 %v7919_v55  ;;  %v10195_v38 = vrot.slane %v10181_v47, %v1799_v41  ;;  %v10200_v55 = vrot.slane %v10181_v47, %v1807_v45 }
 0x235   : > { %4617 = vmatprep.subr.bf16.mxu0 %v7924_v56  ;;  %4699 = vmatprep.subr.bf16.mxu1 %v7927_v57  ;;  %v10209_v56 = vrot.slane %v10181_v47, %v1803_v46  ;;  %v10214_v57 = vrot.slane %v10181_v47, %v1811_v48 }
 0x236   : > { %7068 = vmatprep.mubr.msk.bf16.mxu0 %vm4187_vm0, %v9840_v52  ;;  %7069 = vmatprep.mubr.msk.bf16.mxu1 %vm4187_vm0, %v9840_v52 }
 0x238   : > { %4618 = vmatpush1.bf16.msra.mxu0 %v7922_v58  ;;  %4700 = vmatpush1.bf16.msra.mxu1 %v7925_v59  ;;  %v10217_v58 = vand.u32 %v7976_v50, %v9884_v25  ;;  %v10220_v59 = vand.u32 %v7979_v51, %v9884_v25  ;;  %v8017_v50 = vld [vmem:[%s9755_s21 + $0x2e4] ss:$68 sps:$4 sm:$0xff]   ;;  %v8012_v51 = vld [vmem:[%s9755_s21 + $0x2d8] ss:$68 sps:$4 sm:$0xff]  }
 0x239   : > { %4619 = vmatprep.subr.bf16.mxu0 %v7930_v60  ;;  %4701 = vmatprep.subr.bf16.mxu1 %v7933_v61  ;;  %v7984_v60 = vld [vmem:[%s9755_s21 + $0x34] ss:$68 sps:$4 sm:$0xff]   ;;  %v7987_v61 = vld [vmem:[%s9755_s21 + $0x3c] ss:$68 sps:$4 sm:$0xff]  }
 0x23c   : > { %4620 = vmatpush1.bf16.msra.mxu0 %v7928_v62  ;;  %4702 = vmatpush1.bf16.msra.mxu1 %v7931_v63 }
 0x23d   : > { %4621 = vmatprep.subr.bf16.mxu0 %v7936_v0  ;;  %4703 = vmatprep.subr.bf16.mxu1 %v7939_v1 }
 0x240   : > { %4622 = vmatpush1.bf16.msra.mxu0 %v7934_v2  ;;  %4704 = vmatpush1.bf16.msra.mxu1 %v7937_v3 }
 0x241   : > { %4623 = vmatprep.subr.bf16.mxu0 %v7942_v4  ;;  %4705 = vmatprep.subr.bf16.mxu1 %v7945_v5 }
 0x244   : > { %4624 = vmatpush1.bf16.msra.mxu0 %v7940_v6  ;;  %4706 = vmatpush1.bf16.msra.mxu1 %v7943_v7 }
 0x245   : > { %4625 = vmatprep.subr.bf16.mxu0 %v7948_v8  ;;  %4707 = vmatprep.subr.bf16.mxu1 %v7951_v9  ;;  %v7982_v8 = vld [vmem:[%s9755_s21 + $0x30] ss:$68 sps:$4 sm:$0xff]   ;;  %v7985_v9 = vld [vmem:[%s9755_s21 + $0x38] ss:$68 sps:$4 sm:$0xff]  }
 0x248   : > { %4626 = vmatpush1.bf16.msra.mxu0 %v7946_v10  ;;  %4708 = vmatpush1.bf16.msra.mxu1 %v7949_v11 }
 0x249   : > { %4627 = vmatprep.subr.bf16.mxu0 %v7954_v12  ;;  %4709 = vmatprep.subr.bf16.mxu1 %v7957_v13  ;;  %v7990_v12 = vld [vmem:[%s9755_s21 + $0xbc] ss:$68 sps:$4 sm:$0xff]   ;;  %v7993_v13 = vld [vmem:[%s9755_s21 + $0xc4] ss:$68 sps:$4 sm:$0xff]  }
 0x24c   : > { %4628 = vmatpush1.bf16.msra.mxu0 %v7952_v14  ;;  %4710 = vmatpush1.bf16.msra.mxu1 %v7955_v15 }
 0x24d   : > { %4629 = vmatprep.subr.bf16.mxu0 %v7960_v16  ;;  %4711 = vmatprep.subr.bf16.mxu1 %v7963_v17  ;;  %v7988_v16 = vld [vmem:[%s9755_s21 + $0xb8] ss:$68 sps:$4 sm:$0xff]   ;;  %v7991_v17 = vld [vmem:[%s9755_s21 + $0xc0] ss:$68 sps:$4 sm:$0xff]  }
 0x250   : > { %4630 = vmatpush1.bf16.msra.mxu0 %v7958_v19  ;;  %4712 = vmatpush1.bf16.msra.mxu1 %v7961_v20  ;;  %v7999_v19 = vld [vmem:[%s9755_s21 + $0x14c] ss:$68 sps:$4 sm:$0xff]   ;;  %v7994_v20 = vld [vmem:[%s9755_s21 + $0x140] ss:$68 sps:$4 sm:$0xff]  }
 0x251   : > { %4631 = vmatprep.subr.bf16.mxu0 %v7966_v21  ;;  %4713 = vmatprep.subr.bf16.mxu1 %v7969_v22  ;;  %v7997_v21 = vld [vmem:[%s9755_s21 + $0x148] ss:$68 sps:$4 sm:$0xff]  }
 0x252   : > { %v8002_v22 = vld [vmem:[%s9755_s21 + $0x1cc] ss:$68 sps:$4 sm:$0xff]  }
 0x254   : > { %4632 = vmatpush1.bf16.msra.mxu0 %v7964_v24  ;;  %4714 = vmatpush1.bf16.msra.mxu1 %v7967_v26  ;;  %v8005_v24 = vld [vmem:[%s9755_s21 + $0x1d4] ss:$68 sps:$4 sm:$0xff]   ;;  %v8000_v26 = vld [vmem:[%s9755_s21 + $0x1c8] ss:$68 sps:$4 sm:$0xff]  }
 0x255   : > { %4633 = vmatprep.subr.bf16.mxu0 %v7972_v36  ;;  %4715 = vmatprep.subr.bf16.mxu1 %v7975_v37  ;;  %v8003_v36 = vld [vmem:[%s9755_s21 + $0x1d0] ss:$68 sps:$4 sm:$0xff]  }
 0x256   : > { %v8008_v37 = vld [vmem:[%s9755_s21 + $0x254] ss:$68 sps:$4 sm:$0xff]  }
 0x258   : > { %4634 = vmatpush1.bf16.msra.mxu0 %v7970_v43  ;;  %4716 = vmatpush1.bf16.msra.mxu1 %v7973_v44  ;;  %v8009_v43 = vld [vmem:[%s9755_s21 + $0x258] ss:$68 sps:$4 sm:$0xff]  }
 0x259   : > { %4635 = vmatprep.subr.bf16.mxu0 %v10187_v53  ;;  %4717 = vmatprep.subr.bf16.mxu1 %v10190_v54  ;;  %v8014_v44 = vld [vmem:[%s9755_s21 + $0x2dc] ss:$68 sps:$4 sm:$0xff]  }
 0x25a   : > { %v4321_v62 = vpop.f32.mrb[0].mxu0  ;;  %v4403_v63 = vpop.f32.mrb[0].mxu1 }
 0x25b   : > { %v7357_v0 = vadd.f32 %v4321_v62, %v10195_v38  ;;  %v7359_v1 = vadd.f32 %v4403_v63, %v10200_v55  ;;  %v4323_v2 = vpop.f32.mrb[1].mxu0  ;;  %v4405_v3 = vpop.f32.mrb[1].mxu1  ;;  %v8023_v62 = vld [vmem:[%s9755_s21 + $0x36c] ss:$68 sps:$4 sm:$0xff]   ;;  %v8018_v63 = vld [vmem:[%s9755_s21 + $0x360] ss:$68 sps:$4 sm:$0xff]  }
 0x25c   : > { %v7358_v4 = vadd.f32 %v4323_v2, %v10209_v56  ;;  %v7360_v5 = vadd.f32 %v4405_v3, %v10214_v57  ;;  %v4325_v6 = vpop.f32.mrb[2].mxu0  ;;  %v4407_v7 = vpop.f32.mrb[2].mxu1  ;;  %4636 = vmatpush1.bf16.msra.mxu0 %v10217_v58  ;;  %4718 = vmatpush1.bf16.msra.mxu1 %v10220_v59  ;;  %v8029_v2 = vld [vmem:[%s9755_s21 + $0x3f4] ss:$68 sps:$4 sm:$0xff]   ;;  %v8024_v3 = vld [vmem:[%s9755_s21 + $0x3e8] ss:$68 sps:$4 sm:$0xff]  }
 0x25d   : > { %v4326_v10 = vpop.f32.mrb[3].mxu0  ;;  %v4408_v11 = vpop.f32.mrb[3].mxu1  ;;  %4738 = vmatprep.subr.bf16.mxu0 %v7984_v60  ;;  %4820 = vmatprep.subr.bf16.mxu1 %v7987_v61  ;;  %v8015_v60 = vld [vmem:[%s9755_s21 + $0x2e0] ss:$68 sps:$4 sm:$0xff]   ;;  %v8030_v7 = vld [vmem:[%s9755_s21 + $0x470] ss:$68 sps:$4 sm:$0xff]  }
 0x25e   : > { %v4998_v14 = vcombine.low %v7357_v0, %v7358_v4  ;;  %v4999_v15 = vcombine.low %v7359_v1, %v7360_v5  ;;  %v8020_v61 = vld [vmem:[%s9755_s21 + $0x364] ss:$68 sps:$4 sm:$0xff]   ;;  %v8026_v1 = vld [vmem:[%s9755_s21 + $0x3ec] ss:$68 sps:$4 sm:$0xff]   ;;  %v8032_v5 = vld [vmem:[%s9755_s21 + $0x474] ss:$68 sps:$4 sm:$0xff]  }
 0x25f   : > { %4648 = vmatmul.mubr.bf16.vlgmr.msra.gmra.mrb[8].mxu0 %v9907_v35  ;;  %4730 = vmatmul.mubr.bf16.vlgmr.msra.gmra.mrb[8].mxu1 %v9907_v35  ;;  %v8021_v0 = vld [vmem:[%s9755_s21 + $0x368] ss:$68 sps:$4 sm:$0xff]   ;;  %v8027_v4 = vld [vmem:[%s9755_s21 + $0x3f0] ss:$68 sps:$4 sm:$0xff]   ;;  %v8035_v6 = vld [vmem:[%s9755_s21 + $0x47c] ss:$68 sps:$4 sm:$0xff]  }
 0x260   : > { %5014 = vst [vmem:[%s10239_s24] sm:$0x77] %v4998_v14  ;;  %5015 = vst [vmem:[%s10239_s24 + $0x8] sm:$0x77] %v4999_v15  ;;  %4739 = vmatpush1.bf16.msra.mxu0 %v7982_v8  ;;  %4821 = vmatpush1.bf16.msra.mxu1 %v7985_v9  ;;  %v8033_v8 = vld [vmem:[%s9755_s21 + $0x478] ss:$68 sps:$4 sm:$0xff]  }
 0x261   : > { %4740 = vmatprep.subr.bf16.mxu0 %v7990_v12  ;;  %4822 = vmatprep.subr.bf16.mxu1 %v7993_v13  ;;  %v8038_v9 = vld [vmem:[%s9755_s21 + $0x4fc] ss:$68 sps:$4 sm:$0xff]   ;;  %v8041_v10 = vld [vmem:[%s9755_s21 + $0x504] ss:$68 sps:$4 sm:$0xff]   ;;  %v8047_v14 = vld [vmem:[%s9755_s21 + $0x58c] ss:$68 sps:$4 sm:$0xff]  }
 0x262   : > { %4770 = vmatprep.mubr.bf16.mxu0 %v9753_v40  ;;  %4852 = vmatprep.mubr.bf16.mxu1 %v9753_v40  ;;  %v8036_v11 = vld [vmem:[%s9755_s21 + $0x4f8] ss:$68 sps:$4 sm:$0xff]   ;;  %v8039_v12 = vld [vmem:[%s9755_s21 + $0x500] ss:$68 sps:$4 sm:$0xff]  }
 0x263   : > { %v8044_v13 = vld [vmem:[%s9755_s21 + $0x584] ss:$68 sps:$4 sm:$0xff]  }
 0x264   : > { %4741 = vmatpush1.bf16.msra.mxu0 %v7988_v16  ;;  %4823 = vmatpush1.bf16.msra.mxu1 %v7991_v17  ;;  %v8042_v15 = vld [vmem:[%s9755_s21 + $0x580] ss:$68 sps:$4 sm:$0xff]   ;;  %v8045_v16 = vld [vmem:[%s9755_s21 + $0x588] ss:$68 sps:$4 sm:$0xff]  }
 0x265   : > { %4742 = vmatprep.subr.bf16.mxu0 %v7996_v18  ;;  %4824 = vmatprep.subr.bf16.mxu1 %v7999_v19  ;;  %v8050_v17 = vld [vmem:[%s9755_s21 + $0x60c] ss:$68 sps:$4 sm:$0xff]   ;;  %v8053_v18 = vld [vmem:[%s9755_s21 + $0x614] ss:$68 sps:$4 sm:$0xff]  }
 0x266   : > { %v8048_v19 = vld [vmem:[%s9755_s21 + $0x608] ss:$68 sps:$4 sm:$0xff]  }
 0x268   : > { %4743 = vmatpush1.bf16.msra.mxu0 %v7994_v20  ;;  %4825 = vmatpush1.bf16.msra.mxu1 %v7997_v21  ;;  %v8051_v20 = vld [vmem:[%s9755_s21 + $0x610] ss:$68 sps:$4 sm:$0xff]  }
 0x269   : > { %4744 = vmatprep.subr.bf16.mxu0 %v8002_v22  ;;  %4826 = vmatprep.subr.bf16.mxu1 %v8005_v24  ;;  %v8056_v21 = vld [vmem:[%s9755_s21 + $0x694] ss:$68 sps:$4 sm:$0xff]   ;;  %v8059_v22 = vld [vmem:[%s9755_s21 + $0x69c] ss:$68 sps:$4 sm:$0xff]  }
 0x26a   : > { %v8054_v24 = vld [vmem:[%s9755_s21 + $0x690] ss:$68 sps:$4 sm:$0xff]  }
 0x26c   : > { %4745 = vmatpush1.bf16.msra.mxu0 %v8000_v26  ;;  %4827 = vmatpush1.bf16.msra.mxu1 %v8003_v36  ;;  %v8057_v26 = vld [vmem:[%s9755_s21 + $0x698] ss:$68 sps:$4 sm:$0xff]  }
 0x26d   : > { %4746 = vmatprep.subr.bf16.mxu0 %v8008_v37  ;;  %4828 = vmatprep.subr.bf16.mxu1 %v8011_v39  ;;  %v8062_v36 = vld [vmem:[%s9755_s21 + $0x71c] ss:$68 sps:$4 sm:$0xff]   ;;  %v8065_v37 = vld [vmem:[%s9755_s21 + $0x724] ss:$68 sps:$4 sm:$0xff]  }
 0x26e   : > { %v8060_v39 = vld [vmem:[%s9755_s21 + $0x718] ss:$68 sps:$4 sm:$0xff]  }
 0x270   : > { %4747 = vmatpush1.bf16.msra.mxu0 %v8006_v42  ;;  %4829 = vmatpush1.bf16.msra.mxu1 %v8009_v43  ;;  %v8063_v42 = vld [vmem:[%s9755_s21 + $0x720] ss:$68 sps:$4 sm:$0xff]  }
 0x271   : > { %4748 = vmatprep.subr.bf16.mxu0 %v8014_v44  ;;  %4830 = vmatprep.subr.bf16.mxu1 %v8017_v50  ;;  %v8068_v43 = vld [vmem:[%s9755_s21 + $0x7a4] ss:$68 sps:$4 sm:$0xff]   ;;  %v8071_v44 = vld [vmem:[%s9755_s21 + $0x7ac] ss:$68 sps:$4 sm:$0xff]  }
 0x272   : > { %v8066_v50 = vld [vmem:[%s9755_s21 + $0x7a0] ss:$68 sps:$4 sm:$0xff]  }
 0x274   : > { %4749 = vmatpush1.bf16.msra.mxu0 %v8012_v51  ;;  %4831 = vmatpush1.bf16.msra.mxu1 %v8015_v60  ;;  %v8069_v51 = vld [vmem:[%s9755_s21 + $0x7a8] ss:$68 sps:$4 sm:$0xff]  }
 0x275   : > { %4750 = vmatprep.subr.bf16.mxu0 %v8020_v61  ;;  %4832 = vmatprep.subr.bf16.mxu1 %v8023_v62  ;;  %v8074_v60 = vld [vmem:[%s9755_s21 + $0x82c] ss:$68 sps:$4 sm:$0xff]   ;;  %v8077_v61 = vld [vmem:[%s9755_s21 + $0x834] ss:$68 sps:$4 sm:$0xff]  }
 0x276   : > { %v8072_v62 = vld [vmem:[%s9755_s21 + $0x828] ss:$68 sps:$4 sm:$0xff]  }
 0x278   : > { %4751 = vmatpush1.bf16.msra.mxu0 %v8018_v63  ;;  %4833 = vmatpush1.bf16.msra.mxu1 %v8021_v0  ;;  %v8075_v63 = vld [vmem:[%s9755_s21 + $0x830] ss:$68 sps:$4 sm:$0xff]  }
 0x279   : > { %4752 = vmatprep.subr.bf16.mxu0 %v8026_v1  ;;  %4834 = vmatprep.subr.bf16.mxu1 %v8029_v2  ;;  %v8080_v0 = vld [vmem:[%s9755_s21 + $0x8b4] ss:$68 sps:$4 sm:$0xff]   ;;  %v8083_v1 = vld [vmem:[%s9755_s21 + $0x8bc] ss:$68 sps:$4 sm:$0xff]  }
 0x27a   : > { %v8078_v2 = vld [vmem:[%s9755_s21 + $0x8b0] ss:$68 sps:$4 sm:$0xff]  }
 0x27c   : > { %4753 = vmatpush1.bf16.msra.mxu0 %v8024_v3  ;;  %4835 = vmatpush1.bf16.msra.mxu1 %v8027_v4  ;;  %v8081_v3 = vld [vmem:[%s9755_s21 + $0x8b8] ss:$68 sps:$4 sm:$0xff]  }
 0x27d   : > { %4754 = vmatprep.subr.bf16.mxu0 %v8032_v5  ;;  %4836 = vmatprep.subr.bf16.mxu1 %v8035_v6  ;;  %v8086_v4 = vld [vmem:[%s9755_s21 + $0x93c] ss:$68 sps:$4 sm:$0xff]   ;;  %v8089_v5 = vld [vmem:[%s9755_s21 + $0x944] ss:$68 sps:$4 sm:$0xff]  }
 0x27e   : > { %v8084_v6 = vld [vmem:[%s9755_s21 + $0x938] ss:$68 sps:$4 sm:$0xff]  }
 0x280   : > { %4755 = vmatpush1.bf16.msra.mxu0 %v8030_v7  ;;  %4837 = vmatpush1.bf16.msra.mxu1 %v8033_v8  ;;  %v8087_v7 = vld [vmem:[%s9755_s21 + $0x940] ss:$68 sps:$4 sm:$0xff]  }
 0x281   : > { %4756 = vmatprep.subr.bf16.mxu0 %v8038_v9  ;;  %4838 = vmatprep.subr.bf16.mxu1 %v8041_v10  ;;  %v8092_v8 = vld [vmem:[%s9755_s21 + $0x9c4] ss:$68 sps:$4 sm:$0xff]   ;;  %v8095_v9 = vld [vmem:[%s9755_s21 + $0x9cc] ss:$68 sps:$4 sm:$0xff]  }
 0x282   : > { %v8090_v10 = vld [vmem:[%s9755_s21 + $0x9c0] ss:$68 sps:$4 sm:$0xff]  }
 0x284   : > { %4757 = vmatpush1.bf16.msra.mxu0 %v8036_v11  ;;  %4839 = vmatpush1.bf16.msra.mxu1 %v8039_v12  ;;  %v8093_v11 = vld [vmem:[%s9755_s21 + $0x9c8] ss:$68 sps:$4 sm:$0xff]  }
 0x285   : > { %4758 = vmatprep.subr.bf16.mxu0 %v8044_v13  ;;  %4840 = vmatprep.subr.bf16.mxu1 %v8047_v14  ;;  %v8098_v12 = vld [vmem:[%s9755_s21 + $0xa4c] ss:$68 sps:$4 sm:$0xff]   ;;  %v8101_v13 = vld [vmem:[%s9755_s21 + $0xa54] ss:$68 sps:$4 sm:$0xff]  }
 0x286   : > { %v8096_v14 = vld [vmem:[%s9755_s21 + $0xa48] ss:$68 sps:$4 sm:$0xff]  }
 0x288   : > { %4759 = vmatpush1.bf16.msra.mxu0 %v8042_v15  ;;  %4841 = vmatpush1.bf16.msra.mxu1 %v8045_v16  ;;  %v8099_v15 = vld [vmem:[%s9755_s21 + $0xa50] ss:$68 sps:$4 sm:$0xff]  }
 0x289   : > { %4760 = vmatprep.subr.bf16.mxu0 %v8050_v17  ;;  %4842 = vmatprep.subr.bf16.mxu1 %v8053_v18  ;;  %v8104_v16 = vld [vmem:[%s9755_s21 + $0xad4] ss:$68 sps:$4 sm:$0xff]   ;;  %v8107_v17 = vld [vmem:[%s9755_s21 + $0xadc] ss:$68 sps:$4 sm:$0xff]  }
 0x28a   : > { %v8102_v18 = vld [vmem:[%s9755_s21 + $0xad0] ss:$68 sps:$4 sm:$0xff]  }
 0x28c   : > { %4761 = vmatpush1.bf16.msra.mxu0 %v8048_v19  ;;  %4843 = vmatpush1.bf16.msra.mxu1 %v8051_v20  ;;  %v8105_v19 = vld [vmem:[%s9755_s21 + $0xad8] ss:$68 sps:$4 sm:$0xff]  }
 0x28d   : > { %4762 = vmatprep.subr.bf16.mxu0 %v8056_v21  ;;  %4844 = vmatprep.subr.bf16.mxu1 %v8059_v22  ;;  %v8110_v20 = vld [vmem:[%s9755_s21 + $0xb5c] ss:$68 sps:$4 sm:$0xff]   ;;  %v8113_v21 = vld [vmem:[%s9755_s21 + $0xb64] ss:$68 sps:$4 sm:$0xff]  }
 0x28e   : > { %v8108_v22 = vld [vmem:[%s9755_s21 + $0xb58] ss:$68 sps:$4 sm:$0xff]  }
 0x290   : > { %4763 = vmatpush1.bf16.msra.mxu0 %v8054_v24  ;;  %4845 = vmatpush1.bf16.msra.mxu1 %v8057_v26  ;;  %v8111_v24 = vld [vmem:[%s9755_s21 + $0xb60] ss:$68 sps:$4 sm:$0xff]  }
 0x291   : > { %4764 = vmatprep.subr.bf16.mxu0 %v8062_v36  ;;  %4846 = vmatprep.subr.bf16.mxu1 %v8065_v37  ;;  %v8116_v26 = vld [vmem:[%s9755_s21 + $0xbe4] ss:$68 sps:$4 sm:$0xff]   ;;  %v8119_v36 = vld [vmem:[%s9755_s21 + $0xbec] ss:$68 sps:$4 sm:$0xff]  }
 0x292   : > { %v8114_v37 = vld [vmem:[%s9755_s21 + $0xbe0] ss:$68 sps:$4 sm:$0xff]  }
 0x294   : > { %4765 = vmatpush1.bf16.msra.mxu0 %v8060_v39  ;;  %4847 = vmatpush1.bf16.msra.mxu1 %v8063_v42  ;;  %v8117_v39 = vld [vmem:[%s9755_s21 + $0xbe8] ss:$68 sps:$4 sm:$0xff]  }
 0x295   : > { %4766 = vmatprep.subr.bf16.mxu0 %v8068_v43  ;;  %4848 = vmatprep.subr.bf16.mxu1 %v8071_v44  ;;  %v8122_v42 = vld [vmem:[%s9755_s21 + $0xc6c] ss:$68 sps:$4 sm:$0xff]   ;;  %v8125_v43 = vld [vmem:[%s9755_s21 + $0xc74] ss:$68 sps:$4 sm:$0xff]  }
 0x296   : > { %v8120_v44 = vld [vmem:[%s9755_s21 + $0xc68] ss:$68 sps:$4 sm:$0xff]  }
 0x298   : > { %4767 = vmatpush1.bf16.msra.mxu0 %v8066_v50  ;;  %4849 = vmatpush1.bf16.msra.mxu1 %v8069_v51  ;;  %v8123_v50 = vld [vmem:[%s9755_s21 + $0xc70] ss:$68 sps:$4 sm:$0xff]  }
 0x299   : > { %4768 = vmatprep.subr.bf16.mxu0 %v8074_v60  ;;  %4850 = vmatprep.subr.bf16.mxu1 %v8077_v61  ;;  %v8128_v51 = vld [vmem:[%s9755_s21 + $0xcf4] ss:$68 sps:$4 sm:$0xff]   ;;  %v8131_v60 = vld [vmem:[%s9755_s21 + $0xcfc] ss:$68 sps:$4 sm:$0xff]  }
 0x29a   : > { %v8126_v61 = vld [vmem:[%s9755_s21 + $0xcf0] ss:$68 sps:$4 sm:$0xff]  }
 0x29c   : > { %4769 = vmatpush1.bf16.msra.mxu0 %v8072_v62  ;;  %4851 = vmatpush1.bf16.msra.mxu1 %v8075_v63  ;;  %v8129_v62 = vld [vmem:[%s9755_s21 + $0xcf8] ss:$68 sps:$4 sm:$0xff]  }
 0x29d   : > { %4779 = vmatprep.subr.bf16.mxu0 %v8080_v0  ;;  %4861 = vmatprep.subr.bf16.mxu1 %v8083_v1  ;;  %v8134_v63 = vld [vmem:[%s9755_s21 + $0xd7c] ss:$68 sps:$4 sm:$0xff]   ;;  %v8137_v0 = vld [vmem:[%s9755_s21 + $0xd84] ss:$68 sps:$4 sm:$0xff]  }
 0x29e   : > { %v8140_v1 = vld [vmem:[%s9755_s21 + $0xe04] ss:$68 sps:$4 sm:$0xff]  }
 0x29f   : > { %4771 = vmatmul.mubr.bf16.vlgmr.msra.gmra.mrb[12].mxu0 %v9836_v49  ;;  %4853 = vmatmul.mubr.bf16.vlgmr.msra.gmra.mrb[12].mxu1 %v9836_v49 }
 0x2a0   : > { %4780 = vmatpush1.bf16.msra.mxu0 %v8078_v2  ;;  %4862 = vmatpush1.bf16.msra.mxu1 %v8081_v3  ;;  %v8143_v2 = vld [vmem:[%s9755_s21 + $0xe0c] ss:$68 sps:$4 sm:$0xff]   ;;  %v8132_v3 = vld [vmem:[%s9755_s21 + $0xd78] ss:$68 sps:$4 sm:$0xff]  }
 0x2a1   : > { %4781 = vmatprep.subr.bf16.mxu0 %v8086_v4  ;;  %4863 = vmatprep.subr.bf16.mxu1 %v8089_v5  ;;  %v8135_v4 = vld [vmem:[%s9755_s21 + $0xd80] ss:$68 sps:$4 sm:$0xff]   ;;  %v1815_v5 = vsub.s32 4, %v10162_v23 }
 0x2a2   : > { %7070 = vmatprep.mubr.msk.bf16.mxu0 %vm4187_vm0, %v9840_v52  ;;  %7071 = vmatprep.mubr.msk.bf16.mxu1 %vm4187_vm0, %v9840_v52 }
 0x2a4   : > { %4782 = vmatpush1.bf16.msra.mxu0 %v8084_v6  ;;  %4864 = vmatpush1.bf16.msra.mxu1 %v8087_v7  ;;  %v1823_v6 = vsub.s32 6, %v10162_v23  ;;  %v1819_v7 = vsub.s32 5, %v10162_v23 }
 0x2a5   : > { %4783 = vmatprep.subr.bf16.mxu0 %v8092_v8  ;;  %4865 = vmatprep.subr.bf16.mxu1 %v8095_v9  ;;  %v1827_v8 = vsub.s32 7, %v10162_v23  ;;  %v8138_v9 = vld [vmem:[%s9755_s21 + $0xe00] ss:$68 sps:$4 sm:$0xff]  }
 0x2a8   : > { %4784 = vmatpush1.bf16.msra.mxu0 %v8090_v10  ;;  %4866 = vmatpush1.bf16.msra.mxu1 %v8093_v11  ;;  %v8141_v10 = vld [vmem:[%s9755_s21 + $0xe08] ss:$68 sps:$4 sm:$0xff]   ;;  %v10358_v11 = vand.u32 %v8140_v1, %v9884_v25 }
 0x2a9   : > { %4785 = vmatprep.subr.bf16.mxu0 %v8098_v12  ;;  %4867 = vmatprep.subr.bf16.mxu1 %v8101_v13  ;;  %v10361_v12 = vand.u32 %v8143_v2, %v9884_v25  ;;  %v10366_v13 = vrot.slane %v10181_v47, %v1815_v5  ;;  %v8149_v1 = vld [vmem:[%s9755_s21 + $0x948] ss:$68 sps:$4 sm:$0xff]   ;;  %v8150_v2 = vld [vmem:[%s9755_s21 + $0x590] ss:$68 sps:$4 sm:$0xff]  }
 0x2ac   : > { %4786 = vmatpush1.bf16.msra.mxu0 %v8096_v14  ;;  %4868 = vmatpush1.bf16.msra.mxu1 %v8099_v15  ;;  %v10371_v14 = vrot.slane %v10181_v47, %v1823_v6  ;;  %v10376_v15 = vrot.slane %v10181_v47, %v1819_v7 }
 0x2ad   : > { %4787 = vmatprep.subr.bf16.mxu0 %v8104_v16  ;;  %4869 = vmatprep.subr.bf16.mxu1 %v8107_v17  ;;  %v10381_v16 = vrot.slane %v10181_v47, %v1827_v8  ;;  %v10384_v17 = vand.u32 %v8138_v9, %v9884_v25  ;;  %v8153_v9 = vld [vmem:[%s9755_s21 + $0x618] ss:$68 sps:$4 sm:$0xff]  }
 0x2b0   : > { %4788 = vmatpush1.bf16.msra.mxu0 %v8102_v18  ;;  %4870 = vmatpush1.bf16.msra.mxu1 %v8105_v19  ;;  %v10387_v18 = vand.u32 %v8141_v10, %v9884_v25  ;;  %v8144_v19 = vld [vmem:[%s9755_s21 + $0x480] ss:$68 sps:$4 sm:$0xff]   ;;  %v8154_v10 = vld [vmem:[%s9755_s21 + $0x1d8] ss:$68 sps:$4 sm:$0xff]  }
 0x2b1   : > { %4789 = vmatprep.subr.bf16.mxu0 %v8110_v20  ;;  %4871 = vmatprep.subr.bf16.mxu1 %v8113_v21 }
 0x2b4   : > { %4790 = vmatpush1.bf16.msra.mxu0 %v8108_v22  ;;  %4872 = vmatpush1.bf16.msra.mxu1 %v8111_v24 }
 0x2b5   : > { %4791 = vmatprep.subr.bf16.mxu0 %v8116_v26  ;;  %4873 = vmatprep.subr.bf16.mxu1 %v8119_v36 }
 0x2b8   : > { %4792 = vmatpush1.bf16.msra.mxu0 %v8114_v37  ;;  %4874 = vmatpush1.bf16.msra.mxu1 %v8117_v39 }
 0x2b9   : > { %4793 = vmatprep.subr.bf16.mxu0 %v8122_v42  ;;  %4875 = vmatprep.subr.bf16.mxu1 %v8125_v43  ;;  %v8145_v43 = vld [vmem:[%s9755_s21 + $0x40] ss:$68 sps:$4 sm:$0xff]  }
 0x2bc   : > { %4794 = vmatpush1.bf16.msra.mxu0 %v8120_v44  ;;  %4876 = vmatpush1.bf16.msra.mxu1 %v8123_v50  ;;  %v8146_v44 = vld [vmem:[%s9755_s21 + $0x8c0] ss:$68 sps:$4 sm:$0xff]  }
 0x2bd   : > { %4795 = vmatprep.subr.bf16.mxu0 %v8128_v51  ;;  %4877 = vmatprep.subr.bf16.mxu1 %v8131_v60  ;;  %v8675_v60 = vmov 0  }
 0x2c0   : > { %4796 = vmatpush1.bf16.msra.mxu0 %v8126_v61  ;;  %4878 = vmatpush1.bf16.msra.mxu1 %v8129_v62  ;;  %v8147_v61 = vld [vmem:[%s9755_s21 + $0x508] ss:$68 sps:$4 sm:$0xff]  }
 0x2c1   : > { %4797 = vmatprep.subr.bf16.mxu0 %v8134_v63  ;;  %4879 = vmatprep.subr.bf16.mxu1 %v8137_v0  ;;  %v8148_v0 = vld [vmem:[%s9755_s21 + $0xc8] ss:$68 sps:$4 sm:$0xff]  }
 0x2c4   : > { %4798 = vmatpush1.bf16.msra.mxu0 %v8132_v3  ;;  %4880 = vmatpush1.bf16.msra.mxu1 %v8135_v4  ;;  %v8151_v3 = vld [vmem:[%s9755_s21 + $0x150] ss:$68 sps:$4 sm:$0xff]  }
 0x2c5   : > { %4799 = vmatprep.subr.bf16.mxu0 %v10358_v11  ;;  %4881 = vmatprep.subr.bf16.mxu1 %v10361_v12  ;;  %v8152_v4 = vld [vmem:[%s9755_s21 + $0x9d0] ss:$68 sps:$4 sm:$0xff]  }
 0x2c6   : > { %v4485_v20 = vpop.f32.mrb[4].mxu0  ;;  %v4567_v21 = vpop.f32.mrb[4].mxu1 }
 0x2c7   : > { %v7361_v22 = vadd.f32 %v4485_v20, %v10366_v13  ;;  %v7363_v47 = vadd.f32 %v4567_v21, %v10371_v14  ;;  %v4487_v24 = vpop.f32.mrb[5].mxu0  ;;  %v4569_v26 = vpop.f32.mrb[5].mxu1  ;;  %v8158_v20 = vld [vmem:[%s9755_s21 + $0xae0] ss:$68 sps:$4 sm:$0xff]   ;;  %v8159_v21 = vld [vmem:[%s9755_s21 + $0x728] ss:$68 sps:$4 sm:$0xff]  }
 0x2c8   : > { %v7362_v36 = vadd.f32 %v4487_v24, %v10376_v15  ;;  %v7364_v37 = vadd.f32 %v4569_v26, %v10381_v16  ;;  %v4489_v39 = vpop.f32.mrb[6].mxu0  ;;  %v4571_v42 = vpop.f32.mrb[6].mxu1  ;;  %4800 = vmatpush1.bf16.msra.mxu0 %v10384_v17  ;;  %4882 = vmatpush1.bf16.msra.mxu1 %v10387_v18  ;;  %v8162_v24 = vld [vmem:[%s9755_s21 + $0x7b0] ss:$68 sps:$4 sm:$0xff]  }
 0x2c9   : > { %v4490_v50 = vpop.f32.mrb[7].mxu0  ;;  %v4572_v51 = vpop.f32.mrb[7].mxu1  ;;  %7111 = vmatprep.subr.bf16.mxu0 %v8144_v19  ;;  %4942 = vmatprep.subr.bf16.mxu1 %v8675_v60  ;;  %v8157_v19 = vld [vmem:[%s9755_s21 + $0x260] ss:$68 sps:$4 sm:$0xff]   ;;  %v8163_v26 = vld [vmem:[%s9755_s21 + $0x370] ss:$68 sps:$4 sm:$0xff]  }
 0x2ca   : > { %v5000_v62 = vcombine.low %v7361_v22, %v7362_v36  ;;  %v5001_v63 = vcombine.low %v7363_v47, %v7364_v37  ;;  %v8160_v22 = vld [vmem:[%s9755_s21 + $0x2e8] ss:$68 sps:$4 sm:$0xff]   ;;  %v8164_v36 = vld [vmem:[%s9755_s21 + $0xbf0] ss:$68 sps:$4 sm:$0xff]   ;;  %v8165_v37 = vld [vmem:[%s9755_s21 + $0x838] ss:$68 sps:$4 sm:$0xff]  }
 0x2cb   : > { %4812 = vmatmul.mubr.bf16.vlgmr.msra.gmra.mrb[12].mxu0 %v9907_v35  ;;  %4894 = vmatmul.mubr.bf16.vlgmr.msra.gmra.mrb[12].mxu1 %v9907_v35  ;;  %v8161_v47 = vld [vmem:[%s9755_s21 + $0xb68] ss:$68 sps:$4 sm:$0xff]   ;;  %v10436_v39 = vld [vmem:[%s11486_s0 + $0x10] sm:$0x77]  ;;  %v8168_v50 = vld [vmem:[%s9755_s21 + $0xd00] ss:$68 sps:$4 sm:$0xff]  }
 0x2cc   : > { %5016 = vst [vmem:[%s10239_s24 + $0x10] sm:$0x77] %v5000_v62  ;;  %5017 = vst [vmem:[%s10239_s24 + $0x18] sm:$0x77] %v5001_v63  ;;  %7112 = vmatpush3.bf16.msra.mxu0 %v8145_v43  ;;  %4943 = vmatpush1.bf16.msra.mxu1 %v8146_v44  ;;  %v8166_v42 = vld [vmem:[%s9755_s21 + $0x3f8] ss:$68 sps:$4 sm:$0xff]   ;;  %v5028_v44 = vcombine.high %v10436_v39, %v10436_v39 }
 0x2cd   : > { %7113 = vmatprep.subr.bf16.mxu0 %v8147_v61  ;;  %4944 = vmatprep.subr.bf16.mxu1 %v8675_v60  ;;  %v8167_v43 = vld [vmem:[%s9755_s21 + $0xc78] ss:$68 sps:$4 sm:$0xff]   ;;  %v8173_v51 = vld [vmem:[%s9755_s21 + $0x4] ss:$68 sps:$4 sm:$0xff]  }
 0x2ce   : > { %4934 = vmatprep.mubr.bf16.mxu0 %v9753_v40  ;;  %7072 = vmatprep.mubr.msk.bf16.mxu1 %vm4187_vm0, %v9840_v52  ;;  %v8155_v40 = vld [vmem:[%s9755_s21 + $0xa58] ss:$68 sps:$4 sm:$0xff]   ;;  %v8156_v52 = vld [vmem:[%s9755_s21 + $0x6a0] ss:$68 sps:$4 sm:$0xff]   ;;  %v10446_v61 = vpack.c.bf16 %v5028_v44, %v5028_v44  ;;  %v8169_v63 = vld [vmem:[%s9755_s21 + $0xd88] ss:$68 sps:$4 sm:$0xff]  }
 0x2cf   : > { %v8174_v62 = vld [vmem:[%s9755_s21] ss:$68 sps:$4 sm:$0xff]   ;;  %v8196_v44 = vld [vmem:[%s9755_s21 + $0x22c] ss:$68 sps:$4 sm:$0xff]  }
 0x2d0   : > { %7114 = vmatpush3.bf16.msra.mxu0 %v8148_v0  ;;  %4945 = vmatpush1.bf16.msra.mxu1 %v8149_v1  ;;  %v8170_v0 = vld [vmem:[%s9755_s21 + $0xe10] ss:$68 sps:$4 sm:$0xff]  }
 0x2d1   : > { %7115 = vmatprep.subr.bf16.mxu0 %v8150_v2  ;;  %4946 = vmatprep.subr.bf16.mxu1 %v8675_v60  ;;  %v8175_v1 = vld [vmem:[%s9755_s21 + $0x8c] ss:$68 sps:$4 sm:$0xff]  }
 0x2d2   : > { %v8176_v2 = vld [vmem:[%s9755_s21 + $0x88] ss:$68 sps:$4 sm:$0xff]  }
 0x2d4   : > { %7116 = vmatpush3.bf16.msra.mxu0 %v8151_v3  ;;  %4947 = vmatpush1.bf16.msra.mxu1 %v8152_v4  ;;  %v8177_v3 = vld [vmem:[%s9755_s21 + $0x114] ss:$68 sps:$4 sm:$0xff]  }
 0x2d5   : > { %7117 = vmatprep.subr.bf16.mxu0 %v8153_v9  ;;  %4948 = vmatprep.subr.bf16.mxu1 %v8675_v60  ;;  %v8178_v4 = vld [vmem:[%s9755_s21 + $0x110] ss:$68 sps:$4 sm:$0xff]   ;;  %v8179_v9 = vld [vmem:[%s9755_s21 + $0x19c] ss:$68 sps:$4 sm:$0xff]  }
 0x2d8   : > { %7118 = vmatpush3.bf16.msra.mxu0 %v8154_v10  ;;  %4949 = vmatpush1.bf16.msra.mxu1 %v8155_v40  ;;  %v8180_v10 = vld [vmem:[%s9755_s21 + $0xc] ss:$68 sps:$4 sm:$0xff]  }
 0x2d9   : > { %7119 = vmatprep.subr.bf16.mxu0 %v8156_v52  ;;  %4950 = vmatprep.subr.bf16.mxu1 %v8675_v60  ;;  %v8182_v40 = vld [vmem:[%s9755_s21 + $0x8] ss:$68 sps:$4 sm:$0xff]  }
 0x2da   : > { %v8183_v52 = vld [vmem:[%s9755_s21 + $0x224] ss:$68 sps:$4 sm:$0xff]  }
 0x2dc   : > { %7120 = vmatpush3.bf16.msra.mxu0 %v8157_v19  ;;  %4951 = vmatpush1.bf16.msra.mxu1 %v8158_v20  ;;  %v8184_v19 = vld [vmem:[%s9755_s21 + $0x94] ss:$68 sps:$4 sm:$0xff]   ;;  %v8185_v20 = vld [vmem:[%s9755_s21 + $0x220] ss:$68 sps:$4 sm:$0xff]  }
 0x2dd   : > { %7121 = vmatprep.subr.bf16.mxu0 %v8159_v21  ;;  %4952 = vmatprep.subr.bf16.mxu1 %v8675_v60  ;;  %v8186_v21 = vld [vmem:[%s9755_s21 + $0x90] ss:$68 sps:$4 sm:$0xff]  }
 0x2e0   : > { %7122 = vmatpush3.bf16.msra.mxu0 %v8160_v22  ;;  %4953 = vmatpush1.bf16.msra.mxu1 %v8161_v47  ;;  %v8188_v22 = vld [vmem:[%s9755_s21 + $0x11c] ss:$68 sps:$4 sm:$0xff]   ;;  %v8189_v47 = vld [vmem:[%s9755_s21 + $0x2a8] ss:$68 sps:$4 sm:$0xff]  }
 0x2e1   : > { %7123 = vmatprep.subr.bf16.mxu0 %v8162_v24  ;;  %4954 = vmatprep.subr.bf16.mxu1 %v8675_v60  ;;  %v8190_v24 = vld [vmem:[%s9755_s21 + $0x118] ss:$68 sps:$4 sm:$0xff]  }
 0x2e4   : > { %7124 = vmatpush3.bf16.msra.mxu0 %v8163_v26  ;;  %4955 = vmatpush1.bf16.msra.mxu1 %v8164_v36  ;;  %v8191_v26 = vld [vmem:[%s9755_s21 + $0x334] ss:$68 sps:$4 sm:$0xff]   ;;  %v8192_v36 = vld [vmem:[%s9755_s21 + $0x1a4] ss:$68 sps:$4 sm:$0xff]  }
 0x2e5   : > { %7125 = vmatprep.subr.bf16.mxu0 %v8165_v37  ;;  %4956 = vmatprep.subr.bf16.mxu1 %v8675_v60  ;;  %v8193_v37 = vld [vmem:[%s9755_s21 + $0x330] ss:$68 sps:$4 sm:$0xff]  }
 0x2e8   : > { %7126 = vmatpush3.bf16.msra.mxu0 %v8166_v42  ;;  %4957 = vmatpush1.bf16.msra.mxu1 %v8167_v43  ;;  %v8194_v42 = vld [vmem:[%s9755_s21 + $0x1a0] ss:$68 sps:$4 sm:$0xff]  }
 0x2e9   : > { %4958 = vmatprep.subr.bf16.mxu1 %v8675_v60  ;;  %5039 = vmatprep.subr.bf16.mxu0 %v8173_v51  ;;  %v8195_v43 = vld [vmem:[%s9755_s21 + $0x3bc] ss:$68 sps:$4 sm:$0xff]   ;;  %v8198_v51 = vld [vmem:[%s9755_s21 + $0x228] ss:$68 sps:$4 sm:$0xff]  }
 0x2eb   : > { %4935 = vmatmul.mubr.bf16.vlgmr.msra.gmra.mrb[16].mxu0 %v9836_v49  ;;  %v10457_v49 = vand.u32 %v8170_v0, %v9884_v25  ;;  %v8181_v25 = vld [vmem:[%s9755_s21 + $0x198] ss:$68 sps:$4 sm:$0xff]   ;;  %v8201_v0 = vld [vmem:[%s9755_s21 + $0x440] ss:$68 sps:$4 sm:$0xff]  }
 0x2ec   : > { %4959 = vmatpush1.bf16.msra.mxu1 %v8168_v50  ;;  %5040 = vmatpush1.bf16.msra.mxu0 %v8174_v62  ;;  %v8197_v50 = vld [vmem:[%s9755_s21 + $0x3b8] ss:$68 sps:$4 sm:$0xff]   ;;  %v8199_v62 = vld [vmem:[%s9755_s21 + $0x444] ss:$68 sps:$4 sm:$0xff]  }
 0x2ed   : > { %4960 = vmatprep.subr.bf16.mxu1 %v8675_v60  ;;  %5041 = vmatprep.subr.bf16.mxu0 %v8175_v1  ;;  %v8202_v1 = vld [vmem:[%s9755_s21 + $0x2b0] ss:$68 sps:$4 sm:$0xff]  }
 0x2ee   : > { %5071 = vmatprep.mubr.bf16.mxu0 %v10446_v61 }
 0x2f0   : > { %4961 = vmatpush1.bf16.msra.mxu1 %v8169_v63  ;;  %5042 = vmatpush1.bf16.msra.mxu0 %v8176_v2  ;;  %v8200_v63 = vld [vmem:[%s9755_s21 + $0x2b4] ss:$68 sps:$4 sm:$0xff]   ;;  %v8203_v2 = vld [vmem:[%s9755_s21 + $0x4cc] ss:$68 sps:$4 sm:$0xff]  }
 0x2f1   : > { %4962 = vmatprep.subr.bf16.mxu1 %v8675_v60  ;;  %5043 = vmatprep.subr.bf16.mxu0 %v8177_v3  ;;  %v8204_v3 = vld [vmem:[%s9755_s21 + $0x33c] ss:$68 sps:$4 sm:$0xff]  }
 0x2f4   : > { %4963 = vmatpush1.bf16.msra.mxu1 %v10457_v49  ;;  %5044 = vmatpush1.bf16.msra.mxu0 %v8178_v4  ;;  %v8205_v4 = vld [vmem:[%s9755_s21 + $0x4c8] ss:$68 sps:$4 sm:$0xff]  }
 0x2f5   : > { %5045 = vmatprep.subr.bf16.mxu0 %v8179_v9  ;;  %5121 = vmatprep.subr.bf16.mxu1 %v8180_v10  ;;  %v8206_v9 = vld [vmem:[%s9755_s21 + $0x338] ss:$68 sps:$4 sm:$0xff]  }
 0x2f6   : > { %v8207_v10 = vld [vmem:[%s9755_s21 + $0x554] ss:$68 sps:$4 sm:$0xff]  }
 0x2f7   : > { %4975 = vmatmul.mubr.bf16.vlgmr.msra.gmra.mrb[16].mxu1 %v9907_v35  ;;  %v8187_v35 = vld [vmem:[%s9755_s21 + $0x2ac] ss:$68 sps:$4 sm:$0xff]  }
 0x2f8   : > { %5046 = vmatpush1.bf16.msra.mxu0 %v8181_v25  ;;  %5122 = vmatpush1.bf16.msra.mxu1 %v8182_v40  ;;  %v8208_v25 = vld [vmem:[%s9755_s21 + $0x3c4] ss:$68 sps:$4 sm:$0xff]   ;;  %v8209_v40 = vld [vmem:[%s9755_s21 + $0x550] ss:$68 sps:$4 sm:$0xff]  }
 0x2f9   : > { %5047 = vmatprep.subr.bf16.mxu0 %v8183_v52  ;;  %5123 = vmatprep.subr.bf16.mxu1 %v8184_v19  ;;  %v8210_v52 = vld [vmem:[%s9755_s21 + $0x3c0] ss:$68 sps:$4 sm:$0xff]  }
 0x2fa   : > { %5153 = vmatprep.mubr.bf16.mxu1 %v10446_v61  ;;  %v8211_v19 = vld [vmem:[%s9755_s21 + $0x5dc] ss:$68 sps:$4 sm:$0xff]  }
 0x2fc   : > { %5048 = vmatpush1.bf16.msra.mxu0 %v8185_v20  ;;  %5124 = vmatpush1.bf16.msra.mxu1 %v8186_v21  ;;  %v8212_v20 = vld [vmem:[%s9755_s21 + $0x44c] ss:$68 sps:$4 sm:$0xff]   ;;  %v8213_v21 = vld [vmem:[%s9755_s21 + $0x5d8] ss:$68 sps:$4 sm:$0xff]  }
 0x2fd   : > { %5049 = vmatprep.subr.bf16.mxu0 %v8187_v35  ;;  %5125 = vmatprep.subr.bf16.mxu1 %v8188_v22  ;;  %v8214_v35 = vld [vmem:[%s9755_s21 + $0x448] ss:$68 sps:$4 sm:$0xff]  }
 0x2fe   : > { %v8215_v22 = vld [vmem:[%s9755_s21 + $0x664] ss:$68 sps:$4 sm:$0xff]  }
 0x300   : > { %5050 = vmatpush1.bf16.msra.mxu0 %v8189_v47  ;;  %5126 = vmatpush1.bf16.msra.mxu1 %v8190_v24  ;;  %v8216_v47 = vld [vmem:[%s9755_s21 + $0x4d4] ss:$68 sps:$4 sm:$0xff]   ;;  %v8217_v24 = vld [vmem:[%s9755_s21 + $0x660] ss:$68 sps:$4 sm:$0xff]  }
 0x301   : > { %5051 = vmatprep.subr.bf16.mxu0 %v8191_v26  ;;  %5127 = vmatprep.subr.bf16.mxu1 %v8192_v36  ;;  %v8218_v26 = vld [vmem:[%s9755_s21 + $0x4d0] ss:$68 sps:$4 sm:$0xff]  }
 0x302   : > { %v8219_v36 = vld [vmem:[%s9755_s21 + $0x6ec] ss:$68 sps:$4 sm:$0xff]  }
 0x304   : > { %5052 = vmatpush1.bf16.msra.mxu0 %v8193_v37  ;;  %5128 = vmatpush1.bf16.msra.mxu1 %v8194_v42  ;;  %v8220_v37 = vld [vmem:[%s9755_s21 + $0x55c] ss:$68 sps:$4 sm:$0xff]   ;;  %v8221_v42 = vld [vmem:[%s9755_s21 + $0x6e8] ss:$68 sps:$4 sm:$0xff]  }
 0x305   : > { %5053 = vmatprep.subr.bf16.mxu0 %v8195_v43  ;;  %5129 = vmatprep.subr.bf16.mxu1 %v8196_v44  ;;  %v8222_v43 = vld [vmem:[%s9755_s21 + $0x558] ss:$68 sps:$4 sm:$0xff]  }
 0x306   : > { %v8223_v44 = vld [vmem:[%s9755_s21 + $0x774] ss:$68 sps:$4 sm:$0xff]  }
 0x308   : > { %5054 = vmatpush1.bf16.msra.mxu0 %v8197_v50  ;;  %5130 = vmatpush1.bf16.msra.mxu1 %v8198_v51  ;;  %v8224_v50 = vld [vmem:[%s9755_s21 + $0x5e4] ss:$68 sps:$4 sm:$0xff]  }
 0x309   : > { %5055 = vmatprep.subr.bf16.mxu0 %v8199_v62  ;;  %5131 = vmatprep.subr.bf16.mxu1 %v8200_v63  ;;  %v10514_v51 = vld [vmem:[%s11486_s0 + $0x18] sm:$0x77]  ;;  %v8225_v62 = vld [vmem:[%s9755_s21 + $0x770] ss:$68 sps:$4 sm:$0xff]  }
 0x30a   : > { %v8226_v63 = vld [vmem:[%s9755_s21 + $0x5e0] ss:$68 sps:$4 sm:$0xff]  }
 0x30c   : > { %5056 = vmatpush1.bf16.msra.mxu0 %v8201_v0  ;;  %5132 = vmatpush1.bf16.msra.mxu1 %v8202_v1  ;;  %v8227_v0 = vld [vmem:[%s9755_s21 + $0x7fc] ss:$68 sps:$4 sm:$0xff]   ;;  %v8228_v1 = vld [vmem:[%s9755_s21 + $0x66c] ss:$68 sps:$4 sm:$0xff]  }
 0x30d   : > { %5057 = vmatprep.subr.bf16.mxu0 %v8203_v2  ;;  %5133 = vmatprep.subr.bf16.mxu1 %v8204_v3  ;;  %v5029_v2 = vcombine.high %v10514_v51, %v10514_v51  ;;  %v10524_v3 = vpack.c.bf16 %v10436_v39, %v10436_v39  ;;  %v8234_v39 = vld [vmem:[%s9755_s21 + $0x6f0] ss:$68 sps:$4 sm:$0xff]  }
 0x310   : > { %5058 = vmatpush1.bf16.msra.mxu0 %v8205_v4  ;;  %5134 = vmatpush1.bf16.msra.mxu1 %v8206_v9  ;;  %v8229_v4 = vld [vmem:[%s9755_s21 + $0x7f8] ss:$68 sps:$4 sm:$0xff]   ;;  %v8230_v9 = vld [vmem:[%s9755_s21 + $0x668] ss:$68 sps:$4 sm:$0xff]  }
 0x311   : > { %5059 = vmatprep.subr.bf16.mxu0 %v8207_v10  ;;  %5135 = vmatprep.subr.bf16.mxu1 %v8208_v25  ;;  %v8231_v10 = vld [vmem:[%s9755_s21 + $0x884] ss:$68 sps:$4 sm:$0xff]   ;;  %v8232_v25 = vld [vmem:[%s9755_s21 + $0x6f4] ss:$68 sps:$4 sm:$0xff]  }
 0x314   : > { %5060 = vmatpush1.bf16.msra.mxu0 %v8209_v40  ;;  %5136 = vmatpush1.bf16.msra.mxu1 %v8210_v52  ;;  %v10530_v40 = vpack.c.bf16 %v5029_v2, %v5029_v2  ;;  %v8233_v52 = vld [vmem:[%s9755_s21 + $0x880] ss:$68 sps:$4 sm:$0xff]  }
 0x315   : > { %5061 = vmatprep.subr.bf16.mxu0 %v8211_v19  ;;  %5137 = vmatprep.subr.bf16.mxu1 %v8212_v20  ;;  %v10536_v19 = vld [vmem:[%s10171_s11 + $0x8] sm:$0xff]  ;;  %v8242_v2 = vld [vmem:[%s9755_s21 + $0x800] ss:$68 sps:$4 sm:$0xff]  }
 0x316   : > { %v8235_v20 = vld [vmem:[%s9755_s21 + $0x90c] ss:$68 sps:$4 sm:$0xff]  }
 0x318   : > { %5062 = vmatpush1.bf16.msra.mxu0 %v8213_v21  ;;  %5138 = vmatpush1.bf16.msra.mxu1 %v8214_v35  ;;  %v8236_v21 = vld [vmem:[%s9755_s21 + $0x77c] ss:$68 sps:$4 sm:$0xff]   ;;  %v10545_v35 = vrot.slane %v10536_v19, %v1799_v41  ;;  %v10562_v41 = vrot.slane %v10536_v19, %v1811_v48 }
 0x319   : > { %5063 = vmatprep.subr.bf16.mxu0 %v8215_v22  ;;  %5139 = vmatprep.subr.bf16.mxu1 %v8216_v47  ;;  %v10550_v22 = vrot.slane %v10536_v19, %v1807_v45  ;;  %v8237_v47 = vld [vmem:[%s9755_s21 + $0x908] ss:$68 sps:$4 sm:$0xff]  }
 0x31a   : > { %v8240_v45 = vld [vmem:[%s9755_s21 + $0x804] ss:$68 sps:$4 sm:$0xff]  }
 0x31c   : > { %5064 = vmatpush1.bf16.msra.mxu0 %v8217_v24  ;;  %5140 = vmatpush1.bf16.msra.mxu1 %v8218_v26  ;;  %v8238_v24 = vld [vmem:[%s9755_s21 + $0x778] ss:$68 sps:$4 sm:$0xff]   ;;  %v10557_v26 = vrot.slane %v10536_v19, %v1803_v46 }
 0x31d   : > { %5065 = vmatprep.subr.bf16.mxu0 %v8219_v36  ;;  %5141 = vmatprep.subr.bf16.mxu1 %v8220_v37  ;;  %v8239_v36 = vld [vmem:[%s9755_s21 + $0x994] ss:$68 sps:$4 sm:$0xff]  }
 0x320   : > { %5066 = vmatpush1.bf16.msra.mxu0 %v8221_v42  ;;  %5142 = vmatpush1.bf16.msra.mxu1 %v8222_v43 }
 0x321   : > { %5067 = vmatprep.subr.bf16.mxu0 %v8223_v44  ;;  %5143 = vmatprep.subr.bf16.mxu1 %v8224_v50 }
 0x324   : > { %5068 = vmatpush1.bf16.msra.mxu0 %v8225_v62  ;;  %5144 = vmatpush1.bf16.msra.mxu1 %v8226_v63 }
 0x325   : > { %5069 = vmatprep.subr.bf16.mxu0 %v8227_v0  ;;  %5145 = vmatprep.subr.bf16.mxu1 %v8228_v1  ;;  %v8241_v1 = vld [vmem:[%s9755_s21 + $0x990] ss:$68 sps:$4 sm:$0xff]  }
 0x328   : > { %5070 = vmatpush1.bf16.msra.mxu0 %v8229_v4  ;;  %5146 = vmatpush1.bf16.msra.mxu1 %v8230_v9 }
 0x329   : > { %5080 = vmatprep.subr.bf16.mxu0 %v8231_v10  ;;  %5147 = vmatprep.subr.bf16.mxu1 %v8232_v25  ;;  %v8243_v10 = vld [vmem:[%s9755_s21 + $0xa1c] ss:$68 sps:$4 sm:$0xff]   ;;  %v8244_v25 = vld [vmem:[%s9755_s21 + $0x88c] ss:$68 sps:$4 sm:$0xff]  }
 0x32b   : > { %5072 = vmatmul.mubr.bf16.vlgmr.msra.gmra.mrb[20].mxu0 %v10524_v3 }
 0x32c   : > { %5081 = vmatpush1.bf16.msra.mxu0 %v8233_v52  ;;  %5148 = vmatpush1.bf16.msra.mxu1 %v8234_v39 }
 0x32d   : > { %5082 = vmatprep.subr.bf16.mxu0 %v8235_v20  ;;  %5149 = vmatprep.subr.bf16.mxu1 %v8236_v21  ;;  %v8245_v20 = vld [vmem:[%s9755_s21 + $0xa18] ss:$68 sps:$4 sm:$0xff]   ;;  %v8246_v21 = vld [vmem:[%s9755_s21 + $0x888] ss:$68 sps:$4 sm:$0xff]  }
 0x32e   : > { %7075 = vmatprep.mubr.msk.bf16.mxu0 %vm4187_vm0, %v10530_v40 }
 0x330   : > { %5083 = vmatpush1.bf16.msra.mxu0 %v8237_v47  ;;  %5150 = vmatpush1.bf16.msra.mxu1 %v8238_v24  ;;  %v8247_v47 = vld [vmem:[%s9755_s21 + $0xaa4] ss:$68 sps:$4 sm:$0xff]   ;;  %v8248_v24 = vld [vmem:[%s9755_s21 + $0x914] ss:$68 sps:$4 sm:$0xff]  }
 0x331   : > { %5084 = vmatprep.subr.bf16.mxu0 %v8239_v36  ;;  %5151 = vmatprep.subr.bf16.mxu1 %v8240_v45  ;;  %v8249_v36 = vld [vmem:[%s9755_s21 + $0xaa0] ss:$68 sps:$4 sm:$0xff]   ;;  %v8250_v45 = vld [vmem:[%s9755_s21 + $0x910] ss:$68 sps:$4 sm:$0xff]  }
 0x332   : > { %v4649_v37 = vpop.f32.mrb[8].mxu0  ;;  %v4731_v42 = vpop.f32.mrb[8].mxu1 }
 0x333   : > { %v7365_v43 = vadd.f32 %v4649_v37, %v10545_v35  ;;  %v7367_v46 = vadd.f32 %v4731_v42, %v10550_v22  ;;  %v4651_v44 = vpop.f32.mrb[9].mxu0  ;;  %v4733_v50 = vpop.f32.mrb[9].mxu1  ;;  %v8251_v37 = vld [vmem:[%s9755_s21 + $0xb2c] ss:$68 sps:$4 sm:$0xff]   ;;  %v8252_v42 = vld [vmem:[%s9755_s21 + $0x99c] ss:$68 sps:$4 sm:$0xff]  }
 0x334   : > { %v7366_v62 = vadd.f32 %v4651_v44, %v10557_v26  ;;  %v7368_v48 = vadd.f32 %v4733_v50, %v10562_v41  ;;  %v4653_v63 = vpop.f32.mrb[10].mxu0  ;;  %v4735_v0 = vpop.f32.mrb[10].mxu1  ;;  %5085 = vmatpush1.bf16.msra.mxu0 %v8241_v1  ;;  %5152 = vmatpush1.bf16.msra.mxu1 %v8242_v2  ;;  %v8255_v44 = vld [vmem:[%s9755_s21 + $0xbb4] ss:$68 sps:$4 sm:$0xff]   ;;  %v8256_v50 = vld [vmem:[%s9755_s21 + $0xa24] ss:$68 sps:$4 sm:$0xff]  }
 0x335   : > { %v4654_v4 = vpop.f32.mrb[11].mxu0  ;;  %v4736_v9 = vpop.f32.mrb[11].mxu1  ;;  %5086 = vmatprep.subr.bf16.mxu0 %v8243_v10  ;;  %5162 = vmatprep.subr.bf16.mxu1 %v8244_v25  ;;  %v8259_v63 = vld [vmem:[%s9755_s21 + $0xc3c] ss:$68 sps:$4 sm:$0xff]   ;;  %v8260_v0 = vld [vmem:[%s9755_s21 + $0xaac] ss:$68 sps:$4 sm:$0xff]  }
 0x336   : > { %v5002_v52 = vcombine.low %v7365_v43, %v7366_v62  ;;  %v5003_v39 = vcombine.low %v7367_v46, %v7368_v48  ;;  %v8253_v43 = vld [vmem:[%s9755_s21 + $0xb28] ss:$68 sps:$4 sm:$0xff]   ;;  %v8254_v46 = vld [vmem:[%s9755_s21 + $0x998] ss:$68 sps:$4 sm:$0xff]   ;;  %v8257_v62 = vld [vmem:[%s9755_s21 + $0xbb0] ss:$68 sps:$4 sm:$0xff]  }
 0x337   : > { %5154 = vmatmul.mubr.bf16.vlgmr.msra.gmra.mrb[20].mxu1 %v10524_v3  ;;  %v8258_v48 = vld [vmem:[%s9755_s21 + $0xa20] ss:$68 sps:$4 sm:$0xff]   ;;  %v8261_v1 = vld [vmem:[%s9755_s21 + $0xc38] ss:$68 sps:$4 sm:$0xff]   ;;  %v8262_v2 = vld [vmem:[%s9755_s21 + $0xaa8] ss:$68 sps:$4 sm:$0xff]  }
 0x338   : > { %5018 = vst [vmem:[%s10239_s24 + $0x20] sm:$0x77] %v5002_v52  ;;  %5019 = vst [vmem:[%s10239_s24 + $0x28] sm:$0x77] %v5003_v39  ;;  %5087 = vmatpush1.bf16.msra.mxu0 %v8245_v20  ;;  %5163 = vmatpush1.bf16.msra.mxu1 %v8246_v21  ;;  %v8263_v4 = vld [vmem:[%s9755_s21 + $0xcc4] ss:$68 sps:$4 sm:$0xff]  }
 0x339   : > { %5088 = vmatprep.subr.bf16.mxu0 %v8247_v47  ;;  %5164 = vmatprep.subr.bf16.mxu1 %v8248_v24  ;;  %v8264_v9 = vld [vmem:[%s9755_s21 + $0xb34] ss:$68 sps:$4 sm:$0xff]   ;;  %v8265_v10 = vld [vmem:[%s9755_s21 + $0xcc0] ss:$68 sps:$4 sm:$0xff]   ;;  %v8267_v52 = vld [vmem:[%s9755_s21 + $0xd4c] ss:$68 sps:$4 sm:$0xff]   ;;  %v10609_v24 = vpack.c.bf16 %v10514_v51, %v10514_v51 }
 0x33a   : > { %7076 = vmatprep.mubr.msk.bf16.mxu1 %vm4187_vm0, %v10530_v40  ;;  %v8266_v25 = vld [vmem:[%s9755_s21 + $0xb30] ss:$68 sps:$4 sm:$0xff]   ;;  %v8268_v39 = vld [vmem:[%s9755_s21 + $0xbbc] ss:$68 sps:$4 sm:$0xff]   ;;  %v8269_v20 = vld [vmem:[%s9755_s21 + $0xd48] ss:$68 sps:$4 sm:$0xff]  }
 0x33b   : > { %v8270_v21 = vld [vmem:[%s9755_s21 + $0xbb8] ss:$68 sps:$4 sm:$0xff]   ;;  %v8271_v47 = vld [vmem:[%s9755_s21 + $0xc44] ss:$68 sps:$4 sm:$0xff]  }
 0x33c   : > { %5089 = vmatpush1.bf16.msra.mxu0 %v8249_v36  ;;  %5165 = vmatpush1.bf16.msra.mxu1 %v8250_v45  ;;  %v8272_v36 = vld [vmem:[%s9755_s21 + $0xc40] ss:$68 sps:$4 sm:$0xff]   ;;  %v8273_v45 = vld [vmem:[%s9755_s21 + $0xccc] ss:$68 sps:$4 sm:$0xff]   ;;  %v8277_v51 = vld [vmem:[%s9755_s21 + $0xd54] ss:$68 sps:$4 sm:$0xff]  }
 0x33d   : > { %5090 = vmatprep.subr.bf16.mxu0 %v8251_v37  ;;  %5166 = vmatprep.subr.bf16.mxu1 %v8252_v42  ;;  %v8274_v37 = vld [vmem:[%s9755_s21 + $0x14] ss:$68 sps:$4 sm:$0xff]  }
 0x33e   : > { %v8276_v42 = vld [vmem:[%s9755_s21 + $0x10] ss:$68 sps:$4 sm:$0xff]  }
 0x340   : > { %5091 = vmatpush1.bf16.msra.mxu0 %v8253_v43  ;;  %5167 = vmatpush1.bf16.msra.mxu1 %v8254_v46  ;;  %v8279_v43 = vld [vmem:[%s9755_s21 + $0xd50] ss:$68 sps:$4 sm:$0xff]   ;;  %v8280_v46 = vld [vmem:[%s9755_s21 + $0x98] ss:$68 sps:$4 sm:$0xff]  }
 0x341   : > { %5092 = vmatprep.subr.bf16.mxu0 %v8255_v44  ;;  %5168 = vmatprep.subr.bf16.mxu1 %v8256_v50  ;;  %v8281_v44 = vld [vmem:[%s9755_s21 + $0x124] ss:$68 sps:$4 sm:$0xff]  }
 0x342   : > { %v8282_v50 = vld [vmem:[%s9755_s21 + $0x120] ss:$68 sps:$4 sm:$0xff]  }
 0x344   : > { %5093 = vmatpush1.bf16.msra.mxu0 %v8257_v62  ;;  %5169 = vmatpush1.bf16.msra.mxu1 %v8258_v48  ;;  %v8283_v62 = vld [vmem:[%s9755_s21 + $0x1ac] ss:$68 sps:$4 sm:$0xff]   ;;  %v8284_v48 = vld [vmem:[%s9755_s21 + $0x1c] ss:$68 sps:$4 sm:$0xff]  }
 0x345   : > { %5094 = vmatprep.subr.bf16.mxu0 %v8259_v63  ;;  %5170 = vmatprep.subr.bf16.mxu1 %v8260_v0  ;;  %v8285_v63 = vld [vmem:[%s9755_s21 + $0x1a8] ss:$68 sps:$4 sm:$0xff]   ;;  %v8287_v0 = vld [vmem:[%s9755_s21 + $0x234] ss:$68 sps:$4 sm:$0xff]  }
 0x348   : > { %5095 = vmatpush1.bf16.msra.mxu0 %v8261_v1  ;;  %5171 = vmatpush1.bf16.msra.mxu1 %v8262_v2  ;;  %v8289_v1 = vld [vmem:[%s9755_s21 + $0x230] ss:$68 sps:$4 sm:$0xff]   ;;  %v8290_v2 = vld [vmem:[%s9755_s21 + $0xa0] ss:$68 sps:$4 sm:$0xff]  }
 0x349   : > { %5096 = vmatprep.subr.bf16.mxu0 %v8263_v4  ;;  %5172 = vmatprep.subr.bf16.mxu1 %v8264_v9  ;;  %v8291_v4 = vld [vmem:[%s9755_s21 + $0x2bc] ss:$68 sps:$4 sm:$0xff]   ;;  %v8292_v9 = vld [vmem:[%s9755_s21 + $0x12c] ss:$68 sps:$4 sm:$0xff]  }
 0x34c   : > { %5097 = vmatpush1.bf16.msra.mxu0 %v8265_v10  ;;  %5173 = vmatpush1.bf16.msra.mxu1 %v8266_v25  ;;  %v8293_v10 = vld [vmem:[%s9755_s21 + $0x2b8] ss:$68 sps:$4 sm:$0xff]   ;;  %v8294_v25 = vld [vmem:[%s9755_s21 + $0x128] ss:$68 sps:$4 sm:$0xff]  }
 0x34d   : > { %5098 = vmatprep.subr.bf16.mxu0 %v8267_v52  ;;  %5174 = vmatprep.subr.bf16.mxu1 %v8268_v39  ;;  %v8295_v52 = vld [vmem:[%s9755_s21 + $0x344] ss:$68 sps:$4 sm:$0xff]   ;;  %v8296_v39 = vld [vmem:[%s9755_s21 + $0x1b4] ss:$68 sps:$4 sm:$0xff]  }
 0x350   : > { %5099 = vmatpush1.bf16.msra.mxu0 %v8269_v20  ;;  %5175 = vmatpush1.bf16.msra.mxu1 %v8270_v21  ;;  %v8297_v20 = vld [vmem:[%s9755_s21 + $0x340] ss:$68 sps:$4 sm:$0xff]   ;;  %v8298_v21 = vld [vmem:[%s9755_s21 + $0x1b0] ss:$68 sps:$4 sm:$0xff]  }
 0x351   : > { %5100 = vmatprep.subr.bf16.mxu0 %v9890_v29  ;;  %5176 = vmatprep.subr.bf16.mxu1 %v8271_v47  ;;  %v8275_v29 = vld [vmem:[%s9755_s21 + $0xcc8] ss:$68 sps:$4 sm:$0xff]  }
 0x352   : > { %v8299_v47 = vld [vmem:[%s9755_s21 + $0x3cc] ss:$68 sps:$4 sm:$0xff]  }
 0x354   : > { %5101 = vmatpush1.bf16.msra.mxu0 %v9896_v31  ;;  %5177 = vmatpush1.bf16.msra.mxu1 %v8272_v36  ;;  %v8278_v31 = vld [vmem:[%s9755_s21 + $0x9c] ss:$68 sps:$4 sm:$0xff]  }
 0x355   : > { %5178 = vmatprep.subr.bf16.mxu1 %v8273_v45  ;;  %5203 = vmatprep.subr.bf16.mxu0 %v8274_v37  ;;  %v8300_v36 = vld [vmem:[%s9755_s21 + $0x23c] ss:$68 sps:$4 sm:$0xff]   ;;  %v8301_v45 = vld [vmem:[%s9755_s21 + $0x3c8] ss:$68 sps:$4 sm:$0xff]  }
 0x356   : > { %v8302_v37 = vld [vmem:[%s9755_s21 + $0x238] ss:$68 sps:$4 sm:$0xff]  }
 0x357   : > { %5113 = vmatmul.mubr.bf16.vlgmr.msra.gmra.mrb[20].mxu0 %v10609_v24 }
 0x358   : > { %5179 = vmatpush1.bf16.msra.mxu1 %v8275_v29  ;;  %5204 = vmatpush1.bf16.msra.mxu0 %v8276_v42  ;;  %v8303_v29 = vld [vmem:[%s9755_s21 + $0x454] ss:$68 sps:$4 sm:$0xff]   ;;  %v8304_v42 = vld [vmem:[%s9755_s21 + $0x2c4] ss:$68 sps:$4 sm:$0xff]  }
 0x359   : > { %5180 = vmatprep.subr.bf16.mxu1 %v8277_v51  ;;  %5205 = vmatprep.subr.bf16.mxu0 %v8278_v31  ;;  %v8305_v51 = vld [vmem:[%s9755_s21 + $0x450] ss:$68 sps:$4 sm:$0xff]   ;;  %v8306_v31 = vld [vmem:[%s9755_s21 + $0x2c0] ss:$68 sps:$4 sm:$0xff]  }
 0x35a   : > { %5235 = vmatprep.mubr.bf16.mxu0 %v10446_v61 }
 0x35c   : > { %5181 = vmatpush1.bf16.msra.mxu1 %v8279_v43  ;;  %5206 = vmatpush1.bf16.msra.mxu0 %v8280_v46  ;;  %v8307_v43 = vld [vmem:[%s9755_s21 + $0x4dc] ss:$68 sps:$4 sm:$0xff]   ;;  %v8308_v46 = vld [vmem:[%s9755_s21 + $0x34c] ss:$68 sps:$4 sm:$0xff]  }
 0x35d   : > { %5182 = vmatprep.subr.bf16.mxu1 %v9893_v30  ;;  %5207 = vmatprep.subr.bf16.mxu0 %v8281_v44  ;;  %v8286_v30 = vld [vmem:[%s9755_s21 + $0x18] ss:$68 sps:$4 sm:$0xff]  }
 0x35e   : > { %v8309_v44 = vld [vmem:[%s9755_s21 + $0x4d8] ss:$68 sps:$4 sm:$0xff]  }
 0x360   : > { %5183 = vmatpush1.bf16.msra.mxu1 %v9899_v32  ;;  %5208 = vmatpush1.bf16.msra.mxu0 %v8282_v50  ;;  %v8288_v32 = vld [vmem:[%s9755_s21 + $0xa4] ss:$68 sps:$4 sm:$0xff]  }
 0x361   : > { %5209 = vmatprep.subr.bf16.mxu0 %v8283_v62  ;;  %5285 = vmatprep.subr.bf16.mxu1 %v8284_v48  ;;  %v8310_v50 = vld [vmem:[%s9755_s21 + $0x348] ss:$68 sps:$4 sm:$0xff]   ;;  %v8312_v48 = vld [vmem:[%s9755_s21 + $0x3d4] ss:$68 sps:$4 sm:$0xff]  }
 0x362   : > { %v8311_v62 = vld [vmem:[%s9755_s21 + $0x564] ss:$68 sps:$4 sm:$0xff]  }
 0x363   : > { %5195 = vmatmul.mubr.bf16.vlgmr.msra.gmra.mrb[20].mxu1 %v10609_v24 }
 0x364   : > { %5210 = vmatpush1.bf16.msra.mxu0 %v8285_v63  ;;  %5286 = vmatpush1.bf16.msra.mxu1 %v8286_v30  ;;  %v8313_v63 = vld [vmem:[%s9755_s21 + $0x560] ss:$68 sps:$4 sm:$0xff]   ;;  %v8314_v30 = vld [vmem:[%s9755_s21 + $0x3d0] ss:$68 sps:$4 sm:$0xff]  }
 0x365   : > { %5211 = vmatprep.subr.bf16.mxu0 %v8287_v0  ;;  %5287 = vmatprep.subr.bf16.mxu1 %v8288_v32  ;;  %v8315_v0 = vld [vmem:[%s9755_s21 + $0x5ec] ss:$68 sps:$4 sm:$0xff]   ;;  %v8316_v32 = vld [vmem:[%s9755_s21 + $0x45c] ss:$68 sps:$4 sm:$0xff]  }
 0x366   : > { %5317 = vmatprep.mubr.bf16.mxu1 %v10446_v61 }
 0x368   : > { %5212 = vmatpush1.bf16.msra.mxu0 %v8289_v1  ;;  %5288 = vmatpush1.bf16.msra.mxu1 %v8290_v2  ;;  %v8317_v1 = vld [vmem:[%s9755_s21 + $0x5e8] ss:$68 sps:$4 sm:$0xff]   ;;  %v8318_v2 = vld [vmem:[%s9755_s21 + $0x458] ss:$68 sps:$4 sm:$0xff]  }
 0x369   : > { %5213 = vmatprep.subr.bf16.mxu0 %v8291_v4  ;;  %5289 = vmatprep.subr.bf16.mxu1 %v8292_v9  ;;  %v8319_v4 = vld [vmem:[%s9755_s21 + $0x674] ss:$68 sps:$4 sm:$0xff]   ;;  %v8320_v9 = vld [vmem:[%s9755_s21 + $0x4e4] ss:$68 sps:$4 sm:$0xff]  }
 0x36c   : > { %5214 = vmatpush1.bf16.msra.mxu0 %v8293_v10  ;;  %5290 = vmatpush1.bf16.msra.mxu1 %v8294_v25  ;;  %v8321_v10 = vld [vmem:[%s9755_s21 + $0x670] ss:$68 sps:$4 sm:$0xff]   ;;  %v8322_v25 = vld [vmem:[%s9755_s21 + $0x4e0] ss:$68 sps:$4 sm:$0xff]  }
 0x36d   : > { %5215 = vmatprep.subr.bf16.mxu0 %v8295_v52  ;;  %5291 = vmatprep.subr.bf16.mxu1 %v8296_v39  ;;  %v8323_v52 = vld [vmem:[%s9755_s21 + $0x6fc] ss:$68 sps:$4 sm:$0xff]   ;;  %v8324_v39 = vld [vmem:[%s9755_s21 + $0x56c] ss:$68 sps:$4 sm:$0xff]  }
 0x370   : > { %5216 = vmatpush1.bf16.msra.mxu0 %v8297_v20  ;;  %5292 = vmatpush1.bf16.msra.mxu1 %v8298_v21  ;;  %v8325_v20 = vld [vmem:[%s9755_s21 + $0x6f8] ss:$68 sps:$4 sm:$0xff]   ;;  %v8326_v21 = vld [vmem:[%s9755_s21 + $0x568] ss:$68 sps:$4 sm:$0xff]  }
 0x371   : > { %5217 = vmatprep.subr.bf16.mxu0 %v8299_v47  ;;  %5293 = vmatprep.subr.bf16.mxu1 %v8300_v36  ;;  %v8327_v47 = vld [vmem:[%s9755_s21 + $0x784] ss:$68 sps:$4 sm:$0xff]   ;;  %v8328_v36 = vld [vmem:[%s9755_s21 + $0x5f4] ss:$68 sps:$4 sm:$0xff]  }
 0x374   : > { %5218 = vmatpush1.bf16.msra.mxu0 %v8301_v45  ;;  %5294 = vmatpush1.bf16.msra.mxu1 %v8302_v37  ;;  %v8329_v45 = vld [vmem:[%s9755_s21 + $0x780] ss:$68 sps:$4 sm:$0xff]   ;;  %v8330_v37 = vld [vmem:[%s9755_s21 + $0x5f0] ss:$68 sps:$4 sm:$0xff]  }
 0x375   : > { %5219 = vmatprep.subr.bf16.mxu0 %v8303_v29  ;;  %5295 = vmatprep.subr.bf16.mxu1 %v8304_v42  ;;  %v8331_v29 = vld [vmem:[%s9755_s21 + $0x80c] ss:$68 sps:$4 sm:$0xff]   ;;  %v8332_v42 = vld [vmem:[%s9755_s21 + $0x67c] ss:$68 sps:$4 sm:$0xff]  }
 0x378   : > { %5220 = vmatpush1.bf16.msra.mxu0 %v8305_v51  ;;  %5296 = vmatpush1.bf16.msra.mxu1 %v8306_v31  ;;  %v8333_v51 = vld [vmem:[%s9755_s21 + $0x808] ss:$68 sps:$4 sm:$0xff]   ;;  %v8334_v31 = vld [vmem:[%s9755_s21 + $0x678] ss:$68 sps:$4 sm:$0xff]  }
 0x379   : > { %5221 = vmatprep.subr.bf16.mxu0 %v8307_v43  ;;  %5297 = vmatprep.subr.bf16.mxu1 %v8308_v46  ;;  %v8335_v43 = vld [vmem:[%s9755_s21 + $0x894] ss:$68 sps:$4 sm:$0xff]   ;;  %v8336_v46 = vld [vmem:[%s9755_s21 + $0x704] ss:$68 sps:$4 sm:$0xff]  }
 0x37c   : > { %5222 = vmatpush1.bf16.msra.mxu0 %v8309_v44  ;;  %5298 = vmatpush1.bf16.msra.mxu1 %v8310_v50  ;;  %v8337_v44 = vld [vmem:[%s9755_s21 + $0x890] ss:$68 sps:$4 sm:$0xff]   ;;  %v8338_v50 = vld [vmem:[%s9755_s21 + $0x700] ss:$68 sps:$4 sm:$0xff]  }
 0x37d   : > { %5223 = vmatprep.subr.bf16.mxu0 %v8311_v62  ;;  %5299 = vmatprep.subr.bf16.mxu1 %v8312_v48  ;;  %v8339_v62 = vld [vmem:[%s9755_s21 + $0x91c] ss:$68 sps:$4 sm:$0xff]   ;;  %v8340_v48 = vld [vmem:[%s9755_s21 + $0x78c] ss:$68 sps:$4 sm:$0xff]  }
 0x380   : > { %5224 = vmatpush1.bf16.msra.mxu0 %v8313_v63  ;;  %5300 = vmatpush1.bf16.msra.mxu1 %v8314_v30  ;;  %v10693_v63 = vrot.slane %v10536_v19, %v1815_v5  ;;  %v10698_v30 = vrot.slane %v10536_v19, %v1823_v6  ;;  %v10710_v5 = vrot.slane %v10536_v19, %v1827_v8  ;;  %v8344_v6 = vld [vmem:[%s9755_s21 + $0x814] ss:$68 sps:$4 sm:$0xff]  }
 0x381   : > { %5225 = vmatprep.subr.bf16.mxu0 %v8315_v0  ;;  %5301 = vmatprep.subr.bf16.mxu1 %v8316_v32  ;;  %v8341_v0 = vld [vmem:[%s9755_s21 + $0x918] ss:$68 sps:$4 sm:$0xff]   ;;  %v8342_v32 = vld [vmem:[%s9755_s21 + $0x788] ss:$68 sps:$4 sm:$0xff]  }
 0x384   : > { %5226 = vmatpush1.bf16.msra.mxu0 %v8317_v1  ;;  %5302 = vmatpush1.bf16.msra.mxu1 %v8318_v2  ;;  %v10705_v1 = vrot.slane %v10536_v19, %v1819_v7  ;;  %v8343_v2 = vld [vmem:[%s9755_s21 + $0x9a4] ss:$68 sps:$4 sm:$0xff]  }
 0x385   : > { %5227 = vmatprep.subr.bf16.mxu0 %v8319_v4  ;;  %5303 = vmatprep.subr.bf16.mxu1 %v8320_v9 }
 0x388   : > { %5228 = vmatpush1.bf16.msra.mxu0 %v8321_v10  ;;  %5304 = vmatpush1.bf16.msra.mxu1 %v8322_v25 }
 0x389   : > { %5229 = vmatprep.subr.bf16.mxu0 %v8323_v52  ;;  %5305 = vmatprep.subr.bf16.mxu1 %v8324_v39 }
 0x38c   : > { %5230 = vmatpush1.bf16.msra.mxu0 %v8325_v20  ;;  %5306 = vmatpush1.bf16.msra.mxu1 %v8326_v21  ;;  %v8345_v20 = vld [vmem:[%s9755_s21 + $0x9a0] ss:$68 sps:$4 sm:$0xff]   ;;  %v8346_v21 = vld [vmem:[%s9755_s21 + $0x810] ss:$68 sps:$4 sm:$0xff]  }
 0x38d   : > { %5231 = vmatprep.subr.bf16.mxu0 %v8327_v47  ;;  %5307 = vmatprep.subr.bf16.mxu1 %v8328_v36 }
 0x390   : > { %5232 = vmatpush1.bf16.msra.mxu0 %v8329_v45  ;;  %5308 = vmatpush1.bf16.msra.mxu1 %v8330_v37  ;;  %v8347_v45 = vld [vmem:[%s9755_s21 + $0xa2c] ss:$68 sps:$4 sm:$0xff]   ;;  %v8348_v37 = vld [vmem:[%s9755_s21 + $0x89c] ss:$68 sps:$4 sm:$0xff]  }
 0x391   : > { %5233 = vmatprep.subr.bf16.mxu0 %v8331_v29  ;;  %5309 = vmatprep.subr.bf16.mxu1 %v8332_v42 }
 0x394   : > { %5234 = vmatpush1.bf16.msra.mxu0 %v8333_v51  ;;  %5310 = vmatpush1.bf16.msra.mxu1 %v8334_v31  ;;  %v8349_v51 = vld [vmem:[%s9755_s21 + $0xa28] ss:$68 sps:$4 sm:$0xff]   ;;  %v8350_v31 = vld [vmem:[%s9755_s21 + $0x898] ss:$68 sps:$4 sm:$0xff]  }
 0x395   : > { %5244 = vmatprep.subr.bf16.mxu0 %v8335_v43  ;;  %5311 = vmatprep.subr.bf16.mxu1 %v8336_v46  ;;  %v8351_v43 = vld [vmem:[%s9755_s21 + $0xab4] ss:$68 sps:$4 sm:$0xff]   ;;  %v8352_v46 = vld [vmem:[%s9755_s21 + $0x924] ss:$68 sps:$4 sm:$0xff]  }
 0x397   : > { %5236 = vmatmul.mubr.bf16.vlgmr.msra.gmra.mrb[24].mxu0 %v10524_v3 }
 0x398   : > { %5245 = vmatpush1.bf16.msra.mxu0 %v8337_v44  ;;  %5312 = vmatpush1.bf16.msra.mxu1 %v8338_v50  ;;  %v8353_v44 = vld [vmem:[%s9755_s21 + $0xab0] ss:$68 sps:$4 sm:$0xff]   ;;  %v8354_v50 = vld [vmem:[%s9755_s21 + $0x920] ss:$68 sps:$4 sm:$0xff]  }
 0x399   : > { %5246 = vmatprep.subr.bf16.mxu0 %v8339_v62  ;;  %5313 = vmatprep.subr.bf16.mxu1 %v8340_v48  ;;  %v8355_v62 = vld [vmem:[%s9755_s21 + $0xb3c] ss:$68 sps:$4 sm:$0xff]   ;;  %v8356_v48 = vld [vmem:[%s9755_s21 + $0x9ac] ss:$68 sps:$4 sm:$0xff]  }
 0x39a   : > { %7077 = vmatprep.mubr.msk.bf16.mxu0 %vm4187_vm0, %v10530_v40 }
 0x39c   : > { %5247 = vmatpush1.bf16.msra.mxu0 %v8341_v0  ;;  %5314 = vmatpush1.bf16.msra.mxu1 %v8342_v32  ;;  %v8357_v0 = vld [vmem:[%s9755_s21 + $0xb38] ss:$68 sps:$4 sm:$0xff]   ;;  %v8358_v32 = vld [vmem:[%s9755_s21 + $0x9a8] ss:$68 sps:$4 sm:$0xff]  }
 0x39d   : > { %5248 = vmatprep.subr.bf16.mxu0 %v8343_v2  ;;  %5315 = vmatprep.subr.bf16.mxu1 %v8344_v6  ;;  %v8359_v2 = vld [vmem:[%s9755_s21 + $0xbc4] ss:$68 sps:$4 sm:$0xff]   ;;  %v8360_v6 = vld [vmem:[%s9755_s21 + $0xa34] ss:$68 sps:$4 sm:$0xff]  }
 0x39e   : > { %v4813_v4 = vpop.f32.mrb[12].mxu0  ;;  %v4895_v9 = vpop.f32.mrb[12].mxu1 }
 0x39f   : > { %v7369_v10 = vadd.f32 %v4813_v4, %v10693_v63  ;;  %v7371_v7 = vadd.f32 %v4895_v9, %v10698_v30  ;;  %v4815_v25 = vpop.f32.mrb[13].mxu0  ;;  %v4897_v52 = vpop.f32.mrb[13].mxu1  ;;  %v8361_v4 = vld [vmem:[%s9755_s21 + $0xbc0] ss:$68 sps:$4 sm:$0xff]   ;;  %v8362_v9 = vld [vmem:[%s9755_s21 + $0xa30] ss:$68 sps:$4 sm:$0xff]  }
 0x3a0   : > { %v7370_v23 = vadd.f32 %v4815_v25, %v10705_v1  ;;  %v7372_v8 = vadd.f32 %v4897_v52, %v10710_v5  ;;  %v4817_v19 = vpop.f32.mrb[14].mxu0  ;;  %v4899_v39 = vpop.f32.mrb[14].mxu1  ;;  %5249 = vmatpush1.bf16.msra.mxu0 %v8345_v20  ;;  %5316 = vmatpush1.bf16.msra.mxu1 %v8346_v21  ;;  %v8365_v25 = vld [vmem:[%s9755_s21 + $0xc48] ss:$68 sps:$4 sm:$0xff]   ;;  %v8366_v52 = vld [vmem:[%s9755_s21 + $0xab8] ss:$68 sps:$4 sm:$0xff]  }
 0x3a1   : > { %v4818_v47 = vpop.f32.mrb[15].mxu0  ;;  %v4900_v36 = vpop.f32.mrb[15].mxu1  ;;  %5250 = vmatprep.subr.bf16.mxu0 %v8347_v45  ;;  %5326 = vmatprep.subr.bf16.mxu1 %v8348_v37  ;;  %v8369_v19 = vld [vmem:[%s9755_s21 + $0xcd0] ss:$68 sps:$4 sm:$0xff]   ;;  %v8370_v39 = vld [vmem:[%s9755_s21 + $0xb40] ss:$68 sps:$4 sm:$0xff]  }
 0x3a2   : > { %v5004_v29 = vcombine.low %v7369_v10, %v7370_v23  ;;  %v5005_v42 = vcombine.low %v7371_v7, %v7372_v8  ;;  %v8363_v10 = vld [vmem:[%s9755_s21 + $0xc4c] ss:$68 sps:$4 sm:$0xff]   ;;  %v8364_v7 = vld [vmem:[%s9755_s21 + $0xabc] ss:$68 sps:$4 sm:$0xff]   ;;  %v8367_v23 = vld [vmem:[%s9755_s21 + $0xcd4] ss:$68 sps:$4 sm:$0xff]  }
 0x3a3   : > { %5318 = vmatmul.mubr.bf16.vlgmr.msra.gmra.mrb[24].mxu1 %v10524_v3  ;;  %v8368_v8 = vld [vmem:[%s9755_s21 + $0xb44] ss:$68 sps:$4 sm:$0xff]   ;;  %v8371_v20 = vld [vmem:[%s9755_s21 + $0xd5c] ss:$68 sps:$4 sm:$0xff]   ;;  %v8372_v21 = vld [vmem:[%s9755_s21 + $0xbcc] ss:$68 sps:$4 sm:$0xff]  }
 0x3a4   : > { %5020 = vst [vmem:[%s10239_s24 + $0x30] sm:$0x77] %v5004_v29  ;;  %5021 = vst [vmem:[%s10239_s24 + $0x38] sm:$0x77] %v5005_v42  ;;  %5251 = vmatpush1.bf16.msra.mxu0 %v8349_v51  ;;  %5327 = vmatpush1.bf16.msra.mxu1 %v8350_v31  ;;  %v8373_v47 = vld [vmem:[%s9755_s21 + $0xd58] ss:$68 sps:$4 sm:$0xff]  }
 0x3a5   : > { %5252 = vmatprep.subr.bf16.mxu0 %v8351_v43  ;;  %5328 = vmatprep.subr.bf16.mxu1 %v8352_v46  ;;  %v8374_v36 = vld [vmem:[%s9755_s21 + $0xbc8] ss:$68 sps:$4 sm:$0xff]   ;;  %v8375_v45 = vld [vmem:[%s9755_s21 + $0xc54] ss:$68 sps:$4 sm:$0xff]   ;;  %v8377_v43 = vld [vmem:[%s9755_s21 + $0xcdc] ss:$68 sps:$4 sm:$0xff]  }
 0x3a6   : > { %7078 = vmatprep.mubr.msk.bf16.mxu1 %vm4187_vm0, %v10530_v40  ;;  %v8376_v42 = vld [vmem:[%s9755_s21 + $0xc50] ss:$68 sps:$4 sm:$0xff]   ;;  %v8378_v46 = vld [vmem:[%s9755_s21 + $0x24] ss:$68 sps:$4 sm:$0xff]  }
 0x3a8   : > { %5253 = vmatpush1.bf16.msra.mxu0 %v8353_v44  ;;  %5329 = vmatpush1.bf16.msra.mxu1 %v8354_v50  ;;  %v8379_v44 = vld [vmem:[%s9755_s21 + $0xcd8] ss:$68 sps:$4 sm:$0xff]   ;;  %v8380_v50 = vld [vmem:[%s9755_s21 + $0x20] ss:$68 sps:$4 sm:$0xff]  }
 0x3a9   : > { %5254 = vmatprep.subr.bf16.mxu0 %v8355_v62  ;;  %5330 = vmatprep.subr.bf16.mxu1 %v8356_v48  ;;  %v8381_v62 = vld [vmem:[%s9755_s21 + $0xd64] ss:$68 sps:$4 sm:$0xff]   ;;  %v8382_v48 = vld [vmem:[%s9755_s21 + $0xac] ss:$68 sps:$4 sm:$0xff]  }
 0x3ac   : > { %5255 = vmatpush1.bf16.msra.mxu0 %v8357_v0  ;;  %5331 = vmatpush1.bf16.msra.mxu1 %v8358_v32  ;;  %v8383_v32 = vld [vmem:[%s9755_s21 + $0xd60] ss:$68 sps:$4 sm:$0xff]  }
 0x3ad   : > { %5256 = vmatprep.subr.bf16.mxu0 %v8359_v2  ;;  %5332 = vmatprep.subr.bf16.mxu1 %v8360_v6  ;;  %v8384_v2 = vld [vmem:[%s9755_s21 + $0xa8] ss:$68 sps:$4 sm:$0xff]   ;;  %v8385_v6 = vld [vmem:[%s9755_s21 + $0x134] ss:$68 sps:$4 sm:$0xff]  }
 0x3b0   : > { %5257 = vmatpush1.bf16.msra.mxu0 %v8361_v4  ;;  %5333 = vmatpush1.bf16.msra.mxu1 %v8362_v9 }
 0x3b1   : > { %5258 = vmatprep.subr.bf16.mxu0 %v8363_v10  ;;  %5334 = vmatprep.subr.bf16.mxu1 %v8364_v7 }
 0x3b4   : > { %5259 = vmatpush1.bf16.msra.mxu0 %v8365_v25  ;;  %5335 = vmatpush1.bf16.msra.mxu1 %v8366_v52  ;;  %v8386_v25 = vld [vmem:[%s9755_s21 + $0x130] ss:$68 sps:$4 sm:$0xff]  }
 0x3b5   : > { %5260 = vmatprep.subr.bf16.mxu0 %v8367_v23  ;;  %5336 = vmatprep.subr.bf16.mxu1 %v8368_v8  ;;  %v8387_v23 = vld [vmem:[%s9755_s21 + $0x1bc] ss:$68 sps:$4 sm:$0xff]  }
 0x3b6   : > { %v8389_v8 = vld [vmem:[%s9755_s21 + $0x1b8] ss:$68 sps:$4 sm:$0xff]  }
 0x3b8   : > { %5261 = vmatpush1.bf16.msra.mxu0 %v8369_v19  ;;  %5337 = vmatpush1.bf16.msra.mxu1 %v8370_v39  ;;  %v8390_v19 = vld [vmem:[%s9755_s21 + $0x28] ss:$68 sps:$4 sm:$0xff]   ;;  %v8392_v39 = vld [vmem:[%s9755_s21 + $0xb4] ss:$68 sps:$4 sm:$0xff]  }
 0x3b9   : > { %5262 = vmatprep.subr.bf16.mxu0 %v8371_v20  ;;  %5338 = vmatprep.subr.bf16.mxu1 %v8372_v21  ;;  %v8393_v20 = vld [vmem:[%s9755_s21 + $0x240] ss:$68 sps:$4 sm:$0xff]   ;;  %v8394_v21 = vld [vmem:[%s9755_s21 + $0xb0] ss:$68 sps:$4 sm:$0xff]  }
 0x3bc   : > { %5263 = vmatpush1.bf16.msra.mxu0 %v8373_v47  ;;  %5339 = vmatpush1.bf16.msra.mxu1 %v8374_v36  ;;  %v8395_v47 = vld [vmem:[%s9755_s21 + $0x2cc] ss:$68 sps:$4 sm:$0xff]   ;;  %v8396_v36 = vld [vmem:[%s9755_s21 + $0x13c] ss:$68 sps:$4 sm:$0xff]  }
 0x3bd   : > { %5264 = vmatprep.subr.bf16.mxu0 %v10028_v27  ;;  %5340 = vmatprep.subr.bf16.mxu1 %v8375_v45  ;;  %v8397_v45 = vld [vmem:[%s9755_s21 + $0x2c8] ss:$68 sps:$4 sm:$0xff]  }
 0x3be   : > { %v7127_v37 = vpop.f32.mrb[16].mxu0 }
 0x3bf   : > { %v7128_v29 = vpop.f32.mrb[17].mxu0 }
 0x3c0   : > { %5265 = vmatpush1.bf16.msra.mxu0 %v10034_v33  ;;  %5341 = vmatpush1.bf16.msra.mxu1 %v8376_v42  ;;  %v7129_v51 = vadd.f32 %v7128_v29, %v7127_v37  ;;  %v7130_v31 = vpop.f32.mrb[18].mxu0  ;;  %v10763_v33 = vld [vmem:[%s10171_s11 + $0x10] ss:$0 sm:$0xff]  ;;  %v8400_v42 = vld [vmem:[%s9755_s21 + $0x1c4] ss:$68 sps:$4 sm:$0xff]  }
 0x3c1   : > { %5342 = vmatprep.subr.bf16.mxu1 %v8377_v43  ;;  %5367 = vmatprep.subr.bf16.mxu0 %v8378_v46  ;;  %v7131_v27 = vpop.f32.mrb[19].mxu0  ;;  %v8398_v37 = vld [vmem:[%s9755_s21 + $0x138] ss:$68 sps:$4 sm:$0xff]   ;;  %v8402_v31 = vld [vmem:[%s9755_s21 + $0x1c0] ss:$68 sps:$4 sm:$0xff]  }
 0x3c2   : > { %v4937_v0 = vadd.f32 %v7129_v51, %v10763_v33  ;;  %v8399_v29 = vld [vmem:[%s9755_s21 + $0x354] ss:$68 sps:$4 sm:$0xff]   ;;  %v8403_v43 = vld [vmem:[%s9755_s21 + $0x3dc] ss:$68 sps:$4 sm:$0xff]   ;;  %v8404_v46 = vld [vmem:[%s9755_s21 + $0x24c] ss:$68 sps:$4 sm:$0xff]  }
 0x3c3   : > { %5277 = vmatmul.mubr.bf16.vlgmr.msra.gmra.mrb[24].mxu0 %v10609_v24  ;;  %v8401_v51 = vld [vmem:[%s9755_s21 + $0x350] ss:$68 sps:$4 sm:$0xff]   ;;  %v8405_v27 = vld [vmem:[%s9755_s21 + $0x3d8] ss:$68 sps:$4 sm:$0xff]  }
 0x3c4   : > { %5343 = vmatpush1.bf16.msra.mxu1 %v8379_v44  ;;  %5368 = vmatpush1.bf16.msra.mxu0 %v8380_v50  ;;  %v8406_v44 = vld [vmem:[%s9755_s21 + $0x248] ss:$68 sps:$4 sm:$0xff]  }
 0x3c5   : > { %5344 = vmatprep.subr.bf16.mxu1 %v8381_v62  ;;  %5369 = vmatprep.subr.bf16.mxu0 %v8382_v48  ;;  %v8407_v50 = vld [vmem:[%s9755_s21 + $0x464] ss:$68 sps:$4 sm:$0xff]   ;;  %v8408_v62 = vld [vmem:[%s9755_s21 + $0x2d4] ss:$68 sps:$4 sm:$0xff]  }
 0x3c6   : > { %5399 = vmatprep.mubr.bf16.mxu0 %v10446_v61  ;;  %v8409_v48 = vld [vmem:[%s9755_s21 + $0x460] ss:$68 sps:$4 sm:$0xff]  }
 0x3c8   : > { %5345 = vmatpush1.bf16.msra.mxu1 %v8383_v32  ;;  %5370 = vmatpush1.bf16.msra.mxu0 %v8384_v2  ;;  %v8411_v32 = vld [vmem:[%s9755_s21 + $0x4ec] ss:$68 sps:$4 sm:$0xff]   ;;  %v8412_v2 = vld [vmem:[%s9755_s21 + $0x35c] ss:$68 sps:$4 sm:$0xff]  }
 0x3c9   : > { %5346 = vmatprep.subr.bf16.mxu1 %v10031_v28  ;;  %5371 = vmatprep.subr.bf16.mxu0 %v8385_v6  ;;  %v8388_v28 = vld [vmem:[%s9755_s21 + $0x2c] ss:$68 sps:$4 sm:$0xff]  }
 0x3ca   : > { %v4976_v4 = vpop.f32.mrb[16].mxu1  ;;  %v8413_v6 = vld [vmem:[%s9755_s21 + $0x4e8] ss:$68 sps:$4 sm:$0xff]  }
 0x3cb   : > { %v4977_v9 = vadd.f32 %v4976_v4, %v4937_v0  ;;  %v4978_v10 = vpop.f32.mrb[17].mxu1  ;;  %v8410_v0 = vld [vmem:[%s9755_s21 + $0x2d0] ss:$68 sps:$4 sm:$0xff]   ;;  %v8414_v4 = vld [vmem:[%s9755_s21 + $0x358] ss:$68 sps:$4 sm:$0xff]  }
 0x3cc   : > { %v4979_v7 = vpop.f32.mrb[18].mxu1  ;;  %5347 = vmatpush1.bf16.msra.mxu1 %v10037_v34  ;;  %5372 = vmatpush1.bf16.msra.mxu0 %v8386_v25  ;;  %v8391_v34 = vld [vmem:[%s9755_s21 + $0x244] ss:$68 sps:$4 sm:$0xff]  }
 0x3cd   : > { %5022 = vst [vmem:[%s10239_s24 + $0x40] sm:$0x7] %v4977_v9  ;;  %v4980_v52 = vpop.f32.mrb[19].mxu1  ;;  %5373 = vmatprep.subr.bf16.mxu0 %v8387_v23  ;;  %5449 = vmatprep.subr.bf16.mxu1 %v8388_v28  ;;  %v8415_v9 = vld [vmem:[%s9755_s21 + $0x574] ss:$68 sps:$4 sm:$0xff]  }
 0x3ce   : > { %v8416_v10 = vld [vmem:[%s9755_s21 + $0x3e4] ss:$68 sps:$4 sm:$0xff]   ;;  %v8417_v7 = vld [vmem:[%s9755_s21 + $0x570] ss:$68 sps:$4 sm:$0xff]   ;;  %v8419_v52 = vld [vmem:[%s9755_s21 + $0x5fc] ss:$68 sps:$4 sm:$0xff]  }
 0x3cf   : > { %5359 = vmatmul.mubr.bf16.vlgmr.msra.gmra.mrb[24].mxu1 %v10609_v24  ;;  %v8418_v25 = vld [vmem:[%s9755_s21 + $0x3e0] ss:$68 sps:$4 sm:$0xff]   ;;  %v8420_v23 = vld [vmem:[%s9755_s21 + $0x46c] ss:$68 sps:$4 sm:$0xff]   ;;  %v8421_v28 = vld [vmem:[%s9755_s21 + $0x5f8] ss:$68 sps:$4 sm:$0xff]  }
 0x3d0   : > { %5374 = vmatpush1.bf16.msra.mxu0 %v8389_v8  ;;  %5450 = vmatpush1.bf16.msra.mxu1 %v8390_v19  ;;  %v8422_v8 = vld [vmem:[%s9755_s21 + $0x468] ss:$68 sps:$4 sm:$0xff]  }
 0x3d1   : > { %5375 = vmatprep.subr.bf16.mxu0 %v8391_v34  ;;  %5451 = vmatprep.subr.bf16.mxu1 %v8392_v39  ;;  %v8423_v19 = vld [vmem:[%s9755_s21 + $0x684] ss:$68 sps:$4 sm:$0xff]   ;;  %v8424_v34 = vld [vmem:[%s9755_s21 + $0x4f4] ss:$68 sps:$4 sm:$0xff]  }
 0x3d2   : > { %5481 = vmatprep.mubr.bf16.mxu1 %v10446_v61  ;;  %v8425_v39 = vld [vmem:[%s9755_s21 + $0x680] ss:$68 sps:$4 sm:$0xff]  }
 0x3d4   : > { %5376 = vmatpush1.bf16.msra.mxu0 %v8393_v20  ;;  %5452 = vmatpush1.bf16.msra.mxu1 %v8394_v21  ;;  %v8426_v20 = vld [vmem:[%s9755_s21 + $0x4f0] ss:$68 sps:$4 sm:$0xff]  }
 0x3d5   : > { %5377 = vmatprep.subr.bf16.mxu0 %v8395_v47  ;;  %5453 = vmatprep.subr.bf16.mxu1 %v8396_v36  ;;  %v8427_v21 = vld [vmem:[%s9755_s21 + $0x70c] ss:$68 sps:$4 sm:$0xff]   ;;  %v8428_v47 = vld [vmem:[%s9755_s21 + $0x57c] ss:$68 sps:$4 sm:$0xff]  }
 0x3d6   : > { %v8429_v36 = vld [vmem:[%s9755_s21 + $0x708] ss:$68 sps:$4 sm:$0xff]  }
 0x3d8   : > { %5378 = vmatpush1.bf16.msra.mxu0 %v8397_v45  ;;  %5454 = vmatpush1.bf16.msra.mxu1 %v8398_v37  ;;  %v8430_v45 = vld [vmem:[%s9755_s21 + $0x578] ss:$68 sps:$4 sm:$0xff]  }
 0x3d9   : > { %5379 = vmatprep.subr.bf16.mxu0 %v8399_v29  ;;  %5455 = vmatprep.subr.bf16.mxu1 %v8400_v42  ;;  %v8431_v37 = vld [vmem:[%s9755_s21 + $0x794] ss:$68 sps:$4 sm:$0xff]   ;;  %v8432_v29 = vld [vmem:[%s9755_s21 + $0x604] ss:$68 sps:$4 sm:$0xff]  }
 0x3da   : > { %v8433_v42 = vld [vmem:[%s9755_s21 + $0x790] ss:$68 sps:$4 sm:$0xff]  }
 0x3dc   : > { %5380 = vmatpush1.bf16.msra.mxu0 %v8401_v51  ;;  %5456 = vmatpush1.bf16.msra.mxu1 %v8402_v31  ;;  %v8434_v51 = vld [vmem:[%s9755_s21 + $0x600] ss:$68 sps:$4 sm:$0xff]  }
 0x3dd   : > { %5381 = vmatprep.subr.bf16.mxu0 %v8403_v43  ;;  %5457 = vmatprep.subr.bf16.mxu1 %v8404_v46  ;;  %v8435_v31 = vld [vmem:[%s9755_s21 + $0x81c] ss:$68 sps:$4 sm:$0xff]   ;;  %v8436_v43 = vld [vmem:[%s9755_s21 + $0x68c] ss:$68 sps:$4 sm:$0xff]  }
 0x3de   : > { %v8437_v46 = vld [vmem:[%s9755_s21 + $0x818] ss:$68 sps:$4 sm:$0xff]  }
 0x3e0   : > { %5382 = vmatpush1.bf16.msra.mxu0 %v8405_v27  ;;  %5458 = vmatpush1.bf16.msra.mxu1 %v8406_v44  ;;  %v8438_v27 = vld [vmem:[%s9755_s21 + $0x688] ss:$68 sps:$4 sm:$0xff]  }
 0x3e1   : > { %5383 = vmatprep.subr.bf16.mxu0 %v8407_v50  ;;  %5459 = vmatprep.subr.bf16.mxu1 %v8408_v62  ;;  %v8439_v44 = vld [vmem:[%s9755_s21 + $0x8a4] ss:$68 sps:$4 sm:$0xff]   ;;  %v8440_v50 = vld [vmem:[%s9755_s21 + $0x714] ss:$68 sps:$4 sm:$0xff]  }
 0x3e2   : > { %v8441_v62 = vld [vmem:[%s9755_s21 + $0x8a0] ss:$68 sps:$4 sm:$0xff]  }
 0x3e4   : > { %5384 = vmatpush1.bf16.msra.mxu0 %v8409_v48  ;;  %5460 = vmatpush1.bf16.msra.mxu1 %v8410_v0  ;;  %v8442_v48 = vld [vmem:[%s9755_s21 + $0x710] ss:$68 sps:$4 sm:$0xff]  }
 0x3e5   : > { %5385 = vmatprep.subr.bf16.mxu0 %v8411_v32  ;;  %5461 = vmatprep.subr.bf16.mxu1 %v8412_v2  ;;  %v8443_v0 = vld [vmem:[%s9755_s21 + $0x92c] ss:$68 sps:$4 sm:$0xff]   ;;  %v8444_v32 = vld [vmem:[%s9755_s21 + $0x79c] ss:$68 sps:$4 sm:$0xff]  }
 0x3e6   : > { %v8445_v2 = vld [vmem:[%s9755_s21 + $0x928] ss:$68 sps:$4 sm:$0xff]  }
 0x3e8   : > { %5386 = vmatpush1.bf16.msra.mxu0 %v8413_v6  ;;  %5462 = vmatpush1.bf16.msra.mxu1 %v8414_v4  ;;  %v8446_v6 = vld [vmem:[%s9755_s21 + $0x798] ss:$68 sps:$4 sm:$0xff]  }
 0x3e9   : > { %5387 = vmatprep.subr.bf16.mxu0 %v8415_v9  ;;  %5463 = vmatprep.subr.bf16.mxu1 %v8416_v10  ;;  %v8447_v4 = vld [vmem:[%s9755_s21 + $0x9b4] ss:$68 sps:$4 sm:$0xff]   ;;  %v8448_v9 = vld [vmem:[%s9755_s21 + $0x824] ss:$68 sps:$4 sm:$0xff]  }
 0x3ea   : > { %v8449_v10 = vld [vmem:[%s9755_s21 + $0x9b0] ss:$68 sps:$4 sm:$0xff]  }
 0x3ec   : > { %5388 = vmatpush1.bf16.msra.mxu0 %v8417_v7  ;;  %5464 = vmatpush1.bf16.msra.mxu1 %v8418_v25  ;;  %v8450_v7 = vld [vmem:[%s9755_s21 + $0x820] ss:$68 sps:$4 sm:$0xff]  }
 0x3ed   : > { %5389 = vmatprep.subr.bf16.mxu0 %v8419_v52  ;;  %5465 = vmatprep.subr.bf16.mxu1 %v8420_v23  ;;  %v8451_v25 = vld [vmem:[%s9755_s21 + $0xa3c] ss:$68 sps:$4 sm:$0xff]   ;;  %v8452_v52 = vld [vmem:[%s9755_s21 + $0x8ac] ss:$68 sps:$4 sm:$0xff]  }
 0x3ee   : > { %v8453_v23 = vld [vmem:[%s9755_s21 + $0xa38] ss:$68 sps:$4 sm:$0xff]  }
 0x3f0   : > { %5390 = vmatpush1.bf16.msra.mxu0 %v8421_v28  ;;  %5466 = vmatpush1.bf16.msra.mxu1 %v8422_v8  ;;  %v8454_v28 = vld [vmem:[%s9755_s21 + $0x8a8] ss:$68 sps:$4 sm:$0xff]  }
 0x3f1   : > { %5391 = vmatprep.subr.bf16.mxu0 %v8423_v19  ;;  %5467 = vmatprep.subr.bf16.mxu1 %v8424_v34  ;;  %v8455_v8 = vld [vmem:[%s9755_s21 + $0xac4] ss:$68 sps:$4 sm:$0xff]   ;;  %v8456_v19 = vld [vmem:[%s9755_s21 + $0x934] ss:$68 sps:$4 sm:$0xff]  }
 0x3f2   : > { %v8457_v34 = vld [vmem:[%s9755_s21 + $0xac0] ss:$68 sps:$4 sm:$0xff]  }
 0x3f4   : > { %5392 = vmatpush1.bf16.msra.mxu0 %v8425_v39  ;;  %5468 = vmatpush1.bf16.msra.mxu1 %v8426_v20  ;;  %v8458_v39 = vld [vmem:[%s9755_s21 + $0x930] ss:$68 sps:$4 sm:$0xff]  }
 0x3f5   : > { %5393 = vmatprep.subr.bf16.mxu0 %v8427_v21  ;;  %5469 = vmatprep.subr.bf16.mxu1 %v8428_v47  ;;  %v8459_v20 = vld [vmem:[%s9755_s21 + $0xb4c] ss:$68 sps:$4 sm:$0xff]   ;;  %v8460_v21 = vld [vmem:[%s9755_s21 + $0x9bc] ss:$68 sps:$4 sm:$0xff]  }
 0x3f6   : > { %v8461_v47 = vld [vmem:[%s9755_s21 + $0xb48] ss:$68 sps:$4 sm:$0xff]  }
 0x3f8   : > { %5394 = vmatpush1.bf16.msra.mxu0 %v8429_v36  ;;  %5470 = vmatpush1.bf16.msra.mxu1 %v8430_v45  ;;  %v8462_v36 = vld [vmem:[%s9755_s21 + $0x9b8] ss:$68 sps:$4 sm:$0xff]  }
 0x3f9   : > { %5395 = vmatprep.subr.bf16.mxu0 %v8431_v37  ;;  %5471 = vmatprep.subr.bf16.mxu1 %v8432_v29  ;;  %v8463_v45 = vld [vmem:[%s9755_s21 + $0xbd4] ss:$68 sps:$4 sm:$0xff]   ;;  %v8464_v37 = vld [vmem:[%s9755_s21 + $0xa44] ss:$68 sps:$4 sm:$0xff]  }
 0x3fa   : > { %v8465_v29 = vld [vmem:[%s9755_s21 + $0xbd0] ss:$68 sps:$4 sm:$0xff]  }
 0x3fc   : > { %5396 = vmatpush1.bf16.msra.mxu0 %v8433_v42  ;;  %5472 = vmatpush1.bf16.msra.mxu1 %v8434_v51  ;;  %v8466_v42 = vld [vmem:[%s9755_s21 + $0xa40] ss:$68 sps:$4 sm:$0xff]  }
 0x3fd   : > { %5397 = vmatprep.subr.bf16.mxu0 %v8435_v31  ;;  %5473 = vmatprep.subr.bf16.mxu1 %v8436_v43  ;;  %v8467_v51 = vld [vmem:[%s9755_s21 + $0xc5c] ss:$68 sps:$4 sm:$0xff]   ;;  %v8468_v31 = vld [vmem:[%s9755_s21 + $0xacc] ss:$68 sps:$4 sm:$0xff]  }
 0x3fe   : > { %v8469_v43 = vld [vmem:[%s9755_s21 + $0xc58] ss:$68 sps:$4 sm:$0xff]  }
 0x400   : > { %5398 = vmatpush1.bf16.msra.mxu0 %v8437_v46  ;;  %5474 = vmatpush1.bf16.msra.mxu1 %v8438_v27  ;;  %v8470_v46 = vld [vmem:[%s9755_s21 + $0xac8] ss:$68 sps:$4 sm:$0xff]  }
 0x401   : > { %5408 = vmatprep.subr.bf16.mxu0 %v8439_v44  ;;  %5475 = vmatprep.subr.bf16.mxu1 %v8440_v50  ;;  %v8471_v27 = vld [vmem:[%s9755_s21 + $0xce4] ss:$68 sps:$4 sm:$0xff]   ;;  %v8472_v44 = vld [vmem:[%s9755_s21 + $0xb54] ss:$68 sps:$4 sm:$0xff]  }
 0x402   : > { %v8473_v50 = vld [vmem:[%s9755_s21 + $0xce0] ss:$68 sps:$4 sm:$0xff]  }
 0x403   : > { %5400 = vmatmul.mubr.bf16.vlgmr.msra.gmra.mrb[28].mxu0 %v10524_v3 }
 0x404   : > { %5409 = vmatpush1.bf16.msra.mxu0 %v8441_v62  ;;  %5476 = vmatpush1.bf16.msra.mxu1 %v8442_v48  ;;  %v8474_v62 = vld [vmem:[%s9755_s21 + $0xb50] ss:$68 sps:$4 sm:$0xff]  }
 0x405   : > { %5410 = vmatprep.subr.bf16.mxu0 %v8443_v0  ;;  %5477 = vmatprep.subr.bf16.mxu1 %v8444_v32  ;;  %v8475_v48 = vld [vmem:[%s9755_s21 + $0xd6c] ss:$68 sps:$4 sm:$0xff]   ;;  %v8476_v0 = vld [vmem:[%s9755_s21 + $0xbdc] ss:$68 sps:$4 sm:$0xff]  }
 0x406   : > { %7079 = vmatprep.mubr.msk.bf16.mxu0 %vm4187_vm0, %v10530_v40  ;;  %v8477_v32 = vld [vmem:[%s9755_s21 + $0xd68] ss:$68 sps:$4 sm:$0xff]  }
 0x408   : > { %5411 = vmatpush1.bf16.msra.mxu0 %v8445_v2  ;;  %5478 = vmatpush1.bf16.msra.mxu1 %v8446_v6  ;;  %v8478_v2 = vld [vmem:[%s9755_s21 + $0xbd8] ss:$68 sps:$4 sm:$0xff]   ;;  %v8479_v6 = vld [vmem:[%s9755_s21 + $0xc64] ss:$68 sps:$4 sm:$0xff]  }
 0x409   : > { %5412 = vmatprep.subr.bf16.mxu0 %v8447_v4  ;;  %5479 = vmatprep.subr.bf16.mxu1 %v8448_v9 }
 0x40c   : > { %5413 = vmatpush1.bf16.msra.mxu0 %v8449_v10  ;;  %5480 = vmatpush1.bf16.msra.mxu1 %v8450_v7 }
 0x40d   : > { %5414 = vmatprep.subr.bf16.mxu0 %v8451_v25  ;;  %5490 = vmatprep.subr.bf16.mxu1 %v8452_v52  ;;  %v8480_v52 = vld [vmem:[%s9755_s21 + $0xc60] ss:$68 sps:$4 sm:$0xff]  }
 0x40f   : > { %5482 = vmatmul.mubr.bf16.vlgmr.msra.gmra.mrb[28].mxu1 %v10524_v3 }
 0x410   : > { %5415 = vmatpush1.bf16.msra.mxu0 %v8453_v23  ;;  %5491 = vmatpush1.bf16.msra.mxu1 %v8454_v28  ;;  %v8482_v28 = vld [vmem:[%s9755_s21 + $0x34] ss:$68 sps:$4 sm:$0xff]  }
 0x411   : > { %5416 = vmatprep.subr.bf16.mxu0 %v8455_v8  ;;  %5492 = vmatprep.subr.bf16.mxu1 %v8456_v19  ;;  %v8486_v19 = vld [vmem:[%s9755_s21 + $0xbc] ss:$68 sps:$4 sm:$0xff]  }
 0x412   : > { %7080 = vmatprep.mubr.msk.bf16.mxu1 %vm4187_vm0, %v10530_v40 }
 0x414   : > { %5417 = vmatpush1.bf16.msra.mxu0 %v8457_v34  ;;  %5493 = vmatpush1.bf16.msra.mxu1 %v8458_v39  ;;  %v8487_v34 = vld [vmem:[%s9755_s21 + $0xd70] ss:$68 sps:$4 sm:$0xff]   ;;  %v8488_v39 = vld [vmem:[%s9755_s21 + $0xb8] ss:$68 sps:$4 sm:$0xff]  }
 0x415   : > { %5418 = vmatprep.subr.bf16.mxu0 %v8459_v20  ;;  %5494 = vmatprep.subr.bf16.mxu1 %v8460_v21  ;;  %v8489_v20 = vld [vmem:[%s9755_s21 + $0x144] ss:$68 sps:$4 sm:$0xff]  }
 0x418   : > { %5419 = vmatpush1.bf16.msra.mxu0 %v8461_v47  ;;  %5495 = vmatpush1.bf16.msra.mxu1 %v8462_v36 }
 0x419   : > { %5420 = vmatprep.subr.bf16.mxu0 %v8463_v45  ;;  %5496 = vmatprep.subr.bf16.mxu1 %v8464_v37 }
 0x41c   : > { %5421 = vmatpush1.bf16.msra.mxu0 %v8465_v29  ;;  %5497 = vmatpush1.bf16.msra.mxu1 %v8466_v42  ;;  %v8490_v29 = vld [vmem:[%s9755_s21 + $0x140] ss:$68 sps:$4 sm:$0xff]  }
 0x41d   : > { %5422 = vmatprep.subr.bf16.mxu0 %v8467_v51  ;;  %5498 = vmatprep.subr.bf16.mxu1 %v8468_v31  ;;  %v8492_v51 = vld [vmem:[%s9755_s21 + $0x3c] ss:$68 sps:$4 sm:$0xff]  }
 0x420   : > { %5423 = vmatpush1.bf16.msra.mxu0 %v8469_v43  ;;  %5499 = vmatpush1.bf16.msra.mxu1 %v8470_v46  ;;  %v8496_v43 = vld [vmem:[%s9755_s21 + $0xc4] ss:$68 sps:$4 sm:$0xff]   ;;  %v8497_v46 = vld [vmem:[%s9755_s21 + $0x250] ss:$68 sps:$4 sm:$0xff]  }
 0x421   : > { %5424 = vmatprep.subr.bf16.mxu0 %v8471_v27  ;;  %5500 = vmatprep.subr.bf16.mxu1 %v8472_v44  ;;  %v8498_v27 = vld [vmem:[%s9755_s21 + $0xc0] ss:$68 sps:$4 sm:$0xff]  }
 0x422   : > { %v8499_v44 = vld [vmem:[%s9755_s21 + $0x2dc] ss:$68 sps:$4 sm:$0xff]  }
 0x424   : > { %5425 = vmatpush1.bf16.msra.mxu0 %v8473_v50  ;;  %5501 = vmatpush1.bf16.msra.mxu1 %v8474_v62  ;;  %v8500_v50 = vld [vmem:[%s9755_s21 + $0x14c] ss:$68 sps:$4 sm:$0xff]   ;;  %v8501_v62 = vld [vmem:[%s9755_s21 + $0x2d8] ss:$68 sps:$4 sm:$0xff]  }
 0x425   : > { %5426 = vmatprep.subr.bf16.mxu0 %v8475_v48  ;;  %5502 = vmatprep.subr.bf16.mxu1 %v8476_v0  ;;  %v8502_v48 = vld [vmem:[%s9755_s21 + $0x148] ss:$68 sps:$4 sm:$0xff]  }
 0x426   : > { %v8503_v0 = vld [vmem:[%s9755_s21 + $0x364] ss:$68 sps:$4 sm:$0xff]  }
 0x428   : > { %5427 = vmatpush1.bf16.msra.mxu0 %v8477_v32  ;;  %5503 = vmatpush1.bf16.msra.mxu1 %v8478_v2  ;;  %v8504_v32 = vld [vmem:[%s9755_s21 + $0x1d4] ss:$68 sps:$4 sm:$0xff]   ;;  %v8505_v2 = vld [vmem:[%s9755_s21 + $0x360] ss:$68 sps:$4 sm:$0xff]  }
 0x429   : > { %5428 = vmatprep.subr.bf16.mxu0 %v10187_v53  ;;  %5504 = vmatprep.subr.bf16.mxu1 %v8479_v6  ;;  %v8481_v53 = vld [vmem:[%s9755_s21 + $0xcec] ss:$68 sps:$4 sm:$0xff]  }
 0x42a   : > { %v5114_v4 = vpop.f32.mrb[20].mxu0  ;;  %v8506_v6 = vld [vmem:[%s9755_s21 + $0x1d0] ss:$68 sps:$4 sm:$0xff]  }
 0x42b   : > { %v7373_v9 = vadd.f32 %v5114_v4, %v10195_v38  ;;  %v5116_v10 = vpop.f32.mrb[21].mxu0  ;;  %v8483_v38 = vld [vmem:[%s9755_s21 + $0xce8] ss:$68 sps:$4 sm:$0xff]  }
 0x42c   : > { %v7374_v7 = vadd.f32 %v5116_v10, %v10209_v56  ;;  %v5118_v25 = vpop.f32.mrb[22].mxu0  ;;  %5429 = vmatpush1.bf16.msra.mxu0 %v10217_v58  ;;  %5505 = vmatpush1.bf16.msra.mxu1 %v8480_v52  ;;  %v8484_v56 = vld [vmem:[%s9755_s21 + $0x30] ss:$68 sps:$4 sm:$0xff]   ;;  %v8509_v10 = vld [vmem:[%s9755_s21 + $0x3e8] ss:$68 sps:$4 sm:$0xff]  }
 0x42d   : > { %v5119_v23 = vpop.f32.mrb[23].mxu0  ;;  %5506 = vmatprep.subr.bf16.mxu1 %v8481_v53  ;;  %5531 = vmatprep.subr.bf16.mxu0 %v8482_v28  ;;  %v8485_v58 = vld [vmem:[%s9755_s21 + $0xd74] ss:$68 sps:$4 sm:$0xff]   ;;  %v8507_v4 = vld [vmem:[%s9755_s21 + $0x3ec] ss:$68 sps:$4 sm:$0xff]  }
 0x42e   : > { %v5791_v8 = vcombine.low %v7373_v9, %v7374_v7  ;;  %v8508_v9 = vld [vmem:[%s9755_s21 + $0x25c] ss:$68 sps:$4 sm:$0xff]   ;;  %v8511_v25 = vld [vmem:[%s9755_s21 + $0x474] ss:$68 sps:$4 sm:$0xff]   ;;  %v8512_v52 = vld [vmem:[%s9755_s21 + $0x2e4] ss:$68 sps:$4 sm:$0xff]  }
 0x42f   : > { %5441 = vmatmul.mubr.bf16.vlgmr.msra.gmra.mrb[28].mxu0 %v10609_v24  ;;  %v8510_v7 = vld [vmem:[%s9755_s21 + $0x258] ss:$68 sps:$4 sm:$0xff]   ;;  %v8513_v23 = vld [vmem:[%s9755_s21 + $0x470] ss:$68 sps:$4 sm:$0xff]   ;;  %v8514_v53 = vld [vmem:[%s9755_s21 + $0x2e0] ss:$68 sps:$4 sm:$0xff]  }
 0x430   : > { %7084 = vst [vmem:[%s10239_s24 + $0x44] sm:$0x77] %v5791_v8  ;;  %5507 = vmatpush1.bf16.msra.mxu1 %v8483_v38  ;;  %5532 = vmatpush1.bf16.msra.mxu0 %v8484_v56  ;;  %v8515_v28 = vld [vmem:[%s9755_s21 + $0x4fc] ss:$68 sps:$4 sm:$0xff]   ;;  %v8516_v8 = vld [vmem:[%s9755_s21 + $0x36c] ss:$68 sps:$4 sm:$0xff]  }
 0x431   : > { %5508 = vmatprep.subr.bf16.mxu1 %v8485_v58  ;;  %5533 = vmatprep.subr.bf16.mxu0 %v8486_v19  ;;  %v8517_v38 = vld [vmem:[%s9755_s21 + $0x4f8] ss:$68 sps:$4 sm:$0xff]   ;;  %v8518_v56 = vld [vmem:[%s9755_s21 + $0x368] ss:$68 sps:$4 sm:$0xff]  }
 0x432   : > { %5563 = vmatprep.mubr.bf16.mxu0 %v10446_v61  ;;  %v8519_v58 = vld [vmem:[%s9755_s21 + $0x584] ss:$68 sps:$4 sm:$0xff]   ;;  %v8520_v19 = vld [vmem:[%s9755_s21 + $0x3f4] ss:$68 sps:$4 sm:$0xff]  }
 0x434   : > { %5509 = vmatpush1.bf16.msra.mxu1 %v8487_v34  ;;  %5534 = vmatpush1.bf16.msra.mxu0 %v8488_v39  ;;  %v8521_v34 = vld [vmem:[%s9755_s21 + $0x580] ss:$68 sps:$4 sm:$0xff]   ;;  %v8522_v39 = vld [vmem:[%s9755_s21 + $0x3f0] ss:$68 sps:$4 sm:$0xff]  }
 0x435   : > { %5510 = vmatprep.subr.bf16.mxu1 %v10190_v54  ;;  %5535 = vmatprep.subr.bf16.mxu0 %v8489_v20  ;;  %v8491_v54 = vld [vmem:[%s9755_s21 + $0x1cc] ss:$68 sps:$4 sm:$0xff]  }
 0x436   : > { %v5196_v21 = vpop.f32.mrb[20].mxu1  ;;  %v8523_v20 = vld [vmem:[%s9755_s21 + $0x60c] ss:$68 sps:$4 sm:$0xff]  }
 0x437   : > { %v7375_v47 = vadd.f32 %v5196_v21, %v10200_v55  ;;  %v5198_v36 = vpop.f32.mrb[21].mxu1  ;;  %v8493_v55 = vld [vmem:[%s9755_s21 + $0x1c8] ss:$68 sps:$4 sm:$0xff]   ;;  %v8524_v21 = vld [vmem:[%s9755_s21 + $0x47c] ss:$68 sps:$4 sm:$0xff]  }
 0x438   : > { %v7376_v45 = vadd.f32 %v5198_v36, %v10214_v57  ;;  %v5200_v37 = vpop.f32.mrb[22].mxu1  ;;  %5511 = vmatpush1.bf16.msra.mxu1 %v10220_v59  ;;  %5536 = vmatpush1.bf16.msra.mxu0 %v8490_v29  ;;  %v8494_v57 = vld [vmem:[%s9755_s21 + $0x38] ss:$68 sps:$4 sm:$0xff]   ;;  %v8529_v29 = vld [vmem:[%s9755_s21 + $0x690] ss:$68 sps:$4 sm:$0xff]  }
 0x439   : > { %v5201_v42 = vpop.f32.mrb[23].mxu1  ;;  %5537 = vmatprep.subr.bf16.mxu0 %v8491_v54  ;;  %5613 = vmatprep.subr.bf16.mxu1 %v8492_v51  ;;  %v8495_v59 = vld [vmem:[%s9755_s21 + $0x254] ss:$68 sps:$4 sm:$0xff]   ;;  %v8528_v37 = vld [vmem:[%s9755_s21 + $0x504] ss:$68 sps:$4 sm:$0xff]  }
 0x43a   : > { %v5792_v31 = vcombine.low %v7375_v47, %v7376_v45  ;;  %v8525_v47 = vld [vmem:[%s9755_s21 + $0x608] ss:$68 sps:$4 sm:$0xff]   ;;  %v8526_v36 = vld [vmem:[%s9755_s21 + $0x478] ss:$68 sps:$4 sm:$0xff]   ;;  %v8530_v42 = vld [vmem:[%s9755_s21 + $0x500] ss:$68 sps:$4 sm:$0xff]  }
 0x43b   : > { %5523 = vmatmul.mubr.bf16.vlgmr.msra.gmra.mrb[28].mxu1 %v10609_v24  ;;  %v8527_v45 = vld [vmem:[%s9755_s21 + $0x694] ss:$68 sps:$4 sm:$0xff]   ;;  %v8531_v54 = vld [vmem:[%s9755_s21 + $0x71c] ss:$68 sps:$4 sm:$0xff]   ;;  %v8532_v51 = vld [vmem:[%s9755_s21 + $0x58c] ss:$68 sps:$4 sm:$0xff]  }
 0x43c   : > { %7085 = vst [vmem:[%s10239_s24 + $0x4c] sm:$0x77] %v5792_v31  ;;  %5538 = vmatpush1.bf16.msra.mxu0 %v8493_v55  ;;  %5614 = vmatpush1.bf16.msra.mxu1 %v8494_v57  ;;  %v8533_v31 = vld [vmem:[%s9755_s21 + $0x718] ss:$68 sps:$4 sm:$0xff]   ;;  %v8534_v55 = vld [vmem:[%s9755_s21 + $0x588] ss:$68 sps:$4 sm:$0xff]  }
 0x43d   : > { %5539 = vmatprep.subr.bf16.mxu0 %v8495_v59  ;;  %5615 = vmatprep.subr.bf16.mxu1 %v8496_v43  ;;  %v8535_v57 = vld [vmem:[%s9755_s21 + $0x7a4] ss:$68 sps:$4 sm:$0xff]   ;;  %v8536_v59 = vld [vmem:[%s9755_s21 + $0x614] ss:$68 sps:$4 sm:$0xff]  }
 0x43e   : > { %5645 = vmatprep.mubr.bf16.mxu1 %v10446_v61  ;;  %v8537_v43 = vld [vmem:[%s9755_s21 + $0x7a0] ss:$68 sps:$4 sm:$0xff]  }
 0x440   : > { %5540 = vmatpush1.bf16.msra.mxu0 %v8497_v46  ;;  %5616 = vmatpush1.bf16.msra.mxu1 %v8498_v27  ;;  %v8538_v46 = vld [vmem:[%s9755_s21 + $0x610] ss:$68 sps:$4 sm:$0xff]  }
 0x441   : > { %5541 = vmatprep.subr.bf16.mxu0 %v8499_v44  ;;  %5617 = vmatprep.subr.bf16.mxu1 %v8500_v50  ;;  %v8539_v27 = vld [vmem:[%s9755_s21 + $0x82c] ss:$68 sps:$4 sm:$0xff]   ;;  %v8540_v44 = vld [vmem:[%s9755_s21 + $0x69c] ss:$68 sps:$4 sm:$0xff]  }
 0x442   : > { %v8541_v50 = vld [vmem:[%s9755_s21 + $0x828] ss:$68 sps:$4 sm:$0xff]  }
 0x444   : > { %5542 = vmatpush1.bf16.msra.mxu0 %v8501_v62  ;;  %5618 = vmatpush1.bf16.msra.mxu1 %v8502_v48  ;;  %v8542_v62 = vld [vmem:[%s9755_s21 + $0x698] ss:$68 sps:$4 sm:$0xff]  }
 0x445   : > { %5543 = vmatprep.subr.bf16.mxu0 %v8503_v0  ;;  %5619 = vmatprep.subr.bf16.mxu1 %v8504_v32  ;;  %v8543_v48 = vld [vmem:[%s9755_s21 + $0x8b4] ss:$68 sps:$4 sm:$0xff]   ;;  %v8544_v0 = vld [vmem:[%s9755_s21 + $0x724] ss:$68 sps:$4 sm:$0xff]  }
 0x446   : > { %v8545_v32 = vld [vmem:[%s9755_s21 + $0x8b0] ss:$68 sps:$4 sm:$0xff]  }
 0x448   : > { %5544 = vmatpush1.bf16.msra.mxu0 %v8505_v2  ;;  %5620 = vmatpush1.bf16.msra.mxu1 %v8506_v6  ;;  %v8546_v2 = vld [vmem:[%s9755_s21 + $0x720] ss:$68 sps:$4 sm:$0xff]  }
 0x449   : > { %5545 = vmatprep.subr.bf16.mxu0 %v8507_v4  ;;  %5621 = vmatprep.subr.bf16.mxu1 %v8508_v9  ;;  %v8547_v6 = vld [vmem:[%s9755_s21 + $0x93c] ss:$68 sps:$4 sm:$0xff]   ;;  %v8548_v4 = vld [vmem:[%s9755_s21 + $0x7ac] ss:$68 sps:$4 sm:$0xff]  }
 0x44a   : > { %v8549_v9 = vld [vmem:[%s9755_s21 + $0x938] ss:$68 sps:$4 sm:$0xff]  }
 0x44c   : > { %5546 = vmatpush1.bf16.msra.mxu0 %v8509_v10  ;;  %5622 = vmatpush1.bf16.msra.mxu1 %v8510_v7  ;;  %v8550_v10 = vld [vmem:[%s9755_s21 + $0x7a8] ss:$68 sps:$4 sm:$0xff]  }
 0x44d   : > { %5547 = vmatprep.subr.bf16.mxu0 %v8511_v25  ;;  %5623 = vmatprep.subr.bf16.mxu1 %v8512_v52  ;;  %v8551_v7 = vld [vmem:[%s9755_s21 + $0x9c4] ss:$68 sps:$4 sm:$0xff]   ;;  %v8552_v25 = vld [vmem:[%s9755_s21 + $0x834] ss:$68 sps:$4 sm:$0xff]  }
 0x44e   : > { %v8553_v52 = vld [vmem:[%s9755_s21 + $0x9c0] ss:$68 sps:$4 sm:$0xff]  }
 0x450   : > { %5548 = vmatpush1.bf16.msra.mxu0 %v8513_v23  ;;  %5624 = vmatpush1.bf16.msra.mxu1 %v8514_v53  ;;  %v8554_v23 = vld [vmem:[%s9755_s21 + $0x830] ss:$68 sps:$4 sm:$0xff]  }
 0x451   : > { %5549 = vmatprep.subr.bf16.mxu0 %v8515_v28  ;;  %5625 = vmatprep.subr.bf16.mxu1 %v8516_v8  ;;  %v8555_v53 = vld [vmem:[%s9755_s21 + $0xa4c] ss:$68 sps:$4 sm:$0xff]   ;;  %v8556_v28 = vld [vmem:[%s9755_s21 + $0x8bc] ss:$68 sps:$4 sm:$0xff]  }
 0x452   : > { %v8557_v8 = vld [vmem:[%s9755_s21 + $0xa48] ss:$68 sps:$4 sm:$0xff]  }
 0x454   : > { %5550 = vmatpush1.bf16.msra.mxu0 %v8517_v38  ;;  %5626 = vmatpush1.bf16.msra.mxu1 %v8518_v56  ;;  %v8558_v38 = vld [vmem:[%s9755_s21 + $0x8b8] ss:$68 sps:$4 sm:$0xff]  }
 0x455   : > { %5551 = vmatprep.subr.bf16.mxu0 %v8519_v58  ;;  %5627 = vmatprep.subr.bf16.mxu1 %v8520_v19  ;;  %v8559_v56 = vld [vmem:[%s9755_s21 + $0xad4] ss:$68 sps:$4 sm:$0xff]   ;;  %v8560_v58 = vld [vmem:[%s9755_s21 + $0x944] ss:$68 sps:$4 sm:$0xff]  }
 0x456   : > { %v8561_v19 = vld [vmem:[%s9755_s21 + $0xad0] ss:$68 sps:$4 sm:$0xff]  }
 0x458   : > { %5552 = vmatpush1.bf16.msra.mxu0 %v8521_v34  ;;  %5628 = vmatpush1.bf16.msra.mxu1 %v8522_v39  ;;  %v8562_v34 = vld [vmem:[%s9755_s21 + $0x940] ss:$68 sps:$4 sm:$0xff]  }
 0x459   : > { %5553 = vmatprep.subr.bf16.mxu0 %v8523_v20  ;;  %5629 = vmatprep.subr.bf16.mxu1 %v8524_v21  ;;  %v8563_v39 = vld [vmem:[%s9755_s21 + $0xb5c] ss:$68 sps:$4 sm:$0xff]   ;;  %v8564_v20 = vld [vmem:[%s9755_s21 + $0x9cc] ss:$68 sps:$4 sm:$0xff]  }
 0x45a   : > { %v8565_v21 = vld [vmem:[%s9755_s21 + $0xb58] ss:$68 sps:$4 sm:$0xff]  }
 0x45c   : > { %5554 = vmatpush1.bf16.msra.mxu0 %v8525_v47  ;;  %5630 = vmatpush1.bf16.msra.mxu1 %v8526_v36  ;;  %v8566_v47 = vld [vmem:[%s9755_s21 + $0x9c8] ss:$68 sps:$4 sm:$0xff]  }
 0x45d   : > { %5555 = vmatprep.subr.bf16.mxu0 %v8527_v45  ;;  %5631 = vmatprep.subr.bf16.mxu1 %v8528_v37  ;;  %v8567_v36 = vld [vmem:[%s9755_s21 + $0xbe4] ss:$68 sps:$4 sm:$0xff]   ;;  %v8568_v45 = vld [vmem:[%s9755_s21 + $0xa54] ss:$68 sps:$4 sm:$0xff]  }
 0x45e   : > { %v8569_v37 = vld [vmem:[%s9755_s21 + $0xbe0] ss:$68 sps:$4 sm:$0xff]  }
 0x460   : > { %5556 = vmatpush1.bf16.msra.mxu0 %v8529_v29  ;;  %5632 = vmatpush1.bf16.msra.mxu1 %v8530_v42  ;;  %v8570_v29 = vld [vmem:[%s9755_s21 + $0xa50] ss:$68 sps:$4 sm:$0xff]  }
 0x461   : > { %5557 = vmatprep.subr.bf16.mxu0 %v8531_v54  ;;  %5633 = vmatprep.subr.bf16.mxu1 %v8532_v51  ;;  %v8571_v42 = vld [vmem:[%s9755_s21 + $0xc6c] ss:$68 sps:$4 sm:$0xff]   ;;  %v8572_v54 = vld [vmem:[%s9755_s21 + $0xadc] ss:$68 sps:$4 sm:$0xff]  }
 0x462   : > { %v8573_v51 = vld [vmem:[%s9755_s21 + $0xc68] ss:$68 sps:$4 sm:$0xff]  }
 0x464   : > { %5558 = vmatpush1.bf16.msra.mxu0 %v8533_v31  ;;  %5634 = vmatpush1.bf16.msra.mxu1 %v8534_v55  ;;  %v8574_v31 = vld [vmem:[%s9755_s21 + $0xad8] ss:$68 sps:$4 sm:$0xff]  }
 0x465   : > { %5559 = vmatprep.subr.bf16.mxu0 %v8535_v57  ;;  %5635 = vmatprep.subr.bf16.mxu1 %v8536_v59  ;;  %v8575_v55 = vld [vmem:[%s9755_s21 + $0xcf4] ss:$68 sps:$4 sm:$0xff]   ;;  %v8576_v57 = vld [vmem:[%s9755_s21 + $0xb64] ss:$68 sps:$4 sm:$0xff]  }
 0x466   : > { %v8577_v59 = vld [vmem:[%s9755_s21 + $0xcf0] ss:$68 sps:$4 sm:$0xff]  }
 0x468   : > { %5560 = vmatpush1.bf16.msra.mxu0 %v8537_v43  ;;  %5636 = vmatpush1.bf16.msra.mxu1 %v8538_v46  ;;  %v8578_v43 = vld [vmem:[%s9755_s21 + $0xb60] ss:$68 sps:$4 sm:$0xff]  }
 0x469   : > { %5561 = vmatprep.subr.bf16.mxu0 %v8539_v27  ;;  %5637 = vmatprep.subr.bf16.mxu1 %v8540_v44  ;;  %v8579_v46 = vld [vmem:[%s9755_s21 + $0xd7c] ss:$68 sps:$4 sm:$0xff]   ;;  %v8580_v27 = vld [vmem:[%s9755_s21 + $0xbec] ss:$68 sps:$4 sm:$0xff]  }
 0x46a   : > { %v8581_v44 = vld [vmem:[%s9755_s21 + $0xd78] ss:$68 sps:$4 sm:$0xff]  }
 0x46c   : > { %5562 = vmatpush1.bf16.msra.mxu0 %v8541_v50  ;;  %5638 = vmatpush1.bf16.msra.mxu1 %v8542_v62  ;;  %v8582_v50 = vld [vmem:[%s9755_s21 + $0xbe8] ss:$68 sps:$4 sm:$0xff]   ;;  %v8583_v62 = vld [vmem:[%s9755_s21 + $0xc74] ss:$68 sps:$4 sm:$0xff]  }
 0x46d   : > { %5572 = vmatprep.subr.bf16.mxu0 %v8543_v48  ;;  %5639 = vmatprep.subr.bf16.mxu1 %v8544_v0 }
 0x46f   : > { %5564 = vmatmul.mubr.bf16.vlgmr.msra.gmra.mrb[32].mxu0 %v10524_v3 }
 0x470   : > { %5573 = vmatpush1.bf16.msra.mxu0 %v8545_v32  ;;  %5640 = vmatpush1.bf16.msra.mxu1 %v8546_v2 }
 0x471   : > { %5574 = vmatprep.subr.bf16.mxu0 %v8547_v6  ;;  %5641 = vmatprep.subr.bf16.mxu1 %v8548_v4  ;;  %v8584_v4 = vld [vmem:[%s9755_s21 + $0xc70] ss:$68 sps:$4 sm:$0xff]  }
 0x472   : > { %7081 = vmatprep.mubr.msk.bf16.mxu0 %vm4187_vm0, %v10530_v40 }
 0x474   : > { %5575 = vmatpush1.bf16.msra.mxu0 %v8549_v9  ;;  %5642 = vmatpush1.bf16.msra.mxu1 %v8550_v10  ;;  %v8586_v10 = vld [vmem:[%s9755_s21 + $0x480] ss:$68 sps:$4 sm:$0xff]  }
 0x475   : > { %5576 = vmatprep.subr.bf16.mxu0 %v8551_v7  ;;  %5643 = vmatprep.subr.bf16.mxu1 %v8552_v25  ;;  %v8590_v25 = vld [vmem:[%s9755_s21 + $0x508] ss:$68 sps:$4 sm:$0xff]  }
 0x478   : > { %5577 = vmatpush1.bf16.msra.mxu0 %v8553_v52  ;;  %5644 = vmatpush1.bf16.msra.mxu1 %v8554_v23  ;;  %v8591_v52 = vld [vmem:[%s9755_s21 + $0xd80] ss:$68 sps:$4 sm:$0xff]   ;;  %v8592_v23 = vld [vmem:[%s9755_s21 + $0xc8] ss:$68 sps:$4 sm:$0xff]  }
 0x479   : > { %5578 = vmatprep.subr.bf16.mxu0 %v8555_v53  ;;  %5654 = vmatprep.subr.bf16.mxu1 %v8556_v28  ;;  %v8593_v53 = vld [vmem:[%s9755_s21 + $0x590] ss:$68 sps:$4 sm:$0xff]  }
 0x47b   : > { %5646 = vmatmul.mubr.bf16.vlgmr.msra.gmra.mrb[32].mxu1 %v10524_v3 }
 0x47c   : > { %5579 = vmatpush1.bf16.msra.mxu0 %v8557_v8  ;;  %5655 = vmatpush1.bf16.msra.mxu1 %v8558_v38 }
 0x47d   : > { %5580 = vmatprep.subr.bf16.mxu0 %v8559_v56  ;;  %5656 = vmatprep.subr.bf16.mxu1 %v8560_v58 }
 0x47e   : > { %7082 = vmatprep.mubr.msk.bf16.mxu1 %vm4187_vm0, %v10530_v40 }
 0x480   : > { %5581 = vmatpush1.bf16.msra.mxu0 %v8561_v19  ;;  %5657 = vmatpush1.bf16.msra.mxu1 %v8562_v34 }
 0x481   : > { %5582 = vmatprep.subr.bf16.mxu0 %v8563_v39  ;;  %5658 = vmatprep.subr.bf16.mxu1 %v8564_v20  ;;  %v8599_v39 = vld [vmem:[%s9755_s21 + $0x948] ss:$68 sps:$4 sm:$0xff]   ;;  %v8600_v20 = vld [vmem:[%s9755_s21 + $0x260] ss:$68 sps:$4 sm:$0xff]  }
 0x484   : > { %5583 = vmatpush1.bf16.msra.mxu0 %v8565_v21  ;;  %5659 = vmatpush1.bf16.msra.mxu1 %v8566_v47  ;;  %v8601_v21 = vld [vmem:[%s9755_s21 + $0x728] ss:$68 sps:$4 sm:$0xff]   ;;  %v8602_v47 = vld [vmem:[%s9755_s21 + $0x9d0] ss:$68 sps:$4 sm:$0xff]  }
 0x485   : > { %5584 = vmatprep.subr.bf16.mxu0 %v8567_v36  ;;  %5660 = vmatprep.subr.bf16.mxu1 %v8568_v45  ;;  %v8603_v36 = vld [vmem:[%s9755_s21 + $0x2e8] ss:$68 sps:$4 sm:$0xff]   ;;  %v8605_v45 = vld [vmem:[%s9755_s21 + $0xa58] ss:$68 sps:$4 sm:$0xff]  }
 0x488   : > { %5585 = vmatpush1.bf16.msra.mxu0 %v8569_v37  ;;  %5661 = vmatpush1.bf16.msra.mxu1 %v8570_v29  ;;  %v8606_v37 = vld [vmem:[%s9755_s21 + $0x370] ss:$68 sps:$4 sm:$0xff]   ;;  %v8607_v29 = vld [vmem:[%s9755_s21 + $0x838] ss:$68 sps:$4 sm:$0xff]  }
 0x489   : > { %5586 = vmatprep.subr.bf16.mxu0 %v8571_v42  ;;  %5662 = vmatprep.subr.bf16.mxu1 %v8572_v54  ;;  %v8608_v42 = vld [vmem:[%s9755_s21 + $0xae0] ss:$68 sps:$4 sm:$0xff]   ;;  %v8609_v54 = vld [vmem:[%s9755_s21 + $0x3f8] ss:$68 sps:$4 sm:$0xff]  }
 0x48c   : > { %5587 = vmatpush1.bf16.msra.mxu0 %v8573_v51  ;;  %5663 = vmatpush1.bf16.msra.mxu1 %v8574_v31  ;;  %v8610_v51 = vld [vmem:[%s9755_s21 + $0xb68] ss:$68 sps:$4 sm:$0xff]   ;;  %v8611_v31 = vld [vmem:[%s9755_s21 + $0xbf0] ss:$68 sps:$4 sm:$0xff]  }
 0x48d   : > { %5588 = vmatprep.subr.bf16.mxu0 %v8575_v55  ;;  %5664 = vmatprep.subr.bf16.mxu1 %v8576_v57  ;;  %v8612_v55 = vld [vmem:[%s9755_s21 + $0xc78] ss:$68 sps:$4 sm:$0xff]   ;;  %v8613_v57 = vld [vmem:[%s9755_s21 + $0xd00] ss:$68 sps:$4 sm:$0xff]  }
 0x490   : > { %5589 = vmatpush1.bf16.msra.mxu0 %v8577_v59  ;;  %5665 = vmatpush1.bf16.msra.mxu1 %v8578_v43  ;;  %v8614_v59 = vld [vmem:[%s9755_s21 + $0xd88] ss:$68 sps:$4 sm:$0xff]  }
 0x491   : > { %5590 = vmatprep.subr.bf16.mxu0 %v8579_v46  ;;  %5666 = vmatprep.subr.bf16.mxu1 %v8580_v27 }
 0x494   : > { %5591 = vmatpush1.bf16.msra.mxu0 %v8581_v44  ;;  %5667 = vmatpush1.bf16.msra.mxu1 %v8582_v50 }
 0x495   : > { %5592 = vmatprep.subr.bf16.mxu0 %v10358_v11  ;;  %5668 = vmatprep.subr.bf16.mxu1 %v8583_v62  ;;  %v8585_v11 = vld [vmem:[%s9755_s21 + $0xcfc] ss:$68 sps:$4 sm:$0xff]  }
 0x496   : > { %v5278_v48 = vpop.f32.mrb[24].mxu0 }
 0x497   : > { %v7377_v0 = vadd.f32 %v5278_v48, %v10366_v13  ;;  %v5280_v32 = vpop.f32.mrb[25].mxu0  ;;  %v8587_v13 = vld [vmem:[%s9755_s21 + $0xcf8] ss:$68 sps:$4 sm:$0xff]  }
 0x498   : > { %v7378_v2 = vadd.f32 %v5280_v32, %v10376_v15  ;;  %v5282_v6 = vpop.f32.mrb[26].mxu0  ;;  %5593 = vmatpush1.bf16.msra.mxu0 %v10384_v17  ;;  %5669 = vmatpush1.bf16.msra.mxu1 %v8584_v4  ;;  %v8588_v15 = vld [vmem:[%s9755_s21 + $0x40] ss:$68 sps:$4 sm:$0xff]  }
 0x499   : > { %v5283_v9 = vpop.f32.mrb[27].mxu0  ;;  %5670 = vmatprep.subr.bf16.mxu1 %v8585_v11  ;;  %7133 = vmatprep.subr.bf16.mxu0 %v8586_v10  ;;  %v8589_v17 = vld [vmem:[%s9755_s21 + $0xd84] ss:$68 sps:$4 sm:$0xff]  }
 0x49a   : > { %v5793_v7 = vcombine.low %v7377_v0, %v7378_v2 }
 0x49b   : > { %5605 = vmatmul.mubr.bf16.vlgmr.msra.gmra.mrb[32].mxu0 %v10609_v24 }
 0x49c   : > { %7086 = vst [vmem:[%s10239_s24 + $0x54] sm:$0x77] %v5793_v7  ;;  %5671 = vmatpush1.bf16.msra.mxu1 %v8587_v13  ;;  %7134 = vmatpush3.bf16.msra.mxu0 %v8588_v15 }
 0x49d   : > { %5672 = vmatprep.subr.bf16.mxu1 %v8589_v17  ;;  %7135 = vmatprep.subr.bf16.mxu0 %v8590_v25 }
 0x49e   : > { %5727 = vmatprep.mubr.bf16.mxu0 %v10446_v61  ;;  %v8594_v61 = vld [vmem:[%s9755_s21 + $0x150] ss:$68 sps:$4 sm:$0xff]  }
 0x4a0   : > { %5673 = vmatpush1.bf16.msra.mxu1 %v8591_v52  ;;  %7136 = vmatpush3.bf16.msra.mxu0 %v8592_v23 }
 0x4a1   : > { %5674 = vmatprep.subr.bf16.mxu1 %v10361_v12  ;;  %7137 = vmatprep.subr.bf16.mxu0 %v8593_v53  ;;  %v8595_v12 = vld [vmem:[%s9755_s21 + $0x618] ss:$68 sps:$4 sm:$0xff]  }
 0x4a2   : > { %v5360_v28 = vpop.f32.mrb[24].mxu1 }
 0x4a3   : > { %v7379_v8 = vadd.f32 %v5360_v28, %v10371_v14  ;;  %v5362_v38 = vpop.f32.mrb[25].mxu1  ;;  %v8596_v14 = vld [vmem:[%s9755_s21 + $0x8c0] ss:$68 sps:$4 sm:$0xff]  }
 0x4a4   : > { %v7380_v56 = vadd.f32 %v5362_v38, %v10381_v16  ;;  %v5364_v58 = vpop.f32.mrb[26].mxu1  ;;  %5675 = vmatpush1.bf16.msra.mxu1 %v10387_v18  ;;  %7138 = vmatpush3.bf16.msra.mxu0 %v8594_v61  ;;  %v8597_v16 = vld [vmem:[%s9755_s21 + $0x1d8] ss:$68 sps:$4 sm:$0xff]   ;;  %v8598_v18 = vld [vmem:[%s9755_s21 + $0x6a0] ss:$68 sps:$4 sm:$0xff]   ;;  %v8676_v61 = vmov (!%p7093_p11), 0  }
 0x4a5   : > { %v5365_v19 = vpop.f32.mrb[27].mxu1  ;;  %5735 = vmatprep.subr.bf16.mxu1 %v8675_v60  ;;  %7139 = vmatprep.subr.bf16.mxu0 %v8595_v12  ;;  %v5902_v12 = vld [vmem:[%s11490_s4 + $0x108] sm:$0xff] (!%p7093_p11) }
 0x4a6   : > { %v5794_v34 = vcombine.low %v7379_v8, %v7380_v56  ;;  %8615 = vset.pattern.permute.xlu0 (!%p7093_p11), %v8676_v61  ;;  %v8677_v19 = vmov (!%p7093_p11), 0.0|0.0   ;;  %v5881_v61 = vld [vmem:[%s11490_s4 + $0x60] sm:$0xff] (!%p7093_p11) }
 0x4a7   : > { %5687 = vmatmul.mubr.bf16.vlgmr.msra.gmra.mrb[32].mxu1 %v10609_v24 }
 0x4a8   : > { %7087 = vst [vmem:[%s10239_s24 + $0x5c] sm:$0x77] %v5794_v34  ;;  %5736 = vmatpush1.bf16.msra.mxu1 %v8596_v14  ;;  %7140 = vmatpush3.bf16.msra.mxu0 %v8597_v16  ;;  %v5903_v34 = vld [vmem:[%s11490_s4 + $0x110] sm:$0xff] (!%p7093_p11)  ;;  %v6074_v14 = vld [vmem:[%s11489_s3] sm:$0x7] (!%p7093_p11) }
 0x4a9   : > { %5737 = vmatprep.subr.bf16.mxu1 %v8675_v60  ;;  %7141 = vmatprep.subr.bf16.mxu0 %v8598_v18  ;;  %v5904_v18 = vld [vmem:[%s11490_s4 + $0x118] sm:$0xff] (!%p7093_p11) }
 0x4aa   : > { %7083 = vmatprep.mubr.msk.bf16.mxu1 %vm4187_vm0, %v10530_v40  ;;  %v8604_v40 = vld [vmem:[%s9755_s21 + $0x7b0] ss:$68 sps:$4 sm:$0xff]  }
 0x4ac   : > { %5738 = vmatpush1.bf16.msra.mxu1 %v8599_v39  ;;  %7142 = vmatpush3.bf16.msra.mxu0 %v8600_v20  ;;  %v5885_v39 = vld [vmem:[%s11490_s4 + $0x80] sm:$0xff] (!%p7093_p11)  ;;  %v5886_v20 = vld [vmem:[%s11490_s4 + $0x88] sm:$0xff] (!%p7093_p11) }
 0x4ad   : > { %5739 = vmatprep.subr.bf16.mxu1 %v8675_v60  ;;  %7143 = vmatprep.subr.bf16.mxu0 %v8601_v21  ;;  %v5869_v21 = vld [vmem:[%s11490_s4] sm:$0xff] (!%p7093_p11) }
 0x4b0   : > { %5740 = vmatpush1.bf16.msra.mxu1 %v8602_v47  ;;  %7144 = vmatpush3.bf16.msra.mxu0 %v8603_v36  ;;  %v11107_v47 = vpack.c.bf16 (!%p7093_p11), %v5904_v18, %v5903_v34  ;;  %v5905_v36 = vld [vmem:[%s11490_s4 + $0x120] sm:$0xff] (!%p7093_p11)  ;;  %v5899_v34 = vld [vmem:[%s11490_s4 + $0xf0] sm:$0xff] (!%p7093_p11) }
 0x4b1   : > { %5741 = vmatprep.subr.bf16.mxu1 %v8675_v60  ;;  %7145 = vmatprep.subr.bf16.mxu0 %v8604_v40  ;;  %v5906_v40 = vld [vmem:[%s11490_s4 + $0x128] sm:$0xff] (!%p7093_p11) }
 0x4b4   : > { %5742 = vmatpush1.bf16.msra.mxu1 %v8605_v45  ;;  %7146 = vmatpush3.bf16.msra.mxu0 %v8606_v37  ;;  %v11115_v45 = vpack.c.bf16 (!%p7093_p11), %v5886_v20, %v5885_v39  ;;  %v5870_v37 = vld [vmem:[%s11490_s4 + $0x8] sm:$0xff] (!%p7093_p11) }
 0x4b5   : > { %5743 = vmatprep.subr.bf16.mxu1 %v8675_v60  ;;  %7147 = vmatprep.subr.bf16.mxu0 %v8607_v29  ;;  %v11121_v29 = vpack.c.bf16 (!%p7093_p11), %v5870_v37, %v5869_v21  ;;  %v5883_v21 = vld [vmem:[%s11490_s4 + $0x70] sm:$0xff] (!%p7093_p11)  ;;  %v5918_v37 = vld [vmem:[%s11490_s4 + $0x188] sm:$0xff] (!%p7093_p11) }
 0x4b8   : > { %5744 = vmatpush1.bf16.msra.mxu1 %v8608_v42  ;;  %7148 = vmatpush3.bf16.msra.mxu0 %v8609_v54  ;;  %v5887_v42 = vld [vmem:[%s11490_s4 + $0x90] sm:$0xff] (!%p7093_p11)  ;;  %v5888_v54 = vld [vmem:[%s11490_s4 + $0x98] sm:$0xff] (!%p7093_p11) }
 0x4b9   : > { %5745 = vmatprep.subr.bf16.mxu1 %v8675_v60  ;;  %7226 = vmatprep.subr.bf16.mxu0 (!%p7093_p11), %v11115_v45 }
 0x4bb   : > { %5728 = vmatmul.mubr.bf16.vlgmr.msra.gmra.mrb[36].mxu0 %v10524_v3 }
 0x4bc   : > { %5746 = vmatpush1.bf16.msra.mxu1 %v8610_v51  ;;  %v5871_v51 = vld [vmem:[%s11490_s4 + $0x10] sm:$0xff] (!%p7093_p11)  ;;  %7228 = vmatpush3.bf16.msra.mxu0 (!%p7093_p11), %v11121_v29 }
 0x4bd   : > { %5747 = vmatprep.subr.bf16.mxu1 %v8675_v60 }
 0x4c0   : > { %5748 = vmatpush1.bf16.msra.mxu1 %v8611_v31  ;;  %v11133_v31 = vpack.c.bf16 (!%p7093_p11), %v5888_v54, %v5887_v42 }
 0x4c1   : > { %5749 = vmatprep.subr.bf16.mxu1 %v8675_v60 }
 0x4c2   : > { %7230 = vmatprep.subr.bf16.mxu0 (!%p7093_p11), %v11133_v31 }
 0x4c4   : > { %5750 = vmatpush1.bf16.msra.mxu1 %v8612_v55  ;;  %v5872_v55 = vld [vmem:[%s11490_s4 + $0x18] sm:$0xff] (!%p7093_p11) }
 0x4c5   : > { %5751 = vmatprep.subr.bf16.mxu1 %v8675_v60 }
 0x4c8   : > { %5752 = vmatpush1.bf16.msra.mxu1 %v8613_v57  ;;  %v11139_v57 = vpack.c.bf16 (!%p7093_p11), %v5872_v55, %v5871_v51  ;;  %v5919_v51 = vld [vmem:[%s11490_s4 + $0x190] sm:$0xff] (!%p7093_p11)  ;;  %v5920_v55 = vld [vmem:[%s11490_s4 + $0x198] sm:$0xff] (!%p7093_p11) }
 0x4c9   : > { %5753 = vmatprep.subr.bf16.mxu1 %v8675_v60 }
 0x4ca   : > { %7232 = vmatpush3.bf16.msra.mxu0 (!%p7093_p11), %v11139_v57 }
 0x4cc   : > { %5754 = vmatpush1.bf16.msra.mxu1 %v8614_v59  ;;  %v5889_v59 = vld [vmem:[%s11490_s4 + $0xa0] sm:$0xff] (!%p7093_p11) }
 0x4cd   : > { %5755 = vmatprep.subr.bf16.mxu1 %v8675_v60 }
 0x4d0   : > { %5756 = vmatpush1.bf16.msra.mxu1 %v10457_v49 }
 0x4d1   : > { %7257 = vmatprep.subr.bf16.mxu1 (!%p7093_p11), %v8677_v19 }
 0x4d3   : > { %5768 = vmatmul.mubr.bf16.vlgmr.msra.gmra.mrb[36].mxu1 %v10609_v24 }
 0x502   : > { %v5442_v3 = vpop.f32.mrb[28].mxu0 }
 0x503   : > { %v7381_v43 = vadd.f32 %v5442_v3, %v10545_v35  ;;  %v5444_v46 = vpop.f32.mrb[29].mxu0  ;;  %v5890_v3 = vld [vmem:[%s11490_s4 + $0xa8] sm:$0xff] (!%p7093_p11) }
 0x504   : > { %v7382_v27 = vadd.f32 %v5444_v46, %v10557_v26  ;;  %v5446_v44 = vpop.f32.mrb[30].mxu0  ;;  %v5907_v46 = vld [vmem:[%s11490_s4 + $0x130] sm:$0xff] (!%p7093_p11) }
 0x505   : > { %v5447_v50 = vpop.f32.mrb[31].mxu0  ;;  %v5873_v44 = vld [vmem:[%s11490_s4 + $0x20] sm:$0xff] (!%p7093_p11) }
 0x506   : > { %v5795_v62 = vcombine.low %v7381_v43, %v7382_v27  ;;  %v11148_v43 = vpack.c.bf16 (!%p7093_p11), %v5906_v40, %v5905_v36  ;;  %v11154_v27 = vpack.c.bf16 (!%p7093_p11), %v5890_v3, %v5889_v59  ;;  %v5874_v50 = vld [vmem:[%s11490_s4 + $0x28] sm:$0xff] (!%p7093_p11)  ;;  %v5884_v36 = vld [vmem:[%s11490_s4 + $0x78] sm:$0xff] (!%p7093_p11)  ;;  %v5917_v40 = vld [vmem:[%s11490_s4 + $0x180] sm:$0xff] (!%p7093_p11)  ;;  %v11322_v59 = vpack.c.bf16 (!%p7093_p11), %v5920_v55, %v5919_v51 }
 0x507   : > { %v11307_v42 = vpack.c.bf16 (!%p7093_p11), %v5884_v36, %v5883_v21  ;;  %v11310_v54 = vpack.c.bf16 (!%p7093_p11), %v5918_v37, %v5917_v40  ;;  %v11329_v3 = vld [vmem:[%s11490_s4 + $0x1a0] sm:$0xff] (!%p7093_p11) }
 0x508   : > { %7088 = vst [vmem:[%s10239_s24 + $0x64] sm:$0x77] %v5795_v62  ;;  %v5908_v62 = vld [vmem:[%s11490_s4 + $0x138] sm:$0xff] (!%p7093_p11)  ;;  %7234 = vmatprep.subr.bf16.mxu0 (!%p7093_p11), %v11154_v27 }
 0x50e   : > { %v5524_v48 = vpop.f32.mrb[28].mxu1 }
 0x50f   : > { %v7383_v0 = vadd.f32 %v5524_v48, %v10550_v22  ;;  %v5526_v60 = vpop.f32.mrb[29].mxu1  ;;  %v5891_v48 = vld [vmem:[%s11490_s4 + $0xb0] sm:$0xff] (!%p7093_p11) }
 0x510   : > { %v7384_v49 = vadd.f32 %v5526_v60, %v10562_v41  ;;  %v5528_v32 = vpop.f32.mrb[30].mxu1  ;;  %v11173_v60 = vpack.c.bf16 (!%p7093_p11), %v5874_v50, %v5873_v44  ;;  %v5821_v50 = vld [vmem:[%s11486_s0] sm:$0x77] (!%p7093_p11) }
 0x511   : > { %v5529_v24 = vpop.f32.mrb[31].mxu1  ;;  %v5909_v32 = vld [vmem:[%s11490_s4 + $0x140] sm:$0xff] (!%p7093_p11) }
 0x512   : > { %v5796_v2 = vcombine.low %v7383_v0, %v7384_v49  ;;  %v5892_v0 = vld [vmem:[%s11490_s4 + $0xb8] sm:$0xff] (!%p7093_p11)  ;;  %v11176_v49 = vpack.c.bf16 (!%p7093_p11), %v5908_v62, %v5907_v46  ;;  %7236 = vmatpush3.bf16.msra.mxu0 (!%p7093_p11), %v11173_v60  ;;  %v5922_v46 = vld [vmem:[%s11490_s4 + $0x1a8] sm:$0x7f] (!%p7093_p11) }
 0x513   : > { %v11182_v24 = vpack.c.bf16 (!%p7093_p11), %v5892_v0, %v5891_v48  ;;  %v7288_v44 = vpack.c.bf16 (!%p7093_p11), %v5922_v46, %v11329_v3  ;;  %v5822_v62 = vld [vmem:[%s11486_s0 + $0x8] sm:$0x77] (!%p7093_p11)  ;;  %v5831_v48 = vcombine.high (!%p7093_p11), %v5821_v50, %v5821_v50 }
 0x514   : > { %7089 = vst [vmem:[%s10239_s24 + $0x6c] sm:$0x77] %v5796_v2  ;;  %v5875_v2 = vld [vmem:[%s11490_s4 + $0x30] sm:$0xff] (!%p7093_p11)  ;;  %v5832_v0 = vcombine.high (!%p7093_p11), %v5822_v62, %v5822_v62 }
 0x515   : > { %7238 = vmatprep.subr.bf16.mxu0 (!%p7093_p11), %v11182_v24 }
 0x56e   : > { %v5606_v35 = vpop.f32.mrb[32].mxu0 }
 0x56f   : > { %v7385_v6 = vadd.f32 %v5606_v35, %v10693_v63  ;;  %v5608_v26 = vpop.f32.mrb[33].mxu0  ;;  %v5876_v35 = vld [vmem:[%s11490_s4 + $0x38] sm:$0xff] (!%p7093_p11) }
 0x570   : > { %v7386_v4 = vadd.f32 %v5608_v26, %v10705_v1  ;;  %v5610_v9 = vpop.f32.mrb[34].mxu0  ;;  %v5893_v26 = vld [vmem:[%s11490_s4 + $0xc0] sm:$0xff] (!%p7093_p11) }
 0x571   : > { %v5611_v11 = vpop.f32.mrb[35].mxu0  ;;  %v11201_v9 = vpack.c.bf16 (!%p7093_p11), %v5876_v35, %v5875_v2  ;;  %v11359_v2 = vld [vmem:[%s11486_s0 + $0x18] sm:$0x77] (!%p7093_p11) }
 0x572   : > { %v5797_v10 = vcombine.low %v7385_v6, %v7386_v4  ;;  %v5910_v6 = vld [vmem:[%s11490_s4 + $0x148] sm:$0xff] (!%p7093_p11) }
 0x573   : > { %v5894_v4 = vld [vmem:[%s11490_s4 + $0xc8] sm:$0xff] (!%p7093_p11)  ;;  %v11204_v11 = vpack.c.bf16 (!%p7093_p11), %v5910_v6, %v5909_v32  ;;  %7240 = vmatpush3.bf16.msra.mxu0 (!%p7093_p11), %v11201_v9  ;;  %v11354_v32 = vld [vmem:[%s11486_s0 + $0x10] sm:$0x77] (!%p7093_p11) }
 0x574   : > { %7090 = vst [vmem:[%s10239_s24 + $0x74] sm:$0x77] %v5797_v10  ;;  %v5911_v10 = vld [vmem:[%s11490_s4 + $0x150] sm:$0xff] (!%p7093_p11)  ;;  %v6082_v6 = vcombine.high (!%p7093_p11), %v11354_v32, %v11354_v32 }
 0x57a   : > { %v5688_v7 = vpop.f32.mrb[32].mxu1 }
 0x57b   : > { %v7387_v22 = vadd.f32 %v5688_v7, %v10698_v30  ;;  %v5690_v13 = vpop.f32.mrb[33].mxu1  ;;  %v11210_v7 = vpack.c.bf16 (!%p7093_p11), %v5894_v4, %v5893_v26  ;;  %v6083_v26 = vcombine.high (!%p7093_p11), %v11359_v2, %v11359_v2 }
 0x57c   : > { %v7388_v41 = vadd.f32 %v5690_v13, %v10710_v5  ;;  %v5692_v15 = vpop.f32.mrb[34].mxu1  ;;  %v5823_v5 = vld [vmem:[%s11489_s3] sm:$0x7] (!%p7093_p11)  ;;  %v5878_v13 = vld [vmem:[%s11490_s4 + $0x48] sm:$0xff] (!%p7093_p11) }
 0x57d   : > { %v5693_v17 = vpop.f32.mrb[35].mxu1  ;;  %5826 = vperm.xlu0 (!%p7093_p11), %8615, %v5823_v5   ;;  %v5895_v15 = vld [vmem:[%s11490_s4 + $0xd0] sm:$0xff] (!%p7093_p11)  ;;  %7242 = vmatprep.subr.bf16.mxu0 (!%p7093_p11), %v11210_v7 }
 0x57e   : > { %v5798_v25 = vcombine.low %v7387_v22, %v7388_v41  ;;  %v5877_v22 = vld [vmem:[%s11490_s4 + $0x40] sm:$0xff] (!%p7093_p11)  ;;  %v5912_v41 = vld [vmem:[%s11490_s4 + $0x158] sm:$0xff] (!%p7093_p11) }
 0x57f   : > { %v5896_v17 = vld [vmem:[%s11490_s4 + $0xd8] sm:$0xff] (!%p7093_p11) }
 0x580   : > { %7091 = vst [vmem:[%s10239_s24 + $0x7c] sm:$0x77] %v5798_v25  ;;  %v11229_v25 = vpack.c.bf16 (!%p7093_p11), %v5878_v13, %v5877_v22 }
 0x581   : > { %6077 = vperm.xlu0 (!%p7093_p11), %8615, %v6074_v14   ;;  %v5900_v14 = vld [vmem:[%s11490_s4 + $0xf8] sm:$0xff] (!%p7093_p11) }
 0x582   : > { %7244 = vmatpush3.bf16.msra.mxu0 (!%p7093_p11), %v11229_v25  ;;  %v11291_v20 = vpack.c.bf16 (!%p7093_p11), %v5900_v14, %v5899_v34 }
 0x58e   : > { %v7149_v52 = vpop.f32.mrb[36].mxu0 }
 0x58f   : > { %v7150_v63 = vpop.f32.mrb[37].mxu0 }
 0x590   : > { %v7151_v23 = vadd.f32 %v7150_v63, %v7149_v52  ;;  %v7152_v53 = vpop.f32.mrb[38].mxu0  ;;  %v11232_v52 = vpack.c.bf16 (!%p7093_p11), %v5912_v41, %v5911_v10  ;;  %v5913_v63 = vld [vmem:[%s11490_s4 + $0x160] sm:$0xff] (!%p7093_p11) }
 0x591   : > { %v7153_v1 = vpop.f32.mrb[39].mxu0  ;;  %v5879_v53 = vld [vmem:[%s11490_s4 + $0x50] sm:$0xff] (!%p7093_p11) }
 0x592   : > { %v5730_v28 = vadd.f32 %v7151_v23, %v10763_v33  ;;  %v5901_v33 = vld [vmem:[%s11490_s4 + $0x100] sm:$0xff] (!%p7093_p11)  ;;  %v11238_v23 = vpack.c.bf16 (!%p7093_p11), %v5896_v17, %v5895_v15  ;;  %v5880_v1 = vld [vmem:[%s11490_s4 + $0x58] sm:$0xff] (!%p7093_p11) }
 0x593   : > { %v11092_v16 = vpack.c.bf16 (!%p7093_p11), %v5902_v12, %v5901_v33  ;;  %v5882_v33 = vld [vmem:[%s11490_s4 + $0x68] sm:$0xff] (!%p7093_p11)  ;;  %v5916_v12 = vld [vmem:[%s11490_s4 + $0x178] sm:$0xff] (!%p7093_p11) }
 0x594   : > { %7246 = vmatprep.subr.bf16.mxu0 (!%p7093_p11), %v11238_v23  ;;  %v11285_v18 = vpack.c.bf16 (!%p7093_p11), %v5882_v33, %v5881_v61 }
 0x595   : > { %7259 = vmatpush1.bf16.msra.mxu1 (!%p7093_p11), %v11092_v16 }
 0x596   : > { %7260 = vmatprep.subr.bf16.mxu1 (!%p7093_p11), %v8677_v19 }
 0x599   : > { %7262 = vmatpush1.bf16.msra.mxu1 (!%p7093_p11), %v11107_v47 }
 0x59a   : > { %7263 = vmatprep.subr.bf16.mxu1 (!%p7093_p11), %v8677_v19 }
 0x59d   : > { %7265 = vmatpush1.bf16.msra.mxu1 (!%p7093_p11), %v11148_v43 }
 0x59e   : > { %7266 = vmatprep.subr.bf16.mxu1 (!%p7093_p11), %v8677_v19 }
 0x5a1   : > { %7268 = vmatpush1.bf16.msra.mxu1 (!%p7093_p11), %v11176_v49 }
 0x5a2   : > { %7269 = vmatprep.subr.bf16.mxu1 (!%p7093_p11), %v8677_v19 }
 0x5a3   : > { %5820 = sbr.rel (%p7093_p11) target bundleno = 1808 (0x710), region = 74 }
 0x5a5   : > { %7271 = vmatpush1.bf16.msra.mxu1 (!%p7093_p11), %v11204_v11 }
 0x5a6   : > { %v5769_v8 = vpop.f32.mrb[36].mxu1  ;;  %7272 = vmatprep.subr.bf16.mxu1 (!%p7093_p11), %v8677_v19 }
 0x5a7   : > { %v5770_v38 = vadd.f32 %v5769_v8, %v5730_v28  ;;  %v5771_v56 = vpop.f32.mrb[37].mxu1  ;;  %v5914_v28 = vld [vmem:[%s11490_s4 + $0x168] sm:$0xff] (!%p7093_p11)  ;;  %v5897_v8 = vld [vmem:[%s11490_s4 + $0xe0] sm:$0xff] (!%p7093_p11) }
 0x5a8   : > { %v5772_v58 = vpop.f32.mrb[38].mxu1  ;;  %v11257_v56 = vpack.c.bf16 (!%p7093_p11), %v5880_v1, %v5879_v53 }
 0x5a9   : > { %7092 = vst [vmem:[%s10239_s24 + $0x84] sm:$0x7] %v5770_v38  ;;  %v5773_v30 = vpop.f32.mrb[39].mxu1  ;;  %v5898_v38 = vld [vmem:[%s11490_s4 + $0xe8] sm:$0xff] (!%p7093_p11)  ;;  %7274 = vmatpush1.bf16.msra.mxu1 (!%p7093_p11), %v11232_v52  ;;  %v11260_v58 = vpack.c.bf16 (!%p7093_p11), %v5914_v28, %v5913_v63 }
 0x5aa   : > { %v5915_v30 = vld [vmem:[%s11490_s4 + $0x170] sm:$0xff]  ;;  %v11266_v5 = vpack.c.bf16 %v5898_v38, %v5897_v8  ;;  %7275 = vmatprep.subr.bf16.mxu1 %v8677_v19  ;;  %7248 = vmatpush3.bf16.msra.mxu0 %v11257_v56 }
 0x5ab   : > { %v11288_v39 = vpack.c.bf16 %v5916_v12, %v5915_v30 }
 0x5ac   : > { %7250 = vmatprep.subr.bf16.mxu0 %v11266_v5 }
 0x5ad   : > { %7277 = vmatpush1.bf16.msra.mxu1 %v11260_v58 }
 0x5ae   : > { %7278 = vmatprep.subr.bf16.mxu1 %v8677_v19  ;;  %7252 = vmatpush3.bf16.msra.mxu0 %v11285_v18 }
 0x5af   : > { %7254 = vmatprep.subr.bf16.mxu0 %v11291_v20 }
 0x5b1   : > { %7280 = vmatpush1.bf16.msra.mxu1 %v11288_v39 }
 0x5b2   : > { %7281 = vmatprep.subr.bf16.mxu1 %v8677_v19  ;;  %7256 = vmatpush3.bf16.msra.mxu0 %v11307_v42 }
 0x5b3   : > { %7292 = vmatprep.subr.bf16.mxu0 %v11115_v45  ;;  %v6172_v45 = vld [vmem:[%s11491_s5] sm:$0x1] }
 0x5b5   : > { %7283 = vmatpush1.bf16.msra.mxu1 %v11310_v54 }
 0x5b6   : > { %7284 = vmatprep.subr.bf16.mxu1 %v8677_v19 }
 0x5b9   : > { %7286 = vmatpush1.bf16.msra.mxu1 %v11322_v59 }
 0x5ba   : > { %7287 = vmatprep.subr.bf16.mxu1 %v8677_v19 }
 0x5bd   : > { %7290 = vmatpush1.bf16.msk.msra.mxu1 %vm11338_vm4, %v7288_v44 }
 0x5be   : > { %7323 = vmatprep.subr.bf16.mxu1 %v8677_v19 }
 0x5fc   : > { %v5827_v35 = vpop.permute.xlu0 %5826 }
 0x5fd   : > { %v5835_v4 = vmul.f32 %v5827_v35, %v5821_v50  ;;  %v5836_v10 = vmul.f32 %v5831_v48, %v5827_v35  ;;  %v5837_v22 = vmul.f32 %v5827_v35, %v5822_v62  ;;  %v5838_v13 = vmul.f32 %v5832_v0, %v5827_v35 }
 0x5ff   : > { %v5840_v41 = vsel %vm5839_vm5, %v5835_v4, 0.0  ;;  %v5854_v15 = vsel %vm5839_vm5, %v5837_v22, 0.0  ;;  %v5847_v17 = vsel %vm5839_vm5, %v5836_v10, 0.0  ;;  %v5862_v63 = vsel %vm5861_vm6, %v5838_v13, 0.0 }
 0x600   : > { %v5841_v53 = vrot.slane %v5840_v41, 4  ;;  %v5855_v1 = vrot.slane %v5854_v15, 4  ;;  %v11369_v28 = vpop.permute.xlu0 %6077  ;;  %v5848_v8 = vrot.slane %v5847_v17, 4  ;;  %v5863_v38 = vrot.slane %v5862_v63, 4 }
 0x601   : > { %v6087_v30 = vmul.f32 %v6082_v6, %v11369_v28  ;;  %v6089_v61 = vmul.f32 %v6083_v26, %v11369_v28 }
 0x602   : > { %v5849_v33 = vadd.f32 %v5848_v8, %v5847_v17  ;;  %v5864_v12 = vadd.f32 %v5863_v38, %v5862_v63  ;;  %v5842_v34 = vadd.f32 %v5841_v53, %v5840_v41  ;;  %v5856_v14 = vadd.f32 %v5855_v1, %v5854_v15 }
 0x603   : > { %v6097_v21 = vsel %vm5839_vm5, %v6087_v30, 0.0  ;;  %v6111_v36 = vsel %vm5861_vm6, %v6089_v61, 0.0 }
 0x604   : > { %v6098_v40 = vrot.slane %v6097_v21, 4  ;;  %v6112_v37 = vrot.slane %v6111_v36, 4  ;;  %v5850_v51 = vrot.slane %v5849_v33, 2  ;;  %v5865_v55 = vrot.slane %v5864_v12, 2 }
 0x605   : > { %v5843_v46 = vrot.slane %v5842_v34, 2  ;;  %v5857_v44 = vrot.slane %v5856_v14, 2 }
 0x606   : > { %v6099_v50 = vadd.f32 %v6098_v40, %v6097_v21  ;;  %v6113_v62 = vadd.f32 %v6112_v37, %v6111_v36  ;;  %v5851_v48 = vadd.f32 %v5850_v51, %v5849_v33  ;;  %v5866_v0 = vadd.f32 %v5865_v55, %v5864_v12 }
 0x607   : > { %v5844_v35 = vadd.f32 %v5843_v46, %v5842_v34  ;;  %v5858_v6 = vadd.f32 %v5857_v44, %v5856_v14  ;;  %v6086_v12 = vmul.f32 %v11354_v32, %v11369_v28 }
 0x608   : > { %v6100_v26 = vrot.slane %v6099_v50, 2  ;;  %v6114_v4 = vrot.slane %v6113_v62, 2  ;;  %v5852_v10 = vrot.slane %v5851_v48, 1  ;;  %v5867_v22 = vrot.slane %v5866_v0, 1 }
 0x609   : > { %v5845_v13 = vrot.slane %v5844_v35, 1  ;;  %v5859_v41 = vrot.slane %v5858_v6, 1 }
 0x60a   : > { %v6101_v15 = vadd.f32 %v6100_v26, %v6099_v50  ;;  %v6115_v17 = vadd.f32 %v6114_v4, %v6113_v62  ;;  %v5853_v63 = vadd.f32 %v5852_v10, %v5851_v48  ;;  %v5868_v53 = vadd.f32 %v5867_v22, %v5866_v0 }
 0x60b   : > { %v5846_v1 = vadd.f32 %v5845_v13, %v5844_v35  ;;  %v5860_v8 = vadd.f32 %v5859_v41, %v5858_v6 }
 0x60c   : > { %v6102_v38 = vrot.slane %v6101_v15, 1  ;;  %v6116_v30 = vrot.slane %v6115_v17, 1  ;;  %5994 = vmatprep.mubr.f32.mxu0 %v5853_v63  ;;  %7095 = vmatprep.mubr.msk.f32.mxu1 %vm4187_vm0, %v5868_v53 }
 0x60d   : > { %5995 = vmatmul.mubr.f32.vlgmr.msra.gmra.mrb[0].mxu0 %v5846_v1  ;;  %6065 = vmatmul.mubr.f32.vlgmr.msra.gmra.mrb[0].mxu1 %v5860_v8 }
 0x60e   : > { %v6103_v61 = vadd.f32 %v6102_v38, %v6101_v15  ;;  %v6117_v33 = vadd.f32 %v6116_v30, %v6115_v17  ;;  %7294 = vmatpush3.bf16.msra.mxu0 %v11121_v29  ;;  %7325 = vmatpush1.bf16.msra.mxu1 %v11092_v16  ;;  %v6090_v16 = vsel %vm5839_vm5, %v6086_v12, 0.0 }
 0x60f   : > { %7296 = vmatprep.subr.bf16.mxu0 %v11133_v31  ;;  %7326 = vmatprep.subr.bf16.mxu1 %v8677_v19  ;;  %v6091_v29 = vrot.slane %v6090_v16, 4  ;;  %v6088_v31 = vmul.f32 %v11359_v2, %v11369_v28 }
 0x610   : > { %6243 = vmatprep.mubr.f32.mxu0 %v6103_v61  ;;  %7099 = vmatprep.mubr.msk.f32.mxu1 %vm4187_vm0, %v6117_v33 }
 0x612   : > { %7298 = vmatpush3.bf16.msra.mxu0 %v11139_v57  ;;  %7328 = vmatpush1.bf16.msra.mxu1 %v11107_v47  ;;  %v6092_v47 = vadd.f32 %v6091_v29, %v6090_v16 }
 0x613   : > { %7300 = vmatprep.subr.bf16.mxu0 %v11154_v27  ;;  %7329 = vmatprep.subr.bf16.mxu1 %v8677_v19 }
 0x614   : > { %v6093_v57 = vrot.slane %v6092_v47, 2 }
 0x616   : > { %7302 = vmatpush3.bf16.msra.mxu0 %v11173_v60  ;;  %7331 = vmatpush1.bf16.msra.mxu1 %v11148_v43  ;;  %v6104_v43 = vsel %vm5839_vm5, %v6088_v31, 0.0  ;;  %v6094_v27 = vadd.f32 %v6093_v57, %v6092_v47 }
 0x617   : > { %7304 = vmatprep.subr.bf16.mxu0 %v11182_v24  ;;  %7332 = vmatprep.subr.bf16.mxu1 %v8677_v19  ;;  %v6105_v60 = vrot.slane %v6104_v43, 4 }
 0x618   : > { %v6095_v24 = vrot.slane %v6094_v27, 1 }
 0x61a   : > { %7306 = vmatpush3.bf16.msra.mxu0 %v11201_v9  ;;  %7334 = vmatpush1.bf16.msra.mxu1 %v11176_v49  ;;  %v6106_v49 = vadd.f32 %v6105_v60, %v6104_v43 }
 0x61b   : > { %7308 = vmatprep.subr.bf16.mxu0 %v11210_v7  ;;  %7335 = vmatprep.subr.bf16.mxu1 %v8677_v19 }
 0x61c   : > { %v6107_v9 = vrot.slane %v6106_v49, 2 }
 0x61e   : > { %7310 = vmatpush3.bf16.msra.mxu0 %v11229_v25  ;;  %7337 = vmatpush1.bf16.msra.mxu1 %v11204_v11  ;;  %v6096_v11 = vadd.f32 %v6095_v24, %v6094_v27  ;;  %v6108_v7 = vadd.f32 %v6107_v9, %v6106_v49  ;;  %v6171_v25 = vld [vmem:[%s11490_s4 + $0x1a8] sm:$0x7f] }
 0x61f   : > { %7312 = vmatprep.subr.bf16.mxu0 %v11238_v23  ;;  %7338 = vmatprep.subr.bf16.mxu1 %v8677_v19 }
 0x620   : > { %v6109_v23 = vrot.slane %v6108_v7, 1 }
 0x622   : > { %7314 = vmatpush3.bf16.msra.mxu0 %v11257_v56  ;;  %7340 = vmatpush1.bf16.msra.mxu1 %v11232_v52  ;;  %v7354_v52 = vpack.c.bf16 %v6171_v25, %v11329_v3  ;;  %v6110_v56 = vadd.f32 %v6109_v23, %v6108_v7 }
 0x623   : > { %7316 = vmatprep.subr.bf16.mxu0 %v11266_v5  ;;  %7341 = vmatprep.subr.bf16.mxu1 %v8677_v19 }
 0x626   : > { %7318 = vmatpush3.bf16.msra.mxu0 %v11285_v18  ;;  %7343 = vmatpush1.bf16.msra.mxu1 %v11260_v58  ;;  %v5923_v18 = vld [vmem:[%s11491_s5] sm:$0x1] }
 0x627   : > { %7320 = vmatprep.subr.bf16.mxu0 %v11291_v20  ;;  %7344 = vmatprep.subr.bf16.mxu1 %v8677_v19 }
 0x62a   : > { %7322 = vmatpush3.bf16.msra.mxu0 %v11307_v42  ;;  %7346 = vmatpush1.bf16.msra.mxu1 %v11288_v39 }
 0x62b   : > { %7347 = vmatprep.subr.bf16.mxu1 %v8677_v19 }
 0x62d   : > { %6244 = vmatmul.mubr.f32.vlgmr.msra.gmra.mrb[2].mxu0 %v6096_v11 }
 0x62e   : > { %7349 = vmatpush1.bf16.msra.mxu1 %v11310_v54 }
 0x62f   : > { %7350 = vmatprep.subr.bf16.mxu1 %v8677_v19 }
 0x632   : > { %7352 = vmatpush1.bf16.msra.mxu1 %v11322_v59 }
 0x633   : > { %7353 = vmatprep.subr.bf16.mxu1 %v8677_v19 }
 0x636   : > { %7356 = vmatpush1.bf16.msk.msra.mxu1 %vm11338_vm4, %v7354_v52 }
 0x639   : > { %6314 = vmatmul.mubr.f32.vlgmr.msra.gmra.mrb[2].mxu1 %v6110_v56 }
 0x6e0   : > { %v7187_v58 = vpop.f32.mrb[0].mxu0  ;;  %v6066_v5 = vpop.f32.mrb[0].mxu1 }
 0x6e1   : > { %v7188_v39 = vpop.f32.mrb[1].mxu0  ;;  %v6068_v20 = vpop.f32.mrb[1].mxu1 }
 0x6e2   : > { %v7189_v42 = vadd.f32 %v7188_v39, %v7187_v58 }
 0x6e4   : > { %v5997_v54 = vadd.f32 %v7189_v42, %v5923_v18 }
 0x6e6   : > { %v6067_v59 = vadd.f32 %v6066_v5, %v5997_v54 }
 0x6e8   : > { %6071 = vst.msk [vmem:[#allocation4] sm:$0x1] %vm6070_vm7, %v6067_v59 }
 0x700   : > { %v7222_v19 = vpop.f32.mrb[2].mxu0 }
 0x701   : > { %v7223_v3 = vpop.f32.mrb[3].mxu0 }
 0x702   : > { %v7224_v32 = vadd.f32 %v7223_v3, %v7222_v19 }
 0x704   : > { %v6246_v2 = vadd.f32 %v7224_v32, %v6172_v45 }
 0x70c   : > { %v6315_v28 = vpop.f32.mrb[2].mxu1 }
 0x70d   : > { %v6316_v34 = vadd.f32 %v6315_v28, %v6246_v2  ;;  %v6317_v14 = vpop.f32.mrb[3].mxu1 }
 0x70f   : > { %6320 = vst.msk [vmem:[#allocation4 + $0x1] sm:$0x1] %vm6070_vm7, %v6316_v34 }
 0x710 PF: > { %6327 = sbr.rel (!%p8755_p5) target bundleno = 1821 (0x71d), region = 78  ;;  %v6345_v21 = vld [vmem:[%s10239_s24] sm:$0xff] (%p8755_p5)  ;;  %v6347_v36 = vld [vmem:[%s10239_s24 + $0x8] sm:$0xff] (%p8755_p5)  ;;  %v6349_v40 = vld [vmem:[%s10239_s24 + $0x10] sm:$0xff] (%p8755_p5) }
 0x711   : > { %s7110_s26 = smul.u32 (%p8755_p5), 68, %s8738_s27  ;;  %v6351_v37 = vld [vmem:[%s10239_s24 + $0x18] sm:$0xff] (%p8755_p5)  ;;  %v6353_v51 = vld [vmem:[%s10239_s24 + $0x20] sm:$0xff] (%p8755_p5)  ;;  %v6355_v55 = vld [vmem:[%s10239_s24 + $0x28] sm:$0xff] (%p8755_p5) }
 0x712   : > { %v6357_v46 = vld [vmem:[%s10239_s24 + $0x30] sm:$0xff] (%p8755_p5)  ;;  %v6359_v44 = vld [vmem:[%s10239_s24 + $0x38] sm:$0xff] (%p8755_p5)  ;;  %v6361_v50 = vld [vmem:[%s10239_s24 + $0x44] sm:$0xff] (%p8755_p5) }
 0x713   : > { %s6330_s30 = scalar_lea.vmem (%p8755_p5), %s11492_s6, %s7110_s26  ;;  %v6363_v62 = vld [vmem:[%s10239_s24 + $0x4c] sm:$0xff] (%p8755_p5)  ;;  %v6365_v48 = vld [vmem:[%s10239_s24 + $0x54] sm:$0xff] (%p8755_p5)  ;;  %v6367_v0 = vld [vmem:[%s10239_s24 + $0x5c] sm:$0xff] (%p8755_p5) }
 0x714   : > { %6346 = vst [vmem:[%s6330_s30] sm:$0xff] (%p8755_p5), %v6345_v21  ;;  %6348 = vst [vmem:[%s6330_s30 + $0x8] sm:$0xff] (%p8755_p5), %v6347_v36  ;;  %v6369_v35 = vld [vmem:[%s10239_s24 + $0x64] sm:$0xff] (%p8755_p5)  ;;  %v6371_v6 = vld [vmem:[%s10239_s24 + $0x6c] sm:$0xff] (%p8755_p5) }
 0x715   : > { %6350 = vst [vmem:[%s6330_s30 + $0x10] sm:$0xff] (%p8755_p5), %v6349_v40  ;;  %6352 = vst [vmem:[%s6330_s30 + $0x18] sm:$0xff] (%p8755_p5), %v6351_v37  ;;  %v6373_v26 = vld [vmem:[%s10239_s24 + $0x74] sm:$0xff] (%p8755_p5)  ;;  %v6375_v4 = vld [vmem:[%s10239_s24 + $0x7c] sm:$0xff] (%p8755_p5) }
 0x716   : > { %6354 = vst [vmem:[%s6330_s30 + $0x20] sm:$0xff] (%p8755_p5), %v6353_v51  ;;  %6356 = vst [vmem:[%s6330_s30 + $0x28] sm:$0xff] (%p8755_p5), %v6355_v55  ;;  %v7101_v10 = vld [vmem:[%s10239_s24 + $0x40] sm:$0xf] (%p8755_p5)  ;;  %v7103_v22 = vld [vmem:[%s10239_s24 + $0x84] sm:$0xf] (%p8755_p5) }
 0x717   : > { %6358 = vst [vmem:[%s6330_s30 + $0x30] sm:$0xff] %v6357_v46  ;;  %6360 = vst [vmem:[%s6330_s30 + $0x38] sm:$0xff] %v6359_v44 }
 0x718   : > { %6362 = vst [vmem:[%s6330_s30 + $0x110] sm:$0xff] %v6361_v50  ;;  %6364 = vst [vmem:[%s6330_s30 + $0x118] sm:$0xff] %v6363_v62 }
 0x719   : > { %6366 = vst [vmem:[%s6330_s30 + $0x120] sm:$0xff] %v6365_v48  ;;  %6368 = vst [vmem:[%s6330_s30 + $0x128] sm:$0xff] %v6367_v0 }
 0x71a   : > { %6370 = vst [vmem:[%s6330_s30 + $0x130] sm:$0xff] %v6369_v35  ;;  %6372 = vst [vmem:[%s6330_s30 + $0x138] sm:$0xff] %v6371_v6 }
 0x71b   : > { %6374 = vst [vmem:[%s6330_s30 + $0x140] sm:$0xff] %v6373_v26  ;;  %6376 = vst [vmem:[%s6330_s30 + $0x148] sm:$0xff] %v6375_v4 }
 0x71c   : > { %7102 = vst [vmem:[%s6330_s30 + $0x40] sm:$0xf] %v7101_v10  ;;  %7104 = vst [vmem:[%s6330_s30 + $0x150] sm:$0xf] %v7103_v22 }
 0x71d PF: > { %s8679_s10 = smov [#allocation4]  }
 0x71e   : > { %s6397_s11 = sshll.u32 %s8679_s10, 4  ;;  %s6398_s11 = int_to_ptr.vmem [resolvable:$true] %s6397_s11 }
 0x71f   : > { %s8620_s12 = scalar_lea.vmem %s6398_s11, 32  ;;  %p8627_p1 = scmp.lt.s32.totalorder %s6398_s11, %s6398_s11 }
 0x720   : > { %p8621_p12 = scmp.ne.s32.totalorder %s6398_s11, %s8620_s12  ;;  %p8628_p2 = scmp.lt.s32.totalorder %s8620_s12, %s8620_s12 }
 0x722   : > { %p8622_p13 = pnand %p8621_p12, %p173_p3  ;;  %p8629_p4 = por %p8628_p2, %p8627_p1 }
 0x724   : > { %p8623_p0 = pneg %p8622_p13 }
 0x726   : > { %p8630_p5 = pnand %p8629_p4, %p8623_p0 }
 0x728   : > { %8633 = shalt.err (!%p8630_p5)
}
 0x729   : > { %s8634_s14 = scalar_lea.hbm %s11493_s7, 32 }
 0x72a   : > { %p8635_p6 = scmp.ne.s32.totalorder %s11493_s7, %s8634_s14  ;;  %p8640_p9 = scmp.lt.u32.totalorder %s8634_s14, %s11493_s7 }
 0x72c   : > { %p8636_p7 = pnand %p8635_p6, %p173_p3 }
 0x72e   : > { %p8637_p8 = pneg %p8636_p7 }
 0x730   : > { %p8642_p10 = pnand %p8640_p9, %p8637_p8 }
 0x732   : > { %8645 = shalt.err (!%p8642_p10)
}
 0x733   : > { %s8680_s19 = smov 16   ;;  %s8681_s20 = smov 1  }
 0x734   : > { %7457 = dma.vmem_to_hbm [thread:$0]  (%p173_p3), %s6398_s11, 32, %s11493_s7, [#allocation5], %s8680_s19, %s8680_s19, %s8681_s20  }
 0x735   : > { %8659 = dma.done.wait (%p173_p3), [#allocation5], 32  }
 0x736   : > { %8661 = vsyncadd (%p173_p3), [#allocation5], 4294967264 }
 0x737 PF: > { %p16_p11 = scmp.ge.s32.totalorder %s8741_s28, 6   ;;  %s11498_s24 = smov %s8668_s25 }
 0x738   : > { %s11499_s25 = smov %s8751_s8  ;;  %s11500_s26 = smov %s8741_s28 }
 0x739   :  { %18 = sbr.rel (!%p16_p11) target bundleno = 2 (0x2), region = 162 }
 0x740   :  { %6420 = vsyncpa [#allocation5], 1 }
 0x741   :  { %6422 = vsyncpa [#allocation5 + $0x1], 1 }

// kernel: _lambda_.2
= control target key start
LH: loop header
LB: loop body
LE: loop exit
PB: predicated region body
PF: predicated region fallthrough
CT: control target
= control target key end

     0   :  { %s13102_s12 = smov 0   ;;  %s17136_s0 = inlined_call_operand.vmem [shape: f32[2,49,1024], index: 0, kind: input, shape index: {}]   ;;  %s17137_s1 = inlined_call_operand.vmem [shape: bf16[1024,2176], index: 1, kind: input, shape index: {}]   ;;  %s17138_s2 = inlined_call_operand.vmem [shape: f32[1,2176], index: 2, kind: input, shape index: {}]   ;;  %s17139_s3 = inlined_call_operand.vmem [shape: f32[2,49,2176], index: 3, kind: output, shape index: {}]  }
   0x1 LB: > { %s9709_s13 = sadd.s32 4294967295, %s13080_s12   ;;  %p9713_p0 = scmp.ge.s32.totalorder %s13080_s12, 1  ;;  %s13080_s12 = sphi %s13102_s12, %s13_s12  }
   0x2   : > { %p137_p1 = scmp.lt.s32.totalorder %s13080_s12, 3 }
   0x4   : > { %p138_p2 = pnand %p9713_p0, %p137_p1 }
   0x5   : > { %v11473_v0 = vld [vmem:[%s17137_s1 + $0x4] ss:$68 sps:$4 sm:$0xff] (!%p138_p2)   ;;  %v11475_v1 = vld [vmem:[%s17137_s1 + $0xc] ss:$68 sps:$4 sm:$0xff] (!%p138_p2)   ;;  %v11481_v5 = vld [vmem:[%s17137_s1 + $0x94] ss:$68 sps:$4 sm:$0xff] (!%p138_p2)  }
   0x6   : > { %141 = sbr.rel (%p138_p2) target bundleno = 1338 (0x53a), region = 32  ;;  %7007 = vmatprep.subr.bf16.mxu0 (!%p138_p2), %v11473_v0  ;;  %v11477_v2 = vld [vmem:[%s17137_s1] ss:$68 sps:$4 sm:$0xff] (!%p138_p2)   ;;  %v11478_v3 = vld [vmem:[%s17137_s1 + $0x8] ss:$68 sps:$4 sm:$0xff] (!%p138_p2)   ;;  %7291 = vmatprep.subr.bf16.mxu1 (!%p138_p2), %v11475_v1  ;;  %p161_p3 = scmp.lt.s32.totalorder (!%p138_p2), %s9709_s13, 1 }
   0x7   : > { %v11479_v4 = vld [vmem:[%s17137_s1 + $0x8c] ss:$68 sps:$4 sm:$0xff] (!%p138_p2)   ;;  %7008 = vmatpush1.bf16.msra.mxu0 (!%p138_p2), %v11477_v2  ;;  %7292 = vmatpush1.bf16.msra.mxu1 (!%p138_p2), %v11478_v3  ;;  %v11485_v8 = vld [vmem:[%s17137_s1 + $0x114] ss:$68 sps:$4 sm:$0xff] (!%p138_p2)   ;;  %v11487_v9 = vld [vmem:[%s17137_s1 + $0x11c] ss:$68 sps:$4 sm:$0xff] (!%p138_p2)  }
   0x8   : > { %v11483_v6 = vld [vmem:[%s17137_s1 + $0x88] ss:$68 sps:$4 sm:$0xff] (!%p138_p2)   ;;  %7009 = vmatprep.subr.bf16.mxu0 (!%p138_p2), %v11479_v4  ;;  %v11484_v7 = vld [vmem:[%s17137_s1 + $0x90] ss:$68 sps:$4 sm:$0xff] (!%p138_p2)   ;;  %7293 = vmatprep.subr.bf16.mxu1 (!%p138_p2), %v11481_v5  ;;  %v11490_v11 = vld [vmem:[%s17137_s1 + $0x118] ss:$68 sps:$4 sm:$0xff] (!%p138_p2)  }
   0x9   : > { %v11489_v10 = vld [vmem:[%s17137_s1 + $0x110] ss:$68 sps:$4 sm:$0xff] (!%p138_p2)   ;;  %v11491_v12 = vld [vmem:[%s17137_s1 + $0x19c] ss:$68 sps:$4 sm:$0xff] (!%p138_p2)   ;;  %v11493_v13 = vld [vmem:[%s17137_s1 + $0x1a4] ss:$68 sps:$4 sm:$0xff] (!%p138_p2)  }
   0xa   : > { %v11495_v14 = vld [vmem:[%s17137_s1 + $0x198] ss:$68 sps:$4 sm:$0xff] (!%p138_p2)   ;;  %v11496_v15 = vld [vmem:[%s17137_s1 + $0x1a0] ss:$68 sps:$4 sm:$0xff] (!%p138_p2)   ;;  %v11499_v17 = vld [vmem:[%s17137_s1 + $0x22c] ss:$68 sps:$4 sm:$0xff] (!%p138_p2)  }
   0xb   : > { %7010 = vmatpush1.bf16.msra.mxu0 (!%p138_p2), %v11483_v6  ;;  %7294 = vmatpush1.bf16.msra.mxu1 (!%p138_p2), %v11484_v7  ;;  %v11497_v16 = vld [vmem:[%s17137_s1 + $0x224] ss:$68 sps:$4 sm:$0xff] (!%p138_p2)   ;;  %v11503_v20 = vld [vmem:[%s17137_s1 + $0x2ac] ss:$68 sps:$4 sm:$0xff] (!%p138_p2)   ;;  %v11505_v21 = vld [vmem:[%s17137_s1 + $0x2b4] ss:$68 sps:$4 sm:$0xff] (!%p138_p2)  }
   0xc   : > { %7011 = vmatprep.subr.bf16.mxu0 (!%p138_p2), %v11485_v8  ;;  %7295 = vmatprep.subr.bf16.mxu1 (!%p138_p2), %v11487_v9  ;;  %v11501_v18 = vld [vmem:[%s17137_s1 + $0x220] ss:$68 sps:$4 sm:$0xff] (!%p138_p2)   ;;  %v11502_v19 = vld [vmem:[%s17137_s1 + $0x228] ss:$68 sps:$4 sm:$0xff] (!%p138_p2)   ;;  %v11508_v23 = vld [vmem:[%s17137_s1 + $0x2b0] ss:$68 sps:$4 sm:$0xff] (!%p138_p2)  }
   0xd   : > { %v11507_v22 = vld [vmem:[%s17137_s1 + $0x2a8] ss:$68 sps:$4 sm:$0xff]   ;;  %v11509_v24 = vld [vmem:[%s17137_s1 + $0x334] ss:$68 sps:$4 sm:$0xff]   ;;  %v11511_v25 = vld [vmem:[%s17137_s1 + $0x33c] ss:$68 sps:$4 sm:$0xff]  }
   0xe   : > { %v11513_v26 = vld [vmem:[%s17137_s1 + $0x330] ss:$68 sps:$4 sm:$0xff]   ;;  %v11514_v27 = vld [vmem:[%s17137_s1 + $0x338] ss:$68 sps:$4 sm:$0xff]   ;;  %v11517_v29 = vld [vmem:[%s17137_s1 + $0x3c4] ss:$68 sps:$4 sm:$0xff]  }
   0xf   : > { %7012 = vmatpush1.bf16.msra.mxu0 %v11489_v10  ;;  %7296 = vmatpush1.bf16.msra.mxu1 %v11490_v11  ;;  %v11515_v28 = vld [vmem:[%s17137_s1 + $0x3bc] ss:$68 sps:$4 sm:$0xff]   ;;  %v11521_v32 = vld [vmem:[%s17137_s1 + $0x444] ss:$68 sps:$4 sm:$0xff]   ;;  %v11523_v33 = vld [vmem:[%s17137_s1 + $0x44c] ss:$68 sps:$4 sm:$0xff]  }
  0x10   : > { %7013 = vmatprep.subr.bf16.mxu0 %v11491_v12  ;;  %7297 = vmatprep.subr.bf16.mxu1 %v11493_v13  ;;  %v11519_v30 = vld [vmem:[%s17137_s1 + $0x3b8] ss:$68 sps:$4 sm:$0xff]   ;;  %v11520_v31 = vld [vmem:[%s17137_s1 + $0x3c0] ss:$68 sps:$4 sm:$0xff]   ;;  %v11526_v35 = vld [vmem:[%s17137_s1 + $0x448] ss:$68 sps:$4 sm:$0xff]  }
  0x11   : > { %v11525_v34 = vld [vmem:[%s17137_s1 + $0x440] ss:$68 sps:$4 sm:$0xff]   ;;  %s17141_s13 = smov (!%p161_p3, %s9709_s13), 1  ;;  %v11527_v36 = vld [vmem:[%s17137_s1 + $0x4cc] ss:$68 sps:$4 sm:$0xff]  }
  0x12   : > { %v11529_v37 = vld [vmem:[%s17137_s1 + $0x4d4] ss:$68 sps:$4 sm:$0xff]   ;;  %v11531_v38 = vld [vmem:[%s17137_s1 + $0x4c8] ss:$68 sps:$4 sm:$0xff]   ;;  %s11463_s17 = smul.u32 448, %s17141_s13 }
  0x13   : > { %7014 = vmatpush1.bf16.msra.mxu0 %v11495_v14  ;;  %7298 = vmatpush1.bf16.msra.mxu1 %v11496_v15  ;;  %v11532_v39 = vld [vmem:[%s17137_s1 + $0x4d0] ss:$68 sps:$4 sm:$0xff]   ;;  %v11535_v41 = vld [vmem:[%s17137_s1 + $0x55c] ss:$68 sps:$4 sm:$0xff]   ;;  %v11541_v45 = vld [vmem:[%s17137_s1 + $0x5e4] ss:$68 sps:$4 sm:$0xff]  }
  0x14   : > { %7015 = vmatprep.subr.bf16.mxu0 %v11497_v16  ;;  %7299 = vmatprep.subr.bf16.mxu1 %v11499_v17  ;;  %v11533_v40 = vld [vmem:[%s17137_s1 + $0x554] ss:$68 sps:$4 sm:$0xff]   ;;  %s13252_s30 = scalar_lea.vmem %s17136_s0, %s11463_s17  ;;  %v11539_v44 = vld [vmem:[%s17137_s1 + $0x5dc] ss:$68 sps:$4 sm:$0xff]   ;;  %v11545_v51 = vld [vmem:[%s17137_s1 + $0x664] ss:$68 sps:$4 sm:$0xff]  }
  0x15   : > { %v11537_v42 = vld [vmem:[%s17137_s1 + $0x550] ss:$68 sps:$4 sm:$0xff]   ;;  %v11538_v43 = vld [vmem:[%s17137_s1 + $0x558] ss:$68 sps:$4 sm:$0xff]   ;;  %v173_v46 = vld [vmem:[%s13252_s30 + $0x8] sm:$0xff]  ;;  %s11464_s28 = smul.u32 952, %s17141_s13 }
  0x16   : > { %v181_v47 = vld [vmem:[%s13252_s30 + $0x48] sm:$0xff]  ;;  %v11543_v48 = vld [vmem:[%s17137_s1 + $0x5d8] ss:$68 sps:$4 sm:$0xff]   ;;  %v11544_v49 = vld [vmem:[%s17137_s1 + $0x5e0] ss:$68 sps:$4 sm:$0xff]  }
  0x17   : > { %7016 = vmatpush1.bf16.msra.mxu0 %v11501_v18  ;;  %7300 = vmatpush1.bf16.msra.mxu1 %v11502_v19  ;;  %v13268_v50 = vpack.c.bf16 %v181_v47, %v173_v46  ;;  %v11547_v52 = vld [vmem:[%s17137_s1 + $0x66c] ss:$68 sps:$4 sm:$0xff]   ;;  %v11549_v53 = vld [vmem:[%s17137_s1 + $0x660] ss:$68 sps:$4 sm:$0xff]   ;;  %v11553_v56 = vld [vmem:[%s17137_s1 + $0x6f4] ss:$68 sps:$4 sm:$0xff]   ;;  %s14801_s14 = scalar_lea.vmem %s17139_s3, %s11464_s28 }
  0x18   : > { %7017 = vmatprep.subr.bf16.mxu0 %v11503_v20  ;;  %7301 = vmatprep.subr.bf16.mxu1 %v11505_v21  ;;  %v11550_v54 = vld [vmem:[%s17137_s1 + $0x668] ss:$68 sps:$4 sm:$0xff]   ;;  %v11556_v58 = vld [vmem:[%s17137_s1 + $0x6f0] ss:$68 sps:$4 sm:$0xff]   ;;  %v11559_v60 = vld [vmem:[%s17137_s1 + $0x77c] ss:$68 sps:$4 sm:$0xff]  }
  0x19   : > { %7039 = vmatprep.mubr.bf16.mxu0 %v13268_v50  ;;  %7323 = vmatprep.mubr.bf16.mxu1 %v13268_v50  ;;  %v11551_v55 = vld [vmem:[%s17137_s1 + $0x6ec] ss:$68 sps:$4 sm:$0xff]   ;;  %v11557_v59 = vld [vmem:[%s17137_s1 + $0x774] ss:$68 sps:$4 sm:$0xff]   ;;  %v11563_v63 = vld [vmem:[%s17137_s1 + $0x7fc] ss:$68 sps:$4 sm:$0xff]  }
  0x1a   : > { %v11555_v57 = vld [vmem:[%s17137_s1 + $0x6e8] ss:$68 sps:$4 sm:$0xff]   ;;  %v11561_v61 = vld [vmem:[%s17137_s1 + $0x770] ss:$68 sps:$4 sm:$0xff]   ;;  %v11562_v62 = vld [vmem:[%s17137_s1 + $0x778] ss:$68 sps:$4 sm:$0xff]  }
  0x1b   : > { %7018 = vmatpush1.bf16.msra.mxu0 %v11507_v22  ;;  %7302 = vmatpush1.bf16.msra.mxu1 %v11508_v23  ;;  %v11565_v0 = vld [vmem:[%s17137_s1 + $0x804] ss:$68 sps:$4 sm:$0xff]   ;;  %v11567_v1 = vld [vmem:[%s17137_s1 + $0x7f8] ss:$68 sps:$4 sm:$0xff]   ;;  %v11574_v6 = vld [vmem:[%s17137_s1 + $0x88c] ss:$68 sps:$4 sm:$0xff]  }
  0x1c   : > { %7019 = vmatprep.subr.bf16.mxu0 %v11509_v24  ;;  %7303 = vmatprep.subr.bf16.mxu1 %v11511_v25  ;;  %v11568_v2 = vld [vmem:[%s17137_s1 + $0x800] ss:$68 sps:$4 sm:$0xff]   ;;  %v11572_v8 = vld [vmem:[%s17137_s1 + $0x888] ss:$68 sps:$4 sm:$0xff]   ;;  %v11580_v11 = vld [vmem:[%s17137_s1 + $0x914] ss:$68 sps:$4 sm:$0xff]  }
  0x1d   : > { %v11571_v3 = vld [vmem:[%s17137_s1 + $0x884] ss:$68 sps:$4 sm:$0xff]   ;;  %v11577_v10 = vld [vmem:[%s17137_s1 + $0x90c] ss:$68 sps:$4 sm:$0xff]   ;;  %v11583_v14 = vld [vmem:[%s17137_s1 + $0x994] ss:$68 sps:$4 sm:$0xff]  }
  0x1e   : > { %v172_v4 = vld [vmem:[%s13252_s30] sm:$0xff]  ;;  %v11575_v12 = vld [vmem:[%s17137_s1 + $0x908] ss:$68 sps:$4 sm:$0xff]   ;;  %v11578_v13 = vld [vmem:[%s17137_s1 + $0x910] ss:$68 sps:$4 sm:$0xff]  }
  0x1f   : > { %7020 = vmatpush1.bf16.msra.mxu0 %v11513_v26  ;;  %7304 = vmatpush1.bf16.msra.mxu1 %v11514_v27  ;;  %v180_v5 = vld [vmem:[%s13252_s30 + $0x40] sm:$0xff]  ;;  %v189_v16 = vld [vmem:[%s13252_s30 + $0x88] sm:$0xff]  ;;  %v11581_v18 = vld [vmem:[%s17137_s1 + $0x990] ss:$68 sps:$4 sm:$0xff]  }
  0x20   : > { %7021 = vmatprep.subr.bf16.mxu0 %v11515_v28  ;;  %7305 = vmatprep.subr.bf16.mxu1 %v11517_v29  ;;  %v11569_v7 = vld [vmem:[%s17137_s1 + $0x880] ss:$68 sps:$4 sm:$0xff]   ;;  %v13334_v9 = vpack.c.bf16 %v180_v5, %v172_v4  ;;  %v197_v17 = vld [vmem:[%s13252_s30 + $0xc8] sm:$0xff]  ;;  %v11584_v19 = vld [vmem:[%s17137_s1 + $0x998] ss:$68 sps:$4 sm:$0xff]  }
  0x21   : > { %v11586_v15 = vld [vmem:[%s17137_s1 + $0x99c] ss:$68 sps:$4 sm:$0xff]   ;;  %v13364_v20 = vpack.c.bf16 %v197_v17, %v189_v16  ;;  %v11592_v22 = vld [vmem:[%s17137_s1 + $0xa24] ss:$68 sps:$4 sm:$0xff]   ;;  %v11598_v29 = vld [vmem:[%s17137_s1 + $0xaac] ss:$68 sps:$4 sm:$0xff]  }
  0x22   : > { %v11589_v21 = vld [vmem:[%s17137_s1 + $0xa1c] ss:$68 sps:$4 sm:$0xff]   ;;  %v11595_v28 = vld [vmem:[%s17137_s1 + $0xaa4] ss:$68 sps:$4 sm:$0xff]   ;;  %v11605_v47 = vld [vmem:[%s17137_s1 + $0xbb0] ss:$68 sps:$4 sm:$0xff]  }
  0x23   : > { %7022 = vmatpush1.bf16.msra.mxu0 %v11519_v30  ;;  %7306 = vmatpush1.bf16.msra.mxu1 %v11520_v31  ;;  %v188_v23 = vld [vmem:[%s13252_s30 + $0x80] sm:$0xff]  ;;  %v11587_v25 = vld [vmem:[%s17137_s1 + $0xa18] ss:$68 sps:$4 sm:$0xff]   ;;  %v205_v30 = vld [vmem:[%s13252_s30 + $0x108] sm:$0xff] }
  0x24   : > { %7023 = vmatprep.subr.bf16.mxu0 %v11521_v32  ;;  %7307 = vmatprep.subr.bf16.mxu1 %v11523_v33  ;;  %v196_v24 = vld [vmem:[%s13252_s30 + $0xc0] sm:$0xff]  ;;  %v213_v31 = vld [vmem:[%s13252_s30 + $0x148] sm:$0xff]  ;;  %v11629_v4 = vld [vmem:[%s17137_s1 + $0xdd0] ss:$68 sps:$4 sm:$0xff]  }
  0x25   : > { %v11590_v26 = vld [vmem:[%s17137_s1 + $0xa20] ss:$68 sps:$4 sm:$0xff]   ;;  %v13382_v27 = vpack.c.bf16 %v196_v24, %v188_v23  ;;  %v13397_v33 = vpack.c.bf16 %v213_v31, %v205_v30  ;;  %v11632_v5 = vld [vmem:[%s17137_s1 + $0xdd8] ss:$68 sps:$4 sm:$0xff]   ;;  %v11647_v17 = vld [vmem:[%s17137_s1 + $0xf68] ss:$68 sps:$4 sm:$0xff]  }
  0x26   : > { %v11593_v32 = vld [vmem:[%s17137_s1 + $0xaa0] ss:$68 sps:$4 sm:$0xff]   ;;  %v11652_v16 = vld [vmem:[%s17137_s1 + $0xf74] ss:$68 sps:$4 sm:$0xff]  }
  0x27   : > { %7024 = vmatpush1.bf16.msra.mxu0 %v11525_v34  ;;  %7308 = vmatpush1.bf16.msra.mxu1 %v11526_v35  ;;  %v11596_v34 = vld [vmem:[%s17137_s1 + $0xaa8] ss:$68 sps:$4 sm:$0xff]   ;;  %v220_v46 = vld [vmem:[%s13252_s30 + $0x180] sm:$0x1]  ;;  %v11656_v23 = vld [vmem:[%s17137_s1 + $0xff8] ss:$68 sps:$4 sm:$0xff]  }
  0x28   : > { %7025 = vmatprep.subr.bf16.mxu0 %v11527_v36  ;;  %7309 = vmatprep.subr.bf16.mxu1 %v11529_v37  ;;  %v11601_v35 = vld [vmem:[%s17137_s1 + $0xb2c] ss:$68 sps:$4 sm:$0xff]   ;;  %v11604_v36 = vld [vmem:[%s17137_s1 + $0xb34] ss:$68 sps:$4 sm:$0xff]   ;;  %v204_v37 = vld [vmem:[%s13252_s30 + $0x100] sm:$0xff] }
  0x29   : > { %v11661_v24 = vld [vmem:[%s17137_s1 + $0x107c] ss:$68 sps:$4 sm:$0xff]   ;;  %v174_v30 = vld [vmem:[%s13252_s30 + $0x10] sm:$0xff] }
  0x2a   : > { %v182_v31 = vld [vmem:[%s13252_s30 + $0x50] sm:$0xff] }
  0x2b   : > { %7026 = vmatpush1.bf16.msra.mxu0 %v11531_v38  ;;  %7310 = vmatpush1.bf16.msra.mxu1 %v11532_v39  ;;  %v212_v38 = vld [vmem:[%s13252_s30 + $0x140] sm:$0xff] }
  0x2c   : > { %7027 = vmatprep.subr.bf16.mxu0 %v11533_v40  ;;  %7311 = vmatprep.subr.bf16.mxu1 %v11535_v41  ;;  %v13412_v39 = vpack.c.bf16 %v212_v38, %v204_v37  ;;  %v11599_v40 = vld [vmem:[%s17137_s1 + $0xb28] ss:$68 sps:$4 sm:$0xff]   ;;  %v11602_v41 = vld [vmem:[%s17137_s1 + $0xb30] ss:$68 sps:$4 sm:$0xff]   ;;  %v11665_v37 = vld [vmem:[%s17137_s1 + $0x1100] ss:$68 sps:$4 sm:$0xff]  }
  0x2d   : > { %v11668_v38 = vld [vmem:[%s17137_s1 + $0x1108] ss:$68 sps:$4 sm:$0xff]  }
  0x2f   : > { %7028 = vmatpush1.bf16.msra.mxu0 %v11537_v42  ;;  %7312 = vmatpush1.bf16.msra.mxu1 %v11538_v43  ;;  %v221_v42 = vld [vmem:[%s13252_s30 + $0x188] sm:$0x1]  ;;  %v11607_v43 = vld [vmem:[%s17137_s1 + $0xbb4] ss:$68 sps:$4 sm:$0xff]  }
  0x30   : > { %7029 = vmatprep.subr.bf16.mxu0 %v11539_v44  ;;  %7313 = vmatprep.subr.bf16.mxu1 %v11541_v45  ;;  %v11610_v44 = vld [vmem:[%s17137_s1 + $0xbbc] ss:$68 sps:$4 sm:$0xff]   ;;  %v13427_v45 = vpack.c.bf16 %v221_v42, %v221_v42  ;;  %v11671_v42 = vld [vmem:[%s17137_s1 + $0x1188] ss:$68 sps:$4 sm:$0xff]  }
  0x33   : > { %7030 = vmatpush1.bf16.msra.mxu0 %v11543_v48  ;;  %7314 = vmatpush1.bf16.msra.mxu1 %v11544_v49  ;;  %v11608_v48 = vld [vmem:[%s17137_s1 + $0xbb8] ss:$68 sps:$4 sm:$0xff]  }
  0x34   : > { %7031 = vmatprep.subr.bf16.mxu0 %v11545_v51  ;;  %7315 = vmatprep.subr.bf16.mxu1 %v11547_v52  ;;  %v11613_v49 = vld [vmem:[%s17137_s1 + $0xc3c] ss:$68 sps:$4 sm:$0xff]   ;;  %v11616_v51 = vld [vmem:[%s17137_s1 + $0xc44] ss:$68 sps:$4 sm:$0xff]   ;;  %v13446_v52 = vpack.c.bf16 %v220_v46, %v220_v46  ;;  %v11679_v46 = vld [vmem:[%s17137_s1 + $0x1214] ss:$68 sps:$4 sm:$0xff]  }
  0x37   : > { %7032 = vmatpush1.bf16.msra.mxu0 %v11549_v53  ;;  %7316 = vmatpush1.bf16.msra.mxu1 %v11550_v54  ;;  %v175_v53 = vld [vmem:[%s13252_s30 + $0x18] sm:$0xff] }
  0x38   : > { %7033 = vmatprep.subr.bf16.mxu0 %v11551_v55  ;;  %7317 = vmatprep.subr.bf16.mxu1 %v11553_v56  ;;  %v183_v54 = vld [vmem:[%s13252_s30 + $0x58] sm:$0xff] }
  0x39   : > { %v11611_v55 = vld [vmem:[%s17137_s1 + $0xc38] ss:$68 sps:$4 sm:$0xff]   ;;  %v13453_v56 = vpack.c.bf16 %v183_v54, %v175_v53 }
  0x3a   : > { %v207_v54 = vld [vmem:[%s13252_s30 + $0x118] sm:$0xff] }
  0x3b   : > { %7034 = vmatpush1.bf16.msra.mxu0 %v11555_v57  ;;  %7318 = vmatpush1.bf16.msra.mxu1 %v11556_v58  ;;  %v11614_v57 = vld [vmem:[%s17137_s1 + $0xc40] ss:$68 sps:$4 sm:$0xff]  }
  0x3c   : > { %7035 = vmatprep.subr.bf16.mxu0 %v11557_v59  ;;  %7319 = vmatprep.subr.bf16.mxu1 %v11559_v60  ;;  %v11619_v58 = vld [vmem:[%s17137_s1 + $0xcc4] ss:$68 sps:$4 sm:$0xff]   ;;  %v11622_v59 = vld [vmem:[%s17137_s1 + $0xccc] ss:$68 sps:$4 sm:$0xff]  }
  0x3d   : > { %v11617_v60 = vld [vmem:[%s17137_s1 + $0xcc0] ss:$68 sps:$4 sm:$0xff]  }
  0x3f   : > { %7036 = vmatpush1.bf16.msra.mxu0 %v11561_v61  ;;  %7320 = vmatpush1.bf16.msra.mxu1 %v11562_v62  ;;  %v11620_v61 = vld [vmem:[%s17137_s1 + $0xcc8] ss:$68 sps:$4 sm:$0xff]  }
  0x40   : > { %7037 = vmatprep.subr.bf16.mxu0 %v11563_v63  ;;  %7321 = vmatprep.subr.bf16.mxu1 %v11565_v0  ;;  %v11625_v62 = vld [vmem:[%s17137_s1 + $0xd4c] ss:$68 sps:$4 sm:$0xff]   ;;  %v11628_v63 = vld [vmem:[%s17137_s1 + $0xd54] ss:$68 sps:$4 sm:$0xff]  }
  0x41   : > { %v11623_v0 = vld [vmem:[%s17137_s1 + $0xd48] ss:$68 sps:$4 sm:$0xff]  }
  0x43   : > { %7038 = vmatpush1.bf16.msra.mxu0 %v11567_v1  ;;  %7322 = vmatpush1.bf16.msra.mxu1 %v11568_v2  ;;  %v11626_v1 = vld [vmem:[%s17137_s1 + $0xd50] ss:$68 sps:$4 sm:$0xff]  }
  0x44   : > { %7078 = vmatprep.subr.bf16.mxu0 %v11571_v3  ;;  %7362 = vmatprep.subr.bf16.mxu1 %v11574_v6  ;;  %v11631_v2 = vld [vmem:[%s17137_s1 + $0xdd4] ss:$68 sps:$4 sm:$0xff]   ;;  %v11634_v3 = vld [vmem:[%s17137_s1 + $0xddc] ss:$68 sps:$4 sm:$0xff]  }
  0x45   : > { %v11637_v6 = vld [vmem:[%s17137_s1 + $0xe5c] ss:$68 sps:$4 sm:$0xff]  }
  0x46   : > { %7040 = vmatmul.mubr.bf16.vlgmr.msra.gmra.mrb[0].mxu0 %v13334_v9  ;;  %7324 = vmatmul.mubr.bf16.vlgmr.msra.gmra.mrb[0].mxu1 %v13334_v9 }
  0x47   : > { %7079 = vmatpush1.bf16.msra.mxu0 %v11569_v7  ;;  %7363 = vmatpush1.bf16.msra.mxu1 %v11572_v8  ;;  %v11640_v7 = vld [vmem:[%s17137_s1 + $0xe64] ss:$68 sps:$4 sm:$0xff]   ;;  %v11635_v8 = vld [vmem:[%s17137_s1 + $0xe58] ss:$68 sps:$4 sm:$0xff]  }
  0x48   : > { %7080 = vmatprep.subr.bf16.mxu0 %v11577_v10  ;;  %7364 = vmatprep.subr.bf16.mxu1 %v11580_v11  ;;  %v11638_v10 = vld [vmem:[%s17137_s1 + $0xe60] ss:$68 sps:$4 sm:$0xff]  }
  0x49   : > { %7049 = vmatprep.mubr.bf16.mxu0 %v13364_v20  ;;  %7333 = vmatprep.mubr.bf16.mxu1 %v13364_v20  ;;  %v11643_v11 = vld [vmem:[%s17137_s1 + $0xee4] ss:$68 sps:$4 sm:$0xff]  }
  0x4b   : > { %7081 = vmatpush1.bf16.msra.mxu0 %v11575_v12  ;;  %7365 = vmatpush1.bf16.msra.mxu1 %v11578_v13  ;;  %v11646_v12 = vld [vmem:[%s17137_s1 + $0xeec] ss:$68 sps:$4 sm:$0xff]   ;;  %v11641_v13 = vld [vmem:[%s17137_s1 + $0xee0] ss:$68 sps:$4 sm:$0xff]  }
  0x4c   : > { %7082 = vmatprep.subr.bf16.mxu0 %v11583_v14  ;;  %7366 = vmatprep.subr.bf16.mxu1 %v11586_v15  ;;  %v11644_v14 = vld [vmem:[%s17137_s1 + $0xee8] ss:$68 sps:$4 sm:$0xff]  }
  0x4d   : > { %v11649_v15 = vld [vmem:[%s17137_s1 + $0xf6c] ss:$68 sps:$4 sm:$0xff]  }
  0x4e   : > { %7050 = vmatmul.mubr.bf16.gmra.mrb[4].mxu0 %v13382_v27  ;;  %7334 = vmatmul.mubr.bf16.gmra.mrb[4].mxu1 %v13382_v27 }
  0x4f   : > { %7083 = vmatpush1.bf16.msra.mxu0 %v11581_v18  ;;  %7367 = vmatpush1.bf16.msra.mxu1 %v11584_v19  ;;  %v11650_v18 = vld [vmem:[%s17137_s1 + $0xf70] ss:$68 sps:$4 sm:$0xff]  }
  0x50   : > { %7084 = vmatprep.subr.bf16.mxu0 %v11589_v21  ;;  %7368 = vmatprep.subr.bf16.mxu1 %v11592_v22  ;;  %v11655_v19 = vld [vmem:[%s17137_s1 + $0xff4] ss:$68 sps:$4 sm:$0xff]   ;;  %v11658_v21 = vld [vmem:[%s17137_s1 + $0xffc] ss:$68 sps:$4 sm:$0xff]  }
  0x51   : > { %7059 = vmatprep.mubr.bf16.mxu0 %v13397_v33  ;;  %7343 = vmatprep.mubr.bf16.mxu1 %v13397_v33  ;;  %v11653_v22 = vld [vmem:[%s17137_s1 + $0xff0] ss:$68 sps:$4 sm:$0xff]  }
  0x53   : > { %7085 = vmatpush1.bf16.msra.mxu0 %v11587_v25  ;;  %7369 = vmatpush1.bf16.msra.mxu1 %v11590_v26  ;;  %v11664_v25 = vld [vmem:[%s17137_s1 + $0x1084] ss:$68 sps:$4 sm:$0xff]   ;;  %v11659_v26 = vld [vmem:[%s17137_s1 + $0x1078] ss:$68 sps:$4 sm:$0xff]  }
  0x54   : > { %7086 = vmatprep.subr.bf16.mxu0 %v11595_v28  ;;  %7370 = vmatprep.subr.bf16.mxu1 %v11598_v29  ;;  %v11662_v28 = vld [vmem:[%s17137_s1 + $0x1080] ss:$68 sps:$4 sm:$0xff]  }
  0x55   : > { %v11667_v29 = vld [vmem:[%s17137_s1 + $0x1104] ss:$68 sps:$4 sm:$0xff]  }
  0x56   : > { %7060 = vmatmul.mubr.bf16.gmra.mrb[8].mxu0 %v13412_v39  ;;  %7344 = vmatmul.mubr.bf16.gmra.mrb[8].mxu1 %v13412_v39 }
  0x57   : > { %7087 = vmatpush1.bf16.msra.mxu0 %v11593_v32  ;;  %7371 = vmatpush1.bf16.msra.mxu1 %v11596_v34  ;;  %v11670_v32 = vld [vmem:[%s17137_s1 + $0x110c] ss:$68 sps:$4 sm:$0xff]   ;;  %v13566_v34 = vpack.c.bf16 %v182_v31, %v174_v30  ;;  %v11713_v30 = vld [vmem:[%s17137_s1 + $0x1540] ss:$68 sps:$4 sm:$0xff]  }
  0x58   : > { %7088 = vmatprep.subr.bf16.mxu0 %v11601_v35  ;;  %7372 = vmatprep.subr.bf16.mxu1 %v11604_v36  ;;  %v191_v35 = vld [vmem:[%s13252_s30 + $0x98] sm:$0xff]  ;;  %v11716_v31 = vld [vmem:[%s17137_s1 + $0x1548] ss:$68 sps:$4 sm:$0xff]  }
  0x59   : > { %7069 = vmatprep.mubr.bf16.mxu0 %v13427_v45  ;;  %7353 = vmatprep.mubr.bf16.mxu1 %v13427_v45  ;;  %v199_v36 = vld [vmem:[%s13252_s30 + $0xd8] sm:$0xff] }
  0x5b   : > { %7089 = vmatpush1.bf16.msra.mxu0 %v11599_v40  ;;  %7373 = vmatpush1.bf16.msra.mxu1 %v11602_v41  ;;  %v11673_v40 = vld [vmem:[%s17137_s1 + $0x118c] ss:$68 sps:$4 sm:$0xff]   ;;  %v11676_v41 = vld [vmem:[%s17137_s1 + $0x1194] ss:$68 sps:$4 sm:$0xff]  }
  0x5c   : > { %7090 = vmatprep.subr.bf16.mxu0 %v11607_v43  ;;  %7374 = vmatprep.subr.bf16.mxu1 %v11610_v44  ;;  %v13585_v43 = vpack.c.bf16 %v199_v36, %v191_v35  ;;  %v11674_v44 = vld [vmem:[%s17137_s1 + $0x1190] ss:$68 sps:$4 sm:$0xff]   ;;  %v11719_v36 = vld [vmem:[%s17137_s1 + $0x15c8] ss:$68 sps:$4 sm:$0xff]  }
  0x5d   : > { %v11724_v35 = vld [vmem:[%s17137_s1 + $0x15d4] ss:$68 sps:$4 sm:$0xff]  }
  0x5e   : > { %7070 = vmatmul.mubr.bf16.gmra.mrb[12].mxu0 %v13446_v52  ;;  %7354 = vmatmul.mubr.bf16.gmra.mrb[12].mxu1 %v13446_v52 }
  0x5f   : > { %7091 = vmatpush1.bf16.msra.mxu0 %v11605_v47  ;;  %7375 = vmatpush1.bf16.msra.mxu1 %v11608_v48  ;;  %v190_v47 = vld [vmem:[%s13252_s30 + $0x90] sm:$0xff] }
  0x60   : > { %7092 = vmatprep.subr.bf16.mxu0 %v11613_v49  ;;  %7376 = vmatprep.subr.bf16.mxu1 %v11616_v51  ;;  %v198_v48 = vld [vmem:[%s13252_s30 + $0xd0] sm:$0xff]  ;;  %v11682_v49 = vld [vmem:[%s17137_s1 + $0x121c] ss:$68 sps:$4 sm:$0xff]  }
  0x61   : > { %7110 = vmatprep.mubr.bf16.mxu0 %v13453_v56  ;;  %7394 = vmatprep.mubr.bf16.mxu1 %v13453_v56  ;;  %v11677_v51 = vld [vmem:[%s17137_s1 + $0x1210] ss:$68 sps:$4 sm:$0xff]   ;;  %v13605_v53 = vpack.c.bf16 %v198_v48, %v190_v47  ;;  %v11731_v47 = vld [vmem:[%s17137_s1 + $0x16d8] ss:$68 sps:$4 sm:$0xff]   ;;  %v11734_v48 = vld [vmem:[%s17137_s1 + $0x16e0] ss:$68 sps:$4 sm:$0xff]  }
  0x63   : > { %7093 = vmatpush1.bf16.msra.mxu0 %v11611_v55  ;;  %7377 = vmatpush1.bf16.msra.mxu1 %v11614_v57  ;;  %v215_v55 = vld [vmem:[%s13252_s30 + $0x158] sm:$0xff] }
  0x64   : > { %7094 = vmatprep.subr.bf16.mxu0 %v11619_v58  ;;  %7378 = vmatprep.subr.bf16.mxu1 %v11622_v59  ;;  %v11680_v57 = vld [vmem:[%s17137_s1 + $0x1218] ss:$68 sps:$4 sm:$0xff]   ;;  %v11688_v59 = vld [vmem:[%s17137_s1 + $0x12a4] ss:$68 sps:$4 sm:$0xff]  }
  0x65   : > { %v11685_v58 = vld [vmem:[%s17137_s1 + $0x129c] ss:$68 sps:$4 sm:$0xff]  }
  0x67   : > { %7095 = vmatpush1.bf16.msra.mxu0 %v11617_v60  ;;  %7379 = vmatpush1.bf16.msra.mxu1 %v11620_v61  ;;  %v11683_v60 = vld [vmem:[%s17137_s1 + $0x1298] ss:$68 sps:$4 sm:$0xff]   ;;  %v13621_v61 = vpack.c.bf16 %v215_v55, %v207_v54  ;;  %v11737_v54 = vld [vmem:[%s17137_s1 + $0x1760] ss:$68 sps:$4 sm:$0xff]   ;;  %v11740_v55 = vld [vmem:[%s17137_s1 + $0x1768] ss:$68 sps:$4 sm:$0xff]  }
  0x68   : > { %7096 = vmatprep.subr.bf16.mxu0 %v11625_v62  ;;  %7380 = vmatprep.subr.bf16.mxu1 %v11628_v63  ;;  %v11686_v62 = vld [vmem:[%s17137_s1 + $0x12a0] ss:$68 sps:$4 sm:$0xff]  }
  0x69   : > { %v11691_v63 = vld [vmem:[%s17137_s1 + $0x1324] ss:$68 sps:$4 sm:$0xff]  }
  0x6b   : > { %7097 = vmatpush1.bf16.msra.mxu0 %v11623_v0  ;;  %7381 = vmatpush1.bf16.msra.mxu1 %v11626_v1  ;;  %v206_v0 = vld [vmem:[%s13252_s30 + $0x110] sm:$0xff] }
  0x6c   : > { %7098 = vmatprep.subr.bf16.mxu0 %v11631_v2  ;;  %7382 = vmatprep.subr.bf16.mxu1 %v11634_v3  ;;  %v214_v1 = vld [vmem:[%s13252_s30 + $0x150] sm:$0xff]  ;;  %v11689_v3 = vld [vmem:[%s17137_s1 + $0x1320] ss:$68 sps:$4 sm:$0xff]  }
  0x6d   : > { %v11694_v2 = vld [vmem:[%s17137_s1 + $0x132c] ss:$68 sps:$4 sm:$0xff]  }
  0x6f   : > { %7099 = vmatpush1.bf16.msra.mxu0 %v11629_v4  ;;  %7383 = vmatpush1.bf16.msra.mxu1 %v11632_v5  ;;  %v11692_v4 = vld [vmem:[%s17137_s1 + $0x1328] ss:$68 sps:$4 sm:$0xff]   ;;  %v13644_v5 = vpack.c.bf16 %v214_v1, %v206_v0  ;;  %v11749_v0 = vld [vmem:[%s17137_s1 + $0x1870] ss:$68 sps:$4 sm:$0xff]   ;;  %v11752_v1 = vld [vmem:[%s17137_s1 + $0x1878] ss:$68 sps:$4 sm:$0xff]  }
  0x70   : > { %7100 = vmatprep.subr.bf16.mxu0 %v11637_v6  ;;  %7384 = vmatprep.subr.bf16.mxu1 %v11640_v7  ;;  %v223_v6 = vld [vmem:[%s13252_s30 + $0x198] sm:$0x1]  ;;  %v11697_v7 = vld [vmem:[%s17137_s1 + $0x13ac] ss:$68 sps:$4 sm:$0xff]  }
  0x73   : > { %7101 = vmatpush1.bf16.msra.mxu0 %v11635_v8  ;;  %7385 = vmatpush1.bf16.msra.mxu1 %v11638_v10  ;;  %v11700_v8 = vld [vmem:[%s17137_s1 + $0x13b4] ss:$68 sps:$4 sm:$0xff]   ;;  %v11695_v10 = vld [vmem:[%s17137_s1 + $0x13a8] ss:$68 sps:$4 sm:$0xff]  }
  0x74   : > { %7102 = vmatprep.subr.bf16.mxu0 %v11643_v11  ;;  %7386 = vmatprep.subr.bf16.mxu1 %v11646_v12  ;;  %v13656_v11 = vpack.c.bf16 %v223_v6, %v223_v6  ;;  %v11698_v12 = vld [vmem:[%s17137_s1 + $0x13b0] ss:$68 sps:$4 sm:$0xff]   ;;  %v11758_v6 = vld [vmem:[%s17137_s1 + $0x1900] ss:$68 sps:$4 sm:$0xff]  }
  0x77   : > { %7103 = vmatpush1.bf16.msra.mxu0 %v11641_v13  ;;  %7387 = vmatpush1.bf16.msra.mxu1 %v11644_v14  ;;  %v11703_v13 = vld [vmem:[%s17137_s1 + $0x1434] ss:$68 sps:$4 sm:$0xff]   ;;  %v222_v14 = vld [vmem:[%s13252_s30 + $0x190] sm:$0x1] }
  0x78   : > { %7104 = vmatprep.subr.bf16.mxu0 %v11649_v15  ;;  %7388 = vmatprep.subr.bf16.mxu1 %v11652_v16  ;;  %v11706_v15 = vld [vmem:[%s17137_s1 + $0x143c] ss:$68 sps:$4 sm:$0xff]   ;;  %v11701_v16 = vld [vmem:[%s17137_s1 + $0x1430] ss:$68 sps:$4 sm:$0xff]  }
  0x7b   : > { %7105 = vmatpush1.bf16.msra.mxu0 %v11647_v17  ;;  %7389 = vmatpush1.bf16.msra.mxu1 %v11650_v18  ;;  %v11704_v17 = vld [vmem:[%s17137_s1 + $0x1438] ss:$68 sps:$4 sm:$0xff]   ;;  %v13678_v18 = vpack.c.bf16 %v222_v14, %v222_v14  ;;  %v193_v14 = vld [vmem:[%s13252_s30 + $0xa8] sm:$0xff] }
  0x7c   : > { %7106 = vmatprep.subr.bf16.mxu0 %v11655_v19  ;;  %7390 = vmatprep.subr.bf16.mxu1 %v11658_v21  ;;  %v177_v19 = vld [vmem:[%s13252_s30 + $0x28] sm:$0xff] }
  0x7d   : > { %v185_v21 = vld [vmem:[%s13252_s30 + $0x68] sm:$0xff] }
  0x7f   : > { %7107 = vmatpush1.bf16.msra.mxu0 %v11653_v22  ;;  %7391 = vmatpush1.bf16.msra.mxu1 %v11656_v23  ;;  %v11709_v22 = vld [vmem:[%s17137_s1 + $0x14bc] ss:$68 sps:$4 sm:$0xff]   ;;  %v11712_v23 = vld [vmem:[%s17137_s1 + $0x14c4] ss:$68 sps:$4 sm:$0xff]  }
  0x80   : > { %7108 = vmatprep.subr.bf16.mxu0 %v11661_v24  ;;  %7392 = vmatprep.subr.bf16.mxu1 %v11664_v25  ;;  %v13688_v24 = vpack.c.bf16 %v185_v21, %v177_v19  ;;  %v11707_v25 = vld [vmem:[%s17137_s1 + $0x14b8] ss:$68 sps:$4 sm:$0xff]   ;;  %v11769_v19 = vld [vmem:[%s17137_s1 + $0x1a0c] ss:$68 sps:$4 sm:$0xff]  }
  0x81   : > { %v11772_v21 = vld [vmem:[%s17137_s1 + $0x1a14] ss:$68 sps:$4 sm:$0xff]  }
  0x83   : > { %7109 = vmatpush1.bf16.msra.mxu0 %v11659_v26  ;;  %7393 = vmatpush1.bf16.msra.mxu1 %v11662_v28  ;;  %v11710_v26 = vld [vmem:[%s17137_s1 + $0x14c0] ss:$68 sps:$4 sm:$0xff]  }
  0x84   : > { %7149 = vmatprep.subr.bf16.mxu0 %v11667_v29  ;;  %7433 = vmatprep.subr.bf16.mxu1 %v11670_v32  ;;  %v11715_v28 = vld [vmem:[%s17137_s1 + $0x1544] ss:$68 sps:$4 sm:$0xff]   ;;  %v11718_v29 = vld [vmem:[%s17137_s1 + $0x154c] ss:$68 sps:$4 sm:$0xff]  }
  0x85   : > { %v11721_v32 = vld [vmem:[%s17137_s1 + $0x15cc] ss:$68 sps:$4 sm:$0xff]  }
  0x86   : > { %7111 = vmatmul.mubr.bf16.vlgmr.msra.gmra.mrb[0].mxu0 %v13566_v34  ;;  %7395 = vmatmul.mubr.bf16.vlgmr.msra.gmra.mrb[0].mxu1 %v13566_v34 }
  0x87   : > { %7150 = vmatpush1.bf16.msra.mxu0 %v11665_v37  ;;  %7434 = vmatpush1.bf16.msra.mxu1 %v11668_v38  ;;  %v11722_v37 = vld [vmem:[%s17137_s1 + $0x15d0] ss:$68 sps:$4 sm:$0xff]  }
  0x88   : > { %7151 = vmatprep.subr.bf16.mxu0 %v11673_v40  ;;  %7435 = vmatprep.subr.bf16.mxu1 %v11676_v41  ;;  %v11727_v38 = vld [vmem:[%s17137_s1 + $0x1654] ss:$68 sps:$4 sm:$0xff]   ;;  %v11730_v40 = vld [vmem:[%s17137_s1 + $0x165c] ss:$68 sps:$4 sm:$0xff]  }
  0x89   : > { %7120 = vmatprep.mubr.bf16.mxu0 %v13585_v43  ;;  %7404 = vmatprep.mubr.bf16.mxu1 %v13585_v43  ;;  %v11725_v41 = vld [vmem:[%s17137_s1 + $0x1650] ss:$68 sps:$4 sm:$0xff]  }
  0x8b   : > { %7152 = vmatpush1.bf16.msra.mxu0 %v11671_v42  ;;  %7436 = vmatpush1.bf16.msra.mxu1 %v11674_v44  ;;  %v11728_v42 = vld [vmem:[%s17137_s1 + $0x1658] ss:$68 sps:$4 sm:$0xff]  }
  0x8c   : > { %7153 = vmatprep.subr.bf16.mxu0 %v11679_v46  ;;  %7437 = vmatprep.subr.bf16.mxu1 %v11682_v49  ;;  %v11733_v44 = vld [vmem:[%s17137_s1 + $0x16dc] ss:$68 sps:$4 sm:$0xff]   ;;  %v11736_v46 = vld [vmem:[%s17137_s1 + $0x16e4] ss:$68 sps:$4 sm:$0xff]  }
  0x8d   : > { %v11739_v49 = vld [vmem:[%s17137_s1 + $0x1764] ss:$68 sps:$4 sm:$0xff]  }
  0x8e   : > { %7121 = vmatmul.mubr.bf16.gmra.mrb[4].mxu0 %v13605_v53  ;;  %7405 = vmatmul.mubr.bf16.gmra.mrb[4].mxu1 %v13605_v53 }
  0x8f   : > { %7154 = vmatpush1.bf16.msra.mxu0 %v11677_v51  ;;  %7438 = vmatpush1.bf16.msra.mxu1 %v11680_v57  ;;  %v11742_v51 = vld [vmem:[%s17137_s1 + $0x176c] ss:$68 sps:$4 sm:$0xff]  }
  0x90   : > { %7155 = vmatprep.subr.bf16.mxu0 %v11685_v58  ;;  %7439 = vmatprep.subr.bf16.mxu1 %v11688_v59  ;;  %v11745_v57 = vld [vmem:[%s17137_s1 + $0x17ec] ss:$68 sps:$4 sm:$0xff]   ;;  %v11748_v58 = vld [vmem:[%s17137_s1 + $0x17f4] ss:$68 sps:$4 sm:$0xff]  }
  0x91   : > { %7130 = vmatprep.mubr.bf16.mxu0 %v13621_v61  ;;  %7414 = vmatprep.mubr.bf16.mxu1 %v13621_v61  ;;  %v11743_v59 = vld [vmem:[%s17137_s1 + $0x17e8] ss:$68 sps:$4 sm:$0xff]  }
  0x93   : > { %7156 = vmatpush1.bf16.msra.mxu0 %v11683_v60  ;;  %7440 = vmatpush1.bf16.msra.mxu1 %v11686_v62  ;;  %v11746_v60 = vld [vmem:[%s17137_s1 + $0x17f0] ss:$68 sps:$4 sm:$0xff]  }
  0x94   : > { %7157 = vmatprep.subr.bf16.mxu0 %v11691_v63  ;;  %7441 = vmatprep.subr.bf16.mxu1 %v11694_v2  ;;  %v11751_v62 = vld [vmem:[%s17137_s1 + $0x1874] ss:$68 sps:$4 sm:$0xff]   ;;  %v11754_v63 = vld [vmem:[%s17137_s1 + $0x187c] ss:$68 sps:$4 sm:$0xff]  }
  0x95   : > { %v11757_v2 = vld [vmem:[%s17137_s1 + $0x18fc] ss:$68 sps:$4 sm:$0xff]  }
  0x96   : > { %7131 = vmatmul.mubr.bf16.gmra.mrb[8].mxu0 %v13644_v5  ;;  %7415 = vmatmul.mubr.bf16.gmra.mrb[8].mxu1 %v13644_v5 }
  0x97   : > { %7158 = vmatpush1.bf16.msra.mxu0 %v11689_v3  ;;  %7442 = vmatpush1.bf16.msra.mxu1 %v11692_v4  ;;  %v11760_v3 = vld [vmem:[%s17137_s1 + $0x1904] ss:$68 sps:$4 sm:$0xff]   ;;  %v11755_v4 = vld [vmem:[%s17137_s1 + $0x18f8] ss:$68 sps:$4 sm:$0xff]  }
  0x98   : > { %7159 = vmatprep.subr.bf16.mxu0 %v11697_v7  ;;  %7443 = vmatprep.subr.bf16.mxu1 %v11700_v8  ;;  %v176_v7 = vld [vmem:[%s13252_s30 + $0x20] sm:$0xff] }
  0x99   : > { %7140 = vmatprep.mubr.bf16.mxu0 %v13656_v11  ;;  %7424 = vmatprep.mubr.bf16.mxu1 %v13656_v11  ;;  %v184_v8 = vld [vmem:[%s13252_s30 + $0x60] sm:$0xff] }
  0x9b   : > { %7160 = vmatpush1.bf16.msra.mxu0 %v11695_v10  ;;  %7444 = vmatpush1.bf16.msra.mxu1 %v11698_v12  ;;  %v11763_v10 = vld [vmem:[%s17137_s1 + $0x1984] ss:$68 sps:$4 sm:$0xff]   ;;  %v11766_v12 = vld [vmem:[%s17137_s1 + $0x198c] ss:$68 sps:$4 sm:$0xff]  }
  0x9c   : > { %7161 = vmatprep.subr.bf16.mxu0 %v11703_v13  ;;  %7445 = vmatprep.subr.bf16.mxu1 %v11706_v15  ;;  %v13804_v13 = vpack.c.bf16 %v184_v8, %v176_v7  ;;  %v201_v15 = vld [vmem:[%s13252_s30 + $0xe8] sm:$0xff]  ;;  %v179_v7 = vld [vmem:[%s13252_s30 + $0x38] sm:$0xff] }
  0x9d   : > { %v187_v8 = vld [vmem:[%s13252_s30 + $0x78] sm:$0xff] }
  0x9e   : > { %7141 = vmatmul.mubr.bf16.gmra.mrb[12].mxu0 %v13678_v18  ;;  %7425 = vmatmul.mubr.bf16.gmra.mrb[12].mxu1 %v13678_v18 }
  0x9f   : > { %7162 = vmatpush1.bf16.msra.mxu0 %v11701_v16  ;;  %7446 = vmatpush1.bf16.msra.mxu1 %v11704_v17  ;;  %v11761_v16 = vld [vmem:[%s17137_s1 + $0x1980] ss:$68 sps:$4 sm:$0xff]   ;;  %v11764_v17 = vld [vmem:[%s17137_s1 + $0x1988] ss:$68 sps:$4 sm:$0xff]  }
  0xa0   : > { %7163 = vmatprep.subr.bf16.mxu0 %v11709_v22  ;;  %7447 = vmatprep.subr.bf16.mxu1 %v11712_v23  ;;  %v11767_v22 = vld [vmem:[%s17137_s1 + $0x1a08] ss:$68 sps:$4 sm:$0xff]   ;;  %v13823_v23 = vpack.c.bf16 %v201_v15, %v193_v14  ;;  %v13926_v14 = vpack.c.bf16 %v187_v8, %v179_v7  ;;  %v11803_v15 = vld [vmem:[%s17137_s1 + $0x1d38] ss:$68 sps:$4 sm:$0xff]   ;;  %v186_v7 = vld [vmem:[%s13252_s30 + $0x70] sm:$0xff] }
  0xa1   : > { %7181 = vmatprep.mubr.bf16.mxu0 %v13688_v24  ;;  %7465 = vmatprep.mubr.bf16.mxu1 %v13688_v24  ;;  %v11859_v8 = vld [vmem:[%s17137_s1 + $0x14] ss:$68 sps:$4 sm:$0xff]  }
  0xa3   : > { %7164 = vmatpush1.bf16.msra.mxu0 %v11707_v25  ;;  %7448 = vmatpush1.bf16.msra.mxu1 %v11710_v26  ;;  %v11770_v25 = vld [vmem:[%s17137_s1 + $0x1a10] ss:$68 sps:$4 sm:$0xff]   ;;  %v192_v26 = vld [vmem:[%s13252_s30 + $0xa0] sm:$0xff] }
  0xa4   : > { %7165 = vmatprep.subr.bf16.mxu0 %v11715_v28  ;;  %7449 = vmatprep.subr.bf16.mxu1 %v11718_v29  ;;  %v200_v28 = vld [vmem:[%s13252_s30 + $0xe0] sm:$0xff]  ;;  %v11775_v29 = vld [vmem:[%s17137_s1 + $0x1a94] ss:$68 sps:$4 sm:$0xff]  }
  0xa7   : > { %7166 = vmatpush1.bf16.msra.mxu0 %v11713_v30  ;;  %7450 = vmatpush1.bf16.msra.mxu1 %v11716_v31  ;;  %v11778_v30 = vld [vmem:[%s17137_s1 + $0x1a9c] ss:$68 sps:$4 sm:$0xff]   ;;  %v209_v31 = vld [vmem:[%s13252_s30 + $0x128] sm:$0xff] }
  0xa8   : > { %7167 = vmatprep.subr.bf16.mxu0 %v11721_v32  ;;  %7451 = vmatprep.subr.bf16.mxu1 %v11724_v35  ;;  %v13841_v32 = vpack.c.bf16 %v200_v28, %v192_v26  ;;  %v217_v35 = vld [vmem:[%s13252_s30 + $0x168] sm:$0xff]  ;;  %v11820_v26 = vld [vmem:[%s17137_s1 + $0x1e54] ss:$68 sps:$4 sm:$0xff]  }
  0xa9   : > { %v11815_v28 = vld [vmem:[%s17137_s1 + $0x1e48] ss:$68 sps:$4 sm:$0xff]  }
  0xab   : > { %7168 = vmatpush1.bf16.msra.mxu0 %v11719_v36  ;;  %7452 = vmatpush1.bf16.msra.mxu1 %v11722_v37  ;;  %v11773_v36 = vld [vmem:[%s17137_s1 + $0x1a90] ss:$68 sps:$4 sm:$0xff]   ;;  %v11776_v37 = vld [vmem:[%s17137_s1 + $0x1a98] ss:$68 sps:$4 sm:$0xff]  }
  0xac   : > { %7169 = vmatprep.subr.bf16.mxu0 %v11727_v38  ;;  %7453 = vmatprep.subr.bf16.mxu1 %v11730_v40  ;;  %v11781_v38 = vld [vmem:[%s17137_s1 + $0x1b1c] ss:$68 sps:$4 sm:$0xff]   ;;  %v11784_v40 = vld [vmem:[%s17137_s1 + $0x1b24] ss:$68 sps:$4 sm:$0xff]  }
  0xaf   : > { %7170 = vmatpush1.bf16.msra.mxu0 %v11725_v41  ;;  %7454 = vmatpush1.bf16.msra.mxu1 %v11728_v42  ;;  %v11779_v41 = vld [vmem:[%s17137_s1 + $0x1b18] ss:$68 sps:$4 sm:$0xff]   ;;  %v13859_v42 = vpack.c.bf16 %v217_v35, %v209_v31  ;;  %v11821_v35 = vld [vmem:[%s17137_s1 + $0x1ed0] ss:$68 sps:$4 sm:$0xff]  }
  0xb0   : > { %7171 = vmatprep.subr.bf16.mxu0 %v11733_v44  ;;  %7455 = vmatprep.subr.bf16.mxu1 %v11736_v46  ;;  %v11782_v44 = vld [vmem:[%s17137_s1 + $0x1b20] ss:$68 sps:$4 sm:$0xff]  }
  0xb1   : > { %v11787_v46 = vld [vmem:[%s17137_s1 + $0x1ba4] ss:$68 sps:$4 sm:$0xff]   ;;  %v11826_v31 = vld [vmem:[%s17137_s1 + $0x1edc] ss:$68 sps:$4 sm:$0xff]  }
  0xb3   : > { %7172 = vmatpush1.bf16.msra.mxu0 %v11731_v47  ;;  %7456 = vmatpush1.bf16.msra.mxu1 %v11734_v48  ;;  %v208_v47 = vld [vmem:[%s13252_s30 + $0x120] sm:$0xff] }
  0xb4   : > { %7173 = vmatprep.subr.bf16.mxu0 %v11739_v49  ;;  %7457 = vmatprep.subr.bf16.mxu1 %v11742_v51  ;;  %v216_v48 = vld [vmem:[%s13252_s30 + $0x160] sm:$0xff]  ;;  %v11790_v49 = vld [vmem:[%s17137_s1 + $0x1bac] ss:$68 sps:$4 sm:$0xff]  }
  0xb5   : > { %v11785_v51 = vld [vmem:[%s17137_s1 + $0x1ba0] ss:$68 sps:$4 sm:$0xff]  }
  0xb7   : > { %7174 = vmatpush1.bf16.msra.mxu0 %v11737_v54  ;;  %7458 = vmatpush1.bf16.msra.mxu1 %v11740_v55  ;;  %v11788_v54 = vld [vmem:[%s17137_s1 + $0x1ba8] ss:$68 sps:$4 sm:$0xff]   ;;  %v13882_v55 = vpack.c.bf16 %v216_v48, %v208_v47  ;;  %v11833_v47 = vld [vmem:[%s17137_s1 + $0x1fe0] ss:$68 sps:$4 sm:$0xff]  }
  0xb8   : > { %7175 = vmatprep.subr.bf16.mxu0 %v11745_v57  ;;  %7459 = vmatprep.subr.bf16.mxu1 %v11748_v58  ;;  %v225_v57 = vld [vmem:[%s13252_s30 + $0x1a8] sm:$0x1]  ;;  %v11793_v58 = vld [vmem:[%s17137_s1 + $0x1c2c] ss:$68 sps:$4 sm:$0xff]  }
  0xb9   : > { %v11836_v48 = vld [vmem:[%s17137_s1 + $0x1fe8] ss:$68 sps:$4 sm:$0xff]  }
  0xbb   : > { %7176 = vmatpush1.bf16.msra.mxu0 %v11743_v59  ;;  %7460 = vmatpush1.bf16.msra.mxu1 %v11746_v60  ;;  %v11796_v59 = vld [vmem:[%s17137_s1 + $0x1c34] ss:$68 sps:$4 sm:$0xff]   ;;  %v11791_v60 = vld [vmem:[%s17137_s1 + $0x1c28] ss:$68 sps:$4 sm:$0xff]  }
  0xbc   : > { %7177 = vmatprep.subr.bf16.mxu0 %v11751_v62  ;;  %7461 = vmatprep.subr.bf16.mxu1 %v11754_v63  ;;  %v13894_v62 = vpack.c.bf16 %v225_v57, %v225_v57  ;;  %v11794_v63 = vld [vmem:[%s17137_s1 + $0x1c30] ss:$68 sps:$4 sm:$0xff]  }
  0xbd   : > { %v11842_v57 = vld [vmem:[%s17137_s1 + $0x2070] ss:$68 sps:$4 sm:$0xff]  }
  0xbf   : > { %7178 = vmatpush1.bf16.msra.mxu0 %v11749_v0  ;;  %7462 = vmatpush1.bf16.msra.mxu1 %v11752_v1  ;;  %v11799_v0 = vld [vmem:[%s17137_s1 + $0x1cb4] ss:$68 sps:$4 sm:$0xff]   ;;  %v224_v1 = vld [vmem:[%s13252_s30 + $0x1a0] sm:$0x1] }
  0xc0   : > { %7179 = vmatprep.subr.bf16.mxu0 %v11757_v2  ;;  %7463 = vmatprep.subr.bf16.mxu1 %v11760_v3  ;;  %v11802_v2 = vld [vmem:[%s17137_s1 + $0x1cbc] ss:$68 sps:$4 sm:$0xff]   ;;  %v11797_v3 = vld [vmem:[%s17137_s1 + $0x1cb0] ss:$68 sps:$4 sm:$0xff]  }
  0xc3   : > { %7180 = vmatpush1.bf16.msra.mxu0 %v11755_v4  ;;  %7464 = vmatpush1.bf16.msra.mxu1 %v11758_v6  ;;  %v11800_v4 = vld [vmem:[%s17137_s1 + $0x1cb8] ss:$68 sps:$4 sm:$0xff]   ;;  %v13916_v6 = vpack.c.bf16 %v224_v1, %v224_v1  ;;  %v11856_v1 = vld [vmem:[%s17137_s1 + $0x2184] ss:$68 sps:$4 sm:$0xff]  }
  0xc4   : > { %7220 = vmatprep.subr.bf16.mxu0 %v11763_v10  ;;  %7504 = vmatprep.subr.bf16.mxu1 %v11766_v12  ;;  %v11805_v10 = vld [vmem:[%s17137_s1 + $0x1d3c] ss:$68 sps:$4 sm:$0xff]   ;;  %v11808_v12 = vld [vmem:[%s17137_s1 + $0x1d44] ss:$68 sps:$4 sm:$0xff]  }
  0xc6   : > { %7182 = vmatmul.mubr.bf16.vlgmr.msra.gmra.mrb[0].mxu0 %v13804_v13  ;;  %7466 = vmatmul.mubr.bf16.vlgmr.msra.gmra.mrb[0].mxu1 %v13804_v13 }
  0xc7   : > { %7221 = vmatpush1.bf16.msra.mxu0 %v11761_v16  ;;  %7505 = vmatpush1.bf16.msra.mxu1 %v11764_v17  ;;  %v11806_v16 = vld [vmem:[%s17137_s1 + $0x1d40] ss:$68 sps:$4 sm:$0xff]  }
  0xc8   : > { %7222 = vmatprep.subr.bf16.mxu0 %v11769_v19  ;;  %7506 = vmatprep.subr.bf16.mxu1 %v11772_v21  ;;  %v11811_v17 = vld [vmem:[%s17137_s1 + $0x1dc4] ss:$68 sps:$4 sm:$0xff]   ;;  %v11814_v19 = vld [vmem:[%s17137_s1 + $0x1dcc] ss:$68 sps:$4 sm:$0xff]  }
  0xc9   : > { %7191 = vmatprep.mubr.bf16.mxu0 %v13823_v23  ;;  %7475 = vmatprep.mubr.bf16.mxu1 %v13823_v23  ;;  %v11809_v21 = vld [vmem:[%s17137_s1 + $0x1dc0] ss:$68 sps:$4 sm:$0xff]  }
  0xcb   : > { %7223 = vmatpush1.bf16.msra.mxu0 %v11767_v22  ;;  %7507 = vmatpush1.bf16.msra.mxu1 %v11770_v25  ;;  %v11812_v22 = vld [vmem:[%s17137_s1 + $0x1dc8] ss:$68 sps:$4 sm:$0xff]  }
  0xcc   : > { %7224 = vmatprep.subr.bf16.mxu0 %v11775_v29  ;;  %7508 = vmatprep.subr.bf16.mxu1 %v11778_v30  ;;  %v11817_v25 = vld [vmem:[%s17137_s1 + $0x1e4c] ss:$68 sps:$4 sm:$0xff]   ;;  %v11823_v30 = vld [vmem:[%s17137_s1 + $0x1ed4] ss:$68 sps:$4 sm:$0xff]  }
  0xcd   : > { %v11818_v29 = vld [vmem:[%s17137_s1 + $0x1e50] ss:$68 sps:$4 sm:$0xff]  }
  0xce   : > { %7192 = vmatmul.mubr.bf16.gmra.mrb[4].mxu0 %v13841_v32  ;;  %7476 = vmatmul.mubr.bf16.gmra.mrb[4].mxu1 %v13841_v32 }
  0xcf   : > { %7225 = vmatpush1.bf16.msra.mxu0 %v11773_v36  ;;  %7509 = vmatpush1.bf16.msra.mxu1 %v11776_v37  ;;  %v11824_v36 = vld [vmem:[%s17137_s1 + $0x1ed8] ss:$68 sps:$4 sm:$0xff]  }
  0xd0   : > { %7226 = vmatprep.subr.bf16.mxu0 %v11781_v38  ;;  %7510 = vmatprep.subr.bf16.mxu1 %v11784_v40  ;;  %v11829_v37 = vld [vmem:[%s17137_s1 + $0x1f5c] ss:$68 sps:$4 sm:$0xff]   ;;  %v11832_v38 = vld [vmem:[%s17137_s1 + $0x1f64] ss:$68 sps:$4 sm:$0xff]  }
  0xd1   : > { %7201 = vmatprep.mubr.bf16.mxu0 %v13859_v42  ;;  %7485 = vmatprep.mubr.bf16.mxu1 %v13859_v42  ;;  %v11827_v40 = vld [vmem:[%s17137_s1 + $0x1f58] ss:$68 sps:$4 sm:$0xff]  }
  0xd3   : > { %7227 = vmatpush1.bf16.msra.mxu0 %v11779_v41  ;;  %7511 = vmatpush1.bf16.msra.mxu1 %v11782_v44  ;;  %v11830_v41 = vld [vmem:[%s17137_s1 + $0x1f60] ss:$68 sps:$4 sm:$0xff]  }
  0xd4   : > { %7228 = vmatprep.subr.bf16.mxu0 %v11787_v46  ;;  %7512 = vmatprep.subr.bf16.mxu1 %v11790_v49  ;;  %v11835_v44 = vld [vmem:[%s17137_s1 + $0x1fe4] ss:$68 sps:$4 sm:$0xff]   ;;  %v11838_v46 = vld [vmem:[%s17137_s1 + $0x1fec] ss:$68 sps:$4 sm:$0xff]  }
  0xd5   : > { %v11841_v49 = vld [vmem:[%s17137_s1 + $0x206c] ss:$68 sps:$4 sm:$0xff]  }
  0xd6   : > { %7202 = vmatmul.mubr.bf16.gmra.mrb[8].mxu0 %v13882_v55  ;;  %7486 = vmatmul.mubr.bf16.gmra.mrb[8].mxu1 %v13882_v55 }
  0xd7   : > { %7229 = vmatpush1.bf16.msra.mxu0 %v11785_v51  ;;  %7513 = vmatpush1.bf16.msra.mxu1 %v11788_v54  ;;  %v11844_v51 = vld [vmem:[%s17137_s1 + $0x2074] ss:$68 sps:$4 sm:$0xff]   ;;  %v11839_v54 = vld [vmem:[%s17137_s1 + $0x2068] ss:$68 sps:$4 sm:$0xff]  }
  0xd8   : > { %7230 = vmatprep.subr.bf16.mxu0 %v11793_v58  ;;  %7514 = vmatprep.subr.bf16.mxu1 %v11796_v59  ;;  %v11847_v58 = vld [vmem:[%s17137_s1 + $0x20f4] ss:$68 sps:$4 sm:$0xff]   ;;  %v11850_v59 = vld [vmem:[%s17137_s1 + $0x20fc] ss:$68 sps:$4 sm:$0xff]  }
  0xd9   : > { %7211 = vmatprep.mubr.bf16.mxu0 %v13894_v62  ;;  %7495 = vmatprep.mubr.bf16.mxu1 %v13894_v62 }
  0xdb   : > { %7231 = vmatpush1.bf16.msra.mxu0 %v11791_v60  ;;  %7515 = vmatpush1.bf16.msra.mxu1 %v11794_v63  ;;  %v11845_v60 = vld [vmem:[%s17137_s1 + $0x20f0] ss:$68 sps:$4 sm:$0xff]   ;;  %v11848_v63 = vld [vmem:[%s17137_s1 + $0x20f8] ss:$68 sps:$4 sm:$0xff]  }
  0xdc   : > { %7232 = vmatprep.subr.bf16.mxu0 %v11799_v0  ;;  %7516 = vmatprep.subr.bf16.mxu1 %v11802_v2  ;;  %v11853_v0 = vld [vmem:[%s17137_s1 + $0x217c] ss:$68 sps:$4 sm:$0xff]  }
  0xdd   : > { %v11851_v2 = vld [vmem:[%s17137_s1 + $0x2178] ss:$68 sps:$4 sm:$0xff]  }
  0xde   : > { %7212 = vmatmul.mubr.bf16.gmra.mrb[12].mxu0 %v13916_v6  ;;  %7496 = vmatmul.mubr.bf16.gmra.mrb[12].mxu1 %v13916_v6 }
  0xdf   : > { %7233 = vmatpush1.bf16.msra.mxu0 %v11797_v3  ;;  %7517 = vmatpush1.bf16.msra.mxu1 %v11800_v4  ;;  %v11854_v3 = vld [vmem:[%s17137_s1 + $0x2180] ss:$68 sps:$4 sm:$0xff]   ;;  %v178_v4 = vld [vmem:[%s13252_s30 + $0x30] sm:$0xff] }
  0xe0   : > { %7234 = vmatprep.subr.bf16.mxu0 %v11805_v10  ;;  %7518 = vmatprep.subr.bf16.mxu1 %v11808_v12  ;;  %v11862_v10 = vld [vmem:[%s17137_s1 + $0x1c] ss:$68 sps:$4 sm:$0xff]   ;;  %v11857_v12 = vld [vmem:[%s17137_s1 + $0x10] ss:$68 sps:$4 sm:$0xff]  }
  0xe1   : > { %7252 = vmatprep.mubr.bf16.mxu0 %v13926_v14  ;;  %7536 = vmatprep.mubr.bf16.mxu1 %v13926_v14 }
  0xe3   : > { %7235 = vmatpush1.bf16.msra.mxu0 %v11803_v15  ;;  %7519 = vmatpush1.bf16.msra.mxu1 %v11806_v16  ;;  %v11860_v15 = vld [vmem:[%s17137_s1 + $0x18] ss:$68 sps:$4 sm:$0xff]   ;;  %v14048_v16 = vpack.c.bf16 %v186_v7, %v178_v4  ;;  %v11890_v7 = vld [vmem:[%s17137_s1 + $0x2c0] ss:$68 sps:$4 sm:$0xff]  }
  0xe4   : > { %7236 = vmatprep.subr.bf16.mxu0 %v11811_v17  ;;  %7520 = vmatprep.subr.bf16.mxu1 %v11814_v19  ;;  %v195_v17 = vld [vmem:[%s13252_s30 + $0xb8] sm:$0xff] }
  0xe5   : > { %v203_v19 = vld [vmem:[%s13252_s30 + $0xf8] sm:$0xff] }
  0xe7   : > { %7237 = vmatpush1.bf16.msra.mxu0 %v11809_v21  ;;  %7521 = vmatpush1.bf16.msra.mxu1 %v11812_v22  ;;  %v11865_v21 = vld [vmem:[%s17137_s1 + $0x9c] ss:$68 sps:$4 sm:$0xff]   ;;  %v11868_v22 = vld [vmem:[%s17137_s1 + $0xa4] ss:$68 sps:$4 sm:$0xff]  }
  0xe8   : > { %7238 = vmatprep.subr.bf16.mxu0 %v11817_v25  ;;  %7522 = vmatprep.subr.bf16.mxu1 %v11820_v26  ;;  %v11863_v25 = vld [vmem:[%s17137_s1 + $0x98] ss:$68 sps:$4 sm:$0xff]   ;;  %v11866_v26 = vld [vmem:[%s17137_s1 + $0xa0] ss:$68 sps:$4 sm:$0xff]  }
  0xeb   : > { %7239 = vmatpush1.bf16.msra.mxu0 %v11815_v28  ;;  %7523 = vmatpush1.bf16.msra.mxu1 %v11818_v29  ;;  %v14064_v28 = vpack.c.bf16 %v203_v19, %v195_v17  ;;  %v194_v29 = vld [vmem:[%s13252_s30 + $0xb0] sm:$0xff]  ;;  %v11893_v17 = vld [vmem:[%s17137_s1 + $0x340] ss:$68 sps:$4 sm:$0xff]   ;;  %v11896_v19 = vld [vmem:[%s17137_s1 + $0x348] ss:$68 sps:$4 sm:$0xff]  }
  0xec   : > { %7240 = vmatprep.subr.bf16.mxu0 %v11823_v30  ;;  %7524 = vmatprep.subr.bf16.mxu1 %v11826_v31  ;;  %v202_v30 = vld [vmem:[%s13252_s30 + $0xf0] sm:$0xff]  ;;  %v11871_v31 = vld [vmem:[%s17137_s1 + $0x124] ss:$68 sps:$4 sm:$0xff]  }
  0xef   : > { %7241 = vmatpush1.bf16.msra.mxu0 %v11821_v35  ;;  %7525 = vmatpush1.bf16.msra.mxu1 %v11824_v36  ;;  %v11874_v35 = vld [vmem:[%s17137_s1 + $0x12c] ss:$68 sps:$4 sm:$0xff]   ;;  %v11869_v36 = vld [vmem:[%s17137_s1 + $0x120] ss:$68 sps:$4 sm:$0xff]  }
  0xf0   : > { %7242 = vmatprep.subr.bf16.mxu0 %v11829_v37  ;;  %7526 = vmatprep.subr.bf16.mxu1 %v11832_v38  ;;  %v11872_v37 = vld [vmem:[%s17137_s1 + $0x128] ss:$68 sps:$4 sm:$0xff]   ;;  %v14084_v38 = vpack.c.bf16 %v202_v30, %v194_v29  ;;  %v11907_v29 = vld [vmem:[%s17137_s1 + $0x454] ss:$68 sps:$4 sm:$0xff]   ;;  %v11910_v30 = vld [vmem:[%s17137_s1 + $0x45c] ss:$68 sps:$4 sm:$0xff]  }
  0xf3   : > { %7243 = vmatpush1.bf16.msra.mxu0 %v11827_v40  ;;  %7527 = vmatpush1.bf16.msra.mxu1 %v11830_v41  ;;  %v211_v40 = vld [vmem:[%s13252_s30 + $0x138] sm:$0xff] }
  0xf4   : > { %7244 = vmatprep.subr.bf16.mxu0 %v11835_v44  ;;  %7528 = vmatprep.subr.bf16.mxu1 %v11838_v46  ;;  %v219_v41 = vld [vmem:[%s13252_s30 + $0x178] sm:$0xff]  ;;  %v11877_v44 = vld [vmem:[%s17137_s1 + $0x1ac] ss:$68 sps:$4 sm:$0xff]  }
  0xf5   : > { %v11880_v46 = vld [vmem:[%s17137_s1 + $0x1b4] ss:$68 sps:$4 sm:$0xff]  }
  0xf7   : > { %7245 = vmatpush1.bf16.msra.mxu0 %v11833_v47  ;;  %7529 = vmatpush1.bf16.msra.mxu1 %v11836_v48  ;;  %v11875_v47 = vld [vmem:[%s17137_s1 + $0x1a8] ss:$68 sps:$4 sm:$0xff]   ;;  %v11878_v48 = vld [vmem:[%s17137_s1 + $0x1b0] ss:$68 sps:$4 sm:$0xff]  }
  0xf8   : > { %7246 = vmatprep.subr.bf16.mxu0 %v11841_v49  ;;  %7530 = vmatprep.subr.bf16.mxu1 %v11844_v51  ;;  %v14100_v49 = vpack.c.bf16 %v219_v41, %v211_v40  ;;  %v210_v51 = vld [vmem:[%s13252_s30 + $0x130] sm:$0xff]  ;;  %v11911_v40 = vld [vmem:[%s17137_s1 + $0x4d8] ss:$68 sps:$4 sm:$0xff]   ;;  %v11914_v41 = vld [vmem:[%s17137_s1 + $0x4e0] ss:$68 sps:$4 sm:$0xff]  }
  0xfb   : > { %7247 = vmatpush1.bf16.msra.mxu0 %v11839_v54  ;;  %7531 = vmatpush1.bf16.msra.mxu1 %v11842_v57  ;;  %v218_v54 = vld [vmem:[%s13252_s30 + $0x170] sm:$0xff] }
  0xfc   : > { %7248 = vmatprep.subr.bf16.mxu0 %v11847_v58  ;;  %7532 = vmatprep.subr.bf16.mxu1 %v11850_v59  ;;  %v11883_v57 = vld [vmem:[%s17137_s1 + $0x234] ss:$68 sps:$4 sm:$0xff]   ;;  %v11886_v58 = vld [vmem:[%s17137_s1 + $0x23c] ss:$68 sps:$4 sm:$0xff]  }
  0xfd   : > { %v11881_v59 = vld [vmem:[%s17137_s1 + $0x230] ss:$68 sps:$4 sm:$0xff]  }
  0xff   : > { %7249 = vmatpush1.bf16.msra.mxu0 %v11845_v60  ;;  %7533 = vmatpush1.bf16.msra.mxu1 %v11848_v63  ;;  %v14117_v60 = vpack.c.bf16 %v218_v54, %v210_v51  ;;  %v11884_v63 = vld [vmem:[%s17137_s1 + $0x238] ss:$68 sps:$4 sm:$0xff]   ;;  %v11925_v51 = vld [vmem:[%s17137_s1 + $0x5ec] ss:$68 sps:$4 sm:$0xff]  }
 0x100   : > { %7250 = vmatprep.subr.bf16.mxu0 %v11853_v0  ;;  %7534 = vmatprep.subr.bf16.mxu1 %v11856_v1  ;;  %v227_v0 = vld [vmem:[%s13252_s30 + $0x1b8] sm:$0x1]  ;;  %v11889_v1 = vld [vmem:[%s17137_s1 + $0x2bc] ss:$68 sps:$4 sm:$0xff]  }
 0x101   : > { %v14132_v4 = vpack.c.bf16 %v227_v0, %v227_v0  ;;  %v11928_v54 = vld [vmem:[%s17137_s1 + $0x5f4] ss:$68 sps:$4 sm:$0xff]  }
 0x102   : > { %v11929_v0 = vld [vmem:[%s17137_s1 + $0x670] ss:$68 sps:$4 sm:$0xff]  }
 0x103   : > { %7251 = vmatpush1.bf16.msra.mxu0 %v11851_v2  ;;  %7535 = vmatpush1.bf16.msra.mxu1 %v11854_v3  ;;  %v11892_v2 = vld [vmem:[%s17137_s1 + $0x2c4] ss:$68 sps:$4 sm:$0xff]   ;;  %v11887_v3 = vld [vmem:[%s17137_s1 + $0x2b8] ss:$68 sps:$4 sm:$0xff]  }
 0x104   : > { %7575 = vmatprep.subr.bf16.mxu0 %v11859_v8  ;;  %7859 = vmatprep.subr.bf16.mxu1 %v11862_v10  ;;  %v226_v8 = vld [vmem:[%s13252_s30 + $0x1b0] sm:$0x1]  ;;  %v11895_v10 = vld [vmem:[%s17137_s1 + $0x344] ss:$68 sps:$4 sm:$0xff]  }
 0x106   : > { %7253 = vmatmul.mubr.bf16.vlgmr.msra.gmra.mrb[0].mxu0 %v14048_v16  ;;  %7537 = vmatmul.mubr.bf16.vlgmr.msra.gmra.mrb[0].mxu1 %v14048_v16 }
 0x107   : > { %7576 = vmatpush1.bf16.msra.mxu0 %v11857_v12  ;;  %7860 = vmatpush1.bf16.msra.mxu1 %v11860_v15  ;;  %v11898_v12 = vld [vmem:[%s17137_s1 + $0x34c] ss:$68 sps:$4 sm:$0xff]   ;;  %v14148_v15 = vpack.c.bf16 %v226_v8, %v226_v8  ;;  %v11938_v8 = vld [vmem:[%s17137_s1 + $0x700] ss:$68 sps:$4 sm:$0xff]  }
 0x108   : > { %7577 = vmatprep.subr.bf16.mxu0 %v11865_v21  ;;  %7861 = vmatprep.subr.bf16.mxu1 %v11868_v22  ;;  %v11901_v21 = vld [vmem:[%s17137_s1 + $0x3cc] ss:$68 sps:$4 sm:$0xff]   ;;  %v11904_v22 = vld [vmem:[%s17137_s1 + $0x3d4] ss:$68 sps:$4 sm:$0xff]  }
 0x109   : > { %7262 = vmatprep.mubr.bf16.mxu0 %v14064_v28  ;;  %7546 = vmatprep.mubr.bf16.mxu1 %v14064_v28 }
 0x10b   : > { %7578 = vmatpush1.bf16.msra.mxu0 %v11863_v25  ;;  %7862 = vmatpush1.bf16.msra.mxu1 %v11866_v26  ;;  %v11899_v25 = vld [vmem:[%s17137_s1 + $0x3c8] ss:$68 sps:$4 sm:$0xff]   ;;  %v11902_v26 = vld [vmem:[%s17137_s1 + $0x3d0] ss:$68 sps:$4 sm:$0xff]  }
 0x10c   : > { %7579 = vmatprep.subr.bf16.mxu0 %v11871_v31  ;;  %7863 = vmatprep.subr.bf16.mxu1 %v11874_v35  ;;  %v11905_v31 = vld [vmem:[%s17137_s1 + $0x450] ss:$68 sps:$4 sm:$0xff]   ;;  %v11908_v35 = vld [vmem:[%s17137_s1 + $0x458] ss:$68 sps:$4 sm:$0xff]  }
 0x10e   : > { %7263 = vmatmul.mubr.bf16.gmra.mrb[4].mxu0 %v14084_v38  ;;  %7547 = vmatmul.mubr.bf16.gmra.mrb[4].mxu1 %v14084_v38 }
 0x10f   : > { %7580 = vmatpush1.bf16.msra.mxu0 %v11869_v36  ;;  %7864 = vmatpush1.bf16.msra.mxu1 %v11872_v37  ;;  %v11913_v36 = vld [vmem:[%s17137_s1 + $0x4dc] ss:$68 sps:$4 sm:$0xff]   ;;  %v11916_v37 = vld [vmem:[%s17137_s1 + $0x4e4] ss:$68 sps:$4 sm:$0xff]  }
 0x110   : > { %7581 = vmatprep.subr.bf16.mxu0 %v11877_v44  ;;  %7865 = vmatprep.subr.bf16.mxu1 %v11880_v46  ;;  %v11919_v44 = vld [vmem:[%s17137_s1 + $0x564] ss:$68 sps:$4 sm:$0xff]   ;;  %v11922_v46 = vld [vmem:[%s17137_s1 + $0x56c] ss:$68 sps:$4 sm:$0xff]  }
 0x111   : > { %7272 = vmatprep.mubr.bf16.mxu0 %v14100_v49  ;;  %7556 = vmatprep.mubr.bf16.mxu1 %v14100_v49 }
 0x113   : > { %7582 = vmatpush1.bf16.msra.mxu0 %v11875_v47  ;;  %7866 = vmatpush1.bf16.msra.mxu1 %v11878_v48  ;;  %v11917_v47 = vld [vmem:[%s17137_s1 + $0x560] ss:$68 sps:$4 sm:$0xff]   ;;  %v11920_v48 = vld [vmem:[%s17137_s1 + $0x568] ss:$68 sps:$4 sm:$0xff]  }
 0x114   : > { %7583 = vmatprep.subr.bf16.mxu0 %v11883_v57  ;;  %7867 = vmatprep.subr.bf16.mxu1 %v11886_v58  ;;  %v11923_v57 = vld [vmem:[%s17137_s1 + $0x5e8] ss:$68 sps:$4 sm:$0xff]   ;;  %v11926_v58 = vld [vmem:[%s17137_s1 + $0x5f0] ss:$68 sps:$4 sm:$0xff]  }
 0x116   : > { %7273 = vmatmul.mubr.bf16.gmra.mrb[8].mxu0 %v14117_v60  ;;  %7557 = vmatmul.mubr.bf16.gmra.mrb[8].mxu1 %v14117_v60 }
 0x117   : > { %7584 = vmatpush1.bf16.msra.mxu0 %v11881_v59  ;;  %7868 = vmatpush1.bf16.msra.mxu1 %v11884_v63  ;;  %v11931_v59 = vld [vmem:[%s17137_s1 + $0x674] ss:$68 sps:$4 sm:$0xff]   ;;  %v11934_v63 = vld [vmem:[%s17137_s1 + $0x67c] ss:$68 sps:$4 sm:$0xff]  }
 0x118   : > { %7585 = vmatprep.subr.bf16.mxu0 %v11889_v1  ;;  %7869 = vmatprep.subr.bf16.mxu1 %v11892_v2  ;;  %v11932_v1 = vld [vmem:[%s17137_s1 + $0x678] ss:$68 sps:$4 sm:$0xff]  }
 0x119   : > { %7282 = vmatprep.mubr.bf16.mxu0 %v14132_v4  ;;  %7566 = vmatprep.mubr.bf16.mxu1 %v14132_v4  ;;  %v11937_v2 = vld [vmem:[%s17137_s1 + $0x6fc] ss:$68 sps:$4 sm:$0xff]  }
 0x11b   : > { %7586 = vmatpush1.bf16.msra.mxu0 %v11887_v3  ;;  %7870 = vmatpush1.bf16.msra.mxu1 %v11890_v7  ;;  %v11940_v3 = vld [vmem:[%s17137_s1 + $0x704] ss:$68 sps:$4 sm:$0xff]   ;;  %v11935_v7 = vld [vmem:[%s17137_s1 + $0x6f8] ss:$68 sps:$4 sm:$0xff]  }
 0x11c   : > { %7587 = vmatprep.subr.bf16.mxu0 %v11895_v10  ;;  %7871 = vmatprep.subr.bf16.mxu1 %v11898_v12  ;;  %v11943_v10 = vld [vmem:[%s17137_s1 + $0x784] ss:$68 sps:$4 sm:$0xff]   ;;  %v11946_v12 = vld [vmem:[%s17137_s1 + $0x78c] ss:$68 sps:$4 sm:$0xff]  }
 0x11e   : > { %7283 = vmatmul.mubr.bf16.gmra.mrb[12].mxu0 %v14148_v15  ;;  %7567 = vmatmul.mubr.bf16.gmra.mrb[12].mxu1 %v14148_v15 }
 0x11f   : > { %7588 = vmatpush1.bf16.msra.mxu0 %v11893_v17  ;;  %7872 = vmatpush1.bf16.msra.mxu1 %v11896_v19  ;;  %v11941_v17 = vld [vmem:[%s17137_s1 + $0x780] ss:$68 sps:$4 sm:$0xff]   ;;  %v11944_v19 = vld [vmem:[%s17137_s1 + $0x788] ss:$68 sps:$4 sm:$0xff]  }
 0x120   : > { %7589 = vmatprep.subr.bf16.mxu0 %v11901_v21  ;;  %7873 = vmatprep.subr.bf16.mxu1 %v11904_v22  ;;  %v11949_v21 = vld [vmem:[%s17137_s1 + $0x80c] ss:$68 sps:$4 sm:$0xff]   ;;  %v11952_v22 = vld [vmem:[%s17137_s1 + $0x814] ss:$68 sps:$4 sm:$0xff]  }
 0x121   : > { %7607 = vmatprep.mubr.bf16.mxu0 %v13268_v50  ;;  %7891 = vmatprep.mubr.bf16.mxu1 %v13268_v50 }
 0x123   : > { %7590 = vmatpush1.bf16.msra.mxu0 %v11899_v25  ;;  %7874 = vmatpush1.bf16.msra.mxu1 %v11902_v26  ;;  %v11947_v25 = vld [vmem:[%s17137_s1 + $0x808] ss:$68 sps:$4 sm:$0xff]   ;;  %v11950_v26 = vld [vmem:[%s17137_s1 + $0x810] ss:$68 sps:$4 sm:$0xff]  }
 0x124   : > { %7591 = vmatprep.subr.bf16.mxu0 %v11907_v29  ;;  %7875 = vmatprep.subr.bf16.mxu1 %v11910_v30  ;;  %v11955_v29 = vld [vmem:[%s17137_s1 + $0x894] ss:$68 sps:$4 sm:$0xff]   ;;  %v11958_v30 = vld [vmem:[%s17137_s1 + $0x89c] ss:$68 sps:$4 sm:$0xff]  }
 0x127   : > { %7592 = vmatpush1.bf16.msra.mxu0 %v11905_v31  ;;  %7876 = vmatpush1.bf16.msra.mxu1 %v11908_v35  ;;  %v11953_v31 = vld [vmem:[%s17137_s1 + $0x890] ss:$68 sps:$4 sm:$0xff]   ;;  %v11956_v35 = vld [vmem:[%s17137_s1 + $0x898] ss:$68 sps:$4 sm:$0xff]  }
 0x128   : > { %7593 = vmatprep.subr.bf16.mxu0 %v11913_v36  ;;  %7877 = vmatprep.subr.bf16.mxu1 %v11916_v37  ;;  %v11961_v36 = vld [vmem:[%s17137_s1 + $0x91c] ss:$68 sps:$4 sm:$0xff]   ;;  %v11964_v37 = vld [vmem:[%s17137_s1 + $0x924] ss:$68 sps:$4 sm:$0xff]  }
 0x12b   : > { %7594 = vmatpush1.bf16.msra.mxu0 %v11911_v40  ;;  %7878 = vmatpush1.bf16.msra.mxu1 %v11914_v41  ;;  %v11959_v40 = vld [vmem:[%s17137_s1 + $0x918] ss:$68 sps:$4 sm:$0xff]   ;;  %v11962_v41 = vld [vmem:[%s17137_s1 + $0x920] ss:$68 sps:$4 sm:$0xff]  }
 0x12c   : > { %7595 = vmatprep.subr.bf16.mxu0 %v11919_v44  ;;  %7879 = vmatprep.subr.bf16.mxu1 %v11922_v46  ;;  %v11967_v44 = vld [vmem:[%s17137_s1 + $0x9a4] ss:$68 sps:$4 sm:$0xff]   ;;  %v11970_v46 = vld [vmem:[%s17137_s1 + $0x9ac] ss:$68 sps:$4 sm:$0xff]  }
 0x12f   : > { %7596 = vmatpush1.bf16.msra.mxu0 %v11917_v47  ;;  %7880 = vmatpush1.bf16.msra.mxu1 %v11920_v48  ;;  %v11965_v47 = vld [vmem:[%s17137_s1 + $0x9a0] ss:$68 sps:$4 sm:$0xff]   ;;  %v11968_v48 = vld [vmem:[%s17137_s1 + $0x9a8] ss:$68 sps:$4 sm:$0xff]  }
 0x130   : > { %7597 = vmatprep.subr.bf16.mxu0 %v11925_v51  ;;  %7881 = vmatprep.subr.bf16.mxu1 %v11928_v54  ;;  %v11973_v51 = vld [vmem:[%s17137_s1 + $0xa2c] ss:$68 sps:$4 sm:$0xff]   ;;  %v11976_v54 = vld [vmem:[%s17137_s1 + $0xa34] ss:$68 sps:$4 sm:$0xff]  }
 0x133   : > { %7598 = vmatpush1.bf16.msra.mxu0 %v11923_v57  ;;  %7882 = vmatpush1.bf16.msra.mxu1 %v11926_v58  ;;  %v11971_v57 = vld [vmem:[%s17137_s1 + $0xa28] ss:$68 sps:$4 sm:$0xff]   ;;  %v11974_v58 = vld [vmem:[%s17137_s1 + $0xa30] ss:$68 sps:$4 sm:$0xff]  }
 0x134   : > { %7599 = vmatprep.subr.bf16.mxu0 %v11931_v59  ;;  %7883 = vmatprep.subr.bf16.mxu1 %v11934_v63  ;;  %v11979_v59 = vld [vmem:[%s17137_s1 + $0xab4] ss:$68 sps:$4 sm:$0xff]   ;;  %v11982_v63 = vld [vmem:[%s17137_s1 + $0xabc] ss:$68 sps:$4 sm:$0xff]  }
 0x137   : > { %7600 = vmatpush1.bf16.msra.mxu0 %v11929_v0  ;;  %7884 = vmatpush1.bf16.msra.mxu1 %v11932_v1  ;;  %v11977_v0 = vld [vmem:[%s17137_s1 + $0xab0] ss:$68 sps:$4 sm:$0xff]   ;;  %v11980_v1 = vld [vmem:[%s17137_s1 + $0xab8] ss:$68 sps:$4 sm:$0xff]  }
 0x138   : > { %7601 = vmatprep.subr.bf16.mxu0 %v11937_v2  ;;  %7885 = vmatprep.subr.bf16.mxu1 %v11940_v3  ;;  %v11985_v2 = vld [vmem:[%s17137_s1 + $0xb3c] ss:$68 sps:$4 sm:$0xff]   ;;  %v11988_v3 = vld [vmem:[%s17137_s1 + $0xb44] ss:$68 sps:$4 sm:$0xff]  }
 0x13b   : > { %7602 = vmatpush1.bf16.msra.mxu0 %v11935_v7  ;;  %7886 = vmatpush1.bf16.msra.mxu1 %v11938_v8  ;;  %v11983_v7 = vld [vmem:[%s17137_s1 + $0xb38] ss:$68 sps:$4 sm:$0xff]   ;;  %v11986_v8 = vld [vmem:[%s17137_s1 + $0xb40] ss:$68 sps:$4 sm:$0xff]  }
 0x13c   : > { %7603 = vmatprep.subr.bf16.mxu0 %v11943_v10  ;;  %7887 = vmatprep.subr.bf16.mxu1 %v11946_v12  ;;  %v11991_v10 = vld [vmem:[%s17137_s1 + $0xbc4] ss:$68 sps:$4 sm:$0xff]   ;;  %v11994_v12 = vld [vmem:[%s17137_s1 + $0xbcc] ss:$68 sps:$4 sm:$0xff]  }
 0x13f   : > { %7604 = vmatpush1.bf16.msra.mxu0 %v11941_v17  ;;  %7888 = vmatpush1.bf16.msra.mxu1 %v11944_v19  ;;  %v11989_v17 = vld [vmem:[%s17137_s1 + $0xbc0] ss:$68 sps:$4 sm:$0xff]   ;;  %v11992_v19 = vld [vmem:[%s17137_s1 + $0xbc8] ss:$68 sps:$4 sm:$0xff]  }
 0x140   : > { %7605 = vmatprep.subr.bf16.mxu0 %v11949_v21  ;;  %7889 = vmatprep.subr.bf16.mxu1 %v11952_v22  ;;  %v11997_v21 = vld [vmem:[%s17137_s1 + $0xc4c] ss:$68 sps:$4 sm:$0xff]   ;;  %v12000_v22 = vld [vmem:[%s17137_s1 + $0xc54] ss:$68 sps:$4 sm:$0xff]  }
 0x143   : > { %7606 = vmatpush1.bf16.msra.mxu0 %v11947_v25  ;;  %7890 = vmatpush1.bf16.msra.mxu1 %v11950_v26  ;;  %v11995_v25 = vld [vmem:[%s17137_s1 + $0xc48] ss:$68 sps:$4 sm:$0xff]   ;;  %v11998_v26 = vld [vmem:[%s17137_s1 + $0xc50] ss:$68 sps:$4 sm:$0xff]  }
 0x144   : > { %7646 = vmatprep.subr.bf16.mxu0 %v11955_v29  ;;  %7930 = vmatprep.subr.bf16.mxu1 %v11958_v30  ;;  %v12003_v29 = vld [vmem:[%s17137_s1 + $0xcd4] ss:$68 sps:$4 sm:$0xff]   ;;  %v12006_v30 = vld [vmem:[%s17137_s1 + $0xcdc] ss:$68 sps:$4 sm:$0xff]  }
 0x146   : > { %7608 = vmatmul.mubr.bf16.vlgmr.msra.gmra.mrb[16].mxu0 %v13334_v9  ;;  %7892 = vmatmul.mubr.bf16.vlgmr.msra.gmra.mrb[16].mxu1 %v13334_v9 }
 0x147   : > { %7647 = vmatpush1.bf16.msra.mxu0 %v11953_v31  ;;  %7931 = vmatpush1.bf16.msra.mxu1 %v11956_v35  ;;  %v12001_v31 = vld [vmem:[%s17137_s1 + $0xcd0] ss:$68 sps:$4 sm:$0xff]   ;;  %v12004_v35 = vld [vmem:[%s17137_s1 + $0xcd8] ss:$68 sps:$4 sm:$0xff]  }
 0x148   : > { %7648 = vmatprep.subr.bf16.mxu0 %v11961_v36  ;;  %7932 = vmatprep.subr.bf16.mxu1 %v11964_v37  ;;  %v12009_v36 = vld [vmem:[%s17137_s1 + $0xd5c] ss:$68 sps:$4 sm:$0xff]   ;;  %v12012_v37 = vld [vmem:[%s17137_s1 + $0xd64] ss:$68 sps:$4 sm:$0xff]  }
 0x149   : > { %7617 = vmatprep.mubr.bf16.mxu0 %v13364_v20  ;;  %7901 = vmatprep.mubr.bf16.mxu1 %v13364_v20 }
 0x14b   : > { %7649 = vmatpush1.bf16.msra.mxu0 %v11959_v40  ;;  %7933 = vmatpush1.bf16.msra.mxu1 %v11962_v41  ;;  %v12007_v40 = vld [vmem:[%s17137_s1 + $0xd58] ss:$68 sps:$4 sm:$0xff]   ;;  %v12010_v41 = vld [vmem:[%s17137_s1 + $0xd60] ss:$68 sps:$4 sm:$0xff]  }
 0x14c   : > { %7650 = vmatprep.subr.bf16.mxu0 %v11967_v44  ;;  %7934 = vmatprep.subr.bf16.mxu1 %v11970_v46  ;;  %v12015_v44 = vld [vmem:[%s17137_s1 + $0xde4] ss:$68 sps:$4 sm:$0xff]   ;;  %v12018_v46 = vld [vmem:[%s17137_s1 + $0xdec] ss:$68 sps:$4 sm:$0xff]  }
 0x14e   : > { %7618 = vmatmul.mubr.bf16.gmra.mrb[20].mxu0 %v13382_v27  ;;  %7902 = vmatmul.mubr.bf16.gmra.mrb[20].mxu1 %v13382_v27 }
 0x14f   : > { %7651 = vmatpush1.bf16.msra.mxu0 %v11965_v47  ;;  %7935 = vmatpush1.bf16.msra.mxu1 %v11968_v48  ;;  %v12013_v47 = vld [vmem:[%s17137_s1 + $0xde0] ss:$68 sps:$4 sm:$0xff]   ;;  %v12016_v48 = vld [vmem:[%s17137_s1 + $0xde8] ss:$68 sps:$4 sm:$0xff]  }
 0x150   : > { %7652 = vmatprep.subr.bf16.mxu0 %v11973_v51  ;;  %7936 = vmatprep.subr.bf16.mxu1 %v11976_v54  ;;  %v12021_v51 = vld [vmem:[%s17137_s1 + $0xe6c] ss:$68 sps:$4 sm:$0xff]   ;;  %v12024_v54 = vld [vmem:[%s17137_s1 + $0xe74] ss:$68 sps:$4 sm:$0xff]  }
 0x151   : > { %7627 = vmatprep.mubr.bf16.mxu0 %v13397_v33  ;;  %7911 = vmatprep.mubr.bf16.mxu1 %v13397_v33 }
 0x153   : > { %7653 = vmatpush1.bf16.msra.mxu0 %v11971_v57  ;;  %7937 = vmatpush1.bf16.msra.mxu1 %v11974_v58  ;;  %v12019_v57 = vld [vmem:[%s17137_s1 + $0xe68] ss:$68 sps:$4 sm:$0xff]   ;;  %v12022_v58 = vld [vmem:[%s17137_s1 + $0xe70] ss:$68 sps:$4 sm:$0xff]  }
 0x154   : > { %7654 = vmatprep.subr.bf16.mxu0 %v11979_v59  ;;  %7938 = vmatprep.subr.bf16.mxu1 %v11982_v63  ;;  %v12027_v59 = vld [vmem:[%s17137_s1 + $0xef4] ss:$68 sps:$4 sm:$0xff]   ;;  %v12030_v63 = vld [vmem:[%s17137_s1 + $0xefc] ss:$68 sps:$4 sm:$0xff]  }
 0x156   : > { %7628 = vmatmul.mubr.bf16.gmra.mrb[24].mxu0 %v13412_v39  ;;  %7912 = vmatmul.mubr.bf16.gmra.mrb[24].mxu1 %v13412_v39 }
 0x157   : > { %7655 = vmatpush1.bf16.msra.mxu0 %v11977_v0  ;;  %7939 = vmatpush1.bf16.msra.mxu1 %v11980_v1  ;;  %v12025_v0 = vld [vmem:[%s17137_s1 + $0xef0] ss:$68 sps:$4 sm:$0xff]   ;;  %v12028_v1 = vld [vmem:[%s17137_s1 + $0xef8] ss:$68 sps:$4 sm:$0xff]  }
 0x158   : > { %7656 = vmatprep.subr.bf16.mxu0 %v11985_v2  ;;  %7940 = vmatprep.subr.bf16.mxu1 %v11988_v3  ;;  %v12033_v2 = vld [vmem:[%s17137_s1 + $0xf7c] ss:$68 sps:$4 sm:$0xff]   ;;  %v12036_v3 = vld [vmem:[%s17137_s1 + $0xf84] ss:$68 sps:$4 sm:$0xff]  }
 0x159   : > { %7637 = vmatprep.mubr.bf16.mxu0 %v13427_v45  ;;  %7921 = vmatprep.mubr.bf16.mxu1 %v13427_v45 }
 0x15b   : > { %7657 = vmatpush1.bf16.msra.mxu0 %v11983_v7  ;;  %7941 = vmatpush1.bf16.msra.mxu1 %v11986_v8  ;;  %v12031_v7 = vld [vmem:[%s17137_s1 + $0xf78] ss:$68 sps:$4 sm:$0xff]   ;;  %v12034_v8 = vld [vmem:[%s17137_s1 + $0xf80] ss:$68 sps:$4 sm:$0xff]  }
 0x15c   : > { %7658 = vmatprep.subr.bf16.mxu0 %v11991_v10  ;;  %7942 = vmatprep.subr.bf16.mxu1 %v11994_v12  ;;  %v12039_v10 = vld [vmem:[%s17137_s1 + $0x1004] ss:$68 sps:$4 sm:$0xff]   ;;  %v12042_v12 = vld [vmem:[%s17137_s1 + $0x100c] ss:$68 sps:$4 sm:$0xff]  }
 0x15e   : > { %7638 = vmatmul.mubr.bf16.gmra.mrb[28].mxu0 %v13446_v52  ;;  %7922 = vmatmul.mubr.bf16.gmra.mrb[28].mxu1 %v13446_v52 }
 0x15f   : > { %7659 = vmatpush1.bf16.msra.mxu0 %v11989_v17  ;;  %7943 = vmatpush1.bf16.msra.mxu1 %v11992_v19  ;;  %v12037_v17 = vld [vmem:[%s17137_s1 + $0x1000] ss:$68 sps:$4 sm:$0xff]   ;;  %v12040_v19 = vld [vmem:[%s17137_s1 + $0x1008] ss:$68 sps:$4 sm:$0xff]  }
 0x160   : > { %7660 = vmatprep.subr.bf16.mxu0 %v11997_v21  ;;  %7944 = vmatprep.subr.bf16.mxu1 %v12000_v22  ;;  %v12045_v21 = vld [vmem:[%s17137_s1 + $0x108c] ss:$68 sps:$4 sm:$0xff]   ;;  %v12048_v22 = vld [vmem:[%s17137_s1 + $0x1094] ss:$68 sps:$4 sm:$0xff]  }
 0x161   : > { %7678 = vmatprep.mubr.bf16.mxu0 %v13453_v56  ;;  %7962 = vmatprep.mubr.bf16.mxu1 %v13453_v56 }
 0x163   : > { %7661 = vmatpush1.bf16.msra.mxu0 %v11995_v25  ;;  %7945 = vmatpush1.bf16.msra.mxu1 %v11998_v26  ;;  %v12043_v25 = vld [vmem:[%s17137_s1 + $0x1088] ss:$68 sps:$4 sm:$0xff]   ;;  %v12046_v26 = vld [vmem:[%s17137_s1 + $0x1090] ss:$68 sps:$4 sm:$0xff]  }
 0x164   : > { %7662 = vmatprep.subr.bf16.mxu0 %v12003_v29  ;;  %7946 = vmatprep.subr.bf16.mxu1 %v12006_v30  ;;  %v12051_v29 = vld [vmem:[%s17137_s1 + $0x1114] ss:$68 sps:$4 sm:$0xff]   ;;  %v12054_v30 = vld [vmem:[%s17137_s1 + $0x111c] ss:$68 sps:$4 sm:$0xff]  }
 0x167   : > { %7663 = vmatpush1.bf16.msra.mxu0 %v12001_v31  ;;  %7947 = vmatpush1.bf16.msra.mxu1 %v12004_v35  ;;  %v12049_v31 = vld [vmem:[%s17137_s1 + $0x1110] ss:$68 sps:$4 sm:$0xff]   ;;  %v12052_v35 = vld [vmem:[%s17137_s1 + $0x1118] ss:$68 sps:$4 sm:$0xff]  }
 0x168   : > { %7664 = vmatprep.subr.bf16.mxu0 %v12009_v36  ;;  %7948 = vmatprep.subr.bf16.mxu1 %v12012_v37  ;;  %v12057_v36 = vld [vmem:[%s17137_s1 + $0x119c] ss:$68 sps:$4 sm:$0xff]   ;;  %v12060_v37 = vld [vmem:[%s17137_s1 + $0x11a4] ss:$68 sps:$4 sm:$0xff]  }
 0x16b   : > { %7665 = vmatpush1.bf16.msra.mxu0 %v12007_v40  ;;  %7949 = vmatpush1.bf16.msra.mxu1 %v12010_v41  ;;  %v12055_v40 = vld [vmem:[%s17137_s1 + $0x1198] ss:$68 sps:$4 sm:$0xff]   ;;  %v12058_v41 = vld [vmem:[%s17137_s1 + $0x11a0] ss:$68 sps:$4 sm:$0xff]  }
 0x16c   : > { %7666 = vmatprep.subr.bf16.mxu0 %v12015_v44  ;;  %7950 = vmatprep.subr.bf16.mxu1 %v12018_v46  ;;  %v12063_v44 = vld [vmem:[%s17137_s1 + $0x1224] ss:$68 sps:$4 sm:$0xff]   ;;  %v12066_v46 = vld [vmem:[%s17137_s1 + $0x122c] ss:$68 sps:$4 sm:$0xff]  }
 0x16f   : > { %7667 = vmatpush1.bf16.msra.mxu0 %v12013_v47  ;;  %7951 = vmatpush1.bf16.msra.mxu1 %v12016_v48  ;;  %v12061_v47 = vld [vmem:[%s17137_s1 + $0x1220] ss:$68 sps:$4 sm:$0xff]   ;;  %v12064_v48 = vld [vmem:[%s17137_s1 + $0x1228] ss:$68 sps:$4 sm:$0xff]  }
 0x170   : > { %7668 = vmatprep.subr.bf16.mxu0 %v12021_v51  ;;  %7952 = vmatprep.subr.bf16.mxu1 %v12024_v54  ;;  %v12069_v51 = vld [vmem:[%s17137_s1 + $0x12ac] ss:$68 sps:$4 sm:$0xff]   ;;  %v12072_v54 = vld [vmem:[%s17137_s1 + $0x12b4] ss:$68 sps:$4 sm:$0xff]  }
 0x173   : > { %7669 = vmatpush1.bf16.msra.mxu0 %v12019_v57  ;;  %7953 = vmatpush1.bf16.msra.mxu1 %v12022_v58  ;;  %v12067_v57 = vld [vmem:[%s17137_s1 + $0x12a8] ss:$68 sps:$4 sm:$0xff]   ;;  %v12070_v58 = vld [vmem:[%s17137_s1 + $0x12b0] ss:$68 sps:$4 sm:$0xff]  }
 0x174   : > { %7670 = vmatprep.subr.bf16.mxu0 %v12027_v59  ;;  %7954 = vmatprep.subr.bf16.mxu1 %v12030_v63  ;;  %v12075_v59 = vld [vmem:[%s17137_s1 + $0x1334] ss:$68 sps:$4 sm:$0xff]   ;;  %v12078_v63 = vld [vmem:[%s17137_s1 + $0x133c] ss:$68 sps:$4 sm:$0xff]  }
 0x177   : > { %7671 = vmatpush1.bf16.msra.mxu0 %v12025_v0  ;;  %7955 = vmatpush1.bf16.msra.mxu1 %v12028_v1  ;;  %v12073_v0 = vld [vmem:[%s17137_s1 + $0x1330] ss:$68 sps:$4 sm:$0xff]   ;;  %v12076_v1 = vld [vmem:[%s17137_s1 + $0x1338] ss:$68 sps:$4 sm:$0xff]  }
 0x178   : > { %7672 = vmatprep.subr.bf16.mxu0 %v12033_v2  ;;  %7956 = vmatprep.subr.bf16.mxu1 %v12036_v3  ;;  %v12081_v2 = vld [vmem:[%s17137_s1 + $0x13bc] ss:$68 sps:$4 sm:$0xff]   ;;  %v12084_v3 = vld [vmem:[%s17137_s1 + $0x13c4] ss:$68 sps:$4 sm:$0xff]  }
 0x17b   : > { %7673 = vmatpush1.bf16.msra.mxu0 %v12031_v7  ;;  %7957 = vmatpush1.bf16.msra.mxu1 %v12034_v8  ;;  %v12079_v7 = vld [vmem:[%s17137_s1 + $0x13b8] ss:$68 sps:$4 sm:$0xff]   ;;  %v12082_v8 = vld [vmem:[%s17137_s1 + $0x13c0] ss:$68 sps:$4 sm:$0xff]  }
 0x17c   : > { %7674 = vmatprep.subr.bf16.mxu0 %v12039_v10  ;;  %7958 = vmatprep.subr.bf16.mxu1 %v12042_v12  ;;  %v12087_v10 = vld [vmem:[%s17137_s1 + $0x1444] ss:$68 sps:$4 sm:$0xff]   ;;  %v12090_v12 = vld [vmem:[%s17137_s1 + $0x144c] ss:$68 sps:$4 sm:$0xff]  }
 0x17f   : > { %7675 = vmatpush1.bf16.msra.mxu0 %v12037_v17  ;;  %7959 = vmatpush1.bf16.msra.mxu1 %v12040_v19  ;;  %v12085_v17 = vld [vmem:[%s17137_s1 + $0x1440] ss:$68 sps:$4 sm:$0xff]   ;;  %v12088_v19 = vld [vmem:[%s17137_s1 + $0x1448] ss:$68 sps:$4 sm:$0xff]  }
 0x180   : > { %7676 = vmatprep.subr.bf16.mxu0 %v12045_v21  ;;  %7960 = vmatprep.subr.bf16.mxu1 %v12048_v22  ;;  %v12093_v21 = vld [vmem:[%s17137_s1 + $0x14cc] ss:$68 sps:$4 sm:$0xff]   ;;  %v12096_v22 = vld [vmem:[%s17137_s1 + $0x14d4] ss:$68 sps:$4 sm:$0xff]  }
 0x183   : > { %7677 = vmatpush1.bf16.msra.mxu0 %v12043_v25  ;;  %7961 = vmatpush1.bf16.msra.mxu1 %v12046_v26  ;;  %v12091_v25 = vld [vmem:[%s17137_s1 + $0x14c8] ss:$68 sps:$4 sm:$0xff]   ;;  %v12094_v26 = vld [vmem:[%s17137_s1 + $0x14d0] ss:$68 sps:$4 sm:$0xff]  }
 0x184   : > { %7717 = vmatprep.subr.bf16.mxu0 %v12051_v29  ;;  %8001 = vmatprep.subr.bf16.mxu1 %v12054_v30  ;;  %v12099_v29 = vld [vmem:[%s17137_s1 + $0x1554] ss:$68 sps:$4 sm:$0xff]   ;;  %v12102_v30 = vld [vmem:[%s17137_s1 + $0x155c] ss:$68 sps:$4 sm:$0xff]  }
 0x186   : > { %7679 = vmatmul.mubr.bf16.vlgmr.msra.gmra.mrb[16].mxu0 %v13566_v34  ;;  %7963 = vmatmul.mubr.bf16.vlgmr.msra.gmra.mrb[16].mxu1 %v13566_v34 }
 0x187   : > { %7718 = vmatpush1.bf16.msra.mxu0 %v12049_v31  ;;  %8002 = vmatpush1.bf16.msra.mxu1 %v12052_v35  ;;  %v12097_v31 = vld [vmem:[%s17137_s1 + $0x1550] ss:$68 sps:$4 sm:$0xff]   ;;  %v12100_v35 = vld [vmem:[%s17137_s1 + $0x1558] ss:$68 sps:$4 sm:$0xff]  }
 0x188   : > { %7719 = vmatprep.subr.bf16.mxu0 %v12057_v36  ;;  %8003 = vmatprep.subr.bf16.mxu1 %v12060_v37  ;;  %v12105_v36 = vld [vmem:[%s17137_s1 + $0x15dc] ss:$68 sps:$4 sm:$0xff]   ;;  %v12108_v37 = vld [vmem:[%s17137_s1 + $0x15e4] ss:$68 sps:$4 sm:$0xff]  }
 0x189   : > { %7688 = vmatprep.mubr.bf16.mxu0 %v13585_v43  ;;  %7972 = vmatprep.mubr.bf16.mxu1 %v13585_v43 }
 0x18b   : > { %7720 = vmatpush1.bf16.msra.mxu0 %v12055_v40  ;;  %8004 = vmatpush1.bf16.msra.mxu1 %v12058_v41  ;;  %v12103_v40 = vld [vmem:[%s17137_s1 + $0x15d8] ss:$68 sps:$4 sm:$0xff]   ;;  %v12106_v41 = vld [vmem:[%s17137_s1 + $0x15e0] ss:$68 sps:$4 sm:$0xff]  }
 0x18c   : > { %7721 = vmatprep.subr.bf16.mxu0 %v12063_v44  ;;  %8005 = vmatprep.subr.bf16.mxu1 %v12066_v46  ;;  %v12111_v44 = vld [vmem:[%s17137_s1 + $0x1664] ss:$68 sps:$4 sm:$0xff]   ;;  %v12114_v46 = vld [vmem:[%s17137_s1 + $0x166c] ss:$68 sps:$4 sm:$0xff]  }
 0x18e   : > { %7689 = vmatmul.mubr.bf16.gmra.mrb[20].mxu0 %v13605_v53  ;;  %7973 = vmatmul.mubr.bf16.gmra.mrb[20].mxu1 %v13605_v53 }
 0x18f   : > { %7722 = vmatpush1.bf16.msra.mxu0 %v12061_v47  ;;  %8006 = vmatpush1.bf16.msra.mxu1 %v12064_v48  ;;  %v12109_v47 = vld [vmem:[%s17137_s1 + $0x1660] ss:$68 sps:$4 sm:$0xff]   ;;  %v12112_v48 = vld [vmem:[%s17137_s1 + $0x1668] ss:$68 sps:$4 sm:$0xff]  }
 0x190   : > { %7723 = vmatprep.subr.bf16.mxu0 %v12069_v51  ;;  %8007 = vmatprep.subr.bf16.mxu1 %v12072_v54  ;;  %v12117_v51 = vld [vmem:[%s17137_s1 + $0x16ec] ss:$68 sps:$4 sm:$0xff]   ;;  %v12120_v54 = vld [vmem:[%s17137_s1 + $0x16f4] ss:$68 sps:$4 sm:$0xff]  }
 0x191   : > { %7698 = vmatprep.mubr.bf16.mxu0 %v13621_v61  ;;  %7982 = vmatprep.mubr.bf16.mxu1 %v13621_v61 }
 0x193   : > { %7724 = vmatpush1.bf16.msra.mxu0 %v12067_v57  ;;  %8008 = vmatpush1.bf16.msra.mxu1 %v12070_v58  ;;  %v12115_v57 = vld [vmem:[%s17137_s1 + $0x16e8] ss:$68 sps:$4 sm:$0xff]   ;;  %v12118_v58 = vld [vmem:[%s17137_s1 + $0x16f0] ss:$68 sps:$4 sm:$0xff]  }
 0x194   : > { %7725 = vmatprep.subr.bf16.mxu0 %v12075_v59  ;;  %8009 = vmatprep.subr.bf16.mxu1 %v12078_v63  ;;  %v12123_v59 = vld [vmem:[%s17137_s1 + $0x1774] ss:$68 sps:$4 sm:$0xff]   ;;  %v12126_v63 = vld [vmem:[%s17137_s1 + $0x177c] ss:$68 sps:$4 sm:$0xff]  }
 0x196   : > { %7699 = vmatmul.mubr.bf16.gmra.mrb[24].mxu0 %v13644_v5  ;;  %7983 = vmatmul.mubr.bf16.gmra.mrb[24].mxu1 %v13644_v5 }
 0x197   : > { %7726 = vmatpush1.bf16.msra.mxu0 %v12073_v0  ;;  %8010 = vmatpush1.bf16.msra.mxu1 %v12076_v1  ;;  %v12121_v0 = vld [vmem:[%s17137_s1 + $0x1770] ss:$68 sps:$4 sm:$0xff]   ;;  %v12124_v1 = vld [vmem:[%s17137_s1 + $0x1778] ss:$68 sps:$4 sm:$0xff]  }
 0x198   : > { %7727 = vmatprep.subr.bf16.mxu0 %v12081_v2  ;;  %8011 = vmatprep.subr.bf16.mxu1 %v12084_v3  ;;  %v12129_v2 = vld [vmem:[%s17137_s1 + $0x17fc] ss:$68 sps:$4 sm:$0xff]   ;;  %v12132_v3 = vld [vmem:[%s17137_s1 + $0x1804] ss:$68 sps:$4 sm:$0xff]  }
 0x199   : > { %7708 = vmatprep.mubr.bf16.mxu0 %v13656_v11  ;;  %7992 = vmatprep.mubr.bf16.mxu1 %v13656_v11 }
 0x19b   : > { %7728 = vmatpush1.bf16.msra.mxu0 %v12079_v7  ;;  %8012 = vmatpush1.bf16.msra.mxu1 %v12082_v8  ;;  %v12127_v7 = vld [vmem:[%s17137_s1 + $0x17f8] ss:$68 sps:$4 sm:$0xff]   ;;  %v12130_v8 = vld [vmem:[%s17137_s1 + $0x1800] ss:$68 sps:$4 sm:$0xff]  }
 0x19c   : > { %7729 = vmatprep.subr.bf16.mxu0 %v12087_v10  ;;  %8013 = vmatprep.subr.bf16.mxu1 %v12090_v12  ;;  %v12135_v10 = vld [vmem:[%s17137_s1 + $0x1884] ss:$68 sps:$4 sm:$0xff]   ;;  %v12138_v12 = vld [vmem:[%s17137_s1 + $0x188c] ss:$68 sps:$4 sm:$0xff]  }
 0x19e   : > { %7709 = vmatmul.mubr.bf16.gmra.mrb[28].mxu0 %v13678_v18  ;;  %7993 = vmatmul.mubr.bf16.gmra.mrb[28].mxu1 %v13678_v18 }
 0x19f   : > { %7730 = vmatpush1.bf16.msra.mxu0 %v12085_v17  ;;  %8014 = vmatpush1.bf16.msra.mxu1 %v12088_v19  ;;  %v12133_v17 = vld [vmem:[%s17137_s1 + $0x1880] ss:$68 sps:$4 sm:$0xff]   ;;  %v12136_v19 = vld [vmem:[%s17137_s1 + $0x1888] ss:$68 sps:$4 sm:$0xff]  }
 0x1a0   : > { %7731 = vmatprep.subr.bf16.mxu0 %v12093_v21  ;;  %8015 = vmatprep.subr.bf16.mxu1 %v12096_v22  ;;  %v12141_v21 = vld [vmem:[%s17137_s1 + $0x190c] ss:$68 sps:$4 sm:$0xff]   ;;  %v12144_v22 = vld [vmem:[%s17137_s1 + $0x1914] ss:$68 sps:$4 sm:$0xff]  }
 0x1a1   : > { %7749 = vmatprep.mubr.bf16.mxu0 %v13688_v24  ;;  %8033 = vmatprep.mubr.bf16.mxu1 %v13688_v24 }
 0x1a3   : > { %7732 = vmatpush1.bf16.msra.mxu0 %v12091_v25  ;;  %8016 = vmatpush1.bf16.msra.mxu1 %v12094_v26  ;;  %v12139_v25 = vld [vmem:[%s17137_s1 + $0x1908] ss:$68 sps:$4 sm:$0xff]   ;;  %v12142_v26 = vld [vmem:[%s17137_s1 + $0x1910] ss:$68 sps:$4 sm:$0xff]  }
 0x1a4   : > { %7733 = vmatprep.subr.bf16.mxu0 %v12099_v29  ;;  %8017 = vmatprep.subr.bf16.mxu1 %v12102_v30  ;;  %v12147_v29 = vld [vmem:[%s17137_s1 + $0x1994] ss:$68 sps:$4 sm:$0xff]   ;;  %v12150_v30 = vld [vmem:[%s17137_s1 + $0x199c] ss:$68 sps:$4 sm:$0xff]  }
 0x1a7   : > { %7734 = vmatpush1.bf16.msra.mxu0 %v12097_v31  ;;  %8018 = vmatpush1.bf16.msra.mxu1 %v12100_v35  ;;  %v12145_v31 = vld [vmem:[%s17137_s1 + $0x1990] ss:$68 sps:$4 sm:$0xff]   ;;  %v12148_v35 = vld [vmem:[%s17137_s1 + $0x1998] ss:$68 sps:$4 sm:$0xff]  }
 0x1a8   : > { %7735 = vmatprep.subr.bf16.mxu0 %v12105_v36  ;;  %8019 = vmatprep.subr.bf16.mxu1 %v12108_v37  ;;  %v12153_v36 = vld [vmem:[%s17137_s1 + $0x1a1c] ss:$68 sps:$4 sm:$0xff]   ;;  %v12156_v37 = vld [vmem:[%s17137_s1 + $0x1a24] ss:$68 sps:$4 sm:$0xff]  }
 0x1ab   : > { %7736 = vmatpush1.bf16.msra.mxu0 %v12103_v40  ;;  %8020 = vmatpush1.bf16.msra.mxu1 %v12106_v41  ;;  %v12151_v40 = vld [vmem:[%s17137_s1 + $0x1a18] ss:$68 sps:$4 sm:$0xff]   ;;  %v12154_v41 = vld [vmem:[%s17137_s1 + $0x1a20] ss:$68 sps:$4 sm:$0xff]  }
 0x1ac   : > { %7737 = vmatprep.subr.bf16.mxu0 %v12111_v44  ;;  %8021 = vmatprep.subr.bf16.mxu1 %v12114_v46  ;;  %v12159_v44 = vld [vmem:[%s17137_s1 + $0x1aa4] ss:$68 sps:$4 sm:$0xff]   ;;  %v12162_v46 = vld [vmem:[%s17137_s1 + $0x1aac] ss:$68 sps:$4 sm:$0xff]  }
 0x1af   : > { %7738 = vmatpush1.bf16.msra.mxu0 %v12109_v47  ;;  %8022 = vmatpush1.bf16.msra.mxu1 %v12112_v48  ;;  %v1418_v47 = vlaneseq  ;;  %v12157_v48 = vld [vmem:[%s17137_s1 + $0x1aa0] ss:$68 sps:$4 sm:$0xff]  }
 0x1b0   : > { %7739 = vmatprep.subr.bf16.mxu0 %v12117_v51  ;;  %8023 = vmatprep.subr.bf16.mxu1 %v12120_v54  ;;  %v12160_v51 = vld [vmem:[%s17137_s1 + $0x1aa8] ss:$68 sps:$4 sm:$0xff]  }
 0x1b1   : > { %v12165_v54 = vld [vmem:[%s17137_s1 + $0x1b2c] ss:$68 sps:$4 sm:$0xff]  }
 0x1b3   : > { %7740 = vmatpush1.bf16.msra.mxu0 %v12115_v57  ;;  %8024 = vmatpush1.bf16.msra.mxu1 %v12118_v58  ;;  %v12168_v57 = vld [vmem:[%s17137_s1 + $0x1b34] ss:$68 sps:$4 sm:$0xff]   ;;  %v14730_v58 = vshrl.u32 %v1418_v47, 7 }
 0x1b4   : > { %7741 = vmatprep.subr.bf16.mxu0 %v12123_v59  ;;  %8025 = vmatprep.subr.bf16.mxu1 %v12126_v63  ;;  %v12163_v59 = vld [vmem:[%s17137_s1 + $0x1b28] ss:$68 sps:$4 sm:$0xff]   ;;  %v12166_v63 = vld [vmem:[%s17137_s1 + $0x1b30] ss:$68 sps:$4 sm:$0xff]  }
 0x1b7   : > { %7742 = vmatpush1.bf16.msra.mxu0 %v12121_v0  ;;  %8026 = vmatpush1.bf16.msra.mxu1 %v12124_v1  ;;  %v12171_v0 = vld [vmem:[%s17137_s1 + $0x1bb4] ss:$68 sps:$4 sm:$0xff]   ;;  %v12174_v1 = vld [vmem:[%s17137_s1 + $0x1bbc] ss:$68 sps:$4 sm:$0xff]  }
 0x1b8   : > { %7743 = vmatprep.subr.bf16.mxu0 %v12129_v2  ;;  %8027 = vmatprep.subr.bf16.mxu1 %v12132_v3  ;;  %v12169_v2 = vld [vmem:[%s17137_s1 + $0x1bb0] ss:$68 sps:$4 sm:$0xff]   ;;  %v1420_v3 = vsub.s32 0, %v14730_v58 }
 0x1bb   : > { %7744 = vmatpush1.bf16.msra.mxu0 %v12127_v7  ;;  %8028 = vmatpush1.bf16.msra.mxu1 %v12130_v8  ;;  %v1428_v7 = vsub.s32 2, %v14730_v58  ;;  %v12172_v8 = vld [vmem:[%s17137_s1 + $0x1bb8] ss:$68 sps:$4 sm:$0xff]  }
 0x1bc   : > { %7745 = vmatprep.subr.bf16.mxu0 %v12135_v10  ;;  %8029 = vmatprep.subr.bf16.mxu1 %v12138_v12  ;;  %v1412_v10 = vld [vmem:[%s17138_s2] sm:$0xff]  ;;  %v1424_v12 = vsub.s32 1, %v14730_v58 }
 0x1bf   : > { %7746 = vmatpush1.bf16.msra.mxu0 %v12133_v17  ;;  %8030 = vmatpush1.bf16.msra.mxu1 %v12136_v19  ;;  %v1432_v17 = vsub.s32 3, %v14730_v58  ;;  %v12177_v19 = vld [vmem:[%s17137_s1 + $0x1c3c] ss:$68 sps:$4 sm:$0xff]  }
 0x1c0   : > { %7747 = vmatprep.subr.bf16.mxu0 %v12141_v21  ;;  %8031 = vmatprep.subr.bf16.mxu1 %v12144_v22  ;;  %v12180_v21 = vld [vmem:[%s17137_s1 + $0x1c44] ss:$68 sps:$4 sm:$0xff]   ;;  %v14770_v22 = vrot.slane %v1412_v10, %v1420_v3 }
 0x1c3   : > { %7748 = vmatpush1.bf16.msra.mxu0 %v12139_v25  ;;  %8032 = vmatpush1.bf16.msra.mxu1 %v12142_v26  ;;  %v14774_v25 = vrot.slane %v1412_v10, %v1428_v7  ;;  %v14780_v26 = vrot.slane %v1412_v10, %v1424_v12 }
 0x1c4   : > { %7788 = vmatprep.subr.bf16.mxu0 %v12147_v29  ;;  %8072 = vmatprep.subr.bf16.mxu1 %v12150_v30  ;;  %v14784_v29 = vrot.slane %v1412_v10, %v1432_v17  ;;  %v12175_v30 = vld [vmem:[%s17137_s1 + $0x1c38] ss:$68 sps:$4 sm:$0xff]   ;;  %v12189_v10 = vld [vmem:[%s17137_s1 + $0x1d4c] ss:$68 sps:$4 sm:$0xff]  }
 0x1c6   : > { %7750 = vmatmul.mubr.bf16.vlgmr.msra.gmra.mrb[16].mxu0 %v13804_v13  ;;  %8034 = vmatmul.mubr.bf16.vlgmr.msra.gmra.mrb[16].mxu1 %v13804_v13 }
 0x1c7   : > { %7789 = vmatpush1.bf16.msra.mxu0 %v12145_v31  ;;  %8073 = vmatpush1.bf16.msra.mxu1 %v12148_v35  ;;  %v12178_v31 = vld [vmem:[%s17137_s1 + $0x1c40] ss:$68 sps:$4 sm:$0xff]  }
 0x1c8   : > { %7790 = vmatprep.subr.bf16.mxu0 %v12153_v36  ;;  %8074 = vmatprep.subr.bf16.mxu1 %v12156_v37  ;;  %v12183_v35 = vld [vmem:[%s17137_s1 + $0x1cc4] ss:$68 sps:$4 sm:$0xff]   ;;  %v12186_v36 = vld [vmem:[%s17137_s1 + $0x1ccc] ss:$68 sps:$4 sm:$0xff]  }
 0x1c9   : > { %7759 = vmatprep.mubr.bf16.mxu0 %v13823_v23  ;;  %8043 = vmatprep.mubr.bf16.mxu1 %v13823_v23 }
 0x1cb   : > { %7791 = vmatpush1.bf16.msra.mxu0 %v12151_v40  ;;  %8075 = vmatpush1.bf16.msra.mxu1 %v12154_v41 }
 0x1cc   : > { %7792 = vmatprep.subr.bf16.mxu0 %v12159_v44  ;;  %8076 = vmatprep.subr.bf16.mxu1 %v12162_v46 }
 0x1ce   : > { %7760 = vmatmul.mubr.bf16.gmra.mrb[20].mxu0 %v13841_v32  ;;  %8044 = vmatmul.mubr.bf16.gmra.mrb[20].mxu1 %v13841_v32 }
 0x1cf   : > { %7793 = vmatpush1.bf16.msra.mxu0 %v12157_v48  ;;  %8077 = vmatpush1.bf16.msra.mxu1 %v12160_v51 }
 0x1d0   : > { %7794 = vmatprep.subr.bf16.mxu0 %v12165_v54  ;;  %8078 = vmatprep.subr.bf16.mxu1 %v12168_v57 }
 0x1d1   : > { %7769 = vmatprep.mubr.bf16.mxu0 %v13859_v42  ;;  %8053 = vmatprep.mubr.bf16.mxu1 %v13859_v42 }
 0x1d3   : > { %7795 = vmatpush1.bf16.msra.mxu0 %v12163_v59  ;;  %8079 = vmatpush1.bf16.msra.mxu1 %v12166_v63  ;;  %v12181_v59 = vld [vmem:[%s17137_s1 + $0x1cc0] ss:$68 sps:$4 sm:$0xff]   ;;  %v12184_v63 = vld [vmem:[%s17137_s1 + $0x1cc8] ss:$68 sps:$4 sm:$0xff]  }
 0x1d4   : > { %7796 = vmatprep.subr.bf16.mxu0 %v12171_v0  ;;  %8080 = vmatprep.subr.bf16.mxu1 %v12174_v1 }
 0x1d6   : > { %7770 = vmatmul.mubr.bf16.gmra.mrb[24].mxu0 %v13882_v55  ;;  %8054 = vmatmul.mubr.bf16.gmra.mrb[24].mxu1 %v13882_v55 }
 0x1d7   : > { %7797 = vmatpush1.bf16.msra.mxu0 %v12169_v2  ;;  %8081 = vmatpush1.bf16.msra.mxu1 %v12172_v8 }
 0x1d8   : > { %7798 = vmatprep.subr.bf16.mxu0 %v12177_v19  ;;  %8082 = vmatprep.subr.bf16.mxu1 %v12180_v21  ;;  %v12192_v19 = vld [vmem:[%s17137_s1 + $0x1d54] ss:$68 sps:$4 sm:$0xff]  }
 0x1d9   : > { %v7254_v37 = vpop.f32.mrb[0].mxu0  ;;  %v7538_v40 = vpop.f32.mrb[0].mxu1  ;;  %7779 = vmatprep.mubr.bf16.mxu0 %v13894_v62  ;;  %8063 = vmatprep.mubr.bf16.mxu1 %v13894_v62 }
 0x1da   : > { %v10967_v41 = vadd.f32 %v7254_v37, %v14770_v22  ;;  %v10981_v44 = vadd.f32 %v7538_v40, %v14774_v25  ;;  %v7256_v46 = vpop.f32.mrb[1].mxu0  ;;  %v7540_v47 = vpop.f32.mrb[1].mxu1  ;;  %v12198_v37 = vld [vmem:[%s17137_s1 + $0x1ddc] ss:$68 sps:$4 sm:$0xff]  }
 0x1db   : > { %v10968_v48 = vadd.f32 %v7256_v46, %v14780_v26  ;;  %v10982_v51 = vadd.f32 %v7540_v47, %v14784_v29  ;;  %v7258_v54 = vpop.f32.mrb[2].mxu0  ;;  %v7542_v57 = vpop.f32.mrb[2].mxu1  ;;  %7799 = vmatpush1.bf16.msra.mxu0 %v12175_v30  ;;  %8083 = vmatpush1.bf16.msra.mxu1 %v12178_v31  ;;  %v12187_v31 = vld [vmem:[%s17137_s1 + $0x1d48] ss:$68 sps:$4 sm:$0xff]  }
 0x1dc   : > { %9535 = vst [vmem:[%s14801_s14] sm:$0xff] %v10967_v41  ;;  %9537 = vst [vmem:[%s14801_s14 + $0x10] sm:$0xff] %v10981_v44  ;;  %v10969_v0 = vadd.f32 %v7258_v54, %v14770_v22  ;;  %v10983_v1 = vadd.f32 %v7542_v57, %v14774_v25  ;;  %v7260_v2 = vpop.f32.mrb[3].mxu0  ;;  %v7544_v8 = vpop.f32.mrb[3].mxu1  ;;  %7800 = vmatprep.subr.bf16.mxu0 %v12183_v35  ;;  %8084 = vmatprep.subr.bf16.mxu1 %v12186_v36  ;;  %v12190_v35 = vld [vmem:[%s17137_s1 + $0x1d50] ss:$68 sps:$4 sm:$0xff]  }
 0x1dd   : > { %9536 = vst [vmem:[%s14801_s14 + $0x8] sm:$0xff] %v10968_v48  ;;  %9538 = vst [vmem:[%s14801_s14 + $0x18] sm:$0xff] %v10982_v51  ;;  %v10970_v21 = vadd.f32 %v7260_v2, %v14780_v26  ;;  %v10984_v30 = vadd.f32 %v7544_v8, %v14784_v29  ;;  %v12195_v36 = vld [vmem:[%s17137_s1 + $0x1dd4] ss:$68 sps:$4 sm:$0xff]  }
 0x1de   : > { %9552 = vst [vmem:[%s14801_s14 + $0x88] sm:$0xff] %v10969_v0  ;;  %9554 = vst [vmem:[%s14801_s14 + $0x98] sm:$0xff] %v10983_v1  ;;  %7780 = vmatmul.mubr.bf16.gmra.mrb[28].mxu0 %v13916_v6  ;;  %8064 = vmatmul.mubr.bf16.gmra.mrb[28].mxu1 %v13916_v6  ;;  %v12196_v0 = vld [vmem:[%s17137_s1 + $0x1dd8] ss:$68 sps:$4 sm:$0xff]  }
 0x1df   : > { %9553 = vst [vmem:[%s14801_s14 + $0x90] sm:$0xff] %v10970_v21  ;;  %9555 = vst [vmem:[%s14801_s14 + $0xa0] sm:$0xff] %v10984_v30  ;;  %7801 = vmatpush1.bf16.msra.mxu0 %v12181_v59  ;;  %8085 = vmatpush1.bf16.msra.mxu1 %v12184_v63  ;;  %v12193_v63 = vld [vmem:[%s17137_s1 + $0x1dd0] ss:$68 sps:$4 sm:$0xff]   ;;  %v12204_v21 = vld [vmem:[%s17137_s1 + $0x1e64] ss:$68 sps:$4 sm:$0xff]  }
 0x1e0   : > { %7802 = vmatprep.subr.bf16.mxu0 %v12189_v10  ;;  %8086 = vmatprep.subr.bf16.mxu1 %v12192_v19  ;;  %v12201_v19 = vld [vmem:[%s17137_s1 + $0x1e5c] ss:$68 sps:$4 sm:$0xff]  }
 0x1e1   : > { %v7264_v40 = vpop.f32.mrb[4].mxu0  ;;  %v7548_v41 = vpop.f32.mrb[4].mxu1  ;;  %7820 = vmatprep.mubr.bf16.mxu0 %v13926_v14  ;;  %8104 = vmatprep.mubr.bf16.mxu1 %v13926_v14 }
 0x1e2   : > { %v10971_v44 = vadd.f32 %v7264_v40, %v14770_v22  ;;  %v10985_v46 = vadd.f32 %v7548_v41, %v14774_v25  ;;  %v7266_v47 = vpop.f32.mrb[5].mxu0  ;;  %v7550_v48 = vpop.f32.mrb[5].mxu1  ;;  %v12210_v40 = vld [vmem:[%s17137_s1 + $0x1eec] ss:$68 sps:$4 sm:$0xff]  }
 0x1e3   : > { %v10972_v51 = vadd.f32 %v7266_v47, %v14780_v26  ;;  %v10986_v54 = vadd.f32 %v7550_v48, %v14784_v29  ;;  %v7268_v57 = vpop.f32.mrb[6].mxu0  ;;  %v7552_v59 = vpop.f32.mrb[6].mxu1  ;;  %7803 = vmatpush1.bf16.msra.mxu0 %v12187_v31  ;;  %8087 = vmatpush1.bf16.msra.mxu1 %v12190_v35  ;;  %v12199_v35 = vld [vmem:[%s17137_s1 + $0x1e58] ss:$68 sps:$4 sm:$0xff]  }
 0x1e4   : > { %9569 = vst [vmem:[%s14801_s14 + $0x110] sm:$0xff] %v10971_v44  ;;  %9571 = vst [vmem:[%s14801_s14 + $0x120] sm:$0xff] %v10985_v46  ;;  %v10973_v1 = vadd.f32 %v7268_v57, %v14770_v22  ;;  %v10987_v2 = vadd.f32 %v7552_v59, %v14774_v25  ;;  %v7270_v8 = vpop.f32.mrb[7].mxu0  ;;  %v7554_v10 = vpop.f32.mrb[7].mxu1  ;;  %7804 = vmatprep.subr.bf16.mxu0 %v12195_v36  ;;  %8088 = vmatprep.subr.bf16.mxu1 %v12198_v37  ;;  %v12202_v36 = vld [vmem:[%s17137_s1 + $0x1e60] ss:$68 sps:$4 sm:$0xff]  }
 0x1e5   : > { %9570 = vst [vmem:[%s14801_s14 + $0x118] sm:$0xff] %v10972_v51  ;;  %9572 = vst [vmem:[%s14801_s14 + $0x128] sm:$0xff] %v10986_v54  ;;  %v10974_v30 = vadd.f32 %v7270_v8, %v14780_v26  ;;  %v10988_v31 = vadd.f32 %v7554_v10, %v14784_v29  ;;  %v12207_v37 = vld [vmem:[%s17137_s1 + $0x1ee4] ss:$68 sps:$4 sm:$0xff]  }
 0x1e6   : > { %9586 = vst [vmem:[%s14801_s14 + $0x198] sm:$0xff] %v10973_v1  ;;  %9588 = vst [vmem:[%s14801_s14 + $0x1a8] sm:$0xff] %v10987_v2  ;;  %v12208_v1 = vld [vmem:[%s17137_s1 + $0x1ee8] ss:$68 sps:$4 sm:$0xff]  }
 0x1e7   : > { %9587 = vst [vmem:[%s14801_s14 + $0x1a0] sm:$0xff] %v10974_v30  ;;  %9589 = vst [vmem:[%s14801_s14 + $0x1b0] sm:$0xff] %v10988_v31  ;;  %7805 = vmatpush1.bf16.msra.mxu0 %v12193_v63  ;;  %8089 = vmatpush1.bf16.msra.mxu1 %v12196_v0  ;;  %v12205_v0 = vld [vmem:[%s17137_s1 + $0x1ee0] ss:$68 sps:$4 sm:$0xff]   ;;  %v12216_v30 = vld [vmem:[%s17137_s1 + $0x1f74] ss:$68 sps:$4 sm:$0xff]  }
 0x1e8   : > { %7806 = vmatprep.subr.bf16.mxu0 %v12201_v19  ;;  %8090 = vmatprep.subr.bf16.mxu1 %v12204_v21  ;;  %v12213_v21 = vld [vmem:[%s17137_s1 + $0x1f6c] ss:$68 sps:$4 sm:$0xff]  }
 0x1e9   : > { %v7274_v41 = vpop.f32.mrb[8].mxu0  ;;  %v7558_v44 = vpop.f32.mrb[8].mxu1 }
 0x1ea   : > { %v10975_v46 = vadd.f32 %v7274_v41, %v14770_v22  ;;  %v10989_v47 = vadd.f32 %v7558_v44, %v14774_v25  ;;  %v7276_v48 = vpop.f32.mrb[9].mxu0  ;;  %v7560_v51 = vpop.f32.mrb[9].mxu1  ;;  %v12222_v41 = vld [vmem:[%s17137_s1 + $0x1ffc] ss:$68 sps:$4 sm:$0xff]  }
 0x1eb   : > { %v10976_v54 = vadd.f32 %v7276_v48, %v14780_v26  ;;  %v10990_v57 = vadd.f32 %v7560_v51, %v14784_v29  ;;  %v7278_v59 = vpop.f32.mrb[10].mxu0  ;;  %v7562_v63 = vpop.f32.mrb[10].mxu1  ;;  %7807 = vmatpush1.bf16.msra.mxu0 %v12199_v35  ;;  %8091 = vmatpush1.bf16.msra.mxu1 %v12202_v36  ;;  %v12211_v36 = vld [vmem:[%s17137_s1 + $0x1f68] ss:$68 sps:$4 sm:$0xff]  }
 0x1ec   : > { %9603 = vst [vmem:[%s14801_s14 + $0x220] sm:$0xff] %v10975_v46  ;;  %9605 = vst [vmem:[%s14801_s14 + $0x230] sm:$0xff] %v10989_v47  ;;  %v10977_v2 = vadd.f32 %v7278_v59, %v14770_v22  ;;  %v10991_v8 = vadd.f32 %v7562_v63, %v14774_v25  ;;  %v7280_v10 = vpop.f32.mrb[11].mxu0  ;;  %v7564_v19 = vpop.f32.mrb[11].mxu1  ;;  %7808 = vmatprep.subr.bf16.mxu0 %v12207_v37  ;;  %8092 = vmatprep.subr.bf16.mxu1 %v12210_v40  ;;  %v12214_v37 = vld [vmem:[%s17137_s1 + $0x1f70] ss:$68 sps:$4 sm:$0xff]  }
 0x1ed   : > { %9604 = vst [vmem:[%s14801_s14 + $0x228] sm:$0xff] %v10976_v54  ;;  %9606 = vst [vmem:[%s14801_s14 + $0x238] sm:$0xff] %v10990_v57  ;;  %v10978_v31 = vadd.f32 %v7280_v10, %v14780_v26  ;;  %v10992_v35 = vadd.f32 %v7564_v19, %v14784_v29  ;;  %v12219_v40 = vld [vmem:[%s17137_s1 + $0x1ff4] ss:$68 sps:$4 sm:$0xff]   ;;  %v12226_v10 = vld [vmem:[%s17137_s1 + $0x2080] ss:$68 sps:$4 sm:$0xff]  }
 0x1ee   : > { %9620 = vst [vmem:[%s14801_s14 + $0x2a8] sm:$0xff] %v10977_v2  ;;  %9622 = vst [vmem:[%s14801_s14 + $0x2b8] sm:$0xff] %v10991_v8  ;;  %v12228_v2 = vld [vmem:[%s17137_s1 + $0x2084] ss:$68 sps:$4 sm:$0xff]   ;;  %v12223_v8 = vld [vmem:[%s17137_s1 + $0x2078] ss:$68 sps:$4 sm:$0xff]  }
 0x1ef   : > { %9621 = vst [vmem:[%s14801_s14 + $0x2b0] sm:$0xff] %v10978_v31  ;;  %9623 = vst [vmem:[%s14801_s14 + $0x2c0] sm:$0xff] %v10992_v35  ;;  %7809 = vmatpush1.bf16.msra.mxu0 %v12205_v0  ;;  %8093 = vmatpush1.bf16.msra.mxu1 %v12208_v1  ;;  %v12217_v1 = vld [vmem:[%s17137_s1 + $0x1ff0] ss:$68 sps:$4 sm:$0xff]   ;;  %v12231_v19 = vld [vmem:[%s17137_s1 + $0x2104] ss:$68 sps:$4 sm:$0xff]  }
 0x1f0   : > { %7810 = vmatprep.subr.bf16.mxu0 %v12213_v21  ;;  %8094 = vmatprep.subr.bf16.mxu1 %v12216_v30  ;;  %v12234_v21 = vld [vmem:[%s17137_s1 + $0x210c] ss:$68 sps:$4 sm:$0xff]   ;;  %v12229_v30 = vld [vmem:[%s17137_s1 + $0x2100] ss:$68 sps:$4 sm:$0xff]  }
 0x1f1   : > { %v7284_v44 = vpop.f32.mrb[12].mxu0  ;;  %v7568_v46 = vpop.f32.mrb[12].mxu1  ;;  %v12232_v31 = vld [vmem:[%s17137_s1 + $0x2108] ss:$68 sps:$4 sm:$0xff]  }
 0x1f2   : > { %v10979_v47 = vadd.f32 %v7284_v44, %v14770_v22  ;;  %v10993_v48 = vadd.f32 %v7568_v46, %v14774_v25  ;;  %v7286_v51 = vpop.f32.mrb[13].mxu0  ;;  %v7570_v54 = vpop.f32.mrb[13].mxu1  ;;  %v12220_v22 = vld [vmem:[%s17137_s1 + $0x1ff8] ss:$68 sps:$4 sm:$0xff]   ;;  %v12237_v35 = vld [vmem:[%s17137_s1 + $0x218c] ss:$68 sps:$4 sm:$0xff]  }
 0x1f3   : > { %v10980_v57 = vadd.f32 %v7286_v51, %v14780_v26  ;;  %v10994_v59 = vadd.f32 %v7570_v54, %v14784_v29  ;;  %v7288_v63 = vpop.f32.mrb[14].mxu0  ;;  %v7572_v0 = vpop.f32.mrb[14].mxu1  ;;  %7811 = vmatpush1.bf16.msra.mxu0 %v12211_v36  ;;  %8095 = vmatpush1.bf16.msra.mxu1 %v12214_v37  ;;  %v12225_v29 = vld [vmem:[%s17137_s1 + $0x207c] ss:$68 sps:$4 sm:$0xff]   ;;  %v12240_v36 = vld [vmem:[%s17137_s1 + $0x2194] ss:$68 sps:$4 sm:$0xff]  }
 0x1f4   : > { %9637 = vst [vmem:[%s14801_s14 + $0x330] sm:$0x1] %v10979_v47  ;;  %9639 = vst [vmem:[%s14801_s14 + $0x340] sm:$0x1] %v10993_v48  ;;  %v7289_v25 = vpop.f32.mrb[15].mxu0  ;;  %v7573_v26 = vpop.f32.mrb[15].mxu1  ;;  %7812 = vmatprep.subr.bf16.mxu0 %v12219_v40  ;;  %8096 = vmatprep.subr.bf16.mxu1 %v12222_v41 }
 0x1f5   : > { %9638 = vst [vmem:[%s14801_s14 + $0x338] sm:$0x1] %v10980_v57  ;;  %9640 = vst [vmem:[%s14801_s14 + $0x348] sm:$0x1] %v10994_v59  ;;  %v12235_v37 = vld [vmem:[%s17137_s1 + $0x2188] ss:$68 sps:$4 sm:$0xff]  }
 0x1f6   : > { %v12238_v40 = vld [vmem:[%s17137_s1 + $0x2190] ss:$68 sps:$4 sm:$0xff]   ;;  %v12243_v41 = vld [vmem:[%s17137_s1 + $0x24] ss:$68 sps:$4 sm:$0xff]   ;;  %v12258_v63 = vld [vmem:[%s17137_s1 + $0x13c] ss:$68 sps:$4 sm:$0xff]  }
 0x1f7   : > { %7813 = vmatpush1.bf16.msra.mxu0 %v12217_v1  ;;  %8097 = vmatpush1.bf16.msra.mxu1 %v12220_v22  ;;  %v12246_v44 = vld [vmem:[%s17137_s1 + $0x2c] ss:$68 sps:$4 sm:$0xff]   ;;  %v12241_v46 = vld [vmem:[%s17137_s1 + $0x20] ss:$68 sps:$4 sm:$0xff]   ;;  %v12252_v51 = vld [vmem:[%s17137_s1 + $0xb4] ss:$68 sps:$4 sm:$0xff]  }
 0x1f8   : > { %7814 = vmatprep.subr.bf16.mxu0 %v12225_v29  ;;  %8098 = vmatprep.subr.bf16.mxu1 %v12228_v2  ;;  %v12244_v47 = vld [vmem:[%s17137_s1 + $0x28] ss:$68 sps:$4 sm:$0xff]   ;;  %v12250_v57 = vld [vmem:[%s17137_s1 + $0xb0] ss:$68 sps:$4 sm:$0xff]   ;;  %v12256_v1 = vld [vmem:[%s17137_s1 + $0x138] ss:$68 sps:$4 sm:$0xff]  }
 0x1f9   : > { %v12249_v48 = vld [vmem:[%s17137_s1 + $0xac] ss:$68 sps:$4 sm:$0xff]   ;;  %v12255_v59 = vld [vmem:[%s17137_s1 + $0x134] ss:$68 sps:$4 sm:$0xff]   ;;  %v12261_v22 = vld [vmem:[%s17137_s1 + $0x1bc] ss:$68 sps:$4 sm:$0xff]  }
 0x1fa   : > { %v12247_v54 = vld [vmem:[%s17137_s1 + $0xa8] ss:$68 sps:$4 sm:$0xff]   ;;  %v12253_v0 = vld [vmem:[%s17137_s1 + $0x130] ss:$68 sps:$4 sm:$0xff]   ;;  %v12259_v26 = vld [vmem:[%s17137_s1 + $0x1b8] ss:$68 sps:$4 sm:$0xff]  }
 0x1fb   : > { %7815 = vmatpush1.bf16.msra.mxu0 %v12223_v8  ;;  %8099 = vmatpush1.bf16.msra.mxu1 %v12226_v10  ;;  %v12264_v25 = vld [vmem:[%s17137_s1 + $0x1c4] ss:$68 sps:$4 sm:$0xff]   ;;  %v12270_v8 = vld [vmem:[%s17137_s1 + $0x24c] ss:$68 sps:$4 sm:$0xff]  }
 0x1fc   : > { %7816 = vmatprep.subr.bf16.mxu0 %v12231_v19  ;;  %8100 = vmatprep.subr.bf16.mxu1 %v12234_v21  ;;  %v12262_v29 = vld [vmem:[%s17137_s1 + $0x1c0] ss:$68 sps:$4 sm:$0xff]   ;;  %v12268_v19 = vld [vmem:[%s17137_s1 + $0x248] ss:$68 sps:$4 sm:$0xff]  }
 0x1fd   : > { %v12267_v2 = vld [vmem:[%s17137_s1 + $0x244] ss:$68 sps:$4 sm:$0xff]   ;;  %v12273_v21 = vld [vmem:[%s17137_s1 + $0x2cc] ss:$68 sps:$4 sm:$0xff]  }
 0x1fe   : > { %v12265_v10 = vld [vmem:[%s17137_s1 + $0x240] ss:$68 sps:$4 sm:$0xff]  }
 0x1ff   : > { %7817 = vmatpush1.bf16.msra.mxu0 %v12229_v30  ;;  %8101 = vmatpush1.bf16.msra.mxu1 %v12232_v31  ;;  %v12276_v30 = vld [vmem:[%s17137_s1 + $0x2d4] ss:$68 sps:$4 sm:$0xff]   ;;  %v12271_v31 = vld [vmem:[%s17137_s1 + $0x2c8] ss:$68 sps:$4 sm:$0xff]  }
 0x200   : > { %7818 = vmatprep.subr.bf16.mxu0 %v12237_v35  ;;  %8102 = vmatprep.subr.bf16.mxu1 %v12240_v36  ;;  %v12274_v35 = vld [vmem:[%s17137_s1 + $0x2d0] ss:$68 sps:$4 sm:$0xff]  }
 0x201   : > { %v12279_v36 = vld [vmem:[%s17137_s1 + $0x354] ss:$68 sps:$4 sm:$0xff]  }
 0x203   : > { %7819 = vmatpush1.bf16.msra.mxu0 %v12235_v37  ;;  %8103 = vmatpush1.bf16.msra.mxu1 %v12238_v40  ;;  %v12282_v37 = vld [vmem:[%s17137_s1 + $0x35c] ss:$68 sps:$4 sm:$0xff]   ;;  %v12277_v40 = vld [vmem:[%s17137_s1 + $0x350] ss:$68 sps:$4 sm:$0xff]  }
 0x204   : > { %8143 = vmatprep.subr.bf16.mxu0 %v12243_v41  ;;  %8427 = vmatprep.subr.bf16.mxu1 %v12246_v44  ;;  %v12280_v41 = vld [vmem:[%s17137_s1 + $0x358] ss:$68 sps:$4 sm:$0xff]  }
 0x205   : > { %v12285_v44 = vld [vmem:[%s17137_s1 + $0x3dc] ss:$68 sps:$4 sm:$0xff]  }
 0x206   : > { %7821 = vmatmul.mubr.bf16.vlgmr.msra.gmra.mrb[16].mxu0 %v14048_v16  ;;  %8105 = vmatmul.mubr.bf16.vlgmr.msra.gmra.mrb[16].mxu1 %v14048_v16 }
 0x207   : > { %8144 = vmatpush1.bf16.msra.mxu0 %v12241_v46  ;;  %8428 = vmatpush1.bf16.msra.mxu1 %v12244_v47  ;;  %v12288_v46 = vld [vmem:[%s17137_s1 + $0x3e4] ss:$68 sps:$4 sm:$0xff]   ;;  %v12283_v47 = vld [vmem:[%s17137_s1 + $0x3d8] ss:$68 sps:$4 sm:$0xff]  }
 0x208   : > { %8145 = vmatprep.subr.bf16.mxu0 %v12249_v48  ;;  %8429 = vmatprep.subr.bf16.mxu1 %v12252_v51  ;;  %v12286_v48 = vld [vmem:[%s17137_s1 + $0x3e0] ss:$68 sps:$4 sm:$0xff]  }
 0x209   : > { %7830 = vmatprep.mubr.bf16.mxu0 %v14064_v28  ;;  %8114 = vmatprep.mubr.bf16.mxu1 %v14064_v28  ;;  %v12291_v51 = vld [vmem:[%s17137_s1 + $0x464] ss:$68 sps:$4 sm:$0xff]  }
 0x20b   : > { %8146 = vmatpush1.bf16.msra.mxu0 %v12247_v54  ;;  %8430 = vmatpush1.bf16.msra.mxu1 %v12250_v57  ;;  %v12294_v54 = vld [vmem:[%s17137_s1 + $0x46c] ss:$68 sps:$4 sm:$0xff]   ;;  %v12289_v57 = vld [vmem:[%s17137_s1 + $0x460] ss:$68 sps:$4 sm:$0xff]  }
 0x20c   : > { %8147 = vmatprep.subr.bf16.mxu0 %v12255_v59  ;;  %8431 = vmatprep.subr.bf16.mxu1 %v12258_v63  ;;  %v12292_v59 = vld [vmem:[%s17137_s1 + $0x468] ss:$68 sps:$4 sm:$0xff]  }
 0x20d   : > { %v12297_v63 = vld [vmem:[%s17137_s1 + $0x4ec] ss:$68 sps:$4 sm:$0xff]  }
 0x20e   : > { %7831 = vmatmul.mubr.bf16.gmra.mrb[20].mxu0 %v14084_v38  ;;  %8115 = vmatmul.mubr.bf16.gmra.mrb[20].mxu1 %v14084_v38 }
 0x20f   : > { %8148 = vmatpush1.bf16.msra.mxu0 %v12253_v0  ;;  %8432 = vmatpush1.bf16.msra.mxu1 %v12256_v1  ;;  %v12300_v0 = vld [vmem:[%s17137_s1 + $0x4f4] ss:$68 sps:$4 sm:$0xff]   ;;  %v12295_v1 = vld [vmem:[%s17137_s1 + $0x4e8] ss:$68 sps:$4 sm:$0xff]  }
 0x210   : > { %8149 = vmatprep.subr.bf16.mxu0 %v12261_v22  ;;  %8433 = vmatprep.subr.bf16.mxu1 %v12264_v25  ;;  %v12298_v22 = vld [vmem:[%s17137_s1 + $0x4f0] ss:$68 sps:$4 sm:$0xff]  }
 0x211   : > { %7840 = vmatprep.mubr.bf16.mxu0 %v14100_v49  ;;  %8124 = vmatprep.mubr.bf16.mxu1 %v14100_v49  ;;  %v12303_v25 = vld [vmem:[%s17137_s1 + $0x574] ss:$68 sps:$4 sm:$0xff]  }
 0x213   : > { %8150 = vmatpush1.bf16.msra.mxu0 %v12259_v26  ;;  %8434 = vmatpush1.bf16.msra.mxu1 %v12262_v29  ;;  %v12306_v26 = vld [vmem:[%s17137_s1 + $0x57c] ss:$68 sps:$4 sm:$0xff]   ;;  %v12301_v29 = vld [vmem:[%s17137_s1 + $0x570] ss:$68 sps:$4 sm:$0xff]  }
 0x214   : > { %8151 = vmatprep.subr.bf16.mxu0 %v12267_v2  ;;  %8435 = vmatprep.subr.bf16.mxu1 %v12270_v8  ;;  %v12304_v2 = vld [vmem:[%s17137_s1 + $0x578] ss:$68 sps:$4 sm:$0xff]  }
 0x215   : > { %v12309_v8 = vld [vmem:[%s17137_s1 + $0x5fc] ss:$68 sps:$4 sm:$0xff]  }
 0x216   : > { %7841 = vmatmul.mubr.bf16.gmra.mrb[24].mxu0 %v14117_v60  ;;  %8125 = vmatmul.mubr.bf16.gmra.mrb[24].mxu1 %v14117_v60 }
 0x217   : > { %8152 = vmatpush1.bf16.msra.mxu0 %v12265_v10  ;;  %8436 = vmatpush1.bf16.msra.mxu1 %v12268_v19  ;;  %v12312_v10 = vld [vmem:[%s17137_s1 + $0x604] ss:$68 sps:$4 sm:$0xff]   ;;  %v12307_v19 = vld [vmem:[%s17137_s1 + $0x5f8] ss:$68 sps:$4 sm:$0xff]  }
 0x218   : > { %8153 = vmatprep.subr.bf16.mxu0 %v12273_v21  ;;  %8437 = vmatprep.subr.bf16.mxu1 %v12276_v30  ;;  %v12310_v21 = vld [vmem:[%s17137_s1 + $0x600] ss:$68 sps:$4 sm:$0xff]  }
 0x219   : > { %7850 = vmatprep.mubr.bf16.mxu0 %v14132_v4  ;;  %8134 = vmatprep.mubr.bf16.mxu1 %v14132_v4  ;;  %v12315_v30 = vld [vmem:[%s17137_s1 + $0x684] ss:$68 sps:$4 sm:$0xff]  }
 0x21b   : > { %8154 = vmatpush1.bf16.msra.mxu0 %v12271_v31  ;;  %8438 = vmatpush1.bf16.msra.mxu1 %v12274_v35  ;;  %v12318_v31 = vld [vmem:[%s17137_s1 + $0x68c] ss:$68 sps:$4 sm:$0xff]   ;;  %v12313_v35 = vld [vmem:[%s17137_s1 + $0x680] ss:$68 sps:$4 sm:$0xff]  }
 0x21c   : > { %8155 = vmatprep.subr.bf16.mxu0 %v12279_v36  ;;  %8439 = vmatprep.subr.bf16.mxu1 %v12282_v37  ;;  %v12316_v36 = vld [vmem:[%s17137_s1 + $0x688] ss:$68 sps:$4 sm:$0xff]  }
 0x21d   : > { %v12321_v37 = vld [vmem:[%s17137_s1 + $0x70c] ss:$68 sps:$4 sm:$0xff]  }
 0x21e   : > { %7851 = vmatmul.mubr.bf16.gmra.mrb[28].mxu0 %v14148_v15  ;;  %8135 = vmatmul.mubr.bf16.gmra.mrb[28].mxu1 %v14148_v15 }
 0x21f   : > { %8156 = vmatpush1.bf16.msra.mxu0 %v12277_v40  ;;  %8440 = vmatpush1.bf16.msra.mxu1 %v12280_v41  ;;  %v12324_v40 = vld [vmem:[%s17137_s1 + $0x714] ss:$68 sps:$4 sm:$0xff]   ;;  %v12319_v41 = vld [vmem:[%s17137_s1 + $0x708] ss:$68 sps:$4 sm:$0xff]  }
 0x220   : > { %8157 = vmatprep.subr.bf16.mxu0 %v12285_v44  ;;  %8441 = vmatprep.subr.bf16.mxu1 %v12288_v46  ;;  %v12322_v44 = vld [vmem:[%s17137_s1 + $0x710] ss:$68 sps:$4 sm:$0xff]  }
 0x221   : > { %8175 = vmatprep.mubr.bf16.mxu0 %v13268_v50  ;;  %8459 = vmatprep.mubr.bf16.mxu1 %v13268_v50  ;;  %v12327_v46 = vld [vmem:[%s17137_s1 + $0x794] ss:$68 sps:$4 sm:$0xff]  }
 0x223   : > { %8158 = vmatpush1.bf16.msra.mxu0 %v12283_v47  ;;  %8442 = vmatpush1.bf16.msra.mxu1 %v12286_v48  ;;  %v12330_v47 = vld [vmem:[%s17137_s1 + $0x79c] ss:$68 sps:$4 sm:$0xff]   ;;  %v12325_v48 = vld [vmem:[%s17137_s1 + $0x790] ss:$68 sps:$4 sm:$0xff]  }
 0x224   : > { %8159 = vmatprep.subr.bf16.mxu0 %v12291_v51  ;;  %8443 = vmatprep.subr.bf16.mxu1 %v12294_v54  ;;  %v12328_v51 = vld [vmem:[%s17137_s1 + $0x798] ss:$68 sps:$4 sm:$0xff]  }
 0x225   : > { %v12333_v54 = vld [vmem:[%s17137_s1 + $0x81c] ss:$68 sps:$4 sm:$0xff]  }
 0x227   : > { %8160 = vmatpush1.bf16.msra.mxu0 %v12289_v57  ;;  %8444 = vmatpush1.bf16.msra.mxu1 %v12292_v59  ;;  %v12336_v57 = vld [vmem:[%s17137_s1 + $0x824] ss:$68 sps:$4 sm:$0xff]   ;;  %v12331_v59 = vld [vmem:[%s17137_s1 + $0x818] ss:$68 sps:$4 sm:$0xff]  }
 0x228   : > { %8161 = vmatprep.subr.bf16.mxu0 %v12297_v63  ;;  %8445 = vmatprep.subr.bf16.mxu1 %v12300_v0  ;;  %v12334_v63 = vld [vmem:[%s17137_s1 + $0x820] ss:$68 sps:$4 sm:$0xff]  }
 0x229   : > { %v12339_v0 = vld [vmem:[%s17137_s1 + $0x8a4] ss:$68 sps:$4 sm:$0xff]  }
 0x22b   : > { %8162 = vmatpush1.bf16.msra.mxu0 %v12295_v1  ;;  %8446 = vmatpush1.bf16.msra.mxu1 %v12298_v22  ;;  %v12342_v1 = vld [vmem:[%s17137_s1 + $0x8ac] ss:$68 sps:$4 sm:$0xff]   ;;  %v12337_v22 = vld [vmem:[%s17137_s1 + $0x8a0] ss:$68 sps:$4 sm:$0xff]  }
 0x22c   : > { %8163 = vmatprep.subr.bf16.mxu0 %v12303_v25  ;;  %8447 = vmatprep.subr.bf16.mxu1 %v12306_v26  ;;  %v12340_v25 = vld [vmem:[%s17137_s1 + $0x8a8] ss:$68 sps:$4 sm:$0xff]  }
 0x22d   : > { %v12345_v26 = vld [vmem:[%s17137_s1 + $0x92c] ss:$68 sps:$4 sm:$0xff]  }
 0x22f   : > { %8164 = vmatpush1.bf16.msra.mxu0 %v12301_v29  ;;  %8448 = vmatpush1.bf16.msra.mxu1 %v12304_v2  ;;  %v12348_v29 = vld [vmem:[%s17137_s1 + $0x934] ss:$68 sps:$4 sm:$0xff]   ;;  %v12343_v2 = vld [vmem:[%s17137_s1 + $0x928] ss:$68 sps:$4 sm:$0xff]  }
 0x230   : > { %8165 = vmatprep.subr.bf16.mxu0 %v12309_v8  ;;  %8449 = vmatprep.subr.bf16.mxu1 %v12312_v10  ;;  %v12346_v8 = vld [vmem:[%s17137_s1 + $0x930] ss:$68 sps:$4 sm:$0xff]  }
 0x231   : > { %v12351_v10 = vld [vmem:[%s17137_s1 + $0x9b4] ss:$68 sps:$4 sm:$0xff]  }
 0x233   : > { %8166 = vmatpush1.bf16.msra.mxu0 %v12307_v19  ;;  %8450 = vmatpush1.bf16.msra.mxu1 %v12310_v21  ;;  %v12354_v19 = vld [vmem:[%s17137_s1 + $0x9bc] ss:$68 sps:$4 sm:$0xff]   ;;  %v12349_v21 = vld [vmem:[%s17137_s1 + $0x9b0] ss:$68 sps:$4 sm:$0xff]  }
 0x234   : > { %8167 = vmatprep.subr.bf16.mxu0 %v12315_v30  ;;  %8451 = vmatprep.subr.bf16.mxu1 %v12318_v31  ;;  %v12352_v30 = vld [vmem:[%s17137_s1 + $0x9b8] ss:$68 sps:$4 sm:$0xff]  }
 0x235   : > { %v12357_v31 = vld [vmem:[%s17137_s1 + $0xa3c] ss:$68 sps:$4 sm:$0xff]  }
 0x237   : > { %8168 = vmatpush1.bf16.msra.mxu0 %v12313_v35  ;;  %8452 = vmatpush1.bf16.msra.mxu1 %v12316_v36  ;;  %v12360_v35 = vld [vmem:[%s17137_s1 + $0xa44] ss:$68 sps:$4 sm:$0xff]   ;;  %v12355_v36 = vld [vmem:[%s17137_s1 + $0xa38] ss:$68 sps:$4 sm:$0xff]  }
 0x238   : > { %8169 = vmatprep.subr.bf16.mxu0 %v12321_v37  ;;  %8453 = vmatprep.subr.bf16.mxu1 %v12324_v40  ;;  %v12358_v37 = vld [vmem:[%s17137_s1 + $0xa40] ss:$68 sps:$4 sm:$0xff]  }
 0x239   : > { %v12363_v40 = vld [vmem:[%s17137_s1 + $0xac4] ss:$68 sps:$4 sm:$0xff]  }
 0x23b   : > { %8170 = vmatpush1.bf16.msra.mxu0 %v12319_v41  ;;  %8454 = vmatpush1.bf16.msra.mxu1 %v12322_v44  ;;  %v12366_v41 = vld [vmem:[%s17137_s1 + $0xacc] ss:$68 sps:$4 sm:$0xff]   ;;  %v12361_v44 = vld [vmem:[%s17137_s1 + $0xac0] ss:$68 sps:$4 sm:$0xff]  }
 0x23c   : > { %8171 = vmatprep.subr.bf16.mxu0 %v12327_v46  ;;  %8455 = vmatprep.subr.bf16.mxu1 %v12330_v47  ;;  %v12364_v46 = vld [vmem:[%s17137_s1 + $0xac8] ss:$68 sps:$4 sm:$0xff]  }
 0x23d   : > { %v12369_v47 = vld [vmem:[%s17137_s1 + $0xb4c] ss:$68 sps:$4 sm:$0xff]  }
 0x23f   : > { %8172 = vmatpush1.bf16.msra.mxu0 %v12325_v48  ;;  %8456 = vmatpush1.bf16.msra.mxu1 %v12328_v51  ;;  %v12372_v48 = vld [vmem:[%s17137_s1 + $0xb54] ss:$68 sps:$4 sm:$0xff]   ;;  %v12367_v51 = vld [vmem:[%s17137_s1 + $0xb48] ss:$68 sps:$4 sm:$0xff]  }
 0x240   : > { %8173 = vmatprep.subr.bf16.mxu0 %v12333_v54  ;;  %8457 = vmatprep.subr.bf16.mxu1 %v12336_v57  ;;  %v12370_v54 = vld [vmem:[%s17137_s1 + $0xb50] ss:$68 sps:$4 sm:$0xff]  }
 0x241   : > { %v12375_v57 = vld [vmem:[%s17137_s1 + $0xbd4] ss:$68 sps:$4 sm:$0xff]  }
 0x243   : > { %8174 = vmatpush1.bf16.msra.mxu0 %v12331_v59  ;;  %8458 = vmatpush1.bf16.msra.mxu1 %v12334_v63  ;;  %v12378_v59 = vld [vmem:[%s17137_s1 + $0xbdc] ss:$68 sps:$4 sm:$0xff]   ;;  %v12373_v63 = vld [vmem:[%s17137_s1 + $0xbd0] ss:$68 sps:$4 sm:$0xff]  }
 0x244   : > { %8214 = vmatprep.subr.bf16.mxu0 %v12339_v0  ;;  %8498 = vmatprep.subr.bf16.mxu1 %v12342_v1  ;;  %v12376_v0 = vld [vmem:[%s17137_s1 + $0xbd8] ss:$68 sps:$4 sm:$0xff]  }
 0x245   : > { %v12381_v1 = vld [vmem:[%s17137_s1 + $0xc5c] ss:$68 sps:$4 sm:$0xff]  }
 0x246   : > { %8176 = vmatmul.mubr.bf16.vlgmr.msra.gmra.mrb[32].mxu0 %v13334_v9  ;;  %8460 = vmatmul.mubr.bf16.vlgmr.msra.gmra.mrb[32].mxu1 %v13334_v9 }
 0x247   : > { %8215 = vmatpush1.bf16.msra.mxu0 %v12337_v22  ;;  %8499 = vmatpush1.bf16.msra.mxu1 %v12340_v25  ;;  %v12384_v22 = vld [vmem:[%s17137_s1 + $0xc64] ss:$68 sps:$4 sm:$0xff]   ;;  %v12379_v25 = vld [vmem:[%s17137_s1 + $0xc58] ss:$68 sps:$4 sm:$0xff]  }
 0x248   : > { %8216 = vmatprep.subr.bf16.mxu0 %v12345_v26  ;;  %8500 = vmatprep.subr.bf16.mxu1 %v12348_v29  ;;  %v12382_v26 = vld [vmem:[%s17137_s1 + $0xc60] ss:$68 sps:$4 sm:$0xff]  }
 0x249   : > { %8185 = vmatprep.mubr.bf16.mxu0 %v13364_v20  ;;  %8469 = vmatprep.mubr.bf16.mxu1 %v13364_v20  ;;  %v12387_v29 = vld [vmem:[%s17137_s1 + $0xce4] ss:$68 sps:$4 sm:$0xff]  }
 0x24b   : > { %8217 = vmatpush1.bf16.msra.mxu0 %v12343_v2  ;;  %8501 = vmatpush1.bf16.msra.mxu1 %v12346_v8  ;;  %v12390_v2 = vld [vmem:[%s17137_s1 + $0xcec] ss:$68 sps:$4 sm:$0xff]   ;;  %v12385_v8 = vld [vmem:[%s17137_s1 + $0xce0] ss:$68 sps:$4 sm:$0xff]  }
 0x24c   : > { %8218 = vmatprep.subr.bf16.mxu0 %v12351_v10  ;;  %8502 = vmatprep.subr.bf16.mxu1 %v12354_v19  ;;  %v12388_v10 = vld [vmem:[%s17137_s1 + $0xce8] ss:$68 sps:$4 sm:$0xff]  }
 0x24d   : > { %v12393_v19 = vld [vmem:[%s17137_s1 + $0xd6c] ss:$68 sps:$4 sm:$0xff]  }
 0x24e   : > { %8186 = vmatmul.mubr.bf16.gmra.mrb[36].mxu0 %v13382_v27  ;;  %8470 = vmatmul.mubr.bf16.gmra.mrb[36].mxu1 %v13382_v27 }
 0x24f   : > { %8219 = vmatpush1.bf16.msra.mxu0 %v12349_v21  ;;  %8503 = vmatpush1.bf16.msra.mxu1 %v12352_v30  ;;  %v12396_v21 = vld [vmem:[%s17137_s1 + $0xd74] ss:$68 sps:$4 sm:$0xff]   ;;  %v12391_v30 = vld [vmem:[%s17137_s1 + $0xd68] ss:$68 sps:$4 sm:$0xff]  }
 0x250   : > { %8220 = vmatprep.subr.bf16.mxu0 %v12357_v31  ;;  %8504 = vmatprep.subr.bf16.mxu1 %v12360_v35  ;;  %v12394_v31 = vld [vmem:[%s17137_s1 + $0xd70] ss:$68 sps:$4 sm:$0xff]  }
 0x251   : > { %8195 = vmatprep.mubr.bf16.mxu0 %v13397_v33  ;;  %8479 = vmatprep.mubr.bf16.mxu1 %v13397_v33  ;;  %v12399_v35 = vld [vmem:[%s17137_s1 + $0xdf4] ss:$68 sps:$4 sm:$0xff]  }
 0x253   : > { %8221 = vmatpush1.bf16.msra.mxu0 %v12355_v36  ;;  %8505 = vmatpush1.bf16.msra.mxu1 %v12358_v37  ;;  %v12402_v36 = vld [vmem:[%s17137_s1 + $0xdfc] ss:$68 sps:$4 sm:$0xff]   ;;  %v12397_v37 = vld [vmem:[%s17137_s1 + $0xdf0] ss:$68 sps:$4 sm:$0xff]  }
 0x254   : > { %8222 = vmatprep.subr.bf16.mxu0 %v12363_v40  ;;  %8506 = vmatprep.subr.bf16.mxu1 %v12366_v41  ;;  %v12400_v40 = vld [vmem:[%s17137_s1 + $0xdf8] ss:$68 sps:$4 sm:$0xff]  }
 0x255   : > { %v12405_v41 = vld [vmem:[%s17137_s1 + $0xe7c] ss:$68 sps:$4 sm:$0xff]  }
 0x256   : > { %8196 = vmatmul.mubr.bf16.gmra.mrb[40].mxu0 %v13412_v39  ;;  %8480 = vmatmul.mubr.bf16.gmra.mrb[40].mxu1 %v13412_v39 }
 0x257   : > { %8223 = vmatpush1.bf16.msra.mxu0 %v12361_v44  ;;  %8507 = vmatpush1.bf16.msra.mxu1 %v12364_v46  ;;  %v12408_v44 = vld [vmem:[%s17137_s1 + $0xe84] ss:$68 sps:$4 sm:$0xff]   ;;  %v12403_v46 = vld [vmem:[%s17137_s1 + $0xe78] ss:$68 sps:$4 sm:$0xff]  }
 0x258   : > { %8224 = vmatprep.subr.bf16.mxu0 %v12369_v47  ;;  %8508 = vmatprep.subr.bf16.mxu1 %v12372_v48  ;;  %v12406_v47 = vld [vmem:[%s17137_s1 + $0xe80] ss:$68 sps:$4 sm:$0xff]  }
 0x259   : > { %8205 = vmatprep.mubr.bf16.mxu0 %v13427_v45  ;;  %8489 = vmatprep.mubr.bf16.mxu1 %v13427_v45  ;;  %v12411_v48 = vld [vmem:[%s17137_s1 + $0xf04] ss:$68 sps:$4 sm:$0xff]  }
 0x25b   : > { %8225 = vmatpush1.bf16.msra.mxu0 %v12367_v51  ;;  %8509 = vmatpush1.bf16.msra.mxu1 %v12370_v54  ;;  %v12414_v51 = vld [vmem:[%s17137_s1 + $0xf0c] ss:$68 sps:$4 sm:$0xff]   ;;  %v12409_v54 = vld [vmem:[%s17137_s1 + $0xf00] ss:$68 sps:$4 sm:$0xff]  }
 0x25c   : > { %8226 = vmatprep.subr.bf16.mxu0 %v12375_v57  ;;  %8510 = vmatprep.subr.bf16.mxu1 %v12378_v59  ;;  %v12412_v57 = vld [vmem:[%s17137_s1 + $0xf08] ss:$68 sps:$4 sm:$0xff]  }
 0x25d   : > { %v12417_v59 = vld [vmem:[%s17137_s1 + $0xf8c] ss:$68 sps:$4 sm:$0xff]  }
 0x25e   : > { %8206 = vmatmul.mubr.bf16.gmra.mrb[44].mxu0 %v13446_v52  ;;  %8490 = vmatmul.mubr.bf16.gmra.mrb[44].mxu1 %v13446_v52 }
 0x25f   : > { %8227 = vmatpush1.bf16.msra.mxu0 %v12373_v63  ;;  %8511 = vmatpush1.bf16.msra.mxu1 %v12376_v0  ;;  %v12420_v63 = vld [vmem:[%s17137_s1 + $0xf94] ss:$68 sps:$4 sm:$0xff]   ;;  %v12415_v0 = vld [vmem:[%s17137_s1 + $0xf88] ss:$68 sps:$4 sm:$0xff]  }
 0x260   : > { %8228 = vmatprep.subr.bf16.mxu0 %v12381_v1  ;;  %8512 = vmatprep.subr.bf16.mxu1 %v12384_v22  ;;  %v12418_v1 = vld [vmem:[%s17137_s1 + $0xf90] ss:$68 sps:$4 sm:$0xff]  }
 0x261   : > { %8246 = vmatprep.mubr.bf16.mxu0 %v13453_v56  ;;  %8530 = vmatprep.mubr.bf16.mxu1 %v13453_v56  ;;  %v12423_v22 = vld [vmem:[%s17137_s1 + $0x1014] ss:$68 sps:$4 sm:$0xff]  }
 0x263   : > { %8229 = vmatpush1.bf16.msra.mxu0 %v12379_v25  ;;  %8513 = vmatpush1.bf16.msra.mxu1 %v12382_v26  ;;  %v12426_v25 = vld [vmem:[%s17137_s1 + $0x101c] ss:$68 sps:$4 sm:$0xff]   ;;  %v12421_v26 = vld [vmem:[%s17137_s1 + $0x1010] ss:$68 sps:$4 sm:$0xff]  }
 0x264   : > { %8230 = vmatprep.subr.bf16.mxu0 %v12387_v29  ;;  %8514 = vmatprep.subr.bf16.mxu1 %v12390_v2  ;;  %v12424_v29 = vld [vmem:[%s17137_s1 + $0x1018] ss:$68 sps:$4 sm:$0xff]  }
 0x265   : > { %v12429_v2 = vld [vmem:[%s17137_s1 + $0x109c] ss:$68 sps:$4 sm:$0xff]  }
 0x267   : > { %8231 = vmatpush1.bf16.msra.mxu0 %v12385_v8  ;;  %8515 = vmatpush1.bf16.msra.mxu1 %v12388_v10  ;;  %v12432_v8 = vld [vmem:[%s17137_s1 + $0x10a4] ss:$68 sps:$4 sm:$0xff]   ;;  %v12427_v10 = vld [vmem:[%s17137_s1 + $0x1098] ss:$68 sps:$4 sm:$0xff]  }
 0x268   : > { %8232 = vmatprep.subr.bf16.mxu0 %v12393_v19  ;;  %8516 = vmatprep.subr.bf16.mxu1 %v12396_v21  ;;  %v12430_v19 = vld [vmem:[%s17137_s1 + $0x10a0] ss:$68 sps:$4 sm:$0xff]  }
 0x269   : > { %v12435_v21 = vld [vmem:[%s17137_s1 + $0x1124] ss:$68 sps:$4 sm:$0xff]  }
 0x26b   : > { %8233 = vmatpush1.bf16.msra.mxu0 %v12391_v30  ;;  %8517 = vmatpush1.bf16.msra.mxu1 %v12394_v31  ;;  %v12438_v30 = vld [vmem:[%s17137_s1 + $0x112c] ss:$68 sps:$4 sm:$0xff]   ;;  %v12433_v31 = vld [vmem:[%s17137_s1 + $0x1120] ss:$68 sps:$4 sm:$0xff]  }
 0x26c   : > { %8234 = vmatprep.subr.bf16.mxu0 %v12399_v35  ;;  %8518 = vmatprep.subr.bf16.mxu1 %v12402_v36  ;;  %v12436_v35 = vld [vmem:[%s17137_s1 + $0x1128] ss:$68 sps:$4 sm:$0xff]  }
 0x26d   : > { %v12441_v36 = vld [vmem:[%s17137_s1 + $0x11ac] ss:$68 sps:$4 sm:$0xff]  }
 0x26f   : > { %8235 = vmatpush1.bf16.msra.mxu0 %v12397_v37  ;;  %8519 = vmatpush1.bf16.msra.mxu1 %v12400_v40  ;;  %v12444_v37 = vld [vmem:[%s17137_s1 + $0x11b4] ss:$68 sps:$4 sm:$0xff]   ;;  %v12439_v40 = vld [vmem:[%s17137_s1 + $0x11a8] ss:$68 sps:$4 sm:$0xff]  }
 0x270   : > { %8236 = vmatprep.subr.bf16.mxu0 %v12405_v41  ;;  %8520 = vmatprep.subr.bf16.mxu1 %v12408_v44  ;;  %v12442_v41 = vld [vmem:[%s17137_s1 + $0x11b0] ss:$68 sps:$4 sm:$0xff]  }
 0x271   : > { %v12447_v44 = vld [vmem:[%s17137_s1 + $0x1234] ss:$68 sps:$4 sm:$0xff]  }
 0x273   : > { %8237 = vmatpush1.bf16.msra.mxu0 %v12403_v46  ;;  %8521 = vmatpush1.bf16.msra.mxu1 %v12406_v47  ;;  %v12450_v46 = vld [vmem:[%s17137_s1 + $0x123c] ss:$68 sps:$4 sm:$0xff]   ;;  %v12445_v47 = vld [vmem:[%s17137_s1 + $0x1230] ss:$68 sps:$4 sm:$0xff]  }
 0x274   : > { %8238 = vmatprep.subr.bf16.mxu0 %v12411_v48  ;;  %8522 = vmatprep.subr.bf16.mxu1 %v12414_v51  ;;  %v12448_v48 = vld [vmem:[%s17137_s1 + $0x1238] ss:$68 sps:$4 sm:$0xff]  }
 0x275   : > { %v12453_v51 = vld [vmem:[%s17137_s1 + $0x12bc] ss:$68 sps:$4 sm:$0xff]  }
 0x277   : > { %8239 = vmatpush1.bf16.msra.mxu0 %v12409_v54  ;;  %8523 = vmatpush1.bf16.msra.mxu1 %v12412_v57  ;;  %v12456_v54 = vld [vmem:[%s17137_s1 + $0x12c4] ss:$68 sps:$4 sm:$0xff]   ;;  %v12451_v57 = vld [vmem:[%s17137_s1 + $0x12b8] ss:$68 sps:$4 sm:$0xff]  }
 0x278   : > { %8240 = vmatprep.subr.bf16.mxu0 %v12417_v59  ;;  %8524 = vmatprep.subr.bf16.mxu1 %v12420_v63  ;;  %v12454_v59 = vld [vmem:[%s17137_s1 + $0x12c0] ss:$68 sps:$4 sm:$0xff]  }
 0x279   : > { %v12459_v63 = vld [vmem:[%s17137_s1 + $0x1344] ss:$68 sps:$4 sm:$0xff]  }
 0x27b   : > { %8241 = vmatpush1.bf16.msra.mxu0 %v12415_v0  ;;  %8525 = vmatpush1.bf16.msra.mxu1 %v12418_v1  ;;  %v12462_v0 = vld [vmem:[%s17137_s1 + $0x134c] ss:$68 sps:$4 sm:$0xff]   ;;  %v12457_v1 = vld [vmem:[%s17137_s1 + $0x1340] ss:$68 sps:$4 sm:$0xff]  }
 0x27c   : > { %8242 = vmatprep.subr.bf16.mxu0 %v12423_v22  ;;  %8526 = vmatprep.subr.bf16.mxu1 %v12426_v25  ;;  %v12460_v22 = vld [vmem:[%s17137_s1 + $0x1348] ss:$68 sps:$4 sm:$0xff]  }
 0x27d   : > { %v12465_v25 = vld [vmem:[%s17137_s1 + $0x13cc] ss:$68 sps:$4 sm:$0xff]  }
 0x27f   : > { %8243 = vmatpush1.bf16.msra.mxu0 %v12421_v26  ;;  %8527 = vmatpush1.bf16.msra.mxu1 %v12424_v29  ;;  %v12468_v26 = vld [vmem:[%s17137_s1 + $0x13d4] ss:$68 sps:$4 sm:$0xff]   ;;  %v12463_v29 = vld [vmem:[%s17137_s1 + $0x13c8] ss:$68 sps:$4 sm:$0xff]  }
 0x280   : > { %8244 = vmatprep.subr.bf16.mxu0 %v12429_v2  ;;  %8528 = vmatprep.subr.bf16.mxu1 %v12432_v8  ;;  %v12466_v2 = vld [vmem:[%s17137_s1 + $0x13d0] ss:$68 sps:$4 sm:$0xff]  }
 0x281   : > { %v12471_v8 = vld [vmem:[%s17137_s1 + $0x1454] ss:$68 sps:$4 sm:$0xff]  }
 0x283   : > { %8245 = vmatpush1.bf16.msra.mxu0 %v12427_v10  ;;  %8529 = vmatpush1.bf16.msra.mxu1 %v12430_v19  ;;  %v12474_v10 = vld [vmem:[%s17137_s1 + $0x145c] ss:$68 sps:$4 sm:$0xff]   ;;  %v12469_v19 = vld [vmem:[%s17137_s1 + $0x1450] ss:$68 sps:$4 sm:$0xff]  }
 0x284   : > { %8285 = vmatprep.subr.bf16.mxu0 %v12435_v21  ;;  %8569 = vmatprep.subr.bf16.mxu1 %v12438_v30  ;;  %v12472_v21 = vld [vmem:[%s17137_s1 + $0x1458] ss:$68 sps:$4 sm:$0xff]  }
 0x285   : > { %v12477_v30 = vld [vmem:[%s17137_s1 + $0x14dc] ss:$68 sps:$4 sm:$0xff]  }
 0x286   : > { %8247 = vmatmul.mubr.bf16.vlgmr.msra.gmra.mrb[32].mxu0 %v13566_v34  ;;  %8531 = vmatmul.mubr.bf16.vlgmr.msra.gmra.mrb[32].mxu1 %v13566_v34 }
 0x287   : > { %8286 = vmatpush1.bf16.msra.mxu0 %v12433_v31  ;;  %8570 = vmatpush1.bf16.msra.mxu1 %v12436_v35  ;;  %v12480_v31 = vld [vmem:[%s17137_s1 + $0x14e4] ss:$68 sps:$4 sm:$0xff]   ;;  %v12475_v35 = vld [vmem:[%s17137_s1 + $0x14d8] ss:$68 sps:$4 sm:$0xff]  }
 0x288   : > { %8287 = vmatprep.subr.bf16.mxu0 %v12441_v36  ;;  %8571 = vmatprep.subr.bf16.mxu1 %v12444_v37  ;;  %v12478_v36 = vld [vmem:[%s17137_s1 + $0x14e0] ss:$68 sps:$4 sm:$0xff]  }
 0x289   : > { %8256 = vmatprep.mubr.bf16.mxu0 %v13585_v43  ;;  %8540 = vmatprep.mubr.bf16.mxu1 %v13585_v43  ;;  %v12483_v37 = vld [vmem:[%s17137_s1 + $0x1564] ss:$68 sps:$4 sm:$0xff]  }
 0x28b   : > { %8288 = vmatpush1.bf16.msra.mxu0 %v12439_v40  ;;  %8572 = vmatpush1.bf16.msra.mxu1 %v12442_v41  ;;  %v12486_v40 = vld [vmem:[%s17137_s1 + $0x156c] ss:$68 sps:$4 sm:$0xff]   ;;  %v12481_v41 = vld [vmem:[%s17137_s1 + $0x1560] ss:$68 sps:$4 sm:$0xff]  }
 0x28c   : > { %8289 = vmatprep.subr.bf16.mxu0 %v12447_v44  ;;  %8573 = vmatprep.subr.bf16.mxu1 %v12450_v46  ;;  %v12484_v44 = vld [vmem:[%s17137_s1 + $0x1568] ss:$68 sps:$4 sm:$0xff]  }
 0x28d   : > { %v12489_v46 = vld [vmem:[%s17137_s1 + $0x15ec] ss:$68 sps:$4 sm:$0xff]  }
 0x28e   : > { %8257 = vmatmul.mubr.bf16.gmra.mrb[36].mxu0 %v13605_v53  ;;  %8541 = vmatmul.mubr.bf16.gmra.mrb[36].mxu1 %v13605_v53 }
 0x28f   : > { %8290 = vmatpush1.bf16.msra.mxu0 %v12445_v47  ;;  %8574 = vmatpush1.bf16.msra.mxu1 %v12448_v48  ;;  %v12492_v47 = vld [vmem:[%s17137_s1 + $0x15f4] ss:$68 sps:$4 sm:$0xff]   ;;  %v12487_v48 = vld [vmem:[%s17137_s1 + $0x15e8] ss:$68 sps:$4 sm:$0xff]  }
 0x290   : > { %8291 = vmatprep.subr.bf16.mxu0 %v12453_v51  ;;  %8575 = vmatprep.subr.bf16.mxu1 %v12456_v54  ;;  %v12490_v51 = vld [vmem:[%s17137_s1 + $0x15f0] ss:$68 sps:$4 sm:$0xff]  }
 0x291   : > { %8266 = vmatprep.mubr.bf16.mxu0 %v13621_v61  ;;  %8550 = vmatprep.mubr.bf16.mxu1 %v13621_v61  ;;  %v12495_v54 = vld [vmem:[%s17137_s1 + $0x1674] ss:$68 sps:$4 sm:$0xff]  }
 0x293   : > { %8292 = vmatpush1.bf16.msra.mxu0 %v12451_v57  ;;  %8576 = vmatpush1.bf16.msra.mxu1 %v12454_v59  ;;  %v12498_v57 = vld [vmem:[%s17137_s1 + $0x167c] ss:$68 sps:$4 sm:$0xff]   ;;  %v12493_v59 = vld [vmem:[%s17137_s1 + $0x1670] ss:$68 sps:$4 sm:$0xff]  }
 0x294   : > { %8293 = vmatprep.subr.bf16.mxu0 %v12459_v63  ;;  %8577 = vmatprep.subr.bf16.mxu1 %v12462_v0  ;;  %v12496_v63 = vld [vmem:[%s17137_s1 + $0x1678] ss:$68 sps:$4 sm:$0xff]  }
 0x295   : > { %v12501_v0 = vld [vmem:[%s17137_s1 + $0x16fc] ss:$68 sps:$4 sm:$0xff]  }
 0x296   : > { %8267 = vmatmul.mubr.bf16.gmra.mrb[40].mxu0 %v13644_v5  ;;  %8551 = vmatmul.mubr.bf16.gmra.mrb[40].mxu1 %v13644_v5 }
 0x297   : > { %8294 = vmatpush1.bf16.msra.mxu0 %v12457_v1  ;;  %8578 = vmatpush1.bf16.msra.mxu1 %v12460_v22  ;;  %v12504_v1 = vld [vmem:[%s17137_s1 + $0x1704] ss:$68 sps:$4 sm:$0xff]   ;;  %v12499_v22 = vld [vmem:[%s17137_s1 + $0x16f8] ss:$68 sps:$4 sm:$0xff]  }
 0x298   : > { %8295 = vmatprep.subr.bf16.mxu0 %v12465_v25  ;;  %8579 = vmatprep.subr.bf16.mxu1 %v12468_v26  ;;  %v12502_v25 = vld [vmem:[%s17137_s1 + $0x1700] ss:$68 sps:$4 sm:$0xff]  }
 0x299   : > { %8276 = vmatprep.mubr.bf16.mxu0 %v13656_v11  ;;  %8560 = vmatprep.mubr.bf16.mxu1 %v13656_v11  ;;  %v12507_v26 = vld [vmem:[%s17137_s1 + $0x1784] ss:$68 sps:$4 sm:$0xff]  }
 0x29b   : > { %8296 = vmatpush1.bf16.msra.mxu0 %v12463_v29  ;;  %8580 = vmatpush1.bf16.msra.mxu1 %v12466_v2  ;;  %v12510_v29 = vld [vmem:[%s17137_s1 + $0x178c] ss:$68 sps:$4 sm:$0xff]   ;;  %v12505_v2 = vld [vmem:[%s17137_s1 + $0x1780] ss:$68 sps:$4 sm:$0xff]  }
 0x29c   : > { %8297 = vmatprep.subr.bf16.mxu0 %v12471_v8  ;;  %8581 = vmatprep.subr.bf16.mxu1 %v12474_v10  ;;  %v12508_v8 = vld [vmem:[%s17137_s1 + $0x1788] ss:$68 sps:$4 sm:$0xff]  }
 0x29d   : > { %v12513_v10 = vld [vmem:[%s17137_s1 + $0x180c] ss:$68 sps:$4 sm:$0xff]  }
 0x29e   : > { %8277 = vmatmul.mubr.bf16.gmra.mrb[44].mxu0 %v13678_v18  ;;  %8561 = vmatmul.mubr.bf16.gmra.mrb[44].mxu1 %v13678_v18 }
 0x29f   : > { %8298 = vmatpush1.bf16.msra.mxu0 %v12469_v19  ;;  %8582 = vmatpush1.bf16.msra.mxu1 %v12472_v21  ;;  %v12516_v19 = vld [vmem:[%s17137_s1 + $0x1814] ss:$68 sps:$4 sm:$0xff]   ;;  %v12511_v21 = vld [vmem:[%s17137_s1 + $0x1808] ss:$68 sps:$4 sm:$0xff]  }
 0x2a0   : > { %8299 = vmatprep.subr.bf16.mxu0 %v12477_v30  ;;  %8583 = vmatprep.subr.bf16.mxu1 %v12480_v31  ;;  %v12514_v30 = vld [vmem:[%s17137_s1 + $0x1810] ss:$68 sps:$4 sm:$0xff]  }
 0x2a1   : > { %8317 = vmatprep.mubr.bf16.mxu0 %v13688_v24  ;;  %8601 = vmatprep.mubr.bf16.mxu1 %v13688_v24  ;;  %v12519_v31 = vld [vmem:[%s17137_s1 + $0x1894] ss:$68 sps:$4 sm:$0xff]  }
 0x2a3   : > { %8300 = vmatpush1.bf16.msra.mxu0 %v12475_v35  ;;  %8584 = vmatpush1.bf16.msra.mxu1 %v12478_v36  ;;  %v12522_v35 = vld [vmem:[%s17137_s1 + $0x189c] ss:$68 sps:$4 sm:$0xff]   ;;  %v12517_v36 = vld [vmem:[%s17137_s1 + $0x1890] ss:$68 sps:$4 sm:$0xff]  }
 0x2a4   : > { %8301 = vmatprep.subr.bf16.mxu0 %v12483_v37  ;;  %8585 = vmatprep.subr.bf16.mxu1 %v12486_v40  ;;  %v12520_v37 = vld [vmem:[%s17137_s1 + $0x1898] ss:$68 sps:$4 sm:$0xff]  }
 0x2a5   : > { %v12525_v40 = vld [vmem:[%s17137_s1 + $0x191c] ss:$68 sps:$4 sm:$0xff]  }
 0x2a7   : > { %8302 = vmatpush1.bf16.msra.mxu0 %v12481_v41  ;;  %8586 = vmatpush1.bf16.msra.mxu1 %v12484_v44  ;;  %v12528_v41 = vld [vmem:[%s17137_s1 + $0x1924] ss:$68 sps:$4 sm:$0xff]   ;;  %v12523_v44 = vld [vmem:[%s17137_s1 + $0x1918] ss:$68 sps:$4 sm:$0xff]  }
 0x2a8   : > { %8303 = vmatprep.subr.bf16.mxu0 %v12489_v46  ;;  %8587 = vmatprep.subr.bf16.mxu1 %v12492_v47  ;;  %v12526_v46 = vld [vmem:[%s17137_s1 + $0x1920] ss:$68 sps:$4 sm:$0xff]  }
 0x2a9   : > { %v12531_v47 = vld [vmem:[%s17137_s1 + $0x19a4] ss:$68 sps:$4 sm:$0xff]  }
 0x2ab   : > { %8304 = vmatpush1.bf16.msra.mxu0 %v12487_v48  ;;  %8588 = vmatpush1.bf16.msra.mxu1 %v12490_v51  ;;  %v12534_v48 = vld [vmem:[%s17137_s1 + $0x19ac] ss:$68 sps:$4 sm:$0xff]   ;;  %v12529_v51 = vld [vmem:[%s17137_s1 + $0x19a0] ss:$68 sps:$4 sm:$0xff]  }
 0x2ac   : > { %8305 = vmatprep.subr.bf16.mxu0 %v12495_v54  ;;  %8589 = vmatprep.subr.bf16.mxu1 %v12498_v57  ;;  %v12532_v54 = vld [vmem:[%s17137_s1 + $0x19a8] ss:$68 sps:$4 sm:$0xff]  }
 0x2ad   : > { %v12537_v57 = vld [vmem:[%s17137_s1 + $0x1a2c] ss:$68 sps:$4 sm:$0xff]  }
 0x2af   : > { %8306 = vmatpush1.bf16.msra.mxu0 %v12493_v59  ;;  %8590 = vmatpush1.bf16.msra.mxu1 %v12496_v63  ;;  %v12540_v59 = vld [vmem:[%s17137_s1 + $0x1a34] ss:$68 sps:$4 sm:$0xff]   ;;  %v12535_v63 = vld [vmem:[%s17137_s1 + $0x1a28] ss:$68 sps:$4 sm:$0xff]  }
 0x2b0   : > { %8307 = vmatprep.subr.bf16.mxu0 %v12501_v0  ;;  %8591 = vmatprep.subr.bf16.mxu1 %v12504_v1  ;;  %v12538_v0 = vld [vmem:[%s17137_s1 + $0x1a30] ss:$68 sps:$4 sm:$0xff]  }
 0x2b1   : > { %v12543_v1 = vld [vmem:[%s17137_s1 + $0x1ab4] ss:$68 sps:$4 sm:$0xff]  }
 0x2b3   : > { %8308 = vmatpush1.bf16.msra.mxu0 %v12499_v22  ;;  %8592 = vmatpush1.bf16.msra.mxu1 %v12502_v25  ;;  %v12546_v22 = vld [vmem:[%s17137_s1 + $0x1abc] ss:$68 sps:$4 sm:$0xff]   ;;  %v12541_v25 = vld [vmem:[%s17137_s1 + $0x1ab0] ss:$68 sps:$4 sm:$0xff]  }
 0x2b4   : > { %8309 = vmatprep.subr.bf16.mxu0 %v12507_v26  ;;  %8593 = vmatprep.subr.bf16.mxu1 %v12510_v29  ;;  %v12544_v26 = vld [vmem:[%s17137_s1 + $0x1ab8] ss:$68 sps:$4 sm:$0xff]  }
 0x2b5   : > { %v12549_v29 = vld [vmem:[%s17137_s1 + $0x1b3c] ss:$68 sps:$4 sm:$0xff]  }
 0x2b7   : > { %8310 = vmatpush1.bf16.msra.mxu0 %v12505_v2  ;;  %8594 = vmatpush1.bf16.msra.mxu1 %v12508_v8  ;;  %v12552_v2 = vld [vmem:[%s17137_s1 + $0x1b44] ss:$68 sps:$4 sm:$0xff]   ;;  %v12547_v8 = vld [vmem:[%s17137_s1 + $0x1b38] ss:$68 sps:$4 sm:$0xff]  }
 0x2b8   : > { %8311 = vmatprep.subr.bf16.mxu0 %v12513_v10  ;;  %8595 = vmatprep.subr.bf16.mxu1 %v12516_v19  ;;  %v12550_v10 = vld [vmem:[%s17137_s1 + $0x1b40] ss:$68 sps:$4 sm:$0xff]  }
 0x2b9   : > { %v12555_v19 = vld [vmem:[%s17137_s1 + $0x1bc4] ss:$68 sps:$4 sm:$0xff]  }
 0x2bb   : > { %8312 = vmatpush1.bf16.msra.mxu0 %v12511_v21  ;;  %8596 = vmatpush1.bf16.msra.mxu1 %v12514_v30  ;;  %v12558_v21 = vld [vmem:[%s17137_s1 + $0x1bcc] ss:$68 sps:$4 sm:$0xff]   ;;  %v1436_v30 = vsub.s32 4, %v14730_v58 }
 0x2bc   : > { %8313 = vmatprep.subr.bf16.mxu0 %v12519_v31  ;;  %8597 = vmatprep.subr.bf16.mxu1 %v12522_v35  ;;  %v1444_v31 = vsub.s32 6, %v14730_v58  ;;  %v12553_v35 = vld [vmem:[%s17137_s1 + $0x1bc0] ss:$68 sps:$4 sm:$0xff]  }
 0x2bf   : > { %8314 = vmatpush1.bf16.msra.mxu0 %v12517_v36  ;;  %8598 = vmatpush1.bf16.msra.mxu1 %v12520_v37  ;;  %v12556_v36 = vld [vmem:[%s17137_s1 + $0x1bc8] ss:$68 sps:$4 sm:$0xff]   ;;  %v1440_v37 = vsub.s32 5, %v14730_v58 }
 0x2c0   : > { %8315 = vmatprep.subr.bf16.mxu0 %v12525_v40  ;;  %8599 = vmatprep.subr.bf16.mxu1 %v12528_v41  ;;  %v1448_v40 = vsub.s32 7, %v14730_v58  ;;  %v12561_v41 = vld [vmem:[%s17137_s1 + $0x1c4c] ss:$68 sps:$4 sm:$0xff]  }
 0x2c3   : > { %8316 = vmatpush1.bf16.msra.mxu0 %v12523_v44  ;;  %8600 = vmatpush1.bf16.msra.mxu1 %v12526_v46  ;;  %v12564_v44 = vld [vmem:[%s17137_s1 + $0x1c54] ss:$68 sps:$4 sm:$0xff]   ;;  %v13073_v46 = vld [vmem:[%s17138_s2] sm:$0xff] }
 0x2c4   : > { %8356 = vmatprep.subr.bf16.mxu0 %v12531_v47  ;;  %8640 = vmatprep.subr.bf16.mxu1 %v12534_v48  ;;  %v15686_v47 = vrot.slane %v13073_v46, %v1436_v30  ;;  %v15690_v48 = vrot.slane %v13073_v46, %v1444_v31 }
 0x2c6   : > { %8318 = vmatmul.mubr.bf16.vlgmr.msra.gmra.mrb[32].mxu0 %v13804_v13  ;;  %8602 = vmatmul.mubr.bf16.vlgmr.msra.gmra.mrb[32].mxu1 %v13804_v13 }
 0x2c7   : > { %8357 = vmatpush1.bf16.msra.mxu0 %v12529_v51  ;;  %8641 = vmatpush1.bf16.msra.mxu1 %v12532_v54  ;;  %v15696_v51 = vrot.slane %v13073_v46, %v1440_v37  ;;  %v15700_v54 = vrot.slane %v13073_v46, %v1448_v40 }
 0x2c8   : > { %8358 = vmatprep.subr.bf16.mxu0 %v12537_v57  ;;  %8642 = vmatprep.subr.bf16.mxu1 %v12540_v59  ;;  %v12559_v57 = vld [vmem:[%s17137_s1 + $0x1c48] ss:$68 sps:$4 sm:$0xff]   ;;  %v12562_v59 = vld [vmem:[%s17137_s1 + $0x1c50] ss:$68 sps:$4 sm:$0xff]  }
 0x2c9   : > { %8327 = vmatprep.mubr.bf16.mxu0 %v13823_v23  ;;  %8611 = vmatprep.mubr.bf16.mxu1 %v13823_v23 }
 0x2cb   : > { %8359 = vmatpush1.bf16.msra.mxu0 %v12535_v63  ;;  %8643 = vmatpush1.bf16.msra.mxu1 %v12538_v0  ;;  %v12567_v63 = vld [vmem:[%s17137_s1 + $0x1cd4] ss:$68 sps:$4 sm:$0xff]   ;;  %v12570_v0 = vld [vmem:[%s17137_s1 + $0x1cdc] ss:$68 sps:$4 sm:$0xff]  }
 0x2cc   : > { %8360 = vmatprep.subr.bf16.mxu0 %v12543_v1  ;;  %8644 = vmatprep.subr.bf16.mxu1 %v12546_v22 }
 0x2ce   : > { %8328 = vmatmul.mubr.bf16.gmra.mrb[36].mxu0 %v13841_v32  ;;  %8612 = vmatmul.mubr.bf16.gmra.mrb[36].mxu1 %v13841_v32 }
 0x2cf   : > { %8361 = vmatpush1.bf16.msra.mxu0 %v12541_v25  ;;  %8645 = vmatpush1.bf16.msra.mxu1 %v12544_v26 }
 0x2d0   : > { %8362 = vmatprep.subr.bf16.mxu0 %v12549_v29  ;;  %8646 = vmatprep.subr.bf16.mxu1 %v12552_v2 }
 0x2d1   : > { %8337 = vmatprep.mubr.bf16.mxu0 %v13859_v42  ;;  %8621 = vmatprep.mubr.bf16.mxu1 %v13859_v42 }
 0x2d3   : > { %8363 = vmatpush1.bf16.msra.mxu0 %v12547_v8  ;;  %8647 = vmatpush1.bf16.msra.mxu1 %v12550_v10 }
 0x2d4   : > { %8364 = vmatprep.subr.bf16.mxu0 %v12555_v19  ;;  %8648 = vmatprep.subr.bf16.mxu1 %v12558_v21 }
 0x2d6   : > { %8338 = vmatmul.mubr.bf16.gmra.mrb[40].mxu0 %v13882_v55  ;;  %8622 = vmatmul.mubr.bf16.gmra.mrb[40].mxu1 %v13882_v55 }
 0x2d7   : > { %8365 = vmatpush1.bf16.msra.mxu0 %v12553_v35  ;;  %8649 = vmatpush1.bf16.msra.mxu1 %v12556_v36  ;;  %v12565_v35 = vld [vmem:[%s17137_s1 + $0x1cd0] ss:$68 sps:$4 sm:$0xff]   ;;  %v12568_v36 = vld [vmem:[%s17137_s1 + $0x1cd8] ss:$68 sps:$4 sm:$0xff]  }
 0x2d8   : > { %8366 = vmatprep.subr.bf16.mxu0 %v12561_v41  ;;  %8650 = vmatprep.subr.bf16.mxu1 %v12564_v44 }
 0x2d9   : > { %v7822_v1 = vpop.f32.mrb[16].mxu0  ;;  %v8106_v22 = vpop.f32.mrb[16].mxu1  ;;  %8347 = vmatprep.mubr.bf16.mxu0 %v13894_v62  ;;  %8631 = vmatprep.mubr.bf16.mxu1 %v13894_v62 }
 0x2da   : > { %v10995_v25 = vadd.f32 %v7822_v1, %v15686_v47  ;;  %v11009_v26 = vadd.f32 %v8106_v22, %v15690_v48  ;;  %v7824_v29 = vpop.f32.mrb[17].mxu0  ;;  %v8108_v2 = vpop.f32.mrb[17].mxu1  ;;  %v12576_v1 = vld [vmem:[%s17137_s1 + $0x1d64] ss:$68 sps:$4 sm:$0xff]  }
 0x2db   : > { %v10996_v8 = vadd.f32 %v7824_v29, %v15696_v51  ;;  %v11010_v10 = vadd.f32 %v8108_v2, %v15700_v54  ;;  %v7826_v19 = vpop.f32.mrb[18].mxu0  ;;  %v8110_v21 = vpop.f32.mrb[18].mxu1  ;;  %8367 = vmatpush1.bf16.msra.mxu0 %v12559_v57  ;;  %8651 = vmatpush1.bf16.msra.mxu1 %v12562_v59  ;;  %v12573_v59 = vld [vmem:[%s17137_s1 + $0x1d5c] ss:$68 sps:$4 sm:$0xff]   ;;  %v12582_v29 = vld [vmem:[%s17137_s1 + $0x1dec] ss:$68 sps:$4 sm:$0xff]  }
 0x2dc   : > { %9539 = vst [vmem:[%s14801_s14 + $0x20] sm:$0xff] %v10995_v25  ;;  %9541 = vst [vmem:[%s14801_s14 + $0x30] sm:$0xff] %v11009_v26  ;;  %v10997_v41 = vadd.f32 %v7826_v19, %v15686_v47  ;;  %v11011_v44 = vadd.f32 %v8110_v21, %v15690_v48  ;;  %v7828_v46 = vpop.f32.mrb[19].mxu0  ;;  %v8112_v57 = vpop.f32.mrb[19].mxu1  ;;  %8368 = vmatprep.subr.bf16.mxu0 %v12567_v63  ;;  %8652 = vmatprep.subr.bf16.mxu1 %v12570_v0  ;;  %v12571_v63 = vld [vmem:[%s17137_s1 + $0x1d58] ss:$68 sps:$4 sm:$0xff]  }
 0x2dd   : > { %9540 = vst [vmem:[%s14801_s14 + $0x28] sm:$0xff] %v10996_v8  ;;  %9542 = vst [vmem:[%s14801_s14 + $0x38] sm:$0xff] %v11010_v10  ;;  %v10998_v22 = vadd.f32 %v7828_v46, %v15696_v51  ;;  %v11012_v25 = vadd.f32 %v8112_v57, %v15700_v54  ;;  %v12574_v0 = vld [vmem:[%s17137_s1 + $0x1d60] ss:$68 sps:$4 sm:$0xff]  }
 0x2de   : > { %9556 = vst [vmem:[%s14801_s14 + $0xa8] sm:$0xff] %v10997_v41  ;;  %9558 = vst [vmem:[%s14801_s14 + $0xb8] sm:$0xff] %v11011_v44  ;;  %8348 = vmatmul.mubr.bf16.gmra.mrb[44].mxu0 %v13916_v6  ;;  %8632 = vmatmul.mubr.bf16.gmra.mrb[44].mxu1 %v13916_v6  ;;  %v12579_v26 = vld [vmem:[%s17137_s1 + $0x1de4] ss:$68 sps:$4 sm:$0xff]  }
 0x2df   : > { %9557 = vst [vmem:[%s14801_s14 + $0xb0] sm:$0xff] %v10998_v22  ;;  %9559 = vst [vmem:[%s14801_s14 + $0xc0] sm:$0xff] %v11012_v25  ;;  %8369 = vmatpush1.bf16.msra.mxu0 %v12565_v35  ;;  %8653 = vmatpush1.bf16.msra.mxu1 %v12568_v36  ;;  %v12577_v57 = vld [vmem:[%s17137_s1 + $0x1de0] ss:$68 sps:$4 sm:$0xff]  }
 0x2e0   : > { %8370 = vmatprep.subr.bf16.mxu0 %v12573_v59  ;;  %8654 = vmatprep.subr.bf16.mxu1 %v12576_v1  ;;  %v12580_v59 = vld [vmem:[%s17137_s1 + $0x1de8] ss:$68 sps:$4 sm:$0xff]  }
 0x2e1   : > { %v7832_v2 = vpop.f32.mrb[20].mxu0  ;;  %v8116_v8 = vpop.f32.mrb[20].mxu1  ;;  %8388 = vmatprep.mubr.bf16.mxu0 %v13926_v14  ;;  %8672 = vmatprep.mubr.bf16.mxu1 %v13926_v14 }
 0x2e2   : > { %v10999_v10 = vadd.f32 %v7832_v2, %v15686_v47  ;;  %v11013_v19 = vadd.f32 %v8116_v8, %v15690_v48  ;;  %v7834_v21 = vpop.f32.mrb[21].mxu0  ;;  %v8118_v35 = vpop.f32.mrb[21].mxu1  ;;  %v12588_v2 = vld [vmem:[%s17137_s1 + $0x1e74] ss:$68 sps:$4 sm:$0xff]  }
 0x2e3   : > { %v11000_v36 = vadd.f32 %v7834_v21, %v15696_v51  ;;  %v11014_v41 = vadd.f32 %v8118_v35, %v15700_v54  ;;  %v7836_v44 = vpop.f32.mrb[22].mxu0  ;;  %v8120_v46 = vpop.f32.mrb[22].mxu1  ;;  %8371 = vmatpush1.bf16.msra.mxu0 %v12571_v63  ;;  %8655 = vmatpush1.bf16.msra.mxu1 %v12574_v0  ;;  %v12585_v0 = vld [vmem:[%s17137_s1 + $0x1e6c] ss:$68 sps:$4 sm:$0xff]   ;;  %v12594_v21 = vld [vmem:[%s17137_s1 + $0x1efc] ss:$68 sps:$4 sm:$0xff]  }
 0x2e4   : > { %9573 = vst [vmem:[%s14801_s14 + $0x130] sm:$0xff] %v10999_v10  ;;  %9575 = vst [vmem:[%s14801_s14 + $0x140] sm:$0xff] %v11013_v19  ;;  %v11001_v1 = vadd.f32 %v7836_v44, %v15686_v47  ;;  %v11015_v22 = vadd.f32 %v8120_v46, %v15690_v48  ;;  %v7838_v25 = vpop.f32.mrb[23].mxu0  ;;  %v8122_v63 = vpop.f32.mrb[23].mxu1  ;;  %8372 = vmatprep.subr.bf16.mxu0 %v12579_v26  ;;  %8656 = vmatprep.subr.bf16.mxu1 %v12582_v29  ;;  %v12583_v26 = vld [vmem:[%s17137_s1 + $0x1e68] ss:$68 sps:$4 sm:$0xff]  }
 0x2e5   : > { %9574 = vst [vmem:[%s14801_s14 + $0x138] sm:$0xff] %v11000_v36  ;;  %9576 = vst [vmem:[%s14801_s14 + $0x148] sm:$0xff] %v11014_v41  ;;  %v11002_v8 = vadd.f32 %v7838_v25, %v15696_v51  ;;  %v11016_v10 = vadd.f32 %v8122_v63, %v15700_v54  ;;  %v12586_v29 = vld [vmem:[%s17137_s1 + $0x1e70] ss:$68 sps:$4 sm:$0xff]  }
 0x2e6   : > { %9590 = vst [vmem:[%s14801_s14 + $0x1b8] sm:$0xff] %v11001_v1  ;;  %9592 = vst [vmem:[%s14801_s14 + $0x1c8] sm:$0xff] %v11015_v22  ;;  %v12591_v19 = vld [vmem:[%s17137_s1 + $0x1ef4] ss:$68 sps:$4 sm:$0xff]  }
 0x2e7   : > { %9591 = vst [vmem:[%s14801_s14 + $0x1c0] sm:$0xff] %v11002_v8  ;;  %9593 = vst [vmem:[%s14801_s14 + $0x1d0] sm:$0xff] %v11016_v10  ;;  %8373 = vmatpush1.bf16.msra.mxu0 %v12577_v57  ;;  %8657 = vmatpush1.bf16.msra.mxu1 %v12580_v59  ;;  %v12589_v63 = vld [vmem:[%s17137_s1 + $0x1ef0] ss:$68 sps:$4 sm:$0xff]  }
 0x2e8   : > { %8374 = vmatprep.subr.bf16.mxu0 %v12585_v0  ;;  %8658 = vmatprep.subr.bf16.mxu1 %v12588_v2  ;;  %v12592_v0 = vld [vmem:[%s17137_s1 + $0x1ef8] ss:$68 sps:$4 sm:$0xff]  }
 0x2e9   : > { %v7842_v35 = vpop.f32.mrb[24].mxu0  ;;  %v8126_v36 = vpop.f32.mrb[24].mxu1 }
 0x2ea   : > { %v11003_v41 = vadd.f32 %v7842_v35, %v15686_v47  ;;  %v11017_v44 = vadd.f32 %v8126_v36, %v15690_v48  ;;  %v7844_v46 = vpop.f32.mrb[25].mxu0  ;;  %v8128_v57 = vpop.f32.mrb[25].mxu1  ;;  %v12600_v35 = vld [vmem:[%s17137_s1 + $0x1f84] ss:$68 sps:$4 sm:$0xff]  }
 0x2eb   : > { %v11004_v59 = vadd.f32 %v7844_v46, %v15696_v51  ;;  %v11018_v1 = vadd.f32 %v8128_v57, %v15700_v54  ;;  %v7846_v22 = vpop.f32.mrb[26].mxu0  ;;  %v8130_v25 = vpop.f32.mrb[26].mxu1  ;;  %8375 = vmatpush1.bf16.msra.mxu0 %v12583_v26  ;;  %8659 = vmatpush1.bf16.msra.mxu1 %v12586_v29  ;;  %v12597_v29 = vld [vmem:[%s17137_s1 + $0x1f7c] ss:$68 sps:$4 sm:$0xff]   ;;  %v12606_v46 = vld [vmem:[%s17137_s1 + $0x200c] ss:$68 sps:$4 sm:$0xff]  }
 0x2ec   : > { %9607 = vst [vmem:[%s14801_s14 + $0x240] sm:$0xff] %v11003_v41  ;;  %9609 = vst [vmem:[%s14801_s14 + $0x250] sm:$0xff] %v11017_v44  ;;  %v11005_v2 = vadd.f32 %v7846_v22, %v15686_v47  ;;  %v11019_v8 = vadd.f32 %v8130_v25, %v15690_v48  ;;  %v7848_v10 = vpop.f32.mrb[27].mxu0  ;;  %v8132_v26 = vpop.f32.mrb[27].mxu1  ;;  %8376 = vmatprep.subr.bf16.mxu0 %v12591_v19  ;;  %8660 = vmatprep.subr.bf16.mxu1 %v12594_v21  ;;  %v12595_v19 = vld [vmem:[%s17137_s1 + $0x1f78] ss:$68 sps:$4 sm:$0xff]  }
 0x2ed   : > { %9608 = vst [vmem:[%s14801_s14 + $0x248] sm:$0xff] %v11004_v59  ;;  %9610 = vst [vmem:[%s14801_s14 + $0x258] sm:$0xff] %v11018_v1  ;;  %v11006_v36 = vadd.f32 %v7848_v10, %v15696_v51  ;;  %v11020_v41 = vadd.f32 %v8132_v26, %v15700_v54  ;;  %v12598_v21 = vld [vmem:[%s17137_s1 + $0x1f80] ss:$68 sps:$4 sm:$0xff]  }
 0x2ee   : > { %9624 = vst [vmem:[%s14801_s14 + $0x2c8] sm:$0xff] %v11005_v2  ;;  %9626 = vst [vmem:[%s14801_s14 + $0x2d8] sm:$0xff] %v11019_v8  ;;  %v12603_v44 = vld [vmem:[%s17137_s1 + $0x2004] ss:$68 sps:$4 sm:$0xff]  }
 0x2ef   : > { %9625 = vst [vmem:[%s14801_s14 + $0x2d0] sm:$0xff] %v11006_v36  ;;  %9627 = vst [vmem:[%s14801_s14 + $0x2e0] sm:$0xff] %v11020_v41  ;;  %8377 = vmatpush1.bf16.msra.mxu0 %v12589_v63  ;;  %8661 = vmatpush1.bf16.msra.mxu1 %v12592_v0  ;;  %v12601_v26 = vld [vmem:[%s17137_s1 + $0x2000] ss:$68 sps:$4 sm:$0xff]   ;;  %v12610_v36 = vld [vmem:[%s17137_s1 + $0x2090] ss:$68 sps:$4 sm:$0xff]  }
 0x2f0   : > { %8378 = vmatprep.subr.bf16.mxu0 %v12597_v29  ;;  %8662 = vmatprep.subr.bf16.mxu1 %v12600_v35  ;;  %v12612_v29 = vld [vmem:[%s17137_s1 + $0x2094] ss:$68 sps:$4 sm:$0xff]   ;;  %v12607_v35 = vld [vmem:[%s17137_s1 + $0x2088] ss:$68 sps:$4 sm:$0xff]  }
 0x2f1   : > { %v7852_v57 = vpop.f32.mrb[28].mxu0  ;;  %v8136_v59 = vpop.f32.mrb[28].mxu1  ;;  %v12615_v41 = vld [vmem:[%s17137_s1 + $0x2114] ss:$68 sps:$4 sm:$0xff]  }
 0x2f2   : > { %v11007_v1 = vadd.f32 %v7852_v57, %v15686_v47  ;;  %v11021_v22 = vadd.f32 %v8136_v59, %v15690_v48  ;;  %v7854_v25 = vpop.f32.mrb[29].mxu0  ;;  %v8138_v63 = vpop.f32.mrb[29].mxu1  ;;  %v12604_v47 = vld [vmem:[%s17137_s1 + $0x2008] ss:$68 sps:$4 sm:$0xff]   ;;  %v12619_v59 = vld [vmem:[%s17137_s1 + $0x2198] ss:$68 sps:$4 sm:$0xff]  }
 0x2f3   : > { %v11008_v0 = vadd.f32 %v7854_v25, %v15696_v51  ;;  %v11022_v2 = vadd.f32 %v8138_v63, %v15700_v54  ;;  %v7856_v8 = vpop.f32.mrb[30].mxu0  ;;  %v8140_v10 = vpop.f32.mrb[30].mxu1  ;;  %8379 = vmatpush1.bf16.msra.mxu0 %v12595_v19  ;;  %8663 = vmatpush1.bf16.msra.mxu1 %v12598_v21  ;;  %v12609_v54 = vld [vmem:[%s17137_s1 + $0x208c] ss:$68 sps:$4 sm:$0xff]   ;;  %v12618_v19 = vld [vmem:[%s17137_s1 + $0x211c] ss:$68 sps:$4 sm:$0xff]  }
 0x2f4   : > { %9641 = vst [vmem:[%s14801_s14 + $0x350] sm:$0x1] %v11007_v1  ;;  %9643 = vst [vmem:[%s14801_s14 + $0x360] sm:$0x1] %v11021_v22  ;;  %v7857_v48 = vpop.f32.mrb[31].mxu0  ;;  %v8141_v51 = vpop.f32.mrb[31].mxu1  ;;  %8380 = vmatprep.subr.bf16.mxu0 %v12603_v44  ;;  %8664 = vmatprep.subr.bf16.mxu1 %v12606_v46 }
 0x2f5   : > { %9642 = vst [vmem:[%s14801_s14 + $0x358] sm:$0x1] %v11008_v0  ;;  %9644 = vst [vmem:[%s14801_s14 + $0x368] sm:$0x1] %v11022_v2  ;;  %v12613_v21 = vld [vmem:[%s17137_s1 + $0x2110] ss:$68 sps:$4 sm:$0xff]  }
 0x2f6   : > { %v12616_v44 = vld [vmem:[%s17137_s1 + $0x2118] ss:$68 sps:$4 sm:$0xff]   ;;  %v12624_v57 = vld [vmem:[%s17137_s1 + $0x21a4] ss:$68 sps:$4 sm:$0xff]   ;;  %v12625_v63 = vld [vmem:[%s17137_s1 + $0x30] ss:$68 sps:$4 sm:$0xff]  }
 0x2f7   : > { %8381 = vmatpush1.bf16.msra.mxu0 %v12601_v26  ;;  %8665 = vmatpush1.bf16.msra.mxu1 %v12604_v47  ;;  %v12621_v46 = vld [vmem:[%s17137_s1 + $0x219c] ss:$68 sps:$4 sm:$0xff]   ;;  %v12627_v22 = vld [vmem:[%s17137_s1 + $0x34] ss:$68 sps:$4 sm:$0xff]   ;;  %v12636_v8 = vld [vmem:[%s17137_s1 + $0xc4] ss:$68 sps:$4 sm:$0xff]  }
 0x2f8   : > { %8382 = vmatprep.subr.bf16.mxu0 %v12609_v54  ;;  %8666 = vmatprep.subr.bf16.mxu1 %v12612_v29  ;;  %v12622_v1 = vld [vmem:[%s17137_s1 + $0x21a0] ss:$68 sps:$4 sm:$0xff]   ;;  %v12628_v0 = vld [vmem:[%s17137_s1 + $0x38] ss:$68 sps:$4 sm:$0xff]   ;;  %v12642_v48 = vld [vmem:[%s17137_s1 + $0x14c] ss:$68 sps:$4 sm:$0xff]  }
 0x2f9   : > { %v12630_v25 = vld [vmem:[%s17137_s1 + $0x3c] ss:$68 sps:$4 sm:$0xff]   ;;  %v12639_v47 = vld [vmem:[%s17137_s1 + $0x144] ss:$68 sps:$4 sm:$0xff]   ;;  %v12645_v29 = vld [vmem:[%s17137_s1 + $0x1cc] ss:$68 sps:$4 sm:$0xff]  }
 0x2fa   : > { %v12633_v2 = vld [vmem:[%s17137_s1 + $0xbc] ss:$68 sps:$4 sm:$0xff]   ;;  %v12640_v54 = vld [vmem:[%s17137_s1 + $0x148] ss:$68 sps:$4 sm:$0xff]  }
 0x2fb   : > { %8383 = vmatpush1.bf16.msra.mxu0 %v12607_v35  ;;  %8667 = vmatpush1.bf16.msra.mxu1 %v12610_v36  ;;  %v12631_v10 = vld [vmem:[%s17137_s1 + $0xb8] ss:$68 sps:$4 sm:$0xff]   ;;  %v12634_v26 = vld [vmem:[%s17137_s1 + $0xc0] ss:$68 sps:$4 sm:$0xff]   ;;  %v12643_v36 = vld [vmem:[%s17137_s1 + $0x1c8] ss:$68 sps:$4 sm:$0xff]  }
 0x2fc   : > { %8384 = vmatprep.subr.bf16.mxu0 %v12615_v41  ;;  %8668 = vmatprep.subr.bf16.mxu1 %v12618_v19  ;;  %v12637_v51 = vld [vmem:[%s17137_s1 + $0x140] ss:$68 sps:$4 sm:$0xff]   ;;  %v12648_v35 = vld [vmem:[%s17137_s1 + $0x1d4] ss:$68 sps:$4 sm:$0xff]  }
 0x2fd   : > { %v12646_v41 = vld [vmem:[%s17137_s1 + $0x1d0] ss:$68 sps:$4 sm:$0xff]  }
 0x2fe   : > { %v12651_v19 = vld [vmem:[%s17137_s1 + $0x254] ss:$68 sps:$4 sm:$0xff]  }
 0x2ff   : > { %8385 = vmatpush1.bf16.msra.mxu0 %v12613_v21  ;;  %8669 = vmatpush1.bf16.msra.mxu1 %v12616_v44  ;;  %v12654_v21 = vld [vmem:[%s17137_s1 + $0x25c] ss:$68 sps:$4 sm:$0xff]   ;;  %v12649_v44 = vld [vmem:[%s17137_s1 + $0x250] ss:$68 sps:$4 sm:$0xff]  }
 0x300   : > { %8386 = vmatprep.subr.bf16.mxu0 %v12621_v46  ;;  %8670 = vmatprep.subr.bf16.mxu1 %v12624_v57  ;;  %v12652_v46 = vld [vmem:[%s17137_s1 + $0x258] ss:$68 sps:$4 sm:$0xff]  }
 0x301   : > { %v12657_v57 = vld [vmem:[%s17137_s1 + $0x2dc] ss:$68 sps:$4 sm:$0xff]  }
 0x303   : > { %8387 = vmatpush1.bf16.msra.mxu0 %v12619_v59  ;;  %8671 = vmatpush1.bf16.msra.mxu1 %v12622_v1  ;;  %v12660_v59 = vld [vmem:[%s17137_s1 + $0x2e4] ss:$68 sps:$4 sm:$0xff]   ;;  %v12655_v1 = vld [vmem:[%s17137_s1 + $0x2d8] ss:$68 sps:$4 sm:$0xff]  }
 0x304   : > { %8711 = vmatprep.subr.bf16.mxu0 %v12627_v22  ;;  %8995 = vmatprep.subr.bf16.mxu1 %v12630_v25  ;;  %v12658_v22 = vld [vmem:[%s17137_s1 + $0x2e0] ss:$68 sps:$4 sm:$0xff]  }
 0x305   : > { %v12663_v25 = vld [vmem:[%s17137_s1 + $0x364] ss:$68 sps:$4 sm:$0xff]  }
 0x306   : > { %8389 = vmatmul.mubr.bf16.vlgmr.msra.gmra.mrb[32].mxu0 %v14048_v16  ;;  %8673 = vmatmul.mubr.bf16.vlgmr.msra.gmra.mrb[32].mxu1 %v14048_v16 }
 0x307   : > { %8712 = vmatpush1.bf16.msra.mxu0 %v12625_v63  ;;  %8996 = vmatpush1.bf16.msra.mxu1 %v12628_v0  ;;  %v12666_v63 = vld [vmem:[%s17137_s1 + $0x36c] ss:$68 sps:$4 sm:$0xff]   ;;  %v12661_v0 = vld [vmem:[%s17137_s1 + $0x360] ss:$68 sps:$4 sm:$0xff]  }
 0x308   : > { %8713 = vmatprep.subr.bf16.mxu0 %v12633_v2  ;;  %8997 = vmatprep.subr.bf16.mxu1 %v12636_v8  ;;  %v12664_v2 = vld [vmem:[%s17137_s1 + $0x368] ss:$68 sps:$4 sm:$0xff]  }
 0x309   : > { %8398 = vmatprep.mubr.bf16.mxu0 %v14064_v28  ;;  %8682 = vmatprep.mubr.bf16.mxu1 %v14064_v28  ;;  %v12669_v8 = vld [vmem:[%s17137_s1 + $0x3ec] ss:$68 sps:$4 sm:$0xff]  }
 0x30b   : > { %8714 = vmatpush1.bf16.msra.mxu0 %v12631_v10  ;;  %8998 = vmatpush1.bf16.msra.mxu1 %v12634_v26  ;;  %v12672_v10 = vld [vmem:[%s17137_s1 + $0x3f4] ss:$68 sps:$4 sm:$0xff]   ;;  %v12667_v26 = vld [vmem:[%s17137_s1 + $0x3e8] ss:$68 sps:$4 sm:$0xff]  }
 0x30c   : > { %8715 = vmatprep.subr.bf16.mxu0 %v12639_v47  ;;  %8999 = vmatprep.subr.bf16.mxu1 %v12642_v48  ;;  %v12670_v47 = vld [vmem:[%s17137_s1 + $0x3f0] ss:$68 sps:$4 sm:$0xff]  }
 0x30d   : > { %v12675_v48 = vld [vmem:[%s17137_s1 + $0x474] ss:$68 sps:$4 sm:$0xff]  }
 0x30e   : > { %8399 = vmatmul.mubr.bf16.gmra.mrb[36].mxu0 %v14084_v38  ;;  %8683 = vmatmul.mubr.bf16.gmra.mrb[36].mxu1 %v14084_v38 }
 0x30f   : > { %8716 = vmatpush1.bf16.msra.mxu0 %v12637_v51  ;;  %9000 = vmatpush1.bf16.msra.mxu1 %v12640_v54  ;;  %v12678_v51 = vld [vmem:[%s17137_s1 + $0x47c] ss:$68 sps:$4 sm:$0xff]   ;;  %v12673_v54 = vld [vmem:[%s17137_s1 + $0x470] ss:$68 sps:$4 sm:$0xff]  }
 0x310   : > { %8717 = vmatprep.subr.bf16.mxu0 %v12645_v29  ;;  %9001 = vmatprep.subr.bf16.mxu1 %v12648_v35  ;;  %v12676_v29 = vld [vmem:[%s17137_s1 + $0x478] ss:$68 sps:$4 sm:$0xff]  }
 0x311   : > { %8408 = vmatprep.mubr.bf16.mxu0 %v14100_v49  ;;  %8692 = vmatprep.mubr.bf16.mxu1 %v14100_v49  ;;  %v12681_v35 = vld [vmem:[%s17137_s1 + $0x4fc] ss:$68 sps:$4 sm:$0xff]  }
 0x313   : > { %8718 = vmatpush1.bf16.msra.mxu0 %v12643_v36  ;;  %9002 = vmatpush1.bf16.msra.mxu1 %v12646_v41  ;;  %v12684_v36 = vld [vmem:[%s17137_s1 + $0x504] ss:$68 sps:$4 sm:$0xff]   ;;  %v12679_v41 = vld [vmem:[%s17137_s1 + $0x4f8] ss:$68 sps:$4 sm:$0xff]  }
 0x314   : > { %8719 = vmatprep.subr.bf16.mxu0 %v12651_v19  ;;  %9003 = vmatprep.subr.bf16.mxu1 %v12654_v21  ;;  %v12682_v19 = vld [vmem:[%s17137_s1 + $0x500] ss:$68 sps:$4 sm:$0xff]  }
 0x315   : > { %v12687_v21 = vld [vmem:[%s17137_s1 + $0x584] ss:$68 sps:$4 sm:$0xff]  }
 0x316   : > { %8409 = vmatmul.mubr.bf16.gmra.mrb[40].mxu0 %v14117_v60  ;;  %8693 = vmatmul.mubr.bf16.gmra.mrb[40].mxu1 %v14117_v60 }
 0x317   : > { %8720 = vmatpush1.bf16.msra.mxu0 %v12649_v44  ;;  %9004 = vmatpush1.bf16.msra.mxu1 %v12652_v46  ;;  %v12690_v44 = vld [vmem:[%s17137_s1 + $0x58c] ss:$68 sps:$4 sm:$0xff]   ;;  %v12685_v46 = vld [vmem:[%s17137_s1 + $0x580] ss:$68 sps:$4 sm:$0xff]  }
 0x318   : > { %8721 = vmatprep.subr.bf16.mxu0 %v12657_v57  ;;  %9005 = vmatprep.subr.bf16.mxu1 %v12660_v59  ;;  %v12688_v57 = vld [vmem:[%s17137_s1 + $0x588] ss:$68 sps:$4 sm:$0xff]  }
 0x319   : > { %8418 = vmatprep.mubr.bf16.mxu0 %v14132_v4  ;;  %8702 = vmatprep.mubr.bf16.mxu1 %v14132_v4  ;;  %v12693_v59 = vld [vmem:[%s17137_s1 + $0x60c] ss:$68 sps:$4 sm:$0xff]  }
 0x31b   : > { %8722 = vmatpush1.bf16.msra.mxu0 %v12655_v1  ;;  %9006 = vmatpush1.bf16.msra.mxu1 %v12658_v22  ;;  %v12696_v1 = vld [vmem:[%s17137_s1 + $0x614] ss:$68 sps:$4 sm:$0xff]   ;;  %v12691_v22 = vld [vmem:[%s17137_s1 + $0x608] ss:$68 sps:$4 sm:$0xff]  }
 0x31c   : > { %8723 = vmatprep.subr.bf16.mxu0 %v12663_v25  ;;  %9007 = vmatprep.subr.bf16.mxu1 %v12666_v63  ;;  %v12694_v25 = vld [vmem:[%s17137_s1 + $0x610] ss:$68 sps:$4 sm:$0xff]  }
 0x31d   : > { %v12699_v63 = vld [vmem:[%s17137_s1 + $0x694] ss:$68 sps:$4 sm:$0xff]  }
 0x31e   : > { %8419 = vmatmul.mubr.bf16.gmra.mrb[44].mxu0 %v14148_v15  ;;  %8703 = vmatmul.mubr.bf16.gmra.mrb[44].mxu1 %v14148_v15 }
 0x31f   : > { %8724 = vmatpush1.bf16.msra.mxu0 %v12661_v0  ;;  %9008 = vmatpush1.bf16.msra.mxu1 %v12664_v2  ;;  %v12702_v0 = vld [vmem:[%s17137_s1 + $0x69c] ss:$68 sps:$4 sm:$0xff]   ;;  %v12697_v2 = vld [vmem:[%s17137_s1 + $0x690] ss:$68 sps:$4 sm:$0xff]  }
 0x320   : > { %8725 = vmatprep.subr.bf16.mxu0 %v12669_v8  ;;  %9009 = vmatprep.subr.bf16.mxu1 %v12672_v10  ;;  %v12700_v8 = vld [vmem:[%s17137_s1 + $0x698] ss:$68 sps:$4 sm:$0xff]  }
 0x321   : > { %8743 = vmatprep.mubr.bf16.mxu0 %v13268_v50  ;;  %9027 = vmatprep.mubr.bf16.mxu1 %v13268_v50  ;;  %v12705_v10 = vld [vmem:[%s17137_s1 + $0x71c] ss:$68 sps:$4 sm:$0xff]  }
 0x323   : > { %8726 = vmatpush1.bf16.msra.mxu0 %v12667_v26  ;;  %9010 = vmatpush1.bf16.msra.mxu1 %v12670_v47  ;;  %v12708_v26 = vld [vmem:[%s17137_s1 + $0x724] ss:$68 sps:$4 sm:$0xff]   ;;  %v12703_v47 = vld [vmem:[%s17137_s1 + $0x718] ss:$68 sps:$4 sm:$0xff]  }
 0x324   : > { %8727 = vmatprep.subr.bf16.mxu0 %v12675_v48  ;;  %9011 = vmatprep.subr.bf16.mxu1 %v12678_v51  ;;  %v12706_v48 = vld [vmem:[%s17137_s1 + $0x720] ss:$68 sps:$4 sm:$0xff]  }
 0x325   : > { %v12711_v51 = vld [vmem:[%s17137_s1 + $0x7a4] ss:$68 sps:$4 sm:$0xff]  }
 0x327   : > { %8728 = vmatpush1.bf16.msra.mxu0 %v12673_v54  ;;  %9012 = vmatpush1.bf16.msra.mxu1 %v12676_v29  ;;  %v12714_v54 = vld [vmem:[%s17137_s1 + $0x7ac] ss:$68 sps:$4 sm:$0xff]   ;;  %v12709_v29 = vld [vmem:[%s17137_s1 + $0x7a0] ss:$68 sps:$4 sm:$0xff]  }
 0x328   : > { %8729 = vmatprep.subr.bf16.mxu0 %v12681_v35  ;;  %9013 = vmatprep.subr.bf16.mxu1 %v12684_v36  ;;  %v12712_v35 = vld [vmem:[%s17137_s1 + $0x7a8] ss:$68 sps:$4 sm:$0xff]  }
 0x329   : > { %v12717_v36 = vld [vmem:[%s17137_s1 + $0x82c] ss:$68 sps:$4 sm:$0xff]  }
 0x32b   : > { %8730 = vmatpush1.bf16.msra.mxu0 %v12679_v41  ;;  %9014 = vmatpush1.bf16.msra.mxu1 %v12682_v19  ;;  %v12720_v41 = vld [vmem:[%s17137_s1 + $0x834] ss:$68 sps:$4 sm:$0xff]   ;;  %v12715_v19 = vld [vmem:[%s17137_s1 + $0x828] ss:$68 sps:$4 sm:$0xff]  }
 0x32c   : > { %8731 = vmatprep.subr.bf16.mxu0 %v12687_v21  ;;  %9015 = vmatprep.subr.bf16.mxu1 %v12690_v44  ;;  %v12718_v21 = vld [vmem:[%s17137_s1 + $0x830] ss:$68 sps:$4 sm:$0xff]  }
 0x32d   : > { %v12723_v44 = vld [vmem:[%s17137_s1 + $0x8b4] ss:$68 sps:$4 sm:$0xff]  }
 0x32f   : > { %8732 = vmatpush1.bf16.msra.mxu0 %v12685_v46  ;;  %9016 = vmatpush1.bf16.msra.mxu1 %v12688_v57  ;;  %v12726_v46 = vld [vmem:[%s17137_s1 + $0x8bc] ss:$68 sps:$4 sm:$0xff]   ;;  %v12721_v57 = vld [vmem:[%s17137_s1 + $0x8b0] ss:$68 sps:$4 sm:$0xff]  }
 0x330   : > { %8733 = vmatprep.subr.bf16.mxu0 %v12693_v59  ;;  %9017 = vmatprep.subr.bf16.mxu1 %v12696_v1  ;;  %v12724_v59 = vld [vmem:[%s17137_s1 + $0x8b8] ss:$68 sps:$4 sm:$0xff]  }
 0x331   : > { %v12729_v1 = vld [vmem:[%s17137_s1 + $0x93c] ss:$68 sps:$4 sm:$0xff]  }
 0x333   : > { %8734 = vmatpush1.bf16.msra.mxu0 %v12691_v22  ;;  %9018 = vmatpush1.bf16.msra.mxu1 %v12694_v25  ;;  %v12732_v22 = vld [vmem:[%s17137_s1 + $0x944] ss:$68 sps:$4 sm:$0xff]   ;;  %v12727_v25 = vld [vmem:[%s17137_s1 + $0x938] ss:$68 sps:$4 sm:$0xff]  }
 0x334   : > { %8735 = vmatprep.subr.bf16.mxu0 %v12699_v63  ;;  %9019 = vmatprep.subr.bf16.mxu1 %v12702_v0  ;;  %v12730_v63 = vld [vmem:[%s17137_s1 + $0x940] ss:$68 sps:$4 sm:$0xff]  }
 0x335   : > { %v12735_v0 = vld [vmem:[%s17137_s1 + $0x9c4] ss:$68 sps:$4 sm:$0xff]  }
 0x337   : > { %8736 = vmatpush1.bf16.msra.mxu0 %v12697_v2  ;;  %9020 = vmatpush1.bf16.msra.mxu1 %v12700_v8  ;;  %v12738_v2 = vld [vmem:[%s17137_s1 + $0x9cc] ss:$68 sps:$4 sm:$0xff]   ;;  %v12733_v8 = vld [vmem:[%s17137_s1 + $0x9c0] ss:$68 sps:$4 sm:$0xff]  }
 0x338   : > { %8737 = vmatprep.subr.bf16.mxu0 %v12705_v10  ;;  %9021 = vmatprep.subr.bf16.mxu1 %v12708_v26  ;;  %v12736_v10 = vld [vmem:[%s17137_s1 + $0x9c8] ss:$68 sps:$4 sm:$0xff]  }
 0x339   : > { %v12741_v26 = vld [vmem:[%s17137_s1 + $0xa4c] ss:$68 sps:$4 sm:$0xff]  }
 0x33b   : > { %8738 = vmatpush1.bf16.msra.mxu0 %v12703_v47  ;;  %9022 = vmatpush1.bf16.msra.mxu1 %v12706_v48  ;;  %v12744_v47 = vld [vmem:[%s17137_s1 + $0xa54] ss:$68 sps:$4 sm:$0xff]   ;;  %v12739_v48 = vld [vmem:[%s17137_s1 + $0xa48] ss:$68 sps:$4 sm:$0xff]  }
 0x33c   : > { %8739 = vmatprep.subr.bf16.mxu0 %v12711_v51  ;;  %9023 = vmatprep.subr.bf16.mxu1 %v12714_v54  ;;  %v12742_v51 = vld [vmem:[%s17137_s1 + $0xa50] ss:$68 sps:$4 sm:$0xff]  }
 0x33d   : > { %v12747_v54 = vld [vmem:[%s17137_s1 + $0xad4] ss:$68 sps:$4 sm:$0xff]  }
 0x33f   : > { %8740 = vmatpush1.bf16.msra.mxu0 %v12709_v29  ;;  %9024 = vmatpush1.bf16.msra.mxu1 %v12712_v35  ;;  %v12750_v29 = vld [vmem:[%s17137_s1 + $0xadc] ss:$68 sps:$4 sm:$0xff]   ;;  %v12745_v35 = vld [vmem:[%s17137_s1 + $0xad0] ss:$68 sps:$4 sm:$0xff]  }
 0x340   : > { %8741 = vmatprep.subr.bf16.mxu0 %v12717_v36  ;;  %9025 = vmatprep.subr.bf16.mxu1 %v12720_v41  ;;  %v12748_v36 = vld [vmem:[%s17137_s1 + $0xad8] ss:$68 sps:$4 sm:$0xff]  }
 0x341   : > { %v12753_v41 = vld [vmem:[%s17137_s1 + $0xb5c] ss:$68 sps:$4 sm:$0xff]  }
 0x343   : > { %8742 = vmatpush1.bf16.msra.mxu0 %v12715_v19  ;;  %9026 = vmatpush1.bf16.msra.mxu1 %v12718_v21  ;;  %v12756_v19 = vld [vmem:[%s17137_s1 + $0xb64] ss:$68 sps:$4 sm:$0xff]   ;;  %v12751_v21 = vld [vmem:[%s17137_s1 + $0xb58] ss:$68 sps:$4 sm:$0xff]  }
 0x344   : > { %8782 = vmatprep.subr.bf16.mxu0 %v12723_v44  ;;  %9066 = vmatprep.subr.bf16.mxu1 %v12726_v46  ;;  %v12754_v44 = vld [vmem:[%s17137_s1 + $0xb60] ss:$68 sps:$4 sm:$0xff]  }
 0x345   : > { %v12759_v46 = vld [vmem:[%s17137_s1 + $0xbe4] ss:$68 sps:$4 sm:$0xff]  }
 0x346   : > { %8744 = vmatmul.mubr.bf16.vlgmr.msra.gmra.mrb[48].mxu0 %v13334_v9  ;;  %9028 = vmatmul.mubr.bf16.vlgmr.msra.gmra.mrb[48].mxu1 %v13334_v9 }
 0x347   : > { %8783 = vmatpush1.bf16.msra.mxu0 %v12721_v57  ;;  %9067 = vmatpush1.bf16.msra.mxu1 %v12724_v59  ;;  %v12762_v57 = vld [vmem:[%s17137_s1 + $0xbec] ss:$68 sps:$4 sm:$0xff]   ;;  %v12757_v59 = vld [vmem:[%s17137_s1 + $0xbe0] ss:$68 sps:$4 sm:$0xff]  }
 0x348   : > { %8784 = vmatprep.subr.bf16.mxu0 %v12729_v1  ;;  %9068 = vmatprep.subr.bf16.mxu1 %v12732_v22  ;;  %v12760_v1 = vld [vmem:[%s17137_s1 + $0xbe8] ss:$68 sps:$4 sm:$0xff]  }
 0x349   : > { %8753 = vmatprep.mubr.bf16.mxu0 %v13364_v20  ;;  %9037 = vmatprep.mubr.bf16.mxu1 %v13364_v20  ;;  %v12765_v22 = vld [vmem:[%s17137_s1 + $0xc6c] ss:$68 sps:$4 sm:$0xff]  }
 0x34b   : > { %8785 = vmatpush1.bf16.msra.mxu0 %v12727_v25  ;;  %9069 = vmatpush1.bf16.msra.mxu1 %v12730_v63  ;;  %v12768_v25 = vld [vmem:[%s17137_s1 + $0xc74] ss:$68 sps:$4 sm:$0xff]   ;;  %v12763_v63 = vld [vmem:[%s17137_s1 + $0xc68] ss:$68 sps:$4 sm:$0xff]  }
 0x34c   : > { %8786 = vmatprep.subr.bf16.mxu0 %v12735_v0  ;;  %9070 = vmatprep.subr.bf16.mxu1 %v12738_v2  ;;  %v12766_v0 = vld [vmem:[%s17137_s1 + $0xc70] ss:$68 sps:$4 sm:$0xff]  }
 0x34d   : > { %v12771_v2 = vld [vmem:[%s17137_s1 + $0xcf4] ss:$68 sps:$4 sm:$0xff]  }
 0x34e   : > { %8754 = vmatmul.mubr.bf16.gmra.mrb[52].mxu0 %v13382_v27  ;;  %9038 = vmatmul.mubr.bf16.gmra.mrb[52].mxu1 %v13382_v27 }
 0x34f   : > { %8787 = vmatpush1.bf16.msra.mxu0 %v12733_v8  ;;  %9071 = vmatpush1.bf16.msra.mxu1 %v12736_v10  ;;  %v12774_v8 = vld [vmem:[%s17137_s1 + $0xcfc] ss:$68 sps:$4 sm:$0xff]   ;;  %v12769_v10 = vld [vmem:[%s17137_s1 + $0xcf0] ss:$68 sps:$4 sm:$0xff]  }
 0x350   : > { %8788 = vmatprep.subr.bf16.mxu0 %v12741_v26  ;;  %9072 = vmatprep.subr.bf16.mxu1 %v12744_v47  ;;  %v12772_v26 = vld [vmem:[%s17137_s1 + $0xcf8] ss:$68 sps:$4 sm:$0xff]  }
 0x351   : > { %8763 = vmatprep.mubr.bf16.mxu0 %v13397_v33  ;;  %9047 = vmatprep.mubr.bf16.mxu1 %v13397_v33  ;;  %v12777_v47 = vld [vmem:[%s17137_s1 + $0xd7c] ss:$68 sps:$4 sm:$0xff]  }
 0x353   : > { %8789 = vmatpush1.bf16.msra.mxu0 %v12739_v48  ;;  %9073 = vmatpush1.bf16.msra.mxu1 %v12742_v51  ;;  %v12780_v48 = vld [vmem:[%s17137_s1 + $0xd84] ss:$68 sps:$4 sm:$0xff]   ;;  %v12775_v51 = vld [vmem:[%s17137_s1 + $0xd78] ss:$68 sps:$4 sm:$0xff]  }
 0x354   : > { %8790 = vmatprep.subr.bf16.mxu0 %v12747_v54  ;;  %9074 = vmatprep.subr.bf16.mxu1 %v12750_v29  ;;  %v12778_v54 = vld [vmem:[%s17137_s1 + $0xd80] ss:$68 sps:$4 sm:$0xff]  }
 0x355   : > { %v12783_v29 = vld [vmem:[%s17137_s1 + $0xe04] ss:$68 sps:$4 sm:$0xff]  }
 0x356   : > { %8764 = vmatmul.mubr.bf16.gmra.mrb[56].mxu0 %v13412_v39  ;;  %9048 = vmatmul.mubr.bf16.gmra.mrb[56].mxu1 %v13412_v39 }
 0x357   : > { %8791 = vmatpush1.bf16.msra.mxu0 %v12745_v35  ;;  %9075 = vmatpush1.bf16.msra.mxu1 %v12748_v36  ;;  %v12786_v35 = vld [vmem:[%s17137_s1 + $0xe0c] ss:$68 sps:$4 sm:$0xff]   ;;  %v12781_v36 = vld [vmem:[%s17137_s1 + $0xe00] ss:$68 sps:$4 sm:$0xff]  }
 0x358   : > { %8792 = vmatprep.subr.bf16.mxu0 %v12753_v41  ;;  %9076 = vmatprep.subr.bf16.mxu1 %v12756_v19  ;;  %v12784_v41 = vld [vmem:[%s17137_s1 + $0xe08] ss:$68 sps:$4 sm:$0xff]  }
 0x359   : > { %8773 = vmatprep.mubr.bf16.mxu0 %v13427_v45  ;;  %9057 = vmatprep.mubr.bf16.mxu1 %v13427_v45  ;;  %v12789_v19 = vld [vmem:[%s17137_s1 + $0xe8c] ss:$68 sps:$4 sm:$0xff]  }
 0x35b   : > { %8793 = vmatpush1.bf16.msra.mxu0 %v12751_v21  ;;  %9077 = vmatpush1.bf16.msra.mxu1 %v12754_v44  ;;  %v12792_v21 = vld [vmem:[%s17137_s1 + $0xe94] ss:$68 sps:$4 sm:$0xff]   ;;  %v12787_v44 = vld [vmem:[%s17137_s1 + $0xe88] ss:$68 sps:$4 sm:$0xff]  }
 0x35c   : > { %8794 = vmatprep.subr.bf16.mxu0 %v12759_v46  ;;  %9078 = vmatprep.subr.bf16.mxu1 %v12762_v57  ;;  %v12790_v46 = vld [vmem:[%s17137_s1 + $0xe90] ss:$68 sps:$4 sm:$0xff]  }
 0x35d   : > { %v12795_v57 = vld [vmem:[%s17137_s1 + $0xf14] ss:$68 sps:$4 sm:$0xff]  }
 0x35e   : > { %8774 = vmatmul.mubr.bf16.gmra.mrb[60].mxu0 %v13446_v52  ;;  %9058 = vmatmul.mubr.bf16.gmra.mrb[60].mxu1 %v13446_v52 }
 0x35f   : > { %8795 = vmatpush1.bf16.msra.mxu0 %v12757_v59  ;;  %9079 = vmatpush1.bf16.msra.mxu1 %v12760_v1  ;;  %v12798_v59 = vld [vmem:[%s17137_s1 + $0xf1c] ss:$68 sps:$4 sm:$0xff]   ;;  %v12793_v1 = vld [vmem:[%s17137_s1 + $0xf10] ss:$68 sps:$4 sm:$0xff]  }
 0x360   : > { %8796 = vmatprep.subr.bf16.mxu0 %v12765_v22  ;;  %9080 = vmatprep.subr.bf16.mxu1 %v12768_v25  ;;  %v12796_v22 = vld [vmem:[%s17137_s1 + $0xf18] ss:$68 sps:$4 sm:$0xff]  }
 0x361   : > { %8814 = vmatprep.mubr.bf16.mxu0 %v13453_v56  ;;  %9098 = vmatprep.mubr.bf16.mxu1 %v13453_v56  ;;  %v12801_v25 = vld [vmem:[%s17137_s1 + $0xf9c] ss:$68 sps:$4 sm:$0xff]  }
 0x363   : > { %8797 = vmatpush1.bf16.msra.mxu0 %v12763_v63  ;;  %9081 = vmatpush1.bf16.msra.mxu1 %v12766_v0  ;;  %v12804_v63 = vld [vmem:[%s17137_s1 + $0xfa4] ss:$68 sps:$4 sm:$0xff]   ;;  %v12799_v0 = vld [vmem:[%s17137_s1 + $0xf98] ss:$68 sps:$4 sm:$0xff]  }
 0x364   : > { %8798 = vmatprep.subr.bf16.mxu0 %v12771_v2  ;;  %9082 = vmatprep.subr.bf16.mxu1 %v12774_v8  ;;  %v12802_v2 = vld [vmem:[%s17137_s1 + $0xfa0] ss:$68 sps:$4 sm:$0xff]  }
 0x365   : > { %v12807_v8 = vld [vmem:[%s17137_s1 + $0x1024] ss:$68 sps:$4 sm:$0xff]  }
 0x367   : > { %8799 = vmatpush1.bf16.msra.mxu0 %v12769_v10  ;;  %9083 = vmatpush1.bf16.msra.mxu1 %v12772_v26  ;;  %v12810_v10 = vld [vmem:[%s17137_s1 + $0x102c] ss:$68 sps:$4 sm:$0xff]   ;;  %v12805_v26 = vld [vmem:[%s17137_s1 + $0x1020] ss:$68 sps:$4 sm:$0xff]  }
 0x368   : > { %8800 = vmatprep.subr.bf16.mxu0 %v12777_v47  ;;  %9084 = vmatprep.subr.bf16.mxu1 %v12780_v48  ;;  %v12808_v47 = vld [vmem:[%s17137_s1 + $0x1028] ss:$68 sps:$4 sm:$0xff]  }
 0x369   : > { %v12813_v48 = vld [vmem:[%s17137_s1 + $0x10ac] ss:$68 sps:$4 sm:$0xff]  }
 0x36b   : > { %8801 = vmatpush1.bf16.msra.mxu0 %v12775_v51  ;;  %9085 = vmatpush1.bf16.msra.mxu1 %v12778_v54  ;;  %v12816_v51 = vld [vmem:[%s17137_s1 + $0x10b4] ss:$68 sps:$4 sm:$0xff]   ;;  %v12811_v54 = vld [vmem:[%s17137_s1 + $0x10a8] ss:$68 sps:$4 sm:$0xff]  }
 0x36c   : > { %8802 = vmatprep.subr.bf16.mxu0 %v12783_v29  ;;  %9086 = vmatprep.subr.bf16.mxu1 %v12786_v35  ;;  %v12814_v29 = vld [vmem:[%s17137_s1 + $0x10b0] ss:$68 sps:$4 sm:$0xff]  }
 0x36d   : > { %v12819_v35 = vld [vmem:[%s17137_s1 + $0x1134] ss:$68 sps:$4 sm:$0xff]  }
 0x36f   : > { %8803 = vmatpush1.bf16.msra.mxu0 %v12781_v36  ;;  %9087 = vmatpush1.bf16.msra.mxu1 %v12784_v41  ;;  %v12822_v36 = vld [vmem:[%s17137_s1 + $0x113c] ss:$68 sps:$4 sm:$0xff]   ;;  %v12817_v41 = vld [vmem:[%s17137_s1 + $0x1130] ss:$68 sps:$4 sm:$0xff]  }
 0x370   : > { %8804 = vmatprep.subr.bf16.mxu0 %v12789_v19  ;;  %9088 = vmatprep.subr.bf16.mxu1 %v12792_v21  ;;  %v12820_v19 = vld [vmem:[%s17137_s1 + $0x1138] ss:$68 sps:$4 sm:$0xff]  }
 0x371   : > { %v12825_v21 = vld [vmem:[%s17137_s1 + $0x11bc] ss:$68 sps:$4 sm:$0xff]  }
 0x373   : > { %8805 = vmatpush1.bf16.msra.mxu0 %v12787_v44  ;;  %9089 = vmatpush1.bf16.msra.mxu1 %v12790_v46  ;;  %v12828_v44 = vld [vmem:[%s17137_s1 + $0x11c4] ss:$68 sps:$4 sm:$0xff]   ;;  %v12823_v46 = vld [vmem:[%s17137_s1 + $0x11b8] ss:$68 sps:$4 sm:$0xff]  }
 0x374   : > { %8806 = vmatprep.subr.bf16.mxu0 %v12795_v57  ;;  %9090 = vmatprep.subr.bf16.mxu1 %v12798_v59  ;;  %v12826_v57 = vld [vmem:[%s17137_s1 + $0x11c0] ss:$68 sps:$4 sm:$0xff]  }
 0x375   : > { %v12831_v59 = vld [vmem:[%s17137_s1 + $0x1244] ss:$68 sps:$4 sm:$0xff]  }
 0x377   : > { %8807 = vmatpush1.bf16.msra.mxu0 %v12793_v1  ;;  %9091 = vmatpush1.bf16.msra.mxu1 %v12796_v22  ;;  %v12834_v1 = vld [vmem:[%s17137_s1 + $0x124c] ss:$68 sps:$4 sm:$0xff]   ;;  %v12829_v22 = vld [vmem:[%s17137_s1 + $0x1240] ss:$68 sps:$4 sm:$0xff]  }
 0x378   : > { %8808 = vmatprep.subr.bf16.mxu0 %v12801_v25  ;;  %9092 = vmatprep.subr.bf16.mxu1 %v12804_v63  ;;  %v12832_v25 = vld [vmem:[%s17137_s1 + $0x1248] ss:$68 sps:$4 sm:$0xff]  }
 0x379   : > { %v12837_v63 = vld [vmem:[%s17137_s1 + $0x12cc] ss:$68 sps:$4 sm:$0xff]  }
 0x37b   : > { %8809 = vmatpush1.bf16.msra.mxu0 %v12799_v0  ;;  %9093 = vmatpush1.bf16.msra.mxu1 %v12802_v2  ;;  %v12840_v0 = vld [vmem:[%s17137_s1 + $0x12d4] ss:$68 sps:$4 sm:$0xff]   ;;  %v12835_v2 = vld [vmem:[%s17137_s1 + $0x12c8] ss:$68 sps:$4 sm:$0xff]  }
 0x37c   : > { %8810 = vmatprep.subr.bf16.mxu0 %v12807_v8  ;;  %9094 = vmatprep.subr.bf16.mxu1 %v12810_v10  ;;  %v12838_v8 = vld [vmem:[%s17137_s1 + $0x12d0] ss:$68 sps:$4 sm:$0xff]  }
 0x37d   : > { %v12843_v10 = vld [vmem:[%s17137_s1 + $0x1354] ss:$68 sps:$4 sm:$0xff]  }
 0x37f   : > { %8811 = vmatpush1.bf16.msra.mxu0 %v12805_v26  ;;  %9095 = vmatpush1.bf16.msra.mxu1 %v12808_v47  ;;  %v12846_v26 = vld [vmem:[%s17137_s1 + $0x135c] ss:$68 sps:$4 sm:$0xff]   ;;  %v12841_v47 = vld [vmem:[%s17137_s1 + $0x1350] ss:$68 sps:$4 sm:$0xff]  }
 0x380   : > { %8812 = vmatprep.subr.bf16.mxu0 %v12813_v48  ;;  %9096 = vmatprep.subr.bf16.mxu1 %v12816_v51  ;;  %v12844_v48 = vld [vmem:[%s17137_s1 + $0x1358] ss:$68 sps:$4 sm:$0xff]  }
 0x381   : > { %v12849_v51 = vld [vmem:[%s17137_s1 + $0x13dc] ss:$68 sps:$4 sm:$0xff]  }
 0x383   : > { %8813 = vmatpush1.bf16.msra.mxu0 %v12811_v54  ;;  %9097 = vmatpush1.bf16.msra.mxu1 %v12814_v29  ;;  %v12852_v54 = vld [vmem:[%s17137_s1 + $0x13e4] ss:$68 sps:$4 sm:$0xff]   ;;  %v12847_v29 = vld [vmem:[%s17137_s1 + $0x13d8] ss:$68 sps:$4 sm:$0xff]  }
 0x384   : > { %8853 = vmatprep.subr.bf16.mxu0 %v12819_v35  ;;  %9137 = vmatprep.subr.bf16.mxu1 %v12822_v36  ;;  %v12850_v35 = vld [vmem:[%s17137_s1 + $0x13e0] ss:$68 sps:$4 sm:$0xff]  }
 0x385   : > { %v12855_v36 = vld [vmem:[%s17137_s1 + $0x1464] ss:$68 sps:$4 sm:$0xff]  }
 0x386   : > { %8815 = vmatmul.mubr.bf16.vlgmr.msra.gmra.mrb[48].mxu0 %v13566_v34  ;;  %9099 = vmatmul.mubr.bf16.vlgmr.msra.gmra.mrb[48].mxu1 %v13566_v34 }
 0x387   : > { %8854 = vmatpush1.bf16.msra.mxu0 %v12817_v41  ;;  %9138 = vmatpush1.bf16.msra.mxu1 %v12820_v19  ;;  %v12858_v41 = vld [vmem:[%s17137_s1 + $0x146c] ss:$68 sps:$4 sm:$0xff]   ;;  %v12853_v19 = vld [vmem:[%s17137_s1 + $0x1460] ss:$68 sps:$4 sm:$0xff]  }
 0x388   : > { %8855 = vmatprep.subr.bf16.mxu0 %v12825_v21  ;;  %9139 = vmatprep.subr.bf16.mxu1 %v12828_v44  ;;  %v12856_v21 = vld [vmem:[%s17137_s1 + $0x1468] ss:$68 sps:$4 sm:$0xff]  }
 0x389   : > { %8824 = vmatprep.mubr.bf16.mxu0 %v13585_v43  ;;  %9108 = vmatprep.mubr.bf16.mxu1 %v13585_v43  ;;  %v12861_v44 = vld [vmem:[%s17137_s1 + $0x14ec] ss:$68 sps:$4 sm:$0xff]  }
 0x38b   : > { %8856 = vmatpush1.bf16.msra.mxu0 %v12823_v46  ;;  %9140 = vmatpush1.bf16.msra.mxu1 %v12826_v57  ;;  %v12864_v46 = vld [vmem:[%s17137_s1 + $0x14f4] ss:$68 sps:$4 sm:$0xff]   ;;  %v12859_v57 = vld [vmem:[%s17137_s1 + $0x14e8] ss:$68 sps:$4 sm:$0xff]  }
 0x38c   : > { %8857 = vmatprep.subr.bf16.mxu0 %v12831_v59  ;;  %9141 = vmatprep.subr.bf16.mxu1 %v12834_v1  ;;  %v12862_v59 = vld [vmem:[%s17137_s1 + $0x14f0] ss:$68 sps:$4 sm:$0xff]  }
 0x38d   : > { %v12867_v1 = vld [vmem:[%s17137_s1 + $0x1574] ss:$68 sps:$4 sm:$0xff]  }
 0x38e   : > { %8825 = vmatmul.mubr.bf16.gmra.mrb[52].mxu0 %v13605_v53  ;;  %9109 = vmatmul.mubr.bf16.gmra.mrb[52].mxu1 %v13605_v53 }
 0x38f   : > { %8858 = vmatpush1.bf16.msra.mxu0 %v12829_v22  ;;  %9142 = vmatpush1.bf16.msra.mxu1 %v12832_v25  ;;  %v12870_v22 = vld [vmem:[%s17137_s1 + $0x157c] ss:$68 sps:$4 sm:$0xff]   ;;  %v12865_v25 = vld [vmem:[%s17137_s1 + $0x1570] ss:$68 sps:$4 sm:$0xff]  }
 0x390   : > { %8859 = vmatprep.subr.bf16.mxu0 %v12837_v63  ;;  %9143 = vmatprep.subr.bf16.mxu1 %v12840_v0  ;;  %v12868_v63 = vld [vmem:[%s17137_s1 + $0x1578] ss:$68 sps:$4 sm:$0xff]  }
 0x391   : > { %8834 = vmatprep.mubr.bf16.mxu0 %v13621_v61  ;;  %9118 = vmatprep.mubr.bf16.mxu1 %v13621_v61  ;;  %v12873_v0 = vld [vmem:[%s17137_s1 + $0x15fc] ss:$68 sps:$4 sm:$0xff]  }
 0x393   : > { %8860 = vmatpush1.bf16.msra.mxu0 %v12835_v2  ;;  %9144 = vmatpush1.bf16.msra.mxu1 %v12838_v8  ;;  %v12876_v2 = vld [vmem:[%s17137_s1 + $0x1604] ss:$68 sps:$4 sm:$0xff]   ;;  %v12871_v8 = vld [vmem:[%s17137_s1 + $0x15f8] ss:$68 sps:$4 sm:$0xff]  }
 0x394   : > { %8861 = vmatprep.subr.bf16.mxu0 %v12843_v10  ;;  %9145 = vmatprep.subr.bf16.mxu1 %v12846_v26  ;;  %v12874_v10 = vld [vmem:[%s17137_s1 + $0x1600] ss:$68 sps:$4 sm:$0xff]  }
 0x395   : > { %v12879_v26 = vld [vmem:[%s17137_s1 + $0x1684] ss:$68 sps:$4 sm:$0xff]  }
 0x396   : > { %8835 = vmatmul.mubr.bf16.gmra.mrb[56].mxu0 %v13644_v5  ;;  %9119 = vmatmul.mubr.bf16.gmra.mrb[56].mxu1 %v13644_v5 }
 0x397   : > { %8862 = vmatpush1.bf16.msra.mxu0 %v12841_v47  ;;  %9146 = vmatpush1.bf16.msra.mxu1 %v12844_v48  ;;  %v12882_v47 = vld [vmem:[%s17137_s1 + $0x168c] ss:$68 sps:$4 sm:$0xff]   ;;  %v12877_v48 = vld [vmem:[%s17137_s1 + $0x1680] ss:$68 sps:$4 sm:$0xff]  }
 0x398   : > { %8863 = vmatprep.subr.bf16.mxu0 %v12849_v51  ;;  %9147 = vmatprep.subr.bf16.mxu1 %v12852_v54  ;;  %v12880_v51 = vld [vmem:[%s17137_s1 + $0x1688] ss:$68 sps:$4 sm:$0xff]  }
 0x399   : > { %8844 = vmatprep.mubr.bf16.mxu0 %v13656_v11  ;;  %9128 = vmatprep.mubr.bf16.mxu1 %v13656_v11  ;;  %v12885_v54 = vld [vmem:[%s17137_s1 + $0x170c] ss:$68 sps:$4 sm:$0xff]  }
 0x39b   : > { %8864 = vmatpush1.bf16.msra.mxu0 %v12847_v29  ;;  %9148 = vmatpush1.bf16.msra.mxu1 %v12850_v35  ;;  %v12888_v29 = vld [vmem:[%s17137_s1 + $0x1714] ss:$68 sps:$4 sm:$0xff]   ;;  %v12883_v35 = vld [vmem:[%s17137_s1 + $0x1708] ss:$68 sps:$4 sm:$0xff]  }
 0x39c   : > { %8865 = vmatprep.subr.bf16.mxu0 %v12855_v36  ;;  %9149 = vmatprep.subr.bf16.mxu1 %v12858_v41  ;;  %v12886_v36 = vld [vmem:[%s17137_s1 + $0x1710] ss:$68 sps:$4 sm:$0xff]  }
 0x39d   : > { %v12891_v41 = vld [vmem:[%s17137_s1 + $0x1794] ss:$68 sps:$4 sm:$0xff]  }
 0x39e   : > { %8845 = vmatmul.mubr.bf16.gmra.mrb[60].mxu0 %v13678_v18  ;;  %9129 = vmatmul.mubr.bf16.gmra.mrb[60].mxu1 %v13678_v18 }
 0x39f   : > { %8866 = vmatpush1.bf16.msra.mxu0 %v12853_v19  ;;  %9150 = vmatpush1.bf16.msra.mxu1 %v12856_v21  ;;  %v12894_v19 = vld [vmem:[%s17137_s1 + $0x179c] ss:$68 sps:$4 sm:$0xff]   ;;  %v12889_v21 = vld [vmem:[%s17137_s1 + $0x1790] ss:$68 sps:$4 sm:$0xff]  }
 0x3a0   : > { %8867 = vmatprep.subr.bf16.mxu0 %v12861_v44  ;;  %9151 = vmatprep.subr.bf16.mxu1 %v12864_v46  ;;  %v12892_v44 = vld [vmem:[%s17137_s1 + $0x1798] ss:$68 sps:$4 sm:$0xff]  }
 0x3a1   : > { %8885 = vmatprep.mubr.bf16.mxu0 %v13688_v24  ;;  %9169 = vmatprep.mubr.bf16.mxu1 %v13688_v24  ;;  %v12897_v46 = vld [vmem:[%s17137_s1 + $0x181c] ss:$68 sps:$4 sm:$0xff]  }
 0x3a3   : > { %8868 = vmatpush1.bf16.msra.mxu0 %v12859_v57  ;;  %9152 = vmatpush1.bf16.msra.mxu1 %v12862_v59  ;;  %v12900_v57 = vld [vmem:[%s17137_s1 + $0x1824] ss:$68 sps:$4 sm:$0xff]   ;;  %v12895_v59 = vld [vmem:[%s17137_s1 + $0x1818] ss:$68 sps:$4 sm:$0xff]  }
 0x3a4   : > { %8869 = vmatprep.subr.bf16.mxu0 %v12867_v1  ;;  %9153 = vmatprep.subr.bf16.mxu1 %v12870_v22  ;;  %v12898_v1 = vld [vmem:[%s17137_s1 + $0x1820] ss:$68 sps:$4 sm:$0xff]  }
 0x3a5   : > { %v12903_v22 = vld [vmem:[%s17137_s1 + $0x18a4] ss:$68 sps:$4 sm:$0xff]  }
 0x3a7   : > { %8870 = vmatpush1.bf16.msra.mxu0 %v12865_v25  ;;  %9154 = vmatpush1.bf16.msra.mxu1 %v12868_v63  ;;  %v12906_v25 = vld [vmem:[%s17137_s1 + $0x18ac] ss:$68 sps:$4 sm:$0xff]   ;;  %v12901_v63 = vld [vmem:[%s17137_s1 + $0x18a0] ss:$68 sps:$4 sm:$0xff]  }
 0x3a8   : > { %8871 = vmatprep.subr.bf16.mxu0 %v12873_v0  ;;  %9155 = vmatprep.subr.bf16.mxu1 %v12876_v2  ;;  %v12904_v0 = vld [vmem:[%s17137_s1 + $0x18a8] ss:$68 sps:$4 sm:$0xff]  }
 0x3a9   : > { %v12909_v2 = vld [vmem:[%s17137_s1 + $0x192c] ss:$68 sps:$4 sm:$0xff]  }
 0x3ab   : > { %8872 = vmatpush1.bf16.msra.mxu0 %v12871_v8  ;;  %9156 = vmatpush1.bf16.msra.mxu1 %v12874_v10  ;;  %v12912_v8 = vld [vmem:[%s17137_s1 + $0x1934] ss:$68 sps:$4 sm:$0xff]   ;;  %v12907_v10 = vld [vmem:[%s17137_s1 + $0x1928] ss:$68 sps:$4 sm:$0xff]  }
 0x3ac   : > { %8873 = vmatprep.subr.bf16.mxu0 %v12879_v26  ;;  %9157 = vmatprep.subr.bf16.mxu1 %v12882_v47  ;;  %v12910_v26 = vld [vmem:[%s17137_s1 + $0x1930] ss:$68 sps:$4 sm:$0xff]  }
 0x3ad   : > { %v12915_v47 = vld [vmem:[%s17137_s1 + $0x19b4] ss:$68 sps:$4 sm:$0xff]  }
 0x3af   : > { %8874 = vmatpush1.bf16.msra.mxu0 %v12877_v48  ;;  %9158 = vmatpush1.bf16.msra.mxu1 %v12880_v51  ;;  %v12918_v48 = vld [vmem:[%s17137_s1 + $0x19bc] ss:$68 sps:$4 sm:$0xff]   ;;  %v12913_v51 = vld [vmem:[%s17137_s1 + $0x19b0] ss:$68 sps:$4 sm:$0xff]  }
 0x3b0   : > { %8875 = vmatprep.subr.bf16.mxu0 %v12885_v54  ;;  %9159 = vmatprep.subr.bf16.mxu1 %v12888_v29  ;;  %v12916_v54 = vld [vmem:[%s17137_s1 + $0x19b8] ss:$68 sps:$4 sm:$0xff]  }
 0x3b1   : > { %v12921_v29 = vld [vmem:[%s17137_s1 + $0x1a3c] ss:$68 sps:$4 sm:$0xff]  }
 0x3b3   : > { %8876 = vmatpush1.bf16.msra.mxu0 %v12883_v35  ;;  %9160 = vmatpush1.bf16.msra.mxu1 %v12886_v36  ;;  %v12924_v35 = vld [vmem:[%s17137_s1 + $0x1a44] ss:$68 sps:$4 sm:$0xff]   ;;  %v12919_v36 = vld [vmem:[%s17137_s1 + $0x1a38] ss:$68 sps:$4 sm:$0xff]  }
 0x3b4   : > { %8877 = vmatprep.subr.bf16.mxu0 %v12891_v41  ;;  %9161 = vmatprep.subr.bf16.mxu1 %v12894_v19  ;;  %v12922_v41 = vld [vmem:[%s17137_s1 + $0x1a40] ss:$68 sps:$4 sm:$0xff]  }
 0x3b5   : > { %v12927_v19 = vld [vmem:[%s17137_s1 + $0x1ac4] ss:$68 sps:$4 sm:$0xff]  }
 0x3b7   : > { %8878 = vmatpush1.bf16.msra.mxu0 %v12889_v21  ;;  %9162 = vmatpush1.bf16.msra.mxu1 %v12892_v44  ;;  %v12930_v21 = vld [vmem:[%s17137_s1 + $0x1acc] ss:$68 sps:$4 sm:$0xff]   ;;  %v12925_v44 = vld [vmem:[%s17137_s1 + $0x1ac0] ss:$68 sps:$4 sm:$0xff]  }
 0x3b8   : > { %8879 = vmatprep.subr.bf16.mxu0 %v12897_v46  ;;  %9163 = vmatprep.subr.bf16.mxu1 %v12900_v57  ;;  %v12928_v46 = vld [vmem:[%s17137_s1 + $0x1ac8] ss:$68 sps:$4 sm:$0xff]  }
 0x3b9   : > { %v12933_v57 = vld [vmem:[%s17137_s1 + $0x1b4c] ss:$68 sps:$4 sm:$0xff]  }
 0x3bb   : > { %8880 = vmatpush1.bf16.msra.mxu0 %v12895_v59  ;;  %9164 = vmatpush1.bf16.msra.mxu1 %v12898_v1  ;;  %v12936_v59 = vld [vmem:[%s17137_s1 + $0x1b54] ss:$68 sps:$4 sm:$0xff]   ;;  %v12931_v1 = vld [vmem:[%s17137_s1 + $0x1b48] ss:$68 sps:$4 sm:$0xff]  }
 0x3bc   : > { %8881 = vmatprep.subr.bf16.mxu0 %v12903_v22  ;;  %9165 = vmatprep.subr.bf16.mxu1 %v12906_v25  ;;  %v12934_v22 = vld [vmem:[%s17137_s1 + $0x1b50] ss:$68 sps:$4 sm:$0xff]  }
 0x3bd   : > { %v12939_v25 = vld [vmem:[%s17137_s1 + $0x1bd4] ss:$68 sps:$4 sm:$0xff]  }
 0x3bf   : > { %8882 = vmatpush1.bf16.msra.mxu0 %v12901_v63  ;;  %9166 = vmatpush1.bf16.msra.mxu1 %v12904_v0  ;;  %v12942_v63 = vld [vmem:[%s17137_s1 + $0x1bdc] ss:$68 sps:$4 sm:$0xff]   ;;  %v12937_v0 = vld [vmem:[%s17137_s1 + $0x1bd0] ss:$68 sps:$4 sm:$0xff]  }
 0x3c0   : > { %8883 = vmatprep.subr.bf16.mxu0 %v12909_v2  ;;  %9167 = vmatprep.subr.bf16.mxu1 %v12912_v8  ;;  %v12940_v2 = vld [vmem:[%s17137_s1 + $0x1bd8] ss:$68 sps:$4 sm:$0xff]   ;;  %v16585_v8 = vld [vmem:[%s17138_s2 + $0x8] sm:$0xff] }
 0x3c3   : > { %8884 = vmatpush1.bf16.msra.mxu0 %v12907_v10  ;;  %9168 = vmatpush1.bf16.msra.mxu1 %v12910_v26  ;;  %v12945_v10 = vld [vmem:[%s17137_s1 + $0x1c5c] ss:$68 sps:$4 sm:$0xff]   ;;  %v12948_v26 = vld [vmem:[%s17137_s1 + $0x1c64] ss:$68 sps:$4 sm:$0xff]  }
 0x3c4   : > { %8924 = vmatprep.subr.bf16.mxu0 %v12915_v47  ;;  %9208 = vmatprep.subr.bf16.mxu1 %v12918_v48  ;;  %v16596_v47 = vrot.slane %v16585_v8, %v1420_v3  ;;  %v16601_v48 = vrot.slane %v16585_v8, %v1428_v7  ;;  %v16613_v3 = vrot.slane %v16585_v8, %v1432_v17  ;;  %v12943_v7 = vld [vmem:[%s17137_s1 + $0x1c58] ss:$68 sps:$4 sm:$0xff]  }
 0x3c6   : > { %8886 = vmatmul.mubr.bf16.vlgmr.msra.gmra.mrb[48].mxu0 %v13804_v13  ;;  %9170 = vmatmul.mubr.bf16.vlgmr.msra.gmra.mrb[48].mxu1 %v13804_v13 }
 0x3c7   : > { %8925 = vmatpush1.bf16.msra.mxu0 %v12913_v51  ;;  %9209 = vmatpush1.bf16.msra.mxu1 %v12916_v54  ;;  %v16608_v51 = vrot.slane %v16585_v8, %v1424_v12  ;;  %v12946_v54 = vld [vmem:[%s17137_s1 + $0x1c60] ss:$68 sps:$4 sm:$0xff]  }
 0x3c8   : > { %8926 = vmatprep.subr.bf16.mxu0 %v12921_v29  ;;  %9210 = vmatprep.subr.bf16.mxu1 %v12924_v35  ;;  %v12951_v12 = vld [vmem:[%s17137_s1 + $0x1ce4] ss:$68 sps:$4 sm:$0xff]   ;;  %v12954_v29 = vld [vmem:[%s17137_s1 + $0x1cec] ss:$68 sps:$4 sm:$0xff]  }
 0x3c9   : > { %8895 = vmatprep.mubr.bf16.mxu0 %v13823_v23  ;;  %9179 = vmatprep.mubr.bf16.mxu1 %v13823_v23 }
 0x3cb   : > { %8927 = vmatpush1.bf16.msra.mxu0 %v12919_v36  ;;  %9211 = vmatpush1.bf16.msra.mxu1 %v12922_v41 }
 0x3cc   : > { %8928 = vmatprep.subr.bf16.mxu0 %v12927_v19  ;;  %9212 = vmatprep.subr.bf16.mxu1 %v12930_v21 }
 0x3ce   : > { %8896 = vmatmul.mubr.bf16.gmra.mrb[52].mxu0 %v13841_v32  ;;  %9180 = vmatmul.mubr.bf16.gmra.mrb[52].mxu1 %v13841_v32 }
 0x3cf   : > { %8929 = vmatpush1.bf16.msra.mxu0 %v12925_v44  ;;  %9213 = vmatpush1.bf16.msra.mxu1 %v12928_v46 }
 0x3d0   : > { %8930 = vmatprep.subr.bf16.mxu0 %v12933_v57  ;;  %9214 = vmatprep.subr.bf16.mxu1 %v12936_v59 }
 0x3d1   : > { %8905 = vmatprep.mubr.bf16.mxu0 %v13859_v42  ;;  %9189 = vmatprep.mubr.bf16.mxu1 %v13859_v42 }
 0x3d3   : > { %8931 = vmatpush1.bf16.msra.mxu0 %v12931_v1  ;;  %9215 = vmatpush1.bf16.msra.mxu1 %v12934_v22  ;;  %v12949_v1 = vld [vmem:[%s17137_s1 + $0x1ce0] ss:$68 sps:$4 sm:$0xff]   ;;  %v12952_v22 = vld [vmem:[%s17137_s1 + $0x1ce8] ss:$68 sps:$4 sm:$0xff]  }
 0x3d4   : > { %8932 = vmatprep.subr.bf16.mxu0 %v12939_v25  ;;  %9216 = vmatprep.subr.bf16.mxu1 %v12942_v63 }
 0x3d6   : > { %8906 = vmatmul.mubr.bf16.gmra.mrb[56].mxu0 %v13882_v55  ;;  %9190 = vmatmul.mubr.bf16.gmra.mrb[56].mxu1 %v13882_v55 }
 0x3d7   : > { %8933 = vmatpush1.bf16.msra.mxu0 %v12937_v0  ;;  %9217 = vmatpush1.bf16.msra.mxu1 %v12940_v2 }
 0x3d8   : > { %8934 = vmatprep.subr.bf16.mxu0 %v12945_v10  ;;  %9218 = vmatprep.subr.bf16.mxu1 %v12948_v26  ;;  %v12957_v10 = vld [vmem:[%s17137_s1 + $0x1d6c] ss:$68 sps:$4 sm:$0xff]   ;;  %v12960_v26 = vld [vmem:[%s17137_s1 + $0x1d74] ss:$68 sps:$4 sm:$0xff]  }
 0x3d9   : > { %v8390_v17 = vpop.f32.mrb[32].mxu0  ;;  %v8674_v35 = vpop.f32.mrb[32].mxu1  ;;  %8915 = vmatprep.mubr.bf16.mxu0 %v13894_v62  ;;  %9199 = vmatprep.mubr.bf16.mxu1 %v13894_v62 }
 0x3da   : > { %v11023_v36 = vadd.f32 %v8390_v17, %v16596_v47  ;;  %v11037_v41 = vadd.f32 %v8674_v35, %v16601_v48  ;;  %v8392_v19 = vpop.f32.mrb[33].mxu0  ;;  %v8676_v21 = vpop.f32.mrb[33].mxu1  ;;  %v12963_v17 = vld [vmem:[%s17137_s1 + $0x1df4] ss:$68 sps:$4 sm:$0xff]   ;;  %v12966_v35 = vld [vmem:[%s17137_s1 + $0x1dfc] ss:$68 sps:$4 sm:$0xff]  }
 0x3db   : > { %v11024_v44 = vadd.f32 %v8392_v19, %v16608_v51  ;;  %v11038_v46 = vadd.f32 %v8676_v21, %v16613_v3  ;;  %v8394_v57 = vpop.f32.mrb[34].mxu0  ;;  %v8678_v59 = vpop.f32.mrb[34].mxu1  ;;  %8935 = vmatpush1.bf16.msra.mxu0 %v12943_v7  ;;  %9219 = vmatpush1.bf16.msra.mxu1 %v12946_v54 }
 0x3dc   : > { %9543 = vst [vmem:[%s14801_s14 + $0x40] sm:$0xff] %v11023_v36  ;;  %9545 = vst [vmem:[%s14801_s14 + $0x50] sm:$0xff] %v11037_v41  ;;  %v11025_v25 = vadd.f32 %v8394_v57, %v16596_v47  ;;  %v11039_v63 = vadd.f32 %v8678_v59, %v16601_v48  ;;  %v8396_v0 = vpop.f32.mrb[35].mxu0  ;;  %v8680_v2 = vpop.f32.mrb[35].mxu1  ;;  %8936 = vmatprep.subr.bf16.mxu0 %v12951_v12  ;;  %9220 = vmatprep.subr.bf16.mxu1 %v12954_v29  ;;  %v12955_v12 = vld [vmem:[%s17137_s1 + $0x1d68] ss:$68 sps:$4 sm:$0xff]  }
 0x3dd   : > { %9544 = vst [vmem:[%s14801_s14 + $0x48] sm:$0xff] %v11024_v44  ;;  %9546 = vst [vmem:[%s14801_s14 + $0x58] sm:$0xff] %v11038_v46  ;;  %v11026_v7 = vadd.f32 %v8396_v0, %v16608_v51  ;;  %v11040_v54 = vadd.f32 %v8680_v2, %v16613_v3  ;;  %v12958_v29 = vld [vmem:[%s17137_s1 + $0x1d70] ss:$68 sps:$4 sm:$0xff]  }
 0x3de   : > { %9560 = vst [vmem:[%s14801_s14 + $0xc8] sm:$0xff] %v11025_v25  ;;  %9562 = vst [vmem:[%s14801_s14 + $0xd8] sm:$0xff] %v11039_v63  ;;  %8916 = vmatmul.mubr.bf16.gmra.mrb[60].mxu0 %v13916_v6  ;;  %9200 = vmatmul.mubr.bf16.gmra.mrb[60].mxu1 %v13916_v6  ;;  %v12961_v25 = vld [vmem:[%s17137_s1 + $0x1df0] ss:$68 sps:$4 sm:$0xff]   ;;  %v12964_v63 = vld [vmem:[%s17137_s1 + $0x1df8] ss:$68 sps:$4 sm:$0xff]  }
 0x3df   : > { %9561 = vst [vmem:[%s14801_s14 + $0xd0] sm:$0xff] %v11026_v7  ;;  %9563 = vst [vmem:[%s14801_s14 + $0xe0] sm:$0xff] %v11040_v54  ;;  %8937 = vmatpush1.bf16.msra.mxu0 %v12949_v1  ;;  %9221 = vmatpush1.bf16.msra.mxu1 %v12952_v22  ;;  %v12969_v7 = vld [vmem:[%s17137_s1 + $0x1e7c] ss:$68 sps:$4 sm:$0xff]   ;;  %v12972_v54 = vld [vmem:[%s17137_s1 + $0x1e84] ss:$68 sps:$4 sm:$0xff]  }
 0x3e0   : > { %8938 = vmatprep.subr.bf16.mxu0 %v12957_v10  ;;  %9222 = vmatprep.subr.bf16.mxu1 %v12960_v26 }
 0x3e1   : > { %v8400_v36 = vpop.f32.mrb[36].mxu0  ;;  %v8684_v41 = vpop.f32.mrb[36].mxu1  ;;  %8956 = vmatprep.mubr.bf16.mxu0 %v13926_v14  ;;  %9240 = vmatprep.mubr.bf16.mxu1 %v13926_v14 }
 0x3e2   : > { %v11027_v19 = vadd.f32 %v8400_v36, %v16596_v47  ;;  %v11041_v21 = vadd.f32 %v8684_v41, %v16601_v48  ;;  %v8402_v44 = vpop.f32.mrb[37].mxu0  ;;  %v8686_v46 = vpop.f32.mrb[37].mxu1  ;;  %v12975_v36 = vld [vmem:[%s17137_s1 + $0x1f04] ss:$68 sps:$4 sm:$0xff]   ;;  %v12978_v41 = vld [vmem:[%s17137_s1 + $0x1f0c] ss:$68 sps:$4 sm:$0xff]  }
 0x3e3   : > { %v11028_v57 = vadd.f32 %v8402_v44, %v16608_v51  ;;  %v11042_v59 = vadd.f32 %v8686_v46, %v16613_v3  ;;  %v8404_v1 = vpop.f32.mrb[38].mxu0  ;;  %v8688_v22 = vpop.f32.mrb[38].mxu1  ;;  %8939 = vmatpush1.bf16.msra.mxu0 %v12955_v12  ;;  %9223 = vmatpush1.bf16.msra.mxu1 %v12958_v29 }
 0x3e4   : > { %9577 = vst [vmem:[%s14801_s14 + $0x150] sm:$0xff] %v11027_v19  ;;  %9579 = vst [vmem:[%s14801_s14 + $0x160] sm:$0xff] %v11041_v21  ;;  %v11029_v0 = vadd.f32 %v8404_v1, %v16596_v47  ;;  %v11043_v2 = vadd.f32 %v8688_v22, %v16601_v48  ;;  %v8406_v10 = vpop.f32.mrb[39].mxu0  ;;  %v8690_v26 = vpop.f32.mrb[39].mxu1  ;;  %8940 = vmatprep.subr.bf16.mxu0 %v12963_v17  ;;  %9224 = vmatprep.subr.bf16.mxu1 %v12966_v35  ;;  %v12967_v17 = vld [vmem:[%s17137_s1 + $0x1e78] ss:$68 sps:$4 sm:$0xff]  }
 0x3e5   : > { %9578 = vst [vmem:[%s14801_s14 + $0x158] sm:$0xff] %v11028_v57  ;;  %9580 = vst [vmem:[%s14801_s14 + $0x168] sm:$0xff] %v11042_v59  ;;  %v11030_v12 = vadd.f32 %v8406_v10, %v16608_v51  ;;  %v11044_v29 = vadd.f32 %v8690_v26, %v16613_v3  ;;  %v12970_v35 = vld [vmem:[%s17137_s1 + $0x1e80] ss:$68 sps:$4 sm:$0xff]  }
 0x3e6   : > { %9594 = vst [vmem:[%s14801_s14 + $0x1d8] sm:$0xff] %v11029_v0  ;;  %9596 = vst [vmem:[%s14801_s14 + $0x1e8] sm:$0xff] %v11043_v2  ;;  %v12973_v0 = vld [vmem:[%s17137_s1 + $0x1f00] ss:$68 sps:$4 sm:$0xff]   ;;  %v12976_v2 = vld [vmem:[%s17137_s1 + $0x1f08] ss:$68 sps:$4 sm:$0xff]  }
 0x3e7   : > { %9595 = vst [vmem:[%s14801_s14 + $0x1e0] sm:$0xff] %v11030_v12  ;;  %9597 = vst [vmem:[%s14801_s14 + $0x1f0] sm:$0xff] %v11044_v29  ;;  %8941 = vmatpush1.bf16.msra.mxu0 %v12961_v25  ;;  %9225 = vmatpush1.bf16.msra.mxu1 %v12964_v63  ;;  %v12981_v12 = vld [vmem:[%s17137_s1 + $0x1f8c] ss:$68 sps:$4 sm:$0xff]   ;;  %v12984_v29 = vld [vmem:[%s17137_s1 + $0x1f94] ss:$68 sps:$4 sm:$0xff]  }
 0x3e8   : > { %8942 = vmatprep.subr.bf16.mxu0 %v12969_v7  ;;  %9226 = vmatprep.subr.bf16.mxu1 %v12972_v54 }
 0x3e9   : > { %v8410_v19 = vpop.f32.mrb[40].mxu0  ;;  %v8694_v21 = vpop.f32.mrb[40].mxu1 }
 0x3ea   : > { %v11031_v44 = vadd.f32 %v8410_v19, %v16596_v47  ;;  %v11045_v46 = vadd.f32 %v8694_v21, %v16601_v48  ;;  %v8412_v57 = vpop.f32.mrb[41].mxu0  ;;  %v8696_v59 = vpop.f32.mrb[41].mxu1  ;;  %v12987_v19 = vld [vmem:[%s17137_s1 + $0x2014] ss:$68 sps:$4 sm:$0xff]   ;;  %v12990_v21 = vld [vmem:[%s17137_s1 + $0x201c] ss:$68 sps:$4 sm:$0xff]  }
 0x3eb   : > { %v11032_v1 = vadd.f32 %v8412_v57, %v16608_v51  ;;  %v11046_v22 = vadd.f32 %v8696_v59, %v16613_v3  ;;  %v8414_v25 = vpop.f32.mrb[42].mxu0  ;;  %v8698_v63 = vpop.f32.mrb[42].mxu1  ;;  %8943 = vmatpush1.bf16.msra.mxu0 %v12967_v17  ;;  %9227 = vmatpush1.bf16.msra.mxu1 %v12970_v35 }
 0x3ec   : > { %9611 = vst [vmem:[%s14801_s14 + $0x260] sm:$0xff] %v11031_v44  ;;  %9613 = vst [vmem:[%s14801_s14 + $0x270] sm:$0xff] %v11045_v46  ;;  %v11033_v10 = vadd.f32 %v8414_v25, %v16596_v47  ;;  %v11047_v26 = vadd.f32 %v8698_v63, %v16601_v48  ;;  %v8416_v7 = vpop.f32.mrb[43].mxu0  ;;  %v8700_v54 = vpop.f32.mrb[43].mxu1  ;;  %8944 = vmatprep.subr.bf16.mxu0 %v12975_v36  ;;  %9228 = vmatprep.subr.bf16.mxu1 %v12978_v41  ;;  %v12979_v36 = vld [vmem:[%s17137_s1 + $0x1f88] ss:$68 sps:$4 sm:$0xff]  }
 0x3ed   : > { %9612 = vst [vmem:[%s14801_s14 + $0x268] sm:$0xff] %v11032_v1  ;;  %9614 = vst [vmem:[%s14801_s14 + $0x278] sm:$0xff] %v11046_v22  ;;  %v11034_v17 = vadd.f32 %v8416_v7, %v16608_v51  ;;  %v11048_v35 = vadd.f32 %v8700_v54, %v16613_v3  ;;  %v12982_v41 = vld [vmem:[%s17137_s1 + $0x1f90] ss:$68 sps:$4 sm:$0xff]   ;;  %v12991_v7 = vld [vmem:[%s17137_s1 + $0x2098] ss:$68 sps:$4 sm:$0xff]  }
 0x3ee   : > { %9628 = vst [vmem:[%s14801_s14 + $0x2e8] sm:$0xff] %v11033_v10  ;;  %9630 = vst [vmem:[%s14801_s14 + $0x2f8] sm:$0xff] %v11047_v26  ;;  %v12985_v10 = vld [vmem:[%s17137_s1 + $0x2010] ss:$68 sps:$4 sm:$0xff]   ;;  %v12996_v26 = vld [vmem:[%s17137_s1 + $0x20a4] ss:$68 sps:$4 sm:$0xff]  }
 0x3ef   : > { %9629 = vst [vmem:[%s14801_s14 + $0x2f0] sm:$0xff] %v11034_v17  ;;  %9631 = vst [vmem:[%s14801_s14 + $0x300] sm:$0xff] %v11048_v35  ;;  %8945 = vmatpush1.bf16.msra.mxu0 %v12973_v0  ;;  %9229 = vmatpush1.bf16.msra.mxu1 %v12976_v2  ;;  %v12994_v54 = vld [vmem:[%s17137_s1 + $0x20a0] ss:$68 sps:$4 sm:$0xff]   ;;  %v13000_v35 = vld [vmem:[%s17137_s1 + $0x2128] ss:$68 sps:$4 sm:$0xff]  }
 0x3f0   : > { %8946 = vmatprep.subr.bf16.mxu0 %v12981_v12  ;;  %9230 = vmatprep.subr.bf16.mxu1 %v12984_v29  ;;  %v12999_v12 = vld [vmem:[%s17137_s1 + $0x2124] ss:$68 sps:$4 sm:$0xff]   ;;  %v13002_v29 = vld [vmem:[%s17137_s1 + $0x212c] ss:$68 sps:$4 sm:$0xff]  }
 0x3f1   : > { %v8420_v44 = vpop.f32.mrb[44].mxu0  ;;  %v8704_v46 = vpop.f32.mrb[44].mxu1  ;;  %v12997_v17 = vld [vmem:[%s17137_s1 + $0x2120] ss:$68 sps:$4 sm:$0xff]  }
 0x3f2   : > { %v11035_v57 = vadd.f32 %v8420_v44, %v16596_v47  ;;  %v11049_v59 = vadd.f32 %v8704_v46, %v16601_v48  ;;  %v8422_v1 = vpop.f32.mrb[45].mxu0  ;;  %v8706_v22 = vpop.f32.mrb[45].mxu1  ;;  %v12988_v47 = vld [vmem:[%s17137_s1 + $0x2018] ss:$68 sps:$4 sm:$0xff]   ;;  %v13009_v44 = vld [vmem:[%s17137_s1 + $0x480] ss:$68 sps:$4 sm:$0xff]  }
 0x3f3   : > { %v11036_v25 = vadd.f32 %v8422_v1, %v16608_v51  ;;  %v11050_v63 = vadd.f32 %v8706_v22, %v16613_v3  ;;  %v8424_v0 = vpop.f32.mrb[46].mxu0  ;;  %v8708_v2 = vpop.f32.mrb[46].mxu1  ;;  %8947 = vmatpush1.bf16.msra.mxu0 %v12979_v36  ;;  %9231 = vmatpush1.bf16.msra.mxu1 %v12982_v41  ;;  %v12993_v3 = vld [vmem:[%s17137_s1 + $0x209c] ss:$68 sps:$4 sm:$0xff]   ;;  %v13005_v36 = vld [vmem:[%s17137_s1 + $0x21ac] ss:$68 sps:$4 sm:$0xff]  }
 0x3f4   : > { %9645 = vst [vmem:[%s14801_s14 + $0x370] sm:$0x1] %v11035_v57  ;;  %9647 = vst [vmem:[%s14801_s14 + $0x380] sm:$0x1] %v11049_v59  ;;  %v8425_v48 = vpop.f32.mrb[47].mxu0  ;;  %v8709_v51 = vpop.f32.mrb[47].mxu1  ;;  %8948 = vmatprep.subr.bf16.mxu0 %v12987_v19  ;;  %9232 = vmatprep.subr.bf16.mxu1 %v12990_v21 }
 0x3f5   : > { %9646 = vst [vmem:[%s14801_s14 + $0x378] sm:$0x1] %v11036_v25  ;;  %9648 = vst [vmem:[%s14801_s14 + $0x388] sm:$0x1] %v11050_v63  ;;  %v13008_v41 = vld [vmem:[%s17137_s1 + $0x21b4] ss:$68 sps:$4 sm:$0xff]  }
 0x3f6   : > { %v13003_v19 = vld [vmem:[%s17137_s1 + $0x21a8] ss:$68 sps:$4 sm:$0xff]   ;;  %v13006_v21 = vld [vmem:[%s17137_s1 + $0x21b0] ss:$68 sps:$4 sm:$0xff]   ;;  %v13010_v46 = vld [vmem:[%s17137_s1 + $0xd00] ss:$68 sps:$4 sm:$0xff]  }
 0x3f7   : > { %8949 = vmatpush1.bf16.msra.mxu0 %v12985_v10  ;;  %9233 = vmatpush1.bf16.msra.mxu1 %v12988_v47  ;;  %v13011_v57 = vld [vmem:[%s17137_s1 + $0x40] ss:$68 sps:$4 sm:$0xff]   ;;  %v13013_v1 = vld [vmem:[%s17137_s1 + $0x508] ss:$68 sps:$4 sm:$0xff]   ;;  %v13017_v0 = vld [vmem:[%s17137_s1 + $0x590] ss:$68 sps:$4 sm:$0xff]  }
 0x3f8   : > { %8950 = vmatprep.subr.bf16.mxu0 %v12993_v3  ;;  %9234 = vmatprep.subr.bf16.mxu1 %v12996_v26  ;;  %v13012_v59 = vld [vmem:[%s17137_s1 + $0x8c0] ss:$68 sps:$4 sm:$0xff]   ;;  %v13014_v22 = vld [vmem:[%s17137_s1 + $0xd88] ss:$68 sps:$4 sm:$0xff]   ;;  %v13018_v2 = vld [vmem:[%s17137_s1 + $0xe10] ss:$68 sps:$4 sm:$0xff]  }
 0x3f9   : > { %v13015_v25 = vld [vmem:[%s17137_s1 + $0xc8] ss:$68 sps:$4 sm:$0xff]   ;;  %v13019_v10 = vld [vmem:[%s17137_s1 + $0x150] ss:$68 sps:$4 sm:$0xff]   ;;  %v13021_v48 = vld [vmem:[%s17137_s1 + $0x618] ss:$68 sps:$4 sm:$0xff]  }
 0x3fa   : > { %v13016_v63 = vld [vmem:[%s17137_s1 + $0x948] ss:$68 sps:$4 sm:$0xff]   ;;  %v13020_v47 = vld [vmem:[%s17137_s1 + $0x9d0] ss:$68 sps:$4 sm:$0xff]   ;;  %v13022_v51 = vld [vmem:[%s17137_s1 + $0xe98] ss:$68 sps:$4 sm:$0xff]  }
 0x3fb   : > { %8951 = vmatpush1.bf16.msra.mxu0 %v12991_v7  ;;  %9235 = vmatpush1.bf16.msra.mxu1 %v12994_v54  ;;  %v13023_v3 = vld [vmem:[%s17137_s1 + $0x1d8] ss:$68 sps:$4 sm:$0xff]   ;;  %v13025_v7 = vld [vmem:[%s17137_s1 + $0x6a0] ss:$68 sps:$4 sm:$0xff]  }
 0x3fc   : > { %8952 = vmatprep.subr.bf16.mxu0 %v12999_v12  ;;  %9236 = vmatprep.subr.bf16.mxu1 %v13002_v29  ;;  %v13024_v26 = vld [vmem:[%s17137_s1 + $0xa58] ss:$68 sps:$4 sm:$0xff]   ;;  %v13026_v54 = vld [vmem:[%s17137_s1 + $0xf20] ss:$68 sps:$4 sm:$0xff]  }
 0x3fd   : > { %v13027_v12 = vld [vmem:[%s17137_s1 + $0x260] ss:$68 sps:$4 sm:$0xff]  }
 0x3fe   : > { %v13028_v29 = vld [vmem:[%s17137_s1 + $0xae0] ss:$68 sps:$4 sm:$0xff]  }
 0x3ff   : > { %8953 = vmatpush1.bf16.msra.mxu0 %v12997_v17  ;;  %9237 = vmatpush1.bf16.msra.mxu1 %v13000_v35  ;;  %v13029_v17 = vld [vmem:[%s17137_s1 + $0x728] ss:$68 sps:$4 sm:$0xff]  }
 0x400   : > { %8954 = vmatprep.subr.bf16.mxu0 %v13005_v36  ;;  %9238 = vmatprep.subr.bf16.mxu1 %v13008_v41  ;;  %v13030_v35 = vld [vmem:[%s17137_s1 + $0xfa8] ss:$68 sps:$4 sm:$0xff]  }
 0x401   : > { %v13031_v36 = vld [vmem:[%s17137_s1 + $0x2e8] ss:$68 sps:$4 sm:$0xff]  }
 0x402   : > { %v13032_v41 = vld [vmem:[%s17137_s1 + $0xb68] ss:$68 sps:$4 sm:$0xff]  }
 0x403   : > { %8955 = vmatpush1.bf16.msra.mxu0 %v13003_v19  ;;  %9239 = vmatpush1.bf16.msra.mxu1 %v13006_v21  ;;  %v13033_v19 = vld [vmem:[%s17137_s1 + $0x7b0] ss:$68 sps:$4 sm:$0xff]  }
 0x404   : > { %10807 = vmatprep.subr.bf16.mxu0 %v13009_v44  ;;  %10847 = vmatprep.subr.bf16.mxu1 %v13010_v46  ;;  %v13034_v21 = vld [vmem:[%s17137_s1 + $0x1030] ss:$68 sps:$4 sm:$0xff]  }
 0x405   : > { %v13035_v44 = vld [vmem:[%s17137_s1 + $0x370] ss:$68 sps:$4 sm:$0xff]  }
 0x406   : > { %8957 = vmatmul.mubr.bf16.vlgmr.msra.gmra.mrb[48].mxu0 %v14048_v16  ;;  %9241 = vmatmul.mubr.bf16.vlgmr.msra.gmra.mrb[48].mxu1 %v14048_v16  ;;  %v13036_v46 = vld [vmem:[%s17137_s1 + $0xbf0] ss:$68 sps:$4 sm:$0xff]  }
 0x407   : > { %10808 = vmatpush3.bf16.msra.mxu0 %v13011_v57  ;;  %10848 = vmatpush3.bf16.msra.mxu1 %v13012_v59  ;;  %v13037_v57 = vld [vmem:[%s17137_s1 + $0x838] ss:$68 sps:$4 sm:$0xff]  }
 0x408   : > { %10809 = vmatprep.subr.bf16.mxu0 %v13013_v1  ;;  %10849 = vmatprep.subr.bf16.mxu1 %v13014_v22  ;;  %v13038_v59 = vld [vmem:[%s17137_s1 + $0x10b8] ss:$68 sps:$4 sm:$0xff]  }
 0x409   : > { %8966 = vmatprep.mubr.bf16.mxu0 %v14064_v28  ;;  %9250 = vmatprep.mubr.bf16.mxu1 %v14064_v28  ;;  %v13039_v1 = vld [vmem:[%s17137_s1 + $0x3f8] ss:$68 sps:$4 sm:$0xff]  }
 0x40a   : > { %v13040_v22 = vld [vmem:[%s17137_s1 + $0xc78] ss:$68 sps:$4 sm:$0xff]  }
 0x40b   : > { %10810 = vmatpush3.bf16.msra.mxu0 %v13015_v25  ;;  %10850 = vmatpush3.bf16.msra.mxu1 %v13016_v63  ;;  %v13041_v25 = vld [vmem:[%s17137_s1 + $0x1580] ss:$68 sps:$4 sm:$0xff]  }
 0x40c   : > { %10811 = vmatprep.subr.bf16.mxu0 %v13017_v0  ;;  %10851 = vmatprep.subr.bf16.mxu1 %v13018_v2  ;;  %v13042_v63 = vld [vmem:[%s17137_s1 + $0x1e00] ss:$68 sps:$4 sm:$0xff]  }
 0x40d   : > { %v13043_v0 = vld [vmem:[%s17137_s1 + $0x1140] ss:$68 sps:$4 sm:$0xff]  }
 0x40e   : > { %8967 = vmatmul.mubr.bf16.gmra.mrb[52].mxu0 %v14084_v38  ;;  %9251 = vmatmul.mubr.bf16.gmra.mrb[52].mxu1 %v14084_v38  ;;  %v13044_v2 = vld [vmem:[%s17137_s1 + $0x19c0] ss:$68 sps:$4 sm:$0xff]  }
 0x40f   : > { %10812 = vmatpush3.bf16.msra.mxu0 %v13019_v10  ;;  %10852 = vmatpush3.bf16.msra.mxu1 %v13020_v47  ;;  %v13045_v10 = vld [vmem:[%s17137_s1 + $0x1608] ss:$68 sps:$4 sm:$0xff]  }
 0x410   : > { %10813 = vmatprep.subr.bf16.mxu0 %v13021_v48  ;;  %10853 = vmatprep.subr.bf16.mxu1 %v13022_v51  ;;  %v13048_v47 = vld [vmem:[%s17137_s1 + $0x1a48] ss:$68 sps:$4 sm:$0xff]   ;;  %v13049_v48 = vld [vmem:[%s17137_s1 + $0x1690] ss:$68 sps:$4 sm:$0xff]  }
 0x411   : > { %8976 = vmatprep.mubr.bf16.mxu0 %v14100_v49  ;;  %9260 = vmatprep.mubr.bf16.mxu1 %v14100_v49  ;;  %v13052_v51 = vld [vmem:[%s17137_s1 + $0x1ad0] ss:$68 sps:$4 sm:$0xff]  }
 0x413   : > { %10814 = vmatpush3.bf16.msra.mxu0 %v13023_v3  ;;  %10854 = vmatpush3.bf16.msra.mxu1 %v13024_v26  ;;  %v13053_v3 = vld [vmem:[%s17137_s1 + $0x1718] ss:$68 sps:$4 sm:$0xff]  }
 0x414   : > { %10815 = vmatprep.subr.bf16.mxu0 %v13025_v7  ;;  %10855 = vmatprep.subr.bf16.mxu1 %v13026_v54  ;;  %v13056_v26 = vld [vmem:[%s17137_s1 + $0x1b58] ss:$68 sps:$4 sm:$0xff]   ;;  %v13057_v7 = vld [vmem:[%s17137_s1 + $0x17a0] ss:$68 sps:$4 sm:$0xff]  }
 0x415   : > { %v13060_v54 = vld [vmem:[%s17137_s1 + $0x1be0] ss:$68 sps:$4 sm:$0xff]  }
 0x416   : > { %8977 = vmatmul.mubr.bf16.gmra.mrb[56].mxu0 %v14117_v60  ;;  %9261 = vmatmul.mubr.bf16.gmra.mrb[56].mxu1 %v14117_v60 }
 0x417   : > { %10816 = vmatpush3.bf16.msra.mxu0 %v13027_v12  ;;  %10856 = vmatpush3.bf16.msra.mxu1 %v13028_v29  ;;  %v13061_v12 = vld [vmem:[%s17137_s1 + $0x1828] ss:$68 sps:$4 sm:$0xff]  }
 0x418   : > { %10817 = vmatprep.subr.bf16.mxu0 %v13029_v17  ;;  %10857 = vmatprep.subr.bf16.mxu1 %v13030_v35  ;;  %v13064_v29 = vld [vmem:[%s17137_s1 + $0x1c68] ss:$68 sps:$4 sm:$0xff]   ;;  %v13065_v17 = vld [vmem:[%s17137_s1 + $0x18b0] ss:$68 sps:$4 sm:$0xff]  }
 0x419   : > { %8986 = vmatprep.mubr.bf16.mxu0 %v14132_v4  ;;  %9270 = vmatprep.mubr.bf16.mxu1 %v14132_v4  ;;  %v13068_v35 = vld [vmem:[%s17137_s1 + $0x1cf0] ss:$68 sps:$4 sm:$0xff]  }
 0x41b   : > { %10818 = vmatpush3.bf16.msra.mxu0 %v13031_v36  ;;  %10858 = vmatpush3.bf16.msra.mxu1 %v13032_v41  ;;  %v13069_v36 = vld [vmem:[%s17137_s1 + $0x1938] ss:$68 sps:$4 sm:$0xff]  }
 0x41c   : > { %10819 = vmatprep.subr.bf16.mxu0 %v13033_v19  ;;  %10859 = vmatprep.subr.bf16.mxu1 %v13034_v21  ;;  %v13072_v41 = vld [vmem:[%s17137_s1 + $0x1d78] ss:$68 sps:$4 sm:$0xff]  }
 0x41e   : > { %8987 = vmatmul.mubr.bf16.gmra.mrb[60].mxu0 %v14148_v15  ;;  %9271 = vmatmul.mubr.bf16.gmra.mrb[60].mxu1 %v14148_v15 }
 0x41f   : > { %10820 = vmatpush3.bf16.msra.mxu0 %v13035_v44  ;;  %10860 = vmatpush3.bf16.msra.mxu1 %v13036_v46 }
 0x420   : > { %10821 = vmatprep.subr.bf16.mxu0 %v13037_v57  ;;  %10861 = vmatprep.subr.bf16.mxu1 %v13038_v59 }
 0x421   : > { %9311 = vmatprep.mubr.bf16.mxu0 %v13268_v50  ;;  %9375 = vmatprep.mubr.bf16.mxu1 %v13453_v56  ;;  %v13046_v50 = vld [vmem:[%s17137_s1 + $0x1e88] ss:$68 sps:$4 sm:$0xff]  }
 0x422   : > { %v13047_v56 = vld [vmem:[%s17137_s1 + $0x11c8] ss:$68 sps:$4 sm:$0xff]  }
 0x423   : > { %10822 = vmatpush3.bf16.msra.mxu0 %v13039_v1  ;;  %10862 = vmatpush3.bf16.msra.mxu1 %v13040_v22 }
 0x424   : > { %10887 = vmatprep.subr.bf16.mxu0 %v13041_v25  ;;  %10927 = vmatprep.subr.bf16.mxu1 %v13042_v63 }
 0x426   : > { %9312 = vmatmul.mubr.bf16.vlgmr.msra.gmra.mrb[64].mxu0 %v13334_v9  ;;  %9376 = vmatmul.mubr.bf16.vlgmr.msra.gmra.mrb[64].mxu1 %v13566_v34  ;;  %v13050_v9 = vld [vmem:[%s17137_s1 + $0x1f10] ss:$68 sps:$4 sm:$0xff]  }
 0x427   : > { %10888 = vmatpush3.bf16.msra.mxu0 %v13043_v0  ;;  %10928 = vmatpush3.bf16.msra.mxu1 %v13044_v2  ;;  %v13051_v34 = vld [vmem:[%s17137_s1 + $0x1250] ss:$68 sps:$4 sm:$0xff]  }
 0x428   : > { %10889 = vmatprep.subr.bf16.mxu0 %v13045_v10  ;;  %10929 = vmatprep.subr.bf16.mxu1 %v13046_v50 }
 0x429   : > { %9319 = vmatprep.mubr.bf16.mxu0 %v13364_v20  ;;  %9383 = vmatprep.mubr.bf16.mxu1 %v13585_v43  ;;  %v13054_v20 = vld [vmem:[%s17137_s1 + $0x1f98] ss:$68 sps:$4 sm:$0xff]  }
 0x42a   : > { %v13055_v43 = vld [vmem:[%s17137_s1 + $0x12d8] ss:$68 sps:$4 sm:$0xff]  }
 0x42b   : > { %10890 = vmatpush3.bf16.msra.mxu0 %v13047_v56  ;;  %10930 = vmatpush3.bf16.msra.mxu1 %v13048_v47 }
 0x42c   : > { %10891 = vmatprep.subr.bf16.mxu0 %v13049_v48  ;;  %10931 = vmatprep.subr.bf16.mxu1 %v13050_v9 }
 0x42e   : > { %9320 = vmatmul.mubr.bf16.gmra.mrb[68].mxu0 %v13382_v27  ;;  %9384 = vmatmul.mubr.bf16.gmra.mrb[68].mxu1 %v13605_v53  ;;  %v13058_v27 = vld [vmem:[%s17137_s1 + $0x2020] ss:$68 sps:$4 sm:$0xff]  }
 0x42f   : > { %10892 = vmatpush3.bf16.msra.mxu0 %v13051_v34  ;;  %10932 = vmatpush3.bf16.msra.mxu1 %v13052_v51  ;;  %v13059_v53 = vld [vmem:[%s17137_s1 + $0x1360] ss:$68 sps:$4 sm:$0xff]  }
 0x430   : > { %10893 = vmatprep.subr.bf16.mxu0 %v13053_v3  ;;  %10933 = vmatprep.subr.bf16.mxu1 %v13054_v20 }
 0x431   : > { %9327 = vmatprep.mubr.bf16.mxu0 %v13397_v33  ;;  %9391 = vmatprep.mubr.bf16.mxu1 %v13621_v61  ;;  %v13062_v33 = vld [vmem:[%s17137_s1 + $0x20a8] ss:$68 sps:$4 sm:$0xff]  }
 0x432   : > { %v13063_v61 = vld [vmem:[%s17137_s1 + $0x13e8] ss:$68 sps:$4 sm:$0xff]  }
 0x433   : > { %10894 = vmatpush3.bf16.msra.mxu0 %v13055_v43  ;;  %10934 = vmatpush3.bf16.msra.mxu1 %v13056_v26 }
 0x434   : > { %10895 = vmatprep.subr.bf16.mxu0 %v13057_v7  ;;  %10935 = vmatprep.subr.bf16.mxu1 %v13058_v27 }
 0x436   : > { %9328 = vmatmul.mubr.bf16.gmra.mrb[72].mxu0 %v13412_v39  ;;  %9392 = vmatmul.mubr.bf16.gmra.mrb[72].mxu1 %v13644_v5  ;;  %v13066_v39 = vld [vmem:[%s17137_s1 + $0x2130] ss:$68 sps:$4 sm:$0xff]  }
 0x437   : > { %10896 = vmatpush3.bf16.msra.mxu0 %v13059_v53  ;;  %10936 = vmatpush3.bf16.msra.mxu1 %v13060_v54  ;;  %v13067_v5 = vld [vmem:[%s17137_s1 + $0x1470] ss:$68 sps:$4 sm:$0xff]  }
 0x438   : > { %10897 = vmatprep.subr.bf16.mxu0 %v13061_v12  ;;  %10937 = vmatprep.subr.bf16.mxu1 %v13062_v33 }
 0x439   : > { %9335 = vmatprep.mubr.bf16.mxu0 %v13427_v45  ;;  %9399 = vmatprep.mubr.bf16.mxu1 %v13656_v11  ;;  %v13070_v45 = vld [vmem:[%s17137_s1 + $0x21b8] ss:$68 sps:$4 sm:$0xff]  }
 0x43a   : > { %v13071_v11 = vld [vmem:[%s17137_s1 + $0x14f8] ss:$68 sps:$4 sm:$0xff]  }
 0x43b   : > { %10898 = vmatpush3.bf16.msra.mxu0 %v13063_v61  ;;  %10938 = vmatpush3.bf16.msra.mxu1 %v13064_v29 }
 0x43c   : > { %10899 = vmatprep.subr.bf16.mxu0 %v13065_v17  ;;  %10939 = vmatprep.subr.bf16.mxu1 %v13066_v39 }
 0x43e   : > { %9336 = vmatmul.mubr.bf16.gmra.mrb[76].mxu0 %v13446_v52  ;;  %9400 = vmatmul.mubr.bf16.gmra.mrb[76].mxu1 %v13678_v18  ;;  %v17044_v52 = vrot.slane %v16585_v8, %v1436_v30  ;;  %v17049_v18 = vrot.slane %v16585_v8, %v1444_v31 }
 0x43f   : > { %10900 = vmatpush3.bf16.msra.mxu0 %v13067_v5  ;;  %10940 = vmatpush3.bf16.msra.mxu1 %v13068_v35 }
 0x440   : > { %10901 = vmatprep.subr.bf16.mxu0 %v13069_v36  ;;  %10941 = vmatprep.subr.bf16.mxu1 %v13070_v45 }
 0x441   : > { %9439 = vmatprep.mubr.bf16.mxu0 %v13688_v24  ;;  %9503 = vmatprep.mubr.bf16.mxu1 %v13926_v14  ;;  %v17054_v24 = vrot.slane %v16585_v8, %v1440_v37 }
 0x443   : > { %10902 = vmatpush3.bf16.msra.mxu0 %v13071_v11  ;;  %10942 = vmatpush3.bf16.msra.mxu1 %v13072_v41 }
 0x446   : > { %9440 = vmatmul.mubr.bf16.vlgmr.msra.gmra.mrb[80].mxu0 %v13804_v13  ;;  %9504 = vmatmul.mubr.bf16.vlgmr.msra.gmra.mrb[80].mxu1 %v14048_v16  ;;  %v17059_v13 = vrot.slane %v16585_v8, %v1448_v40 }
 0x447   : > { %9447 = vmatprep.mubr.bf16.mxu0 %v13823_v23  ;;  %9511 = vmatprep.mubr.bf16.mxu1 %v14064_v28 }
 0x44e   : > { %9448 = vmatmul.mubr.bf16.gmra.mrb[84].mxu0 %v13841_v32  ;;  %9512 = vmatmul.mubr.bf16.gmra.mrb[84].mxu1 %v14084_v38 }
 0x44f   : > { %9455 = vmatprep.mubr.bf16.mxu0 %v13859_v42  ;;  %9519 = vmatprep.mubr.bf16.mxu1 %v14100_v49 }
 0x456   : > { %9456 = vmatmul.mubr.bf16.gmra.mrb[88].mxu0 %v13882_v55  ;;  %9520 = vmatmul.mubr.bf16.gmra.mrb[88].mxu1 %v14117_v60 }
 0x457   : > { %9463 = vmatprep.mubr.bf16.mxu0 %v13894_v62  ;;  %9527 = vmatprep.mubr.bf16.mxu1 %v14132_v4 }
 0x45e   : > { %9464 = vmatmul.mubr.bf16.gmra.mrb[92].mxu0 %v13916_v6  ;;  %9528 = vmatmul.mubr.bf16.gmra.mrb[92].mxu1 %v14148_v15 }
 0x4d9   : > { %v8958_v23 = vpop.f32.mrb[48].mxu0  ;;  %v9242_v32 = vpop.f32.mrb[48].mxu1 }
 0x4da   : > { %v11051_v42 = vadd.f32 %v8958_v23, %v17044_v52  ;;  %v11065_v55 = vadd.f32 %v9242_v32, %v17049_v18  ;;  %v8960_v62 = vpop.f32.mrb[49].mxu0  ;;  %v9244_v6 = vpop.f32.mrb[49].mxu1 }
 0x4db   : > { %v11052_v14 = vadd.f32 %v8960_v62, %v17054_v24  ;;  %v11066_v16 = vadd.f32 %v9244_v6, %v17059_v13  ;;  %v8962_v28 = vpop.f32.mrb[50].mxu0  ;;  %v9246_v38 = vpop.f32.mrb[50].mxu1 }
 0x4dc   : > { %9547 = vst [vmem:[%s14801_s14 + $0x60] sm:$0xff] %v11051_v42  ;;  %9549 = vst [vmem:[%s14801_s14 + $0x70] sm:$0xff] %v11065_v55  ;;  %v11053_v49 = vadd.f32 %v8962_v28, %v17044_v52  ;;  %v11067_v60 = vadd.f32 %v9246_v38, %v17049_v18  ;;  %v8964_v4 = vpop.f32.mrb[51].mxu0  ;;  %v9248_v15 = vpop.f32.mrb[51].mxu1 }
 0x4dd   : > { %9548 = vst [vmem:[%s14801_s14 + $0x68] sm:$0xff] %v11052_v14  ;;  %9550 = vst [vmem:[%s14801_s14 + $0x78] sm:$0xff] %v11066_v16  ;;  %v11054_v58 = vadd.f32 %v8964_v4, %v17054_v24  ;;  %v11068_v30 = vadd.f32 %v9248_v15, %v17059_v13 }
 0x4de   : > { %9564 = vst [vmem:[%s14801_s14 + $0xe8] sm:$0xff] %v11053_v49  ;;  %9566 = vst [vmem:[%s14801_s14 + $0xf8] sm:$0xff] %v11067_v60 }
 0x4df   : > { %9565 = vst [vmem:[%s14801_s14 + $0xf0] sm:$0xff] %v11054_v58  ;;  %9567 = vst [vmem:[%s14801_s14 + $0x100] sm:$0xff] %v11068_v30 }
 0x4e1   : > { %v8968_v31 = vpop.f32.mrb[52].mxu0  ;;  %v9252_v37 = vpop.f32.mrb[52].mxu1 }
 0x4e2   : > { %v11055_v40 = vadd.f32 %v8968_v31, %v17044_v52  ;;  %v11069_v8 = vadd.f32 %v9252_v37, %v17049_v18  ;;  %v8970_v19 = vpop.f32.mrb[53].mxu0  ;;  %v9254_v21 = vpop.f32.mrb[53].mxu1 }
 0x4e3   : > { %v11056_v44 = vadd.f32 %v8970_v19, %v17054_v24  ;;  %v11070_v46 = vadd.f32 %v9254_v21, %v17059_v13  ;;  %v8972_v57 = vpop.f32.mrb[54].mxu0  ;;  %v9256_v59 = vpop.f32.mrb[54].mxu1 }
 0x4e4   : > { %9581 = vst [vmem:[%s14801_s14 + $0x170] sm:$0xff] %v11055_v40  ;;  %9583 = vst [vmem:[%s14801_s14 + $0x180] sm:$0xff] %v11069_v8  ;;  %v11057_v1 = vadd.f32 %v8972_v57, %v17044_v52  ;;  %v11071_v22 = vadd.f32 %v9256_v59, %v17049_v18  ;;  %v8974_v25 = vpop.f32.mrb[55].mxu0  ;;  %v9258_v63 = vpop.f32.mrb[55].mxu1 }
 0x4e5   : > { %9582 = vst [vmem:[%s14801_s14 + $0x178] sm:$0xff] %v11056_v44  ;;  %9584 = vst [vmem:[%s14801_s14 + $0x188] sm:$0xff] %v11070_v46  ;;  %v11058_v0 = vadd.f32 %v8974_v25, %v17054_v24  ;;  %v11072_v2 = vadd.f32 %v9258_v63, %v17059_v13 }
 0x4e6   : > { %9598 = vst [vmem:[%s14801_s14 + $0x1f8] sm:$0xff] %v11057_v1  ;;  %9600 = vst [vmem:[%s14801_s14 + $0x208] sm:$0xff] %v11071_v22 }
 0x4e7   : > { %9599 = vst [vmem:[%s14801_s14 + $0x200] sm:$0xff] %v11058_v0  ;;  %9601 = vst [vmem:[%s14801_s14 + $0x210] sm:$0xff] %v11072_v2 }
 0x4e9   : > { %v8978_v10 = vpop.f32.mrb[56].mxu0  ;;  %v9262_v50 = vpop.f32.mrb[56].mxu1 }
 0x4ea   : > { %v11059_v56 = vadd.f32 %v8978_v10, %v17044_v52  ;;  %v11073_v47 = vadd.f32 %v9262_v50, %v17049_v18  ;;  %v8980_v48 = vpop.f32.mrb[57].mxu0  ;;  %v9264_v9 = vpop.f32.mrb[57].mxu1 }
 0x4eb   : > { %v11060_v34 = vadd.f32 %v8980_v48, %v17054_v24  ;;  %v11074_v51 = vadd.f32 %v9264_v9, %v17059_v13  ;;  %v8982_v3 = vpop.f32.mrb[58].mxu0  ;;  %v9266_v20 = vpop.f32.mrb[58].mxu1 }
 0x4ec   : > { %9615 = vst [vmem:[%s14801_s14 + $0x280] sm:$0xff] %v11059_v56  ;;  %9617 = vst [vmem:[%s14801_s14 + $0x290] sm:$0xff] %v11073_v47  ;;  %v11061_v43 = vadd.f32 %v8982_v3, %v17044_v52  ;;  %v11075_v26 = vadd.f32 %v9266_v20, %v17049_v18  ;;  %v8984_v7 = vpop.f32.mrb[59].mxu0  ;;  %v9268_v27 = vpop.f32.mrb[59].mxu1 }
 0x4ed   : > { %9616 = vst [vmem:[%s14801_s14 + $0x288] sm:$0xff] %v11060_v34  ;;  %9618 = vst [vmem:[%s14801_s14 + $0x298] sm:$0xff] %v11074_v51  ;;  %v11062_v53 = vadd.f32 %v8984_v7, %v17054_v24  ;;  %v11076_v54 = vadd.f32 %v9268_v27, %v17059_v13 }
 0x4ee   : > { %9632 = vst [vmem:[%s14801_s14 + $0x308] sm:$0xff] %v11061_v43  ;;  %9634 = vst [vmem:[%s14801_s14 + $0x318] sm:$0xff] %v11075_v26 }
 0x4ef   : > { %9633 = vst [vmem:[%s14801_s14 + $0x310] sm:$0xff] %v11062_v53  ;;  %9635 = vst [vmem:[%s14801_s14 + $0x320] sm:$0xff] %v11076_v54 }
 0x4f1   : > { %v8988_v12 = vpop.f32.mrb[60].mxu0  ;;  %v9272_v33 = vpop.f32.mrb[60].mxu1 }
 0x4f2   : > { %v11063_v61 = vadd.f32 %v8988_v12, %v17044_v52  ;;  %v11077_v29 = vadd.f32 %v9272_v33, %v17049_v18  ;;  %v8990_v17 = vpop.f32.mrb[61].mxu0  ;;  %v9274_v39 = vpop.f32.mrb[61].mxu1  ;;  %v9716_v52 = vld [vmem:[%s17138_s2 + $0x10] ss:$0 sm:$0xff] }
 0x4f3   : > { %v11064_v5 = vadd.f32 %v8990_v17, %v17054_v24  ;;  %v11078_v35 = vadd.f32 %v9274_v39, %v17059_v13  ;;  %v8992_v36 = vpop.f32.mrb[62].mxu0  ;;  %v9276_v45 = vpop.f32.mrb[62].mxu1 }
 0x4f4   : > { %9649 = vst [vmem:[%s14801_s14 + $0x390] sm:$0x1] %v11063_v61  ;;  %9651 = vst [vmem:[%s14801_s14 + $0x3a0] sm:$0x1] %v11077_v29  ;;  %v8993_v11 = vpop.f32.mrb[63].mxu0  ;;  %v9277_v41 = vpop.f32.mrb[63].mxu1 }
 0x4f5   : > { %9650 = vst [vmem:[%s14801_s14 + $0x398] sm:$0x1] %v11064_v5  ;;  %9652 = vst [vmem:[%s14801_s14 + $0x3a8] sm:$0x1] %v11078_v35 }
 0x4f9   : > { %v10823_v23 = vpop.f32.mrb[64].mxu0  ;;  %v10863_v32 = vpop.f32.mrb[64].mxu1 }
 0x4fa   : > { %v10824_v18 = vpop.f32.mrb[65].mxu0  ;;  %v10864_v42 = vpop.f32.mrb[65].mxu1 }
 0x4fb   : > { %v10825_v55 = vadd.f32 %v10824_v18, %v10823_v23  ;;  %v10865_v24 = vadd.f32 %v10864_v42, %v10863_v32  ;;  %v10826_v62 = vpop.f32.mrb[66].mxu0  ;;  %v10866_v13 = vpop.f32.mrb[66].mxu1 }
 0x4fc   : > { %v10827_v6 = vpop.f32.mrb[67].mxu0  ;;  %v10867_v14 = vpop.f32.mrb[67].mxu1 }
 0x4fd   : > { %v9314_v16 = vadd.f32 %v10825_v55, %v9716_v52  ;;  %v10828_v28 = vadd.f32 %v10827_v6, %v10826_v62  ;;  %v10868_v38 = vadd.f32 %v10867_v14, %v10866_v13 }
 0x4ff   : > { %v9378_v49 = vadd.f32 %v10865_v24, %v9314_v16  ;;  %v9317_v60 = vadd.f32 %v10828_v28, %v9716_v52 }
 0x501   : > { %v9381_v4 = vadd.f32 %v10868_v38, %v9317_v60  ;;  %v10829_v15 = vpop.f32.mrb[68].mxu0  ;;  %v10869_v58 = vpop.f32.mrb[68].mxu1 }
 0x502   : > { %v10830_v30 = vpop.f32.mrb[69].mxu0  ;;  %v10870_v31 = vpop.f32.mrb[69].mxu1 }
 0x503   : > { %v10831_v37 = vadd.f32 %v10830_v30, %v10829_v15  ;;  %v10871_v40 = vadd.f32 %v10870_v31, %v10869_v58  ;;  %v10832_v8 = vpop.f32.mrb[70].mxu0  ;;  %v10872_v19 = vpop.f32.mrb[70].mxu1 }
 0x504   : > { %v10833_v21 = vpop.f32.mrb[71].mxu0  ;;  %v10873_v44 = vpop.f32.mrb[71].mxu1 }
 0x505   : > { %v9322_v46 = vadd.f32 %v10831_v37, %v9716_v52  ;;  %v10834_v57 = vadd.f32 %v10833_v21, %v10832_v8  ;;  %v10874_v59 = vadd.f32 %v10873_v44, %v10872_v19 }
 0x507   : > { %v9386_v1 = vadd.f32 %v10871_v40, %v9322_v46  ;;  %v9325_v22 = vadd.f32 %v10834_v57, %v9716_v52 }
 0x509   : > { %v9389_v25 = vadd.f32 %v10874_v59, %v9325_v22  ;;  %v10835_v63 = vpop.f32.mrb[72].mxu0  ;;  %v10875_v0 = vpop.f32.mrb[72].mxu1 }
 0x50a   : > { %v10836_v2 = vpop.f32.mrb[73].mxu0  ;;  %v10876_v10 = vpop.f32.mrb[73].mxu1 }
 0x50b   : > { %v10837_v50 = vadd.f32 %v10836_v2, %v10835_v63  ;;  %v10877_v56 = vadd.f32 %v10876_v10, %v10875_v0  ;;  %v10838_v47 = vpop.f32.mrb[74].mxu0  ;;  %v10878_v48 = vpop.f32.mrb[74].mxu1 }
 0x50c   : > { %v10839_v9 = vpop.f32.mrb[75].mxu0  ;;  %v10879_v34 = vpop.f32.mrb[75].mxu1 }
 0x50d   : > { %v9330_v51 = vadd.f32 %v10837_v50, %v9716_v52  ;;  %v10840_v3 = vadd.f32 %v10839_v9, %v10838_v47  ;;  %v10880_v20 = vadd.f32 %v10879_v34, %v10878_v48 }
 0x50f   : > { %v9394_v43 = vadd.f32 %v10877_v56, %v9330_v51  ;;  %v9333_v26 = vadd.f32 %v10840_v3, %v9716_v52 }
 0x511   : > { %v17120_v7 = vadd.f32 %v10880_v20, %v9333_v26  ;;  %v10841_v27 = vpop.f32.mrb[76].mxu0  ;;  %v10881_v53 = vpop.f32.mrb[76].mxu1 }
 0x512   : > { %v10842_v54 = vpop.f32.mrb[77].mxu0  ;;  %v10882_v12 = vpop.f32.mrb[77].mxu1 }
 0x513   : > { %v10843_v33 = vadd.f32 %v10842_v54, %v10841_v27  ;;  %v10883_v61 = vadd.f32 %v10882_v12, %v10881_v53  ;;  %v10844_v29 = vpop.f32.mrb[78].mxu0  ;;  %v10884_v17 = vpop.f32.mrb[78].mxu1 }
 0x514   : > { %v10845_v39 = vpop.f32.mrb[79].mxu0  ;;  %v10885_v5 = vpop.f32.mrb[79].mxu1 }
 0x515   : > { %v9338_v35 = vadd.f32 %v10843_v33, %v9716_v52 }
 0x517   : > { %v17122_v36 = vadd.f32 %v10883_v61, %v9338_v35 }
 0x519   : > { %v10903_v45 = vpop.f32.mrb[80].mxu0  ;;  %v10943_v11 = vpop.f32.mrb[80].mxu1 }
 0x51a   : > { %v10904_v41 = vpop.f32.mrb[81].mxu0  ;;  %v10944_v23 = vpop.f32.mrb[81].mxu1 }
 0x51b   : > { %v10905_v32 = vadd.f32 %v10904_v41, %v10903_v45  ;;  %v10945_v18 = vadd.f32 %v10944_v23, %v10943_v11  ;;  %v10906_v42 = vpop.f32.mrb[82].mxu0  ;;  %v10946_v55 = vpop.f32.mrb[82].mxu1 }
 0x51c   : > { %v10907_v24 = vpop.f32.mrb[83].mxu0  ;;  %v10947_v62 = vpop.f32.mrb[83].mxu1 }
 0x51d   : > { %v9442_v13 = vadd.f32 %v10905_v32, %v9378_v49  ;;  %v10908_v6 = vadd.f32 %v10907_v24, %v10906_v42  ;;  %v10948_v14 = vadd.f32 %v10947_v62, %v10946_v55 }
 0x51f   : > { %v9506_v16 = vadd.f32 %v10945_v18, %v9442_v13  ;;  %v9445_v28 = vadd.f32 %v10908_v6, %v9381_v4 }
 0x521   : > { %9551 = vst [vmem:[%s14801_s14 + $0x80] sm:$0xff] %v9506_v16  ;;  %v9509_v52 = vadd.f32 %v10948_v14, %v9445_v28  ;;  %v10909_v38 = vpop.f32.mrb[84].mxu0  ;;  %v10949_v60 = vpop.f32.mrb[84].mxu1 }
 0x522   : > { %v10910_v15 = vpop.f32.mrb[85].mxu0  ;;  %v10950_v58 = vpop.f32.mrb[85].mxu1 }
 0x523   : > { %9568 = vst [vmem:[%s14801_s14 + $0x108] sm:$0xff] %v9509_v52  ;;  %v10911_v30 = vadd.f32 %v10910_v15, %v10909_v38  ;;  %v10951_v31 = vadd.f32 %v10950_v58, %v10949_v60  ;;  %v10912_v37 = vpop.f32.mrb[86].mxu0  ;;  %v10952_v40 = vpop.f32.mrb[86].mxu1 }
 0x524   : > { %v10913_v8 = vpop.f32.mrb[87].mxu0  ;;  %v10953_v19 = vpop.f32.mrb[87].mxu1 }
 0x525   : > { %v9450_v49 = vadd.f32 %v10911_v30, %v9386_v1  ;;  %v10914_v21 = vadd.f32 %v10913_v8, %v10912_v37  ;;  %v10954_v44 = vadd.f32 %v10953_v19, %v10952_v40 }
 0x527   : > { %v9514_v46 = vadd.f32 %v10951_v31, %v9450_v49  ;;  %v9453_v4 = vadd.f32 %v10914_v21, %v9389_v25 }
 0x529   : > { %9585 = vst [vmem:[%s14801_s14 + $0x190] sm:$0xff] %v9514_v46  ;;  %v9517_v57 = vadd.f32 %v10954_v44, %v9453_v4  ;;  %v10915_v59 = vpop.f32.mrb[88].mxu0  ;;  %v10955_v22 = vpop.f32.mrb[88].mxu1 }
 0x52a   : > { %v10916_v63 = vpop.f32.mrb[89].mxu0  ;;  %v10956_v0 = vpop.f32.mrb[89].mxu1 }
 0x52b   : > { %9602 = vst [vmem:[%s14801_s14 + $0x218] sm:$0xff] %v9517_v57  ;;  %v10917_v2 = vadd.f32 %v10916_v63, %v10915_v59  ;;  %v10957_v10 = vadd.f32 %v10956_v0, %v10955_v22  ;;  %v10918_v50 = vpop.f32.mrb[90].mxu0  ;;  %v10958_v56 = vpop.f32.mrb[90].mxu1 }
 0x52c   : > { %v10919_v47 = vpop.f32.mrb[91].mxu0  ;;  %v10959_v48 = vpop.f32.mrb[91].mxu1 }
 0x52d   : > { %v9458_v1 = vadd.f32 %v10917_v2, %v9394_v43  ;;  %v10920_v9 = vadd.f32 %v10919_v47, %v10918_v50  ;;  %v10960_v34 = vadd.f32 %v10959_v48, %v10958_v56 }
 0x52f   : > { %v9522_v51 = vadd.f32 %v10957_v10, %v9458_v1  ;;  %v9461_v25 = vadd.f32 %v10920_v9, %v17120_v7 }
 0x531   : > { %9619 = vst [vmem:[%s14801_s14 + $0x2a0] sm:$0xff] %v9522_v51  ;;  %v9525_v3 = vadd.f32 %v10960_v34, %v9461_v25  ;;  %v10921_v20 = vpop.f32.mrb[92].mxu0  ;;  %v10961_v26 = vpop.f32.mrb[92].mxu1 }
 0x532   : > { %v10922_v27 = vpop.f32.mrb[93].mxu0  ;;  %v10962_v53 = vpop.f32.mrb[93].mxu1 }
 0x533   : > { %9636 = vst [vmem:[%s14801_s14 + $0x328] sm:$0xff] %v9525_v3  ;;  %v10923_v54 = vadd.f32 %v10922_v27, %v10921_v20  ;;  %v10963_v12 = vadd.f32 %v10962_v53, %v10961_v26  ;;  %v10924_v33 = vpop.f32.mrb[94].mxu0  ;;  %v10964_v61 = vpop.f32.mrb[94].mxu1 }
 0x534   : > { %v10925_v29 = vpop.f32.mrb[95].mxu0  ;;  %v10965_v17 = vpop.f32.mrb[95].mxu1 }
 0x535   : > { %v9466_v43 = vadd.f32 %v10923_v54, %v17122_v36 }
 0x537   : > { %v9530_v39 = vadd.f32 %v10963_v12, %v9466_v43 }
 0x539   : > { %9653 = vst [vmem:[%s14801_s14 + $0x3b0] sm:$0x1] %v9530_v39 }
 0x53a PF: > { %s13_s12 = sadd.s32 1, %s13080_s12  }
 0x53b   : > { %p10_p4 = scmp.ge.s32.totalorder %s13_s12, 4  }
 0x53d   :  { %12 = sbr.rel (!%p10_p4) target bundleno = 1 (0x1), region = 62 }

</bundles_post_ra>
